<compile_context>
chip_gen: v7x
topology: tpu7x:2x2x1
jax: 0.10.0
libtpu: 0.0.40
codegen_flags: <defaults>
</compile_context>

<pallas_src>
import jax
import jax.numpy as jnp
from jax import lax
from jax.experimental import pallas as pl
from jax.experimental.pallas import tpu as pltpu

BF16 = jnp.bfloat16
F32 = jnp.float32


# ---------------------------------------------------------------------------
# Pallas kernels
# ---------------------------------------------------------------------------
def ln_pw_kernel(x_ref, g_ref, b_ref, w11_ref, b11_ref, w211_ref, b211_ref,
                 xn_ref, t_ref, att1_ref):
    """norm1(inp) fused with conv11[0] (1x1 c->c) and conv211 (1x1 c->nset)."""
    x = x_ref[...]
    mu = jnp.mean(x, axis=-1, keepdims=True)
    var = jnp.mean((x - mu) ** 2, axis=-1, keepdims=True)
    xn = (x - mu) * lax.rsqrt(var + 1e-6) * g_ref[...] + b_ref[...]
    xnb = xn.astype(BF16)
    xn_ref[...] = xnb
    t_ref[...] = (jnp.dot(xnb, w11_ref[...], preferred_element_type=F32)
                  + b11_ref[...]).astype(BF16)
    att1_ref[...] = (jnp.dot(xnb, w211_ref[...], preferred_element_type=F32)
                     + b211_ref[...]).astype(BF16)


def pw31_kernel(d_ref, w_ref, b_ref, o_ref):
    """pointwise_conv31 on both depthwise halves at once.  The weight is block
    diagonal [[wpw,0],[0,wpw]] so (T,2c)@(2c,c) directly yields x3=[p1|p2]."""
    o_ref[...] = (jnp.dot(d_ref[...], w_ref[...], preferred_element_type=F32)
                  + b_ref[...]).astype(BF16)


def kba_ffn_kernel(a2a_ref, a2b_ref, att1_ref, ufx_ref, x3_ref, lgsca_ref, inp_ref,
                   w2c_ref, b2c_ref, wk_ref, bk_ref, r_ref, w3_ref, b3_ref,
                   lng_ref, lnb_ref, w4a_ref, b4a_ref, w4b_ref, b4b_ref,
                   w5_ref, b5_ref, o_ref):
    """conv2 tail + att combine + KBA + '*ga1+x3' + '*lg*sca' + conv3 + residual (y),
    fused with the FFN half (norm1(y) -> conv4 -> SimpleGate -> conv5 -> residual)."""
    # conv2 tail: SimpleGate + 1x1 -> nset (attgamma pre-folded into w2c/b2c;
    # a2 arrives pre-split, so no unaligned in-kernel lane slice).
    g2 = (a2a_ref[...].astype(F32) * a2b_ref[...].astype(F32)).astype(BF16)
    att = (jnp.dot(g2, w2c_ref[...], preferred_element_type=F32)
           + b2c_ref[...] + att1_ref[...].astype(F32))
    attb = att.astype(BF16)
    # per-pixel kernel weights / bias from the basis (ga1 pre-folded into wk/bk)
    attk = jnp.dot(attb, wk_ref[...], preferred_element_type=F32)   # (T, c*cg*KK)
    bias = jnp.dot(attb, bk_ref[...], preferred_element_type=F32)   # (T, c)
    # grouped per-pixel matvec: uf arrives pre-expanded to attk's column layout, so
    # the ragged per-channel reduce is one bf16 0/1 matmul (exact) on the MXU.
    prod = (attk * ufx_ref[...].astype(F32)).astype(BF16)
    kba = jnp.dot(prod, r_ref[...], preferred_element_type=F32) + bias
    # (KBA*ga1 + x3) * lg * sca  ->  conv3 (beta folded)  ->  first residual
    xm = ((kba + x3_ref[...].astype(F32)) * lgsca_ref[...].astype(F32)).astype(BF16)
    y = (inp_ref[...]
         + jnp.dot(xm, w3_ref[...], preferred_element_type=F32) + b3_ref[...])
    # FFN half (the reference re-uses self.norm1 here).
    mu = jnp.mean(y, axis=-1, keepdims=True)
    var = jnp.mean((y - mu) ** 2, axis=-1, keepdims=True)
    xn = ((y - mu) * lax.rsqrt(var + 1e-6) * lng_ref[...] + lnb_ref[...]).astype(BF16)
    h = ((jnp.dot(xn, w4a_ref[...], preferred_element_type=F32) + b4a_ref[...])
         * (jnp.dot(xn, w4b_ref[...], preferred_element_type=F32) + b4b_ref[...]))
    o_ref[...] = (y
                  + jnp.dot(h.astype(BF16), w5_ref[...], preferred_element_type=F32)
                  + b5_ref[...])


# ---------------------------------------------------------------------------
# pallas_call helper (generation-aware tiling)
# ---------------------------------------------------------------------------
def _tpu_vmem_capacity_bytes():
    try:
        info = pltpu.get_tpu_info()
        for name in ("vmem_capacity_bytes", "vmem_bytes", "vmem_size_bytes"):
            v = getattr(info, name, None)
            if v:
                return int(v)
    except Exception:
        pass
    return 64 * 1024 * 1024          # conservative (v7x-sized) fallback


def _budgets():
    cap = _tpu_vmem_capacity_bytes()
    if cap >= 100 * 1024 * 1024:      # v5e / v6e: 128 MiB VMEM
        return 96 * 1024 * 1024, 512, 512
    # v7x: 64 MiB VMEM -> smaller scoped limit, kba tile one notch lower
    return 48 * 1024 * 1024, 512, 256


def _pick_tile(n_rows, max_tile):
    # HBM-bound kernels want big pixel tiles (~85% of roofline at 512 rows), but
    # keep >= 2 grid steps so both v7x TensorCores get work.
    t = max_tile
    while t > 128 and n_rows < 2 * t:
        t //= 2
    return t


def _row_call(kernel, row_inputs, full_inputs, outputs, *, max_tile, vmem_limit):
    """Run `kernel` tiled over pixel rows.

    row_inputs : list of (N, ci) slabs tiled along rows.
    full_inputs: small 2-D arrays resident for every grid step.
    outputs    : list of (cols, dtype) for each kernel output.
    """
    n = row_inputs[0].shape[0]
    tile = _pick_tile(n, max_tile)
    grid_n = pl.cdiv(n, tile)
    if grid_n > 1 and grid_n % 2 == 1:
        grid_n += 1                   # even split across v7x's two TensorCores
    n_pad = grid_n * tile
    if n_pad != n:                    # no copy for the common case N % tile == 0
        row_inputs = [jnp.pad(a, ((0, n_pad - n), (0, 0))) for a in row_inputs]
    in_specs = (
        [pl.BlockSpec((tile, a.shape[1]), lambda i: (i, 0)) for a in row_inputs]
        + [pl.BlockSpec(f.shape, lambda i: (0, 0)) for f in full_inputs]
    )
    out_shape = tuple(jax.ShapeDtypeStruct((n_pad, oc), dt) for oc, dt in outputs)
    out_specs = tuple(pl.BlockSpec((tile, oc), lambda i: (i, 0)) for oc, _ in outputs)
    outs = pl.pallas_call(
        kernel,
        out_shape=out_shape,
        grid=(grid_n,),
        in_specs=in_specs,
        out_specs=out_specs,
        compiler_params=pltpu.CompilerParams(
            dimension_semantics=("parallel",),
            vmem_limit_bytes=vmem_limit,
        ),
    )(*row_inputs, *full_inputs)
    if not isinstance(outs, (list, tuple)):
        outs = (outs,)
    return tuple(o[:n] if n_pad != n else o for o in outs)


# ---------------------------------------------------------------------------
# Plain-JAX glue (spatial convs, unfold)
# ---------------------------------------------------------------------------
def conv2d_nhwc(x, w_hwio, b, groups=1, dilation=1, padding=0, out_dtype=F32):
    out = lax.conv_general_dilated(
        x, w_hwio.astype(x.dtype),
        window_strides=(1, 1),
        padding=((padding, padding), (padding, padding)),
        rhs_dilation=(dilation, dilation),
        dimension_numbers=("NHWC", "HWIO", "NHWC"),
        feature_group_count=groups,
        preferred_element_type=F32,
    )
    return (out + b.reshape(1, 1, 1, -1)).astype(out_dtype)


def unfold3x3(x):
    # (B,H,W,C) -> (B*H*W, C*9); feature index = c*9 + (dh*3+dw)  (F.unfold order)
    B, H, W, C = x.shape
    xp = jnp.pad(x, ((0, 0), (1, 1), (1, 1), (0, 0)))
    patches = [xp[:, dh:dh + H, dw:dw + W, :] for dh in range(3) for dw in range(3)]
    return jnp.stack(patches, axis=-1).reshape(B * H * W, C * 9)


# ---------------------------------------------------------------------------
# Parameters (deterministic synthetic init, shapes follow the module __init__)
# ---------------------------------------------------------------------------
def init_params(key, c, nset=32, k=3, gc=4):
    interc = min(c, 32)
    g = c // gc
    keys = iter(jax.random.split(key, 40))

    def nrm(shape, scale=0.1):
        return jax.random.normal(next(keys), shape, F32) * scale

    p = {}
    p["ln_g"] = jnp.ones((1, c), F32)
    p["ln_b"] = jnp.zeros((1, c), F32)
    # sca: 1x1 conv c->c (after global average pool)
    p["w_sca"], p["b_sca"] = nrm((c, c)), nrm((c,), 0.01)
    # conv11: 1x1 c->c  then 5x5 grouped (groups=c//4)
    p["w11a"], p["b11a"] = nrm((c, c)), nrm((c,), 0.01)
    p["w11b"], p["b11b"] = nrm((5, 5, 4, c)), nrm((c,), 0.01)
    # conv2: 3x3 grouped (groups=interc) c->interc, SimpleGate, 1x1 interc//2 -> nset
    p["w2a"], p["b2a"] = nrm((3, 3, c // interc, interc)), nrm((interc,), 0.01)
    p["w2c"], p["b2c"] = nrm((interc // 2, nset)), nrm((nset,), 0.01)
    # conv211: 1x1 c -> nset
    p["w211"], p["b211"] = nrm((c, nset)), nrm((nset,), 0.01)
    # conv3: 1x1 c -> c ; conv4: 1x1 c -> 2c ; conv5: 1x1 c -> c
    p["w3"], p["b3"] = nrm((c, c)), nrm((c,), 0.01)
    p["w4"], p["b4"] = nrm((c, 2 * c)), nrm((2 * c,), 0.01)
    p["w5"], p["b5"] = nrm((c, c)), nrm((c,), 0.01)
    # depthwise 3x3 dil=2 (c//2 -> c, groups=c//2) ; pointwise c -> c//2
    p["wdw"], p["bdw"] = nrm((3, 3, 1, c)), nrm((c,), 0.01)
    p["wpw"], p["bpw"] = nrm((c, c // 2)), nrm((c // 2,), 0.01)
    # KBA basis: w (nset, c * c//g * k^2), b (nset, c)
    p["w_kba"] = nrm((nset, c * (c // g) * k * k), 0.05)
    p["b_kba"] = nrm((nset, c), 0.05)
    p["ga1"] = jnp.full((1, c), 0.01, F32)
    p["attgamma"] = jnp.full((1, nset), 0.01, F32)
    p["beta"] = jnp.full((1, c), 0.01, F32)
    p["gamma"] = jnp.full((1, c), 0.01, F32)
    return p


# ---------------------------------------------------------------------------
# Forward pass (matches KBBlock_s.forward)
# ---------------------------------------------------------------------------
def kbblock_forward(params, inp_nchw, nset=32, k=3, gc=4):
    x_nhwc = jnp.transpose(inp_nchw, (0, 2, 3, 1)).astype(F32)
    B, H, W, C = x_nhwc.shape
    N = B * H * W
    interc = min(C, 32)
    g = C // gc
    cg = C // g                  # channels per group (= gc)
    KK = k * k
    cgkk = cg * KK

    vmem_limit, gen_tile, kba_tile = _budgets()
    inp2d = x_nhwc.reshape(N, C)

    # ---- weight prep: fold scalars into adjacent weights, cast matmul weights bf16 ----
    ln_g, ln_b = params["ln_g"], params["ln_b"]
    w11a = params["w11a"].astype(BF16)
    b11a = params["b11a"].reshape(1, -1)
    w211 = params["w211"].astype(BF16)
    b211 = params["b211"].reshape(1, -1)
    # pointwise_conv31 as a block-diagonal weight: [d1 | d2] @ w_bd = [p1 | p2]
    wpw = params["wpw"]
    w_bd = (jnp.zeros((2 * C, C), F32)
            .at[:C, :C // 2].set(wpw)
            .at[C:, C // 2:].set(wpw)).astype(BF16)
    b31 = jnp.concatenate([params["bpw"], params["bpw"]]).reshape(1, -1)
    w2c_s = (params["w2c"] * params["attgamma"]).astype(BF16)           # attgamma folded
    b2c_s = params["b2c"].reshape(1, -1) * params["attgamma"]
    ga1_col = jnp.repeat(params["ga1"][0], cgkk)                        # ga1 folded into basis
    wk_s = (params["w_kba"] * ga1_col[None, :]).astype(BF16)
    bk_s = (params["b_kba"] * params["ga1"]).astype(BF16)
    w3_s = (params["w3"] * params["beta"]).astype(BF16)                 # beta folded
    b3_s = params["b3"].reshape(1, -1) * params["beta"]
    w4a = params["w4"][:, :C].astype(BF16)
    w4b = params["w4"][:, C:].astype(BF16)
    b4a = params["b4"][:C].reshape(1, -1)
    b4b = params["b4"][C:].reshape(1, -1)
    w5_s = (params["w5"] * params["gamma"]).astype(BF16)                # gamma folded
    b5_s = params["b5"].reshape(1, -1) * params["gamma"]
    # 0/1 segmented-reduce matrix for the per-channel KBA reduce (exact in bf16)
    R = ((jnp.arange(C * cgkk) // cgkk)[:, None]
         == jnp.arange(C)[None, :]).astype(BF16)                        # (C*cg*KK, C)

    # ---- kernel 1: norm1(inp) fused with conv11[0] and conv211 ----
    xn2d, t2d, att1 = _row_call(
        ln_pw_kernel, [inp2d], [ln_g, ln_b, w11a, b11a, w211, b211],
        [(C, BF16), (C, BF16), (nset, BF16)],
        max_tile=gen_tile, vmem_limit=vmem_limit)
    xn = xn2d.reshape(B, H, W, C)

    # ---- XLA glue: sca, 5x5 grouped conv, dilated depthwise convs, 3x3 grouped conv ----
    pooled = jnp.mean(xn.astype(F32), axis=(1, 2))                      # (B, C)
    sca = pooled @ params["w_sca"] + params["b_sca"]                    # tiny -> plain XLA
    lg = conv2d_nhwc(t2d.reshape(B, H, W, C), params["w11b"], params["b11b"],
                     groups=C // 4, padding=2)
    lgsca2d = (lg * sca[:, None, None, :]).astype(BF16).reshape(N, C)   # fold sca into lg
    d1 = conv2d_nhwc(xn[..., :C // 2], params["wdw"], params["bdw"],
                     groups=C // 2, dilation=2, padding=2, out_dtype=BF16)
    d2 = conv2d_nhwc(xn[..., C // 2:], params["wdw"], params["bdw"],
                     groups=C // 2, dilation=2, padding=2, out_dtype=BF16)
    d12 = jnp.concatenate([d1, d2], axis=-1).reshape(N, 2 * C)          # (N, 2C) bf16
    a2 = conv2d_nhwc(xn, params["w2a"], params["b2a"],
                     groups=interc, padding=1, out_dtype=BF16).reshape(N, interc)
    a2a, a2b = a2[:, :interc // 2], a2[:, interc // 2:]                 # pre-split SimpleGate

    # ---- kernel 2: pointwise_conv31 on both halves -> x3 = [p1 | p2] ----
    (x3_2d,) = _row_call(pw31_kernel, [d12], [w_bd, b31], [(C, BF16)],
                         max_tile=gen_tile, vmem_limit=vmem_limit)

    # im2col for the KBA matvec, pre-expanded to w_kba's (out-channel-major) column
    # layout so the kernel needs no replication matmul / relayout.  Stored in bf16.
    # TODO(synk): build this unfold in-kernel from a haloed spatial block to remove
    # the (dominant) uf HBM slab entirely.
    x3_nhwc = x3_2d.reshape(B, H, W, C)
    x3_rep = jnp.broadcast_to(x3_nhwc.reshape(B, H, W, g, 1, cg),
                              (B, H, W, g, cg, cg)).reshape(B, H, W, C * cg)
    uf = unfold3x3(x3_rep)                                              # (N, C*cg*KK) bf16

    # ---- kernel 3: conv2-tail + att + KBA + combine + conv3 + residual + FFN ----
    (out2d,) = _row_call(
        kba_ffn_kernel,
        [a2a, a2b, att1, uf, x3_2d, lgsca2d, inp2d],
        [w2c_s, b2c_s, wk_s, bk_s, R, w3_s, b3_s,
         ln_g, ln_b, w4a, b4a, w4b, b4b, w5_s, b5_s],
        [(C, F32)],
        max_tile=kba_tile, vmem_limit=vmem_limit)

    return out2d.reshape(B, H, W, C).transpose(0, 3, 1, 2)              # back to NCHW


# ---------------------------------------------------------------------------
if __name__ == "__main__":
    key = jax.random.PRNGKey(0)
    k_inp, k_par = jax.random.split(key)

    B, C, H, W = 2, 8, 16, 16        # c must be divisible by 4 (gc=4, grouped convs)
    inp = jax.random.normal(k_inp, (B, C, H, W), F32)
    params = init_params(k_par, C)

    out = jax.jit(kbblock_forward)(params, inp)
    out = jax.block_until_ready(out)

    assert out.shape == (B, C, H, W), out.shape
    assert bool(jnp.all(jnp.isfinite(out)))
    print("KERNEL_OK")
</pallas_src>

<mosaic_0001>
module attributes {stable_mosaic.version = 11 : i64} {
  func.func @ln_pw_kernel(%arg0: i32, %arg1: memref<256x8xf32, #tpu.memory_space<vmem>>, %arg2: memref<1x8xf32, #tpu.memory_space<vmem>>, %arg3: memref<1x8xf32, #tpu.memory_space<vmem>>, %arg4: memref<8x8xbf16, #tpu.memory_space<vmem>>, %arg5: memref<1x8xf32, #tpu.memory_space<vmem>>, %arg6: memref<8x32xbf16, #tpu.memory_space<vmem>>, %arg7: memref<1x32xf32, #tpu.memory_space<vmem>>, %arg8: memref<256x8xbf16, #tpu.memory_space<vmem>>, %arg9: memref<256x8xbf16, #tpu.memory_space<vmem>>, %arg10: memref<256x32xbf16, #tpu.memory_space<vmem>>) attributes {dimension_semantics = [#tpu.dimension_semantics<parallel>], iteration_bounds = array<i64: 2>, scalar_prefetch = 0 : i64, scratch_operands = 0 : i64, tpu.core_type = #tpu.core_type<tc>, window_params = [{transform_indices = @transform_0, window_bounds = array<i64: 256, 8>}, {pipeline_mode = #tpu.pipeline_mode<synchronous>, transform_indices = @transform_1, window_bounds = array<i64: 1, 8>}, {pipeline_mode = #tpu.pipeline_mode<synchronous>, transform_indices = @transform_2, window_bounds = array<i64: 1, 8>}, {pipeline_mode = #tpu.pipeline_mode<synchronous>, transform_indices = @transform_3, window_bounds = array<i64: 8, 8>}, {pipeline_mode = #tpu.pipeline_mode<synchronous>, transform_indices = @transform_4, window_bounds = array<i64: 1, 8>}, {pipeline_mode = #tpu.pipeline_mode<synchronous>, transform_indices = @transform_5, window_bounds = array<i64: 8, 32>}, {pipeline_mode = #tpu.pipeline_mode<synchronous>, transform_indices = @transform_6, window_bounds = array<i64: 1, 32>}, {transform_indices = @transform_7, window_bounds = array<i64: 256, 8>}, {transform_indices = @transform_8, window_bounds = array<i64: 256, 8>}, {transform_indices = @transform_9, window_bounds = array<i64: 256, 32>}]} {
    %c0 = arith.constant 0 : index
    %c0_0 = arith.constant 0 : index
    %0 = vector.load %arg1[%c0, %c0_0] : memref<256x8xf32, #tpu.memory_space<vmem>>, vector<256x8xf32>
    %cst = arith.constant dense<0.000000e+00> : vector<256xf32>
    %1 = vector.multi_reduction <add>, %0, %cst [1] : vector<256x8xf32> to vector<256xf32>
    %2 = vector.shape_cast %1 : vector<256xf32> to vector<256x1xf32>
    %cst_1 = arith.constant 8.000000e+00 : f32
    %3 = vector.broadcast %cst_1 : f32 to vector<256x1xf32>
    %4 = arith.divf %2, %3 : vector<256x1xf32>
    %5 = vector.broadcast %4 : vector<256x1xf32> to vector<256x8xf32>
    %6 = arith.subf %0, %5 : vector<256x8xf32>
    %7 = arith.mulf %6, %6 : vector<256x8xf32>
    %cst_2 = arith.constant dense<0.000000e+00> : vector<256xf32>
    %8 = vector.multi_reduction <add>, %7, %cst_2 [1] : vector<256x8xf32> to vector<256xf32>
    %9 = vector.shape_cast %8 : vector<256xf32> to vector<256x1xf32>
    %cst_3 = arith.constant 8.000000e+00 : f32
    %10 = vector.broadcast %cst_3 : f32 to vector<256x1xf32>
    %11 = arith.divf %9, %10 : vector<256x1xf32>
    %12 = vector.broadcast %4 : vector<256x1xf32> to vector<256x8xf32>
    %13 = arith.subf %0, %12 : vector<256x8xf32>
    %cst_4 = arith.constant 9.99999997E-7 : f32
    %14 = vector.broadcast %cst_4 : f32 to vector<256x1xf32>
    %15 = arith.addf %11, %14 : vector<256x1xf32>
    %16 = math.rsqrt %15 : vector<256x1xf32>
    %17 = vector.broadcast %16 : vector<256x1xf32> to vector<256x8xf32>
    %18 = arith.mulf %13, %17 : vector<256x8xf32>
    %c0_5 = arith.constant 0 : index
    %c0_6 = arith.constant 0 : index
    %19 = vector.load %arg2[%c0_5, %c0_6] : memref<1x8xf32, #tpu.memory_space<vmem>>, vector<1x8xf32>
    %20 = vector.broadcast %19 : vector<1x8xf32> to vector<256x8xf32>
    %21 = arith.mulf %18, %20 : vector<256x8xf32>
    %c0_7 = arith.constant 0 : index
    %c0_8 = arith.constant 0 : index
    %22 = vector.load %arg3[%c0_7, %c0_8] : memref<1x8xf32, #tpu.memory_space<vmem>>, vector<1x8xf32>
    %23 = vector.broadcast %22 : vector<1x8xf32> to vector<256x8xf32>
    %24 = arith.addf %21, %23 : vector<256x8xf32>
    %25 = arith.truncf %24 : vector<256x8xf32> to vector<256x8xbf16>
    %c0_9 = arith.constant 0 : index
    %c0_10 = arith.constant 0 : index
    %26 = vector.load %arg8[%c0_9, %c0_10] : memref<256x8xbf16, #tpu.memory_space<vmem>>, vector<256x8xbf16>
    tpu.vector_store %arg8[%c0_9, %c0_10], %25 {strides = array<i32>} : memref<256x8xbf16, #tpu.memory_space<vmem>>, vector<256x8xbf16>,
    %c0_11 = arith.constant 0 : index
    %c0_12 = arith.constant 0 : index
    %27 = vector.load %arg4[%c0_11, %c0_12] : memref<8x8xbf16, #tpu.memory_space<vmem>>, vector<8x8xbf16>
    %cst_13 = arith.constant dense<0.000000e+00> : vector<256x8xf32>
    %28 = tpu.matmul %25, %27, %cst_13 {dimension_numbers = #tpu.dot_dimension_numbers<[1], [0], [0], [1], [0, 0, 1, 1], [], []>} : vector<256x8xbf16>, vector<8x8xbf16>, vector<256x8xf32> -> vector<256x8xf32>
    %c0_14 = arith.constant 0 : index
    %c0_15 = arith.constant 0 : index
    %29 = vector.load %arg5[%c0_14, %c0_15] : memref<1x8xf32, #tpu.memory_space<vmem>>, vector<1x8xf32>
    %30 = vector.broadcast %29 : vector<1x8xf32> to vector<256x8xf32>
    %31 = arith.addf %28, %30 : vector<256x8xf32>
    %32 = arith.truncf %31 : vector<256x8xf32> to vector<256x8xbf16>
    %c0_16 = arith.constant 0 : index
    %c0_17 = arith.constant 0 : index
    %33 = vector.load %arg9[%c0_16, %c0_17] : memref<256x8xbf16, #tpu.memory_space<vmem>>, vector<256x8xbf16>
    tpu.vector_store %arg9[%c0_16, %c0_17], %32 {strides = array<i32>} : memref<256x8xbf16, #tpu.memory_space<vmem>>, vector<256x8xbf16>,
    %c0_18 = arith.constant 0 : index
    %c0_19 = arith.constant 0 : index
    %34 = vector.load %arg6[%c0_18, %c0_19] : memref<8x32xbf16, #tpu.memory_space<vmem>>, vector<8x32xbf16>
    %cst_20 = arith.constant dense<0.000000e+00> : vector<256x32xf32>
    %35 = tpu.matmul %25, %34, %cst_20 {dimension_numbers = #tpu.dot_dimension_numbers<[1], [0], [0], [1], [0, 0, 1, 1], [], []>} : vector<256x8xbf16>, vector<8x32xbf16>, vector<256x32xf32> -> vector<256x32xf32>
    %c0_21 = arith.constant 0 : index
    %c0_22 = arith.constant 0 : index
    %36 = vector.load %arg7[%c0_21, %c0_22] : memref<1x32xf32, #tpu.memory_space<vmem>>, vector<1x32xf32>
    %37 = vector.broadcast %36 : vector<1x32xf32> to vector<256x32xf32>
    %38 = arith.addf %35, %37 : vector<256x32xf32>
    %39 = arith.truncf %38 : vector<256x32xf32> to vector<256x32xbf16>
    %c0_23 = arith.constant 0 : index
    %c0_24 = arith.constant 0 : index
    %40 = vector.load %arg10[%c0_23, %c0_24] : memref<256x32xbf16, #tpu.memory_space<vmem>>, vector<256x32xbf16>
    tpu.vector_store %arg10[%c0_23, %c0_24], %39 {strides = array<i32>} : memref<256x32xbf16, #tpu.memory_space<vmem>>, vector<256x32xbf16>,
    return
  }
  func.func @transform_0(%arg0: i32) -> (i32, i32) {
    %c0_i32 = arith.constant 0 : i32
    %c0_i32_0 = arith.constant 0 : i32
    return %arg0, %c0_i32 : i32, i32
  }
  func.func @transform_1(%arg0: i32) -> (i32, i32) {
    %c0_i32 = arith.constant 0 : i32
    %c0_i32_0 = arith.constant 0 : i32
    %c0_i32_1 = arith.constant 0 : i32
    return %c0_i32, %c0_i32_0 : i32, i32
  }
  func.func @transform_2(%arg0: i32) -> (i32, i32) {
    %c0_i32 = arith.constant 0 : i32
    %c0_i32_0 = arith.constant 0 : i32
    %c0_i32_1 = arith.constant 0 : i32
    return %c0_i32, %c0_i32_0 : i32, i32
  }
  func.func @transform_3(%arg0: i32) -> (i32, i32) {
    %c0_i32 = arith.constant 0 : i32
    %c0_i32_0 = arith.constant 0 : i32
    %c0_i32_1 = arith.constant 0 : i32
    return %c0_i32, %c0_i32_0 : i32, i32
  }
  func.func @transform_4(%arg0: i32) -> (i32, i32) {
    %c0_i32 = arith.constant 0 : i32
    %c0_i32_0 = arith.constant 0 : i32
    %c0_i32_1 = arith.constant 0 : i32
    return %c0_i32, %c0_i32_0 : i32, i32
  }
  func.func @transform_5(%arg0: i32) -> (i32, i32) {
    %c0_i32 = arith.constant 0 : i32
    %c0_i32_0 = arith.constant 0 : i32
    %c0_i32_1 = arith.constant 0 : i32
    return %c0_i32, %c0_i32_0 : i32, i32
  }
  func.func @transform_6(%arg0: i32) -> (i32, i32) {
    %c0_i32 = arith.constant 0 : i32
    %c0_i32_0 = arith.constant 0 : i32
    %c0_i32_1 = arith.constant 0 : i32
    return %c0_i32, %c0_i32_0 : i32, i32
  }
  func.func @transform_7(%arg0: i32) -> (i32, i32) {
    %c0_i32 = arith.constant 0 : i32
    %c0_i32_0 = arith.constant 0 : i32
    return %arg0, %c0_i32 : i32, i32
  }
  func.func @transform_8(%arg0: i32) -> (i32, i32) {
    %c0_i32 = arith.constant 0 : i32
    %c0_i32_0 = arith.constant 0 : i32
    return %arg0, %c0_i32 : i32, i32
  }
  func.func @transform_9(%arg0: i32) -> (i32, i32) {
    %c0_i32 = arith.constant 0 : i32
    %c0_i32_0 = arith.constant 0 : i32
    return %arg0, %c0_i32 : i32, i32
  }
}

module attributes {stable_mosaic.version = 11 : i64} {
  func.func @pw31_kernel(%arg0: i32, %arg1: memref<256x16xbf16, #tpu.memory_space<vmem>>, %arg2: memref<16x8xbf16, #tpu.memory_space<vmem>>, %arg3: memref<1x8xf32, #tpu.memory_space<vmem>>, %arg4: memref<256x8xbf16, #tpu.memory_space<vmem>>) attributes {dimension_semantics = [#tpu.dimension_semantics<parallel>], iteration_bounds = array<i64: 2>, scalar_prefetch = 0 : i64, scratch_operands = 0 : i64, tpu.core_type = #tpu.core_type<tc>, window_params = [{transform_indices = @transform_0, window_bounds = array<i64: 256, 16>}, {pipeline_mode = #tpu.pipeline_mode<synchronous>, transform_indices = @transform_1, window_bounds = array<i64: 16, 8>}, {pipeline_mode = #tpu.pipeline_mode<synchronous>, transform_indices = @transform_2, window_bounds = array<i64: 1, 8>}, {transform_indices = @transform_3, window_bounds = array<i64: 256, 8>}]} {
    %c0 = arith.constant 0 : index
    %c0_0 = arith.constant 0 : index
    %0 = vector.load %arg1[%c0, %c0_0] : memref<256x16xbf16, #tpu.memory_space<vmem>>, vector<256x16xbf16>
    %c0_1 = arith.constant 0 : index
    %c0_2 = arith.constant 0 : index
    %1 = vector.load %arg2[%c0_1, %c0_2] : memref<16x8xbf16, #tpu.memory_space<vmem>>, vector<16x8xbf16>
    %cst = arith.constant dense<0.000000e+00> : vector<256x8xf32>
    %2 = tpu.matmul %0, %1, %cst {dimension_numbers = #tpu.dot_dimension_numbers<[1], [0], [0], [1], [0, 0, 1, 1], [], []>} : vector<256x16xbf16>, vector<16x8xbf16>, vector<256x8xf32> -> vector<256x8xf32>
    %c0_3 = arith.constant 0 : index
    %c0_4 = arith.constant 0 : index
    %3 = vector.load %arg3[%c0_3, %c0_4] : memref<1x8xf32, #tpu.memory_space<vmem>>, vector<1x8xf32>
    %4 = vector.broadcast %3 : vector<1x8xf32> to vector<256x8xf32>
    %5 = arith.addf %2, %4 : vector<256x8xf32>
    %6 = arith.truncf %5 : vector<256x8xf32> to vector<256x8xbf16>
    %c0_5 = arith.constant 0 : index
    %c0_6 = arith.constant 0 : index
    %7 = vector.load %arg4[%c0_5, %c0_6] : memref<256x8xbf16, #tpu.memory_space<vmem>>, vector<256x8xbf16>
    tpu.vector_store %arg4[%c0_5, %c0_6], %6 {strides = array<i32>} : memref<256x8xbf16, #tpu.memory_space<vmem>>, vector<256x8xbf16>,
    return
  }
  func.func @transform_0(%arg0: i32) -> (i32, i32) {
    %c0_i32 = arith.constant 0 : i32
    %c0_i32_0 = arith.constant 0 : i32
    return %arg0, %c0_i32 : i32, i32
  }
  func.func @transform_1(%arg0: i32) -> (i32, i32) {
    %c0_i32 = arith.constant 0 : i32
    %c0_i32_0 = arith.constant 0 : i32
    %c0_i32_1 = arith.constant 0 : i32
    return %c0_i32, %c0_i32_0 : i32, i32
  }
  func.func @transform_2(%arg0: i32) -> (i32, i32) {
    %c0_i32 = arith.constant 0 : i32
    %c0_i32_0 = arith.constant 0 : i32
    %c0_i32_1 = arith.constant 0 : i32
    return %c0_i32, %c0_i32_0 : i32, i32
  }
  func.func @transform_3(%arg0: i32) -> (i32, i32) {
    %c0_i32 = arith.constant 0 : i32
    %c0_i32_0 = arith.constant 0 : i32
    return %arg0, %c0_i32 : i32, i32
  }
}

module attributes {stable_mosaic.version = 11 : i64} {
  func.func @kba_ffn_kernel(%arg0: i32, %arg1: memref<256x4xbf16, #tpu.memory_space<vmem>>, %arg2: memref<256x4xbf16, #tpu.memory_space<vmem>>, %arg3: memref<256x32xbf16, #tpu.memory_space<vmem>>, %arg4: memref<256x288xbf16, #tpu.memory_space<vmem>>, %arg5: memref<256x8xbf16, #tpu.memory_space<vmem>>, %arg6: memref<256x8xbf16, #tpu.memory_space<vmem>>, %arg7: memref<256x8xf32, #tpu.memory_space<vmem>>, %arg8: memref<4x32xbf16, #tpu.memory_space<vmem>>, %arg9: memref<1x32xf32, #tpu.memory_space<vmem>>, %arg10: memref<32x288xbf16, #tpu.memory_space<vmem>>, %arg11: memref<32x8xbf16, #tpu.memory_space<vmem>>, %arg12: memref<288x8xbf16, #tpu.memory_space<vmem>>, %arg13: memref<8x8xbf16, #tpu.memory_space<vmem>>, %arg14: memref<1x8xf32, #tpu.memory_space<vmem>>, %arg15: memref<1x8xf32, #tpu.memory_space<vmem>>, %arg16: memref<1x8xf32, #tpu.memory_space<vmem>>, %arg17: memref<8x8xbf16, #tpu.memory_space<vmem>>, %arg18: memref<1x8xf32, #tpu.memory_space<vmem>>, %arg19: memref<8x8xbf16, #tpu.memory_space<vmem>>, %arg20: memref<1x8xf32, #tpu.memory_space<vmem>>, %arg21: memref<8x8xbf16, #tpu.memory_space<vmem>>, %arg22: memref<1x8xf32, #tpu.memory_space<vmem>>, %arg23: memref<256x8xf32, #tpu.memory_space<vmem>>) attributes {dimension_semantics = [#tpu.dimension_semantics<parallel>], iteration_bounds = array<i64: 2>, scalar_prefetch = 0 : i64, scratch_operands = 0 : i64, tpu.core_type = #tpu.core_type<tc>, window_params = [{transform_indices = @transform_0, window_bounds = array<i64: 256, 4>}, {transform_indices = @transform_1, window_bounds = array<i64: 256, 4>}, {transform_indices = @transform_2, window_bounds = array<i64: 256, 32>}, {transform_indices = @transform_3, window_bounds = array<i64: 256, 288>}, {transform_indices = @transform_4, window_bounds = array<i64: 256, 8>}, {transform_indices = @transform_5, window_bounds = array<i64: 256, 8>}, {transform_indices = @transform_6, window_bounds = array<i64: 256, 8>}, {pipeline_mode = #tpu.pipeline_mode<synchronous>, transform_indices = @transform_7, window_bounds = array<i64: 4, 32>}, {pipeline_mode = #tpu.pipeline_mode<synchronous>, transform_indices = @transform_8, window_bounds = array<i64: 1, 32>}, {pipeline_mode = #tpu.pipeline_mode<synchronous>, transform_indices = @transform_9, window_bounds = array<i64: 32, 288>}, {pipeline_mode = #tpu.pipeline_mode<synchronous>, transform_indices = @transform_10, window_bounds = array<i64: 32, 8>}, {pipeline_mode = #tpu.pipeline_mode<synchronous>, transform_indices = @transform_11, window_bounds = array<i64: 288, 8>}, {pipeline_mode = #tpu.pipeline_mode<synchronous>, transform_indices = @transform_12, window_bounds = array<i64: 8, 8>}, {pipeline_mode = #tpu.pipeline_mode<synchronous>, transform_indices = @transform_13, window_bounds = array<i64: 1, 8>}, {pipeline_mode = #tpu.pipeline_mode<synchronous>, transform_indices = @transform_14, window_bounds = array<i64: 1, 8>}, {pipeline_mode = #tpu.pipeline_mode<synchronous>, transform_indices = @transform_15, window_bounds = array<i64: 1, 8>}, {pipeline_mode = #tpu.pipeline_mode<synchronous>, transform_indices = @transform_16, window_bounds = array<i64: 8, 8>}, {pipeline_mode = #tpu.pipeline_mode<synchronous>, transform_indices = @transform_17, window_bounds = array<i64: 1, 8>}, {pipeline_mode = #tpu.pipeline_mode<synchronous>, transform_indices = @transform_18, window_bounds = array<i64: 8, 8>}, {pipeline_mode = #tpu.pipeline_mode<synchronous>, transform_indices = @transform_19, window_bounds = array<i64: 1, 8>}, {pipeline_mode = #tpu.pipeline_mode<synchronous>, transform_indices = @transform_20, window_bounds = array<i64: 8, 8>}, {pipeline_mode = #tpu.pipeline_mode<synchronous>, transform_indices = @transform_21, window_bounds = array<i64: 1, 8>}, {transform_indices = @transform_22, window_bounds = array<i64: 256, 8>}]} {
    %c0 = arith.constant 0 : index
    %c0_0 = arith.constant 0 : index
    %0 = vector.load %arg1[%c0, %c0_0] : memref<256x4xbf16, #tpu.memory_space<vmem>>, vector<256x4xbf16>
    %1 = arith.extf %0 : vector<256x4xbf16> to vector<256x4xf32>
    %c0_1 = arith.constant 0 : index
    %c0_2 = arith.constant 0 : index
    %2 = vector.load %arg2[%c0_1, %c0_2] : memref<256x4xbf16, #tpu.memory_space<vmem>>, vector<256x4xbf16>
    %3 = arith.extf %2 : vector<256x4xbf16> to vector<256x4xf32>
    %4 = arith.mulf %1, %3 : vector<256x4xf32>
    %5 = arith.truncf %4 : vector<256x4xf32> to vector<256x4xbf16>
    %c0_3 = arith.constant 0 : index
    %c0_4 = arith.constant 0 : index
    %6 = vector.load %arg8[%c0_3, %c0_4] : memref<4x32xbf16, #tpu.memory_space<vmem>>, vector<4x32xbf16>
    %cst = arith.constant dense<0.000000e+00> : vector<256x32xf32>
    %7 = tpu.matmul %5, %6, %cst {dimension_numbers = #tpu.dot_dimension_numbers<[1], [0], [0], [1], [0, 0, 1, 1], [], []>} : vector<256x4xbf16>, vector<4x32xbf16>, vector<256x32xf32> -> vector<256x32xf32>
    %c0_5 = arith.constant 0 : index
    %c0_6 = arith.constant 0 : index
    %8 = vector.load %arg9[%c0_5, %c0_6] : memref<1x32xf32, #tpu.memory_space<vmem>>, vector<1x32xf32>
    %9 = vector.broadcast %8 : vector<1x32xf32> to vector<256x32xf32>
    %10 = arith.addf %7, %9 : vector<256x32xf32>
    %c0_7 = arith.constant 0 : index
    %c0_8 = arith.constant 0 : index
    %11 = vector.load %arg3[%c0_7, %c0_8] : memref<256x32xbf16, #tpu.memory_space<vmem>>, vector<256x32xbf16>
    %12 = arith.extf %11 : vector<256x32xbf16> to vector<256x32xf32>
    %13 = arith.addf %10, %12 : vector<256x32xf32>
    %14 = arith.truncf %13 : vector<256x32xf32> to vector<256x32xbf16>
    %c0_9 = arith.constant 0 : index
    %c0_10 = arith.constant 0 : index
    %15 = vector.load %arg10[%c0_9, %c0_10] : memref<32x288xbf16, #tpu.memory_space<vmem>>, vector<32x288xbf16>
    %cst_11 = arith.constant dense<0.000000e+00> : vector<256x288xf32>
    %16 = tpu.matmul %14, %15, %cst_11 {dimension_numbers = #tpu.dot_dimension_numbers<[1], [0], [0], [1], [0, 0, 1, 1], [], []>} : vector<256x32xbf16>, vector<32x288xbf16>, vector<256x288xf32> -> vector<256x288xf32>
    %c0_12 = arith.constant 0 : index
    %c0_13 = arith.constant 0 : index
    %17 = vector.load %arg11[%c0_12, %c0_13] : memref<32x8xbf16, #tpu.memory_space<vmem>>, vector<32x8xbf16>
    %cst_14 = arith.constant dense<0.000000e+00> : vector<256x8xf32>
    %18 = tpu.matmul %14, %17, %cst_14 {dimension_numbers = #tpu.dot_dimension_numbers<[1], [0], [0], [1], [0, 0, 1, 1], [], []>} : vector<256x32xbf16>, vector<32x8xbf16>, vector<256x8xf32> -> vector<256x8xf32>
    %c0_15 = arith.constant 0 : index
    %c0_16 = arith.constant 0 : index
    %19 = vector.load %arg4[%c0_15, %c0_16] : memref<256x288xbf16, #tpu.memory_space<vmem>>, vector<256x288xbf16>
    %20 = arith.extf %19 : vector<256x288xbf16> to vector<256x288xf32>
    %21 = arith.mulf %16, %20 : vector<256x288xf32>
    %22 = arith.truncf %21 : vector<256x288xf32> to vector<256x288xbf16>
    %c0_17 = arith.constant 0 : index
    %c0_18 = arith.constant 0 : index
    %23 = vector.load %arg12[%c0_17, %c0_18] : memref<288x8xbf16, #tpu.memory_space<vmem>>, vector<288x8xbf16>
    %cst_19 = arith.constant dense<0.000000e+00> : vector<256x8xf32>
    %24 = tpu.matmul %22, %23, %cst_19 {dimension_numbers = #tpu.dot_dimension_numbers<[1], [0], [0], [1], [0, 0, 1, 1], [], []>} : vector<256x288xbf16>, vector<288x8xbf16>, vector<256x8xf32> -> vector<256x8xf32>
    %25 = arith.addf %24, %18 : vector<256x8xf32>
    %c0_20 = arith.constant 0 : index
    %c0_21 = arith.constant 0 : index
    %26 = vector.load %arg5[%c0_20, %c0_21] : memref<256x8xbf16, #tpu.memory_space<vmem>>, vector<256x8xbf16>
    %27 = arith.extf %26 : vector<256x8xbf16> to vector<256x8xf32>
    %28 = arith.addf %25, %27 : vector<256x8xf32>
    %c0_22 = arith.constant 0 : index
    %c0_23 = arith.constant 0 : index
    %29 = vector.load %arg6[%c0_22, %c0_23] : memref<256x8xbf16, #tpu.memory_space<vmem>>, vector<256x8xbf16>
    %30 = arith.extf %29 : vector<256x8xbf16> to vector<256x8xf32>
    %31 = arith.mulf %28, %30 : vector<256x8xf32>
    %32 = arith.truncf %31 : vector<256x8xf32> to vector<256x8xbf16>
    %c0_24 = arith.constant 0 : index
    %c0_25 = arith.constant 0 : index
    %33 = vector.load %arg7[%c0_24, %c0_25] : memref<256x8xf32, #tpu.memory_space<vmem>>, vector<256x8xf32>
    %c0_26 = arith.constant 0 : index
    %c0_27 = arith.constant 0 : index
    %34 = vector.load %arg13[%c0_26, %c0_27] : memref<8x8xbf16, #tpu.memory_space<vmem>>, vector<8x8xbf16>
    %cst_28 = arith.constant dense<0.000000e+00> : vector<256x8xf32>
    %35 = tpu.matmul %32, %34, %cst_28 {dimension_numbers = #tpu.dot_dimension_numbers<[1], [0], [0], [1], [0, 0, 1, 1], [], []>} : vector<256x8xbf16>, vector<8x8xbf16>, vector<256x8xf32> -> vector<256x8xf32>
    %36 = arith.addf %33, %35 : vector<256x8xf32>
    %c0_29 = arith.constant 0 : index
    %c0_30 = arith.constant 0 : index
    %37 = vector.load %arg14[%c0_29, %c0_30] : memref<1x8xf32, #tpu.memory_space<vmem>>, vector<1x8xf32>
    %38 = vector.broadcast %37 : vector<1x8xf32> to vector<256x8xf32>
    %39 = arith.addf %36, %38 : vector<256x8xf32>
    %cst_31 = arith.constant dense<0.000000e+00> : vector<256xf32>
    %40 = vector.multi_reduction <add>, %39, %cst_31 [1] : vector<256x8xf32> to vector<256xf32>
    %41 = vector.shape_cast %40 : vector<256xf32> to vector<256x1xf32>
    %cst_32 = arith.constant 8.000000e+00 : f32
    %42 = vector.broadcast %cst_32 : f32 to vector<256x1xf32>
    %43 = arith.divf %41, %42 : vector<256x1xf32>
    %44 = vector.broadcast %43 : vector<256x1xf32> to vector<256x8xf32>
    %45 = arith.subf %39, %44 : vector<256x8xf32>
    %46 = arith.mulf %45, %45 : vector<256x8xf32>
    %cst_33 = arith.constant dense<0.000000e+00> : vector<256xf32>
    %47 = vector.multi_reduction <add>, %46, %cst_33 [1] : vector<256x8xf32> to vector<256xf32>
    %48 = vector.shape_cast %47 : vector<256xf32> to vector<256x1xf32>
    %cst_34 = arith.constant 8.000000e+00 : f32
    %49 = vector.broadcast %cst_34 : f32 to vector<256x1xf32>
    %50 = arith.divf %48, %49 : vector<256x1xf32>
    %51 = vector.broadcast %43 : vector<256x1xf32> to vector<256x8xf32>
    %52 = arith.subf %39, %51 : vector<256x8xf32>
    %cst_35 = arith.constant 9.99999997E-7 : f32
    %53 = vector.broadcast %cst_35 : f32 to vector<256x1xf32>
    %54 = arith.addf %50, %53 : vector<256x1xf32>
    %55 = math.rsqrt %54 : vector<256x1xf32>
    %56 = vector.broadcast %55 : vector<256x1xf32> to vector<256x8xf32>
    %57 = arith.mulf %52, %56 : vector<256x8xf32>
    %c0_36 = arith.constant 0 : index
    %c0_37 = arith.constant 0 : index
    %58 = vector.load %arg15[%c0_36, %c0_37] : memref<1x8xf32, #tpu.memory_space<vmem>>, vector<1x8xf32>
    %59 = vector.broadcast %58 : vector<1x8xf32> to vector<256x8xf32>
    %60 = arith.mulf %57, %59 : vector<256x8xf32>
    %c0_38 = arith.constant 0 : index
    %c0_39 = arith.constant 0 : index
    %61 = vector.load %arg16[%c0_38, %c0_39] : memref<1x8xf32, #tpu.memory_space<vmem>>, vector<1x8xf32>
    %62 = vector.broadcast %61 : vector<1x8xf32> to vector<256x8xf32>
    %63 = arith.addf %60, %62 : vector<256x8xf32>
    %64 = arith.truncf %63 : vector<256x8xf32> to vector<256x8xbf16>
    %c0_40 = arith.constant 0 : index
    %c0_41 = arith.constant 0 : index
    %65 = vector.load %arg17[%c0_40, %c0_41] : memref<8x8xbf16, #tpu.memory_space<vmem>>, vector<8x8xbf16>
    %cst_42 = arith.constant dense<0.000000e+00> : vector<256x8xf32>
    %66 = tpu.matmul %64, %65, %cst_42 {dimension_numbers = #tpu.dot_dimension_numbers<[1], [0], [0], [1], [0, 0, 1, 1], [], []>} : vector<256x8xbf16>, vector<8x8xbf16>, vector<256x8xf32> -> vector<256x8xf32>
    %c0_43 = arith.constant 0 : index
    %c0_44 = arith.constant 0 : index
    %67 = vector.load %arg18[%c0_43, %c0_44] : memref<1x8xf32, #tpu.memory_space<vmem>>, vector<1x8xf32>
    %68 = vector.broadcast %67 : vector<1x8xf32> to vector<256x8xf32>
    %69 = arith.addf %66, %68 : vector<256x8xf32>
    %c0_45 = arith.constant 0 : index
    %c0_46 = arith.constant 0 : index
    %70 = vector.load %arg19[%c0_45, %c0_46] : memref<8x8xbf16, #tpu.memory_space<vmem>>, vector<8x8xbf16>
    %cst_47 = arith.constant dense<0.000000e+00> : vector<256x8xf32>
    %71 = tpu.matmul %64, %70, %cst_47 {dimension_numbers = #tpu.dot_dimension_numbers<[1], [0], [0], [1], [0, 0, 1, 1], [], []>} : vector<256x8xbf16>, vector<8x8xbf16>, vector<256x8xf32> -> vector<256x8xf32>
    %c0_48 = arith.constant 0 : index
    %c0_49 = arith.constant 0 : index
    %72 = vector.load %arg20[%c0_48, %c0_49] : memref<1x8xf32, #tpu.memory_space<vmem>>, vector<1x8xf32>
    %73 = vector.broadcast %72 : vector<1x8xf32> to vector<256x8xf32>
    %74 = arith.addf %71, %73 : vector<256x8xf32>
    %75 = arith.mulf %69, %74 : vector<256x8xf32>
    %76 = arith.truncf %75 : vector<256x8xf32> to vector<256x8xbf16>
    %c0_50 = arith.constant 0 : index
    %c0_51 = arith.constant 0 : index
    %77 = vector.load %arg21[%c0_50, %c0_51] : memref<8x8xbf16, #tpu.memory_space<vmem>>, vector<8x8xbf16>
    %cst_52 = arith.constant dense<0.000000e+00> : vector<256x8xf32>
    %78 = tpu.matmul %76, %77, %cst_52 {dimension_numbers = #tpu.dot_dimension_numbers<[1], [0], [0], [1], [0, 0, 1, 1], [], []>} : vector<256x8xbf16>, vector<8x8xbf16>, vector<256x8xf32> -> vector<256x8xf32>
    %79 = arith.addf %39, %78 : vector<256x8xf32>
    %c0_53 = arith.constant 0 : index
    %c0_54 = arith.constant 0 : index
    %80 = vector.load %arg22[%c0_53, %c0_54] : memref<1x8xf32, #tpu.memory_space<vmem>>, vector<1x8xf32>
    %81 = vector.broadcast %80 : vector<1x8xf32> to vector<256x8xf32>
    %82 = arith.addf %79, %81 : vector<256x8xf32>
    %c0_55 = arith.constant 0 : index
    %c0_56 = arith.constant 0 : index
    %83 = vector.load %arg23[%c0_55, %c0_56] : memref<256x8xf32, #tpu.memory_space<vmem>>, vector<256x8xf32>
    tpu.vector_store %arg23[%c0_55, %c0_56], %82 {strides = array<i32>} : memref<256x8xf32, #tpu.memory_space<vmem>>, vector<256x8xf32>,
    return
  }
  func.func @transform_0(%arg0: i32) -> (i32, i32) {
    %c0_i32 = arith.constant 0 : i32
    %c0_i32_0 = arith.constant 0 : i32
    return %arg0, %c0_i32 : i32, i32
  }
  func.func @transform_1(%arg0: i32) -> (i32, i32) {
    %c0_i32 = arith.constant 0 : i32
    %c0_i32_0 = arith.constant 0 : i32
    return %arg0, %c0_i32 : i32, i32
  }
  func.func @transform_2(%arg0: i32) -> (i32, i32) {
    %c0_i32 = arith.constant 0 : i32
    %c0_i32_0 = arith.constant 0 : i32
    return %arg0, %c0_i32 : i32, i32
  }
  func.func @transform_3(%arg0: i32) -> (i32, i32) {
    %c0_i32 = arith.constant 0 : i32
    %c0_i32_0 = arith.constant 0 : i32
    return %arg0, %c0_i32 : i32, i32
  }
  func.func @transform_4(%arg0: i32) -> (i32, i32) {
    %c0_i32 = arith.constant 0 : i32
    %c0_i32_0 = arith.constant 0 : i32
    return %arg0, %c0_i32 : i32, i32
  }
  func.func @transform_5(%arg0: i32) -> (i32, i32) {
    %c0_i32 = arith.constant 0 : i32
    %c0_i32_0 = arith.constant 0 : i32
    return %arg0, %c0_i32 : i32, i32
  }
  func.func @transform_6(%arg0: i32) -> (i32, i32) {
    %c0_i32 = arith.constant 0 : i32
    %c0_i32_0 = arith.constant 0 : i32
    return %arg0, %c0_i32 : i32, i32
  }
  func.func @transform_7(%arg0: i32) -> (i32, i32) {
    %c0_i32 = arith.constant 0 : i32
    %c0_i32_0 = arith.constant 0 : i32
    %c0_i32_1 = arith.constant 0 : i32
    return %c0_i32, %c0_i32_0 : i32, i32
  }
  func.func @transform_8(%arg0: i32) -> (i32, i32) {
    %c0_i32 = arith.constant 0 : i32
    %c0_i32_0 = arith.constant 0 : i32
    %c0_i32_1 = arith.constant 0 : i32
    return %c0_i32, %c0_i32_0 : i32, i32
  }
  func.func @transform_9(%arg0: i32) -> (i32, i32) {
    %c0_i32 = arith.constant 0 : i32
    %c0_i32_0 = arith.constant 0 : i32
    %c0_i32_1 = arith.constant 0 : i32
    return %c0_i32, %c0_i32_0 : i32, i32
  }
  func.func @transform_10(%arg0: i32) -> (i32, i32) {
    %c0_i32 = arith.constant 0 : i32
    %c0_i32_0 = arith.constant 0 : i32
    %c0_i32_1 = arith.constant 0 : i32
    return %c0_i32, %c0_i32_0 : i32, i32
  }
  func.func @transform_11(%arg0: i32) -> (i32, i32) {
    %c0_i32 = arith.constant 0 : i32
    %c0_i32_0 = arith.constant 0 : i32
    %c0_i32_1 = arith.constant 0 : i32
    return %c0_i32, %c0_i32_0 : i32, i32
  }
  func.func @transform_12(%arg0: i32) -> (i32, i32) {
    %c0_i32 = arith.constant 0 : i32
    %c0_i32_0 = arith.constant 0 : i32
    %c0_i32_1 = arith.constant 0 : i32
    return %c0_i32, %c0_i32_0 : i32, i32
  }
  func.func @transform_13(%arg0: i32) -> (i32, i32) {
    %c0_i32 = arith.constant 0 : i32
    %c0_i32_0 = arith.constant 0 : i32
    %c0_i32_1 = arith.constant 0 : i32
    return %c0_i32, %c0_i32_0 : i32, i32
  }
  func.func @transform_14(%arg0: i32) -> (i32, i32) {
    %c0_i32 = arith.constant 0 : i32
    %c0_i32_0 = arith.constant 0 : i32
    %c0_i32_1 = arith.constant 0 : i32
    return %c0_i32, %c0_i32_0 : i32, i32
  }
  func.func @transform_15(%arg0: i32) -> (i32, i32) {
    %c0_i32 = arith.constant 0 : i32
    %c0_i32_0 = arith.constant 0 : i32
    %c0_i32_1 = arith.constant 0 : i32
    return %c0_i32, %c0_i32_0 : i32, i32
  }
  func.func @transform_16(%arg0: i32) -> (i32, i32) {
    %c0_i32 = arith.constant 0 : i32
    %c0_i32_0 = arith.constant 0 : i32
    %c0_i32_1 = arith.constant 0 : i32
    return %c0_i32, %c0_i32_0 : i32, i32
  }
  func.func @transform_17(%arg0: i32) -> (i32, i32) {
    %c0_i32 = arith.constant 0 : i32
    %c0_i32_0 = arith.constant 0 : i32
    %c0_i32_1 = arith.constant 0 : i32
    return %c0_i32, %c0_i32_0 : i32, i32
  }
  func.func @transform_18(%arg0: i32) -> (i32, i32) {
    %c0_i32 = arith.constant 0 : i32
    %c0_i32_0 = arith.constant 0 : i32
    %c0_i32_1 = arith.constant 0 : i32
    return %c0_i32, %c0_i32_0 : i32, i32
  }
  func.func @transform_19(%arg0: i32) -> (i32, i32) {
    %c0_i32 = arith.constant 0 : i32
    %c0_i32_0 = arith.constant 0 : i32
    %c0_i32_1 = arith.constant 0 : i32
    return %c0_i32, %c0_i32_0 : i32, i32
  }
  func.func @transform_20(%arg0: i32) -> (i32, i32) {
    %c0_i32 = arith.constant 0 : i32
    %c0_i32_0 = arith.constant 0 : i32
    %c0_i32_1 = arith.constant 0 : i32
    return %c0_i32, %c0_i32_0 : i32, i32
  }
  func.func @transform_21(%arg0: i32) -> (i32, i32) {
    %c0_i32 = arith.constant 0 : i32
    %c0_i32_0 = arith.constant 0 : i32
    %c0_i32_1 = arith.constant 0 : i32
    return %c0_i32, %c0_i32_0 : i32, i32
  }
  func.func @transform_22(%arg0: i32) -> (i32, i32) {
    %c0_i32 = arith.constant 0 : i32
    %c0_i32_0 = arith.constant 0 : i32
    return %arg0, %c0_i32 : i32, i32
  }
}

</mosaic_0001>

<bundles_post_ra>
// kernel: kbblock_forward.3
= control target key start
LH: loop header
LB: loop body
LE: loop exit
PB: predicated region body
PF: predicated region fallthrough
CT: control target
= control target key end

     0   :  { %15 = vsyncpa [#allocation3], 0  ;;  %s3563_s0 = inlined_call_operand.vmem [shape: f32[512,8], index: 0, kind: input, shape index: {}]   ;;  %s3564_s1 = inlined_call_operand.hbm [shape: f32[1,8], index: 1, kind: input, shape index: {}]   ;;  %s3565_s2 = inlined_call_operand.hbm [shape: f32[1,8], index: 2, kind: input, shape index: {}]   ;;  %s3566_s3 = inlined_call_operand.vmem [shape: bf16[8,8], index: 3, kind: input, shape index: {}]   ;;  %s3567_s4 = inlined_call_operand.hbm [shape: f32[1,8], index: 4, kind: input, shape index: {}]   ;;  %s3568_s5 = inlined_call_operand.vmem [shape: bf16[8,32], index: 5, kind: input, shape index: {}]   ;;  %s3569_s6 = inlined_call_operand.hbm [shape: f32[1,32], index: 6, kind: input, shape index: {}]   ;;  %s3570_s7 = inlined_call_operand.vmem [shape: bf16[512,8], index: 7, kind: output, shape index: {0}]   ;;  %s3571_s8 = inlined_call_operand.vmem [shape: bf16[512,8], index: 8, kind: output, shape index: {1}]   ;;  %s3572_s9 = inlined_call_operand.vmem [shape: bf16[512,32], index: 9, kind: output, shape index: {2}]  }
   0x1   :  { %16 = vsyncpa [#allocation5], 0 }
   0x2   :  { %17 = vsyncpa [#allocation8], 0  ;;  %s2637_s30 = smov 0  }
   0x3 LB: > { %s1983_s10 = sadd.s32 4294967295, %s2581_s30   ;;  %p1985_p0 = scmp.ge.s32.totalorder %s2581_s30, 1  ;;  %s2581_s30 = sphi %s2637_s30, %s23_s30  }
   0x4   : > { %p258_p1 = scmp.lt.s32.totalorder %s2581_s30, 3  ;;  %p2647_p2 = scmp.eq.s32.totalorder %s1983_s10, 0 }
   0x5   : > { %s2583_s12 = smov [#allocation4]   ;;  %s2584_s15 = smov [#allocation2]  }
   0x6   : > { %s3576_s11 = scalar_select %p2647_p2, 1, 0 }
   0x7   : > { %s282_s13 = sshll.u32 %s2583_s12, 4  ;;  %p2651_p3 = pnand %p1985_p0, %p258_p1  ;;  %s283_s13 = int_to_ptr.vmem [resolvable:$true] %s282_s13 }
   0x8   : > { %s271_s16 = sshll.u32 %s2584_s15, 4  ;;  %s2585_s17 = smov [#allocation6]   ;;  %s2663_s16 = int_to_ptr.vmem [resolvable:$true] %s271_s16 }
   0x9   : > { %s3577_s14 = scalar_select %p2651_p3, 1, 0 }
   0xa   : > { %p2354_p4 = pneg %p2651_p3  ;;  %s296_s18 = sshll.u32 %s2585_s17, 4  ;;  %s2665_s18 = int_to_ptr.vmem [resolvable:$true] %s296_s18 }
   0xb   : > { %s2586_s20 = smov [#allocation7]   ;;  %s2451_s24 = scalar_lea.hbm %s3565_s2, 16 }
   0xc   : > { %p2659_p5 = pnand %p2647_p2, %p2354_p4  ;;  %s310_s21 = sshll.u32 %s2586_s20, 4  ;;  %s2667_s21 = int_to_ptr.vmem [resolvable:$true] %s310_s21 }
   0xd   : > { %p2452_p6 = scmp.ne.s32.totalorder %s3565_s2, %s2451_s24  ;;  %p2458_p10 = scmp.lt.u32.totalorder %s2451_s24, %s3565_s2 }
   0xe   : > { %p2677_p7 = pneg %p2659_p5 }
  0x10   : > { %p2454_p8 = pnand %p2677_p7, %p2452_p6 }
  0x12   : > { %p2455_p9 = pneg %p2454_p8 }
  0x14   : > { %p2460_p11 = pnand %p2458_p10, %p2455_p9 }
  0x16   : > { %2463 = shalt.err (!%p2460_p11)
}
  0x17   : > { %s2464_s12 = scalar_lea.vmem %s283_s13, 16  ;;  %s2471_s15 = scalar_lea.vmem %s283_s13, 32 }
  0x18   : > { %p2465_p12 = scmp.ne.s32.totalorder %s283_s13, %s2464_s12  ;;  %p2472_p1 = scmp.lt.s32.totalorder %s283_s13, %s283_s13 }
  0x19   : > { %p2473_p4 = scmp.lt.s32.totalorder %s2471_s15, %s2464_s12 }
  0x1a   : > { %p2467_p13 = pnand %p2465_p12, %p2677_p7 }
  0x1b   : > { %p2474_p2 = por %p2473_p4, %p2472_p1 }
  0x1c   : > { %p2468_p0 = pneg %p2467_p13 }
  0x1e   : > { %p2475_p3 = pnand %p2474_p2, %p2468_p0 }
  0x20   : > { %2478 = shalt.err (!%p2475_p3)
}
  0x21   : > { %2360 = dma.hbm_to_vmem [thread:$0]  (!%p2659_p5), %s3565_s2, 16, %s283_s13, [#allocation5]  }
  0x22   : > { %s2479_s24 = scalar_lea.hbm %s3564_s1, 16 }
  0x23   : > { %p2480_p6 = scmp.ne.s32.totalorder %s3564_s1, %s2479_s24  ;;  %p2486_p2 = scmp.lt.u32.totalorder %s2479_s24, %s3564_s1 }
  0x25   : > { %p2482_p8 = pnand %p2480_p6, %p2677_p7 }
  0x27   : > { %p2483_p9 = pneg %p2482_p8 }
  0x29   : > { %p2488_p3 = pnand %p2486_p2, %p2483_p9 }
  0x2b   : > { %2491 = shalt.err (!%p2488_p3)
}
  0x2c   : > { %s2492_s13 = scalar_lea.vmem %s2663_s16, 16  ;;  %s2499_s12 = scalar_lea.vmem %s2663_s16, 32 }
  0x2d   : > { %p2493_p10 = scmp.ne.s32.totalorder %s2663_s16, %s2492_s13  ;;  %p2500_p13 = scmp.lt.s32.totalorder %s2663_s16, %s2663_s16 }
  0x2e   : > { %p2501_p0 = scmp.lt.s32.totalorder %s2499_s12, %s2492_s13 }
  0x2f   : > { %p2495_p11 = pnand %p2493_p10, %p2677_p7 }
  0x30   : > { %p2502_p1 = por %p2501_p0, %p2500_p13 }
  0x31   : > { %p2496_p12 = pneg %p2495_p11 }
  0x33   : > { %p2503_p4 = pnand %p2502_p1, %p2496_p12 }
  0x35   : > { %2506 = shalt.err (!%p2503_p4)
}
  0x36   : > { %2357 = dma.hbm_to_vmem [thread:$0]  (!%p2659_p5), %s3564_s1, 16, %s2663_s16, [#allocation3]  }
  0x37   : > { %s2507_s23 = scalar_lea.hbm %s3567_s4, 16 }
  0x38   : > { %p2508_p6 = scmp.ne.s32.totalorder %s3567_s4, %s2507_s23  ;;  %p2514_p2 = scmp.lt.u32.totalorder %s2507_s23, %s3567_s4 }
  0x3a   : > { %p2510_p8 = pnand %p2508_p6, %p2677_p7 }
  0x3c   : > { %p2511_p9 = pneg %p2510_p8 }
  0x3e   : > { %p2516_p3 = pnand %p2514_p2, %p2511_p9 }
  0x40   : > { %2519 = shalt.err (!%p2516_p3)
}
  0x41   : > { %s2520_s16 = scalar_lea.vmem %s2665_s18, 16  ;;  %s2527_s29 = scalar_lea.vmem %s2665_s18, 32 }
  0x42   : > { %p2521_p10 = scmp.ne.s32.totalorder %s2665_s18, %s2520_s16  ;;  %p2528_p13 = scmp.lt.s32.totalorder %s2665_s18, %s2665_s18 }
  0x43   : > { %p2529_p0 = scmp.lt.s32.totalorder %s2527_s29, %s2520_s16 }
  0x44   : > { %p2523_p11 = pnand %p2521_p10, %p2677_p7 }
  0x45   : > { %p2530_p1 = por %p2529_p0, %p2528_p13 }
  0x46   : > { %p2524_p12 = pneg %p2523_p11 }
  0x48   : > { %p2531_p4 = pnand %p2530_p1, %p2524_p12 }
  0x4a   : > { %2534 = shalt.err (!%p2531_p4)
}
  0x4b   : > { %2363 = dma.hbm_to_vmem [thread:$0]  (!%p2659_p5), %s3567_s4, 16, %s2665_s18, [#allocation5]  }
  0x4c   : > { %s2535_s20 = scalar_lea.hbm %s3569_s6, 16 }
  0x4d   : > { %p2536_p6 = scmp.ne.s32.totalorder %s3569_s6, %s2535_s20  ;;  %p2542_p2 = scmp.lt.u32.totalorder %s2535_s20, %s3569_s6 }
  0x4f   : > { %p2538_p8 = pnand %p2536_p6, %p2677_p7 }
  0x51   : > { %p2539_p9 = pneg %p2538_p8 }
  0x53   : > { %p2544_p3 = pnand %p2542_p2, %p2539_p9 }
  0x55   : > { %2547 = shalt.err (!%p2544_p3)
}
  0x56   : > { %s2548_s18 = scalar_lea.vmem %s2667_s21, 16  ;;  %s2555_s26 = scalar_lea.vmem %s2667_s21, 32 }
  0x57   : > { %p2549_p10 = scmp.ne.s32.totalorder %s2667_s21, %s2548_s18  ;;  %p2556_p13 = scmp.lt.s32.totalorder %s2667_s21, %s2667_s21 }
  0x58   : > { %p2557_p0 = scmp.lt.s32.totalorder %s2555_s26, %s2548_s18 }
  0x59   : > { %p2551_p11 = pnand %p2549_p10, %p2677_p7 }
  0x5a   : > { %p2558_p1 = por %p2557_p0, %p2556_p13 }
  0x5b   : > { %p2552_p12 = pneg %p2551_p11 }
  0x5d   : > { %p2559_p4 = pnand %p2558_p1, %p2552_p12 }
  0x5f   : > { %2562 = shalt.err (!%p2559_p4)
}
  0x60   : > { %2366 = dma.hbm_to_vmem [thread:$0]  (!%p2659_p5), %s3569_s6, 16, %s2667_s21, [#allocation8]  }
  0x61   : > { %p3580_p6 = scmp.ne.s32.totalorder %s3577_s14, 0 }
  0x62   : > { %p3581_p7 = scmp.ne.s32.totalorder (!%p3580_p6), %s3576_s11, 0 }
  0x63   : > { %332 = sbr.rel (%p3580_p6) target bundleno = 719 (0x2cf), region = 48 }
  0x6a   : > { %2568 = dma.done.wait (%p3581_p7), [#allocation3], 16  }
  0x6b   : > { %2570 = vsyncadd (%p3581_p7), [#allocation3], 4294967280 }
  0x6c   : > { %2572 = dma.done.wait (%p3581_p7), [#allocation5], 32  }
  0x6d   : > { %2574 = vsyncadd (%p3581_p7), [#allocation5], 4294967264 }
  0x6e   : > { %2576 = dma.done.wait (%p3581_p7), [#allocation8], 16  }
  0x6f   : > { %2578 = vsyncadd (%p3581_p7), [#allocation8], 4294967280  ;;  %s1996_s14 = sshll.u32 %s1983_s10, 5  ;;  %vm447_vm0 = vcmask 64512   ;;  %vm1160_vm1 = vcmask 1043456   ;;  %vm1071_vm2 = vcmask 60416  }
  0x70   : > { %p391_p5 = scmp.lt.s32.totalorder %s1996_s14, 63  ;;  %vm1785_vm3 = vcmask 257024  }
  0x72   : > { %s3583_s14 = smov (!%p391_p5, %s1996_s14), 63 }
  0x73   : > { %s1997_s19 = sshll.u32 %s3583_s14, 3  ;;  %s3153_s15 = sshll.u32 %s3583_s14, 2 }
  0x74   : > { %s2787_s29 = scalar_lea.vmem %s3563_s0, %s1997_s19  ;;  %s3163_s22 = scalar_lea.vmem %s3570_s7, %s3153_s15 }
  0x75   : > { %v2790_v0 = vld [vmem:[%s2787_s29] sm:$0xff]  ;;  %v2793_v1 = vld [vmem:[%s2787_s29 + $0x10] sm:$0xff]  ;;  %v2796_v2 = vld [vmem:[%s2787_s29 + $0x8] sm:$0xff]  ;;  %s3362_s25 = scalar_lea.vmem %s3571_s8, %s3153_s15  ;;  %s3368_s28 = scalar_lea.vmem %s3572_s9, %s3153_s15 }
  0x76   : > { %v448_v3 = vsel %vm447_vm0, %v2790_v0, 0.0  ;;  %v454_v4 = vsel %vm447_vm0, %v2793_v1, 0.0  ;;  %v2803_v5 = vld [vmem:[%s2787_s29 + $0x18] sm:$0xff]  ;;  %v451_v6 = vsel %vm447_vm0, %v2796_v2, 0.0  ;;  %v2810_v8 = vld [vmem:[%s2787_s29 + $0x20] sm:$0xff]  ;;  %v2813_v9 = vld [vmem:[%s2787_s29 + $0x28] sm:$0xff] }
  0x77   : > { %449 = vadd.xlane.f32.xlu0 %v448_v3  ;;  %455 = vadd.xlane.f32.xlu1 %v454_v4  ;;  %v457_v7 = vsel %vm447_vm0, %v2803_v5, 0.0  ;;  %v460_v10 = vsel %vm447_vm0, %v2810_v8, 0.0  ;;  %v463_v11 = vsel %vm447_vm0, %v2813_v9, 0.0  ;;  %v2820_v12 = vld [vmem:[%s2787_s29 + $0x30] sm:$0xff]  ;;  %v2823_v13 = vld [vmem:[%s2787_s29 + $0x38] sm:$0xff]  ;;  %v2830_v16 = vld [vmem:[%s2787_s29 + $0x40] sm:$0xff] }
  0x78   : > { %v466_v14 = vsel %vm447_vm0, %v2820_v12, 0.0  ;;  %v469_v15 = vsel %vm447_vm0, %v2823_v13, 0.0  ;;  %v2833_v17 = vld [vmem:[%s2787_s29 + $0x48] sm:$0xff]  ;;  %v472_v18 = vsel %vm447_vm0, %v2830_v16, 0.0  ;;  %v2840_v20 = vld [vmem:[%s2787_s29 + $0x50] sm:$0xff]  ;;  %v2843_v21 = vld [vmem:[%s2787_s29 + $0x58] sm:$0xff] }
  0x79   : > { %v475_v19 = vsel %vm447_vm0, %v2833_v17, 0.0  ;;  %v478_v22 = vsel %vm447_vm0, %v2840_v20, 0.0  ;;  %v481_v23 = vsel %vm447_vm0, %v2843_v21, 0.0  ;;  %v2850_v24 = vld [vmem:[%s2787_s29 + $0x60] sm:$0xff]  ;;  %v2853_v25 = vld [vmem:[%s2787_s29 + $0x68] sm:$0xff]  ;;  %v2860_v28 = vld [vmem:[%s2787_s29 + $0x70] sm:$0xff] }
  0x7a   : > { %v484_v26 = vsel %vm447_vm0, %v2850_v24, 0.0  ;;  %v487_v27 = vsel %vm447_vm0, %v2853_v25, 0.0  ;;  %v2863_v29 = vld [vmem:[%s2787_s29 + $0x78] sm:$0xff]  ;;  %v490_v30 = vsel %vm447_vm0, %v2860_v28, 0.0  ;;  %v2870_v32 = vld [vmem:[%s2787_s29 + $0x80] sm:$0xff]  ;;  %v2873_v33 = vld [vmem:[%s2787_s29 + $0x88] sm:$0xff] }
  0x7b   : > { %452 = vadd.xlane.f32.xlu0 %v451_v6  ;;  %458 = vadd.xlane.f32.xlu1 %v457_v7  ;;  %v493_v31 = vsel %vm447_vm0, %v2863_v29, 0.0  ;;  %v496_v34 = vsel %vm447_vm0, %v2870_v32, 0.0  ;;  %v499_v35 = vsel %vm447_vm0, %v2873_v33, 0.0  ;;  %v2880_v36 = vld [vmem:[%s2787_s29 + $0x90] sm:$0xff]  ;;  %v2883_v37 = vld [vmem:[%s2787_s29 + $0x98] sm:$0xff]  ;;  %v2890_v40 = vld [vmem:[%s2787_s29 + $0xa0] sm:$0xff] }
  0x7c   : > { %v502_v38 = vsel %vm447_vm0, %v2880_v36, 0.0  ;;  %v505_v39 = vsel %vm447_vm0, %v2883_v37, 0.0  ;;  %v2893_v41 = vld [vmem:[%s2787_s29 + $0xa8] sm:$0xff]  ;;  %v508_v42 = vsel %vm447_vm0, %v2890_v40, 0.0  ;;  %v2900_v44 = vld [vmem:[%s2787_s29 + $0xb0] sm:$0xff]  ;;  %v2903_v45 = vld [vmem:[%s2787_s29 + $0xb8] sm:$0xff] }
  0x7d   : > { %v511_v43 = vsel %vm447_vm0, %v2893_v41, 0.0  ;;  %v514_v46 = vsel %vm447_vm0, %v2900_v44, 0.0  ;;  %v517_v47 = vsel %vm447_vm0, %v2903_v45, 0.0  ;;  %v2910_v48 = vld [vmem:[%s2787_s29 + $0xc0] sm:$0xff]  ;;  %v2913_v49 = vld [vmem:[%s2787_s29 + $0xc8] sm:$0xff]  ;;  %v2920_v52 = vld [vmem:[%s2787_s29 + $0xd0] sm:$0xff] }
  0x7e   : > { %v520_v50 = vsel %vm447_vm0, %v2910_v48, 0.0  ;;  %v523_v51 = vsel %vm447_vm0, %v2913_v49, 0.0  ;;  %v2923_v53 = vld [vmem:[%s2787_s29 + $0xd8] sm:$0xff]  ;;  %v526_v54 = vsel %vm447_vm0, %v2920_v52, 0.0  ;;  %v2930_v56 = vld [vmem:[%s2787_s29 + $0xe0] sm:$0xff]  ;;  %v2933_v57 = vld [vmem:[%s2787_s29 + $0xe8] sm:$0xff] }
  0x7f   : > { %461 = vadd.xlane.f32.xlu0 %v460_v10  ;;  %464 = vadd.xlane.f32.xlu1 %v463_v11  ;;  %v529_v55 = vsel %vm447_vm0, %v2923_v53, 0.0  ;;  %v532_v58 = vsel %vm447_vm0, %v2930_v56, 0.0  ;;  %v535_v59 = vsel %vm447_vm0, %v2933_v57, 0.0  ;;  %v2940_v60 = vld [vmem:[%s2787_s29 + $0xf0] sm:$0xff]  ;;  %v2943_v61 = vld [vmem:[%s2787_s29 + $0xf8] sm:$0xff] }
  0x80   : > { %v538_v62 = vsel %vm447_vm0, %v2940_v60, 0.0  ;;  %v541_v63 = vsel %vm447_vm0, %v2943_v61, 0.0 }
  0x83   : > { %467 = vadd.xlane.f32.xlu0 %v466_v14  ;;  %470 = vadd.xlane.f32.xlu1 %v469_v15 }
  0x87   : > { %473 = vadd.xlane.f32.xlu0 %v472_v18  ;;  %476 = vadd.xlane.f32.xlu1 %v475_v19 }
  0x8b   : > { %479 = vadd.xlane.f32.xlu0 %v478_v22  ;;  %482 = vadd.xlane.f32.xlu1 %v481_v23 }
  0x8f   : > { %485 = vadd.xlane.f32.xlu0 %v484_v26  ;;  %488 = vadd.xlane.f32.xlu1 %v487_v27 }
  0x93   : > { %491 = vadd.xlane.f32.xlu0 %v490_v30  ;;  %494 = vadd.xlane.f32.xlu1 %v493_v31 }
  0x97   : > { %497 = vadd.xlane.f32.xlu0 %v496_v34  ;;  %500 = vadd.xlane.f32.xlu1 %v499_v35 }
  0x9b   : > { %503 = vadd.xlane.f32.xlu0 %v502_v38  ;;  %506 = vadd.xlane.f32.xlu1 %v505_v39 }
  0x9f   : > { %509 = vadd.xlane.f32.xlu0 %v508_v42  ;;  %512 = vadd.xlane.f32.xlu1 %v511_v43 }
  0xa3   : > { %515 = vadd.xlane.f32.xlu0 %v514_v46  ;;  %518 = vadd.xlane.f32.xlu1 %v517_v47 }
  0xa7   : > { %521 = vadd.xlane.f32.xlu0 %v520_v50  ;;  %524 = vadd.xlane.f32.xlu1 %v523_v51 }
  0xab   : > { %527 = vadd.xlane.f32.xlu0 %v526_v54  ;;  %530 = vadd.xlane.f32.xlu1 %v529_v55 }
  0xaf   : > { %533 = vadd.xlane.f32.xlu0 %v532_v58  ;;  %536 = vadd.xlane.f32.xlu1 %v535_v59 }
  0xb3   : > { %539 = vadd.xlane.f32.xlu0 %v538_v62  ;;  %542 = vadd.xlane.f32.xlu1 %v541_v63 }
 0x104   : > { %v450_v3 = vpop.xlane.xlu0 %449  ;;  %v456_v4 = vpop.xlane.xlu1 %455 }
 0x105   : > { %v545_v6 = vmul.f32 0.125, %v450_v3  ;;  %v547_v7 = vmul.f32 0.125, %v456_v4 }
 0x107   : > { %v2950_v10 = vsub.f32 %v2790_v0, %v545_v6  ;;  %v2953_v11 = vsub.f32 %v2793_v1, %v547_v7 }
 0x108   : > { %v453_v14 = vpop.xlane.xlu0 %452  ;;  %v459_v15 = vpop.xlane.xlu1 %458 }
 0x109   : > { %v546_v18 = vmul.f32 0.125, %v453_v14  ;;  %v548_v19 = vmul.f32 0.125, %v459_v15  ;;  %v609_v22 = vmul.f32 %v2950_v10, %v2950_v10  ;;  %v611_v23 = vmul.f32 %v2953_v11, %v2953_v11 }
 0x10b   : > { %v2960_v26 = vsub.f32 %v2796_v2, %v546_v18  ;;  %v2963_v27 = vsub.f32 %v2803_v5, %v548_v19  ;;  %v641_v0 = vsel %vm447_vm0, %v609_v22, 0.0  ;;  %v647_v31 = vsel %vm447_vm0, %v611_v23, 0.0 }
 0x10c   : > { %642 = vadd.xlane.f32.xlu0 %v641_v0  ;;  %v462_v1 = vpop.xlane.xlu0 %461  ;;  %v465_v30 = vpop.xlane.xlu1 %464 }
 0x10d   : > { %v549_v34 = vmul.f32 0.125, %v462_v1  ;;  %v550_v35 = vmul.f32 0.125, %v465_v30  ;;  %v610_v38 = vmul.f32 %v2960_v26, %v2960_v26  ;;  %v612_v39 = vmul.f32 %v2963_v27, %v2963_v27 }
 0x10f   : > { %v2972_v2 = vsub.f32 %v2810_v8, %v549_v34  ;;  %v2975_v5 = vsub.f32 %v2813_v9, %v550_v35  ;;  %v644_v42 = vsel %vm447_vm0, %v610_v38, 0.0  ;;  %v650_v47 = vsel %vm447_vm0, %v612_v39, 0.0 }
 0x110   : > { %648 = vadd.xlane.f32.xlu0 %v647_v31  ;;  %645 = vadd.xlane.f32.xlu1 %v644_v42  ;;  %v468_v43 = vpop.xlane.xlu0 %467  ;;  %v471_v46 = vpop.xlane.xlu1 %470 }
 0x111   : > { %v551_v50 = vmul.f32 0.125, %v468_v43  ;;  %v552_v51 = vmul.f32 0.125, %v471_v46  ;;  %v613_v54 = vmul.f32 %v2972_v2, %v2972_v2  ;;  %v614_v8 = vmul.f32 %v2975_v5, %v2975_v5 }
 0x113   : > { %v2984_v55 = vsub.f32 %v2820_v12, %v551_v50  ;;  %v2987_v9 = vsub.f32 %v2823_v13, %v552_v51  ;;  %v653_v58 = vsel %vm447_vm0, %v613_v54, 0.0  ;;  %v656_v63 = vsel %vm447_vm0, %v614_v8, 0.0 }
 0x114   : > { %651 = vadd.xlane.f32.xlu1 %v650_v47  ;;  %654 = vadd.xlane.f32.xlu0 %v653_v58  ;;  %v474_v59 = vpop.xlane.xlu0 %473  ;;  %v477_v62 = vpop.xlane.xlu1 %476 }
 0x115   : > { %v553_v3 = vmul.f32 0.125, %v474_v59  ;;  %v554_v4 = vmul.f32 0.125, %v477_v62  ;;  %v615_v6 = vmul.f32 %v2984_v55, %v2984_v55  ;;  %v616_v12 = vmul.f32 %v2987_v9, %v2987_v9 }
 0x117   : > { %v2996_v7 = vsub.f32 %v2830_v16, %v553_v3  ;;  %v2999_v13 = vsub.f32 %v2833_v17, %v554_v4  ;;  %v659_v14 = vsel %vm447_vm0, %v615_v6, 0.0  ;;  %v662_v19 = vsel %vm447_vm0, %v616_v12, 0.0 }
 0x118   : > { %657 = vadd.xlane.f32.xlu1 %v656_v63  ;;  %660 = vadd.xlane.f32.xlu0 %v659_v14  ;;  %v480_v15 = vpop.xlane.xlu0 %479  ;;  %v483_v18 = vpop.xlane.xlu1 %482 }
 0x119   : > { %v555_v22 = vmul.f32 0.125, %v480_v15  ;;  %v556_v23 = vmul.f32 0.125, %v483_v18  ;;  %v617_v0 = vmul.f32 %v2996_v7, %v2996_v7  ;;  %v618_v16 = vmul.f32 %v2999_v13, %v2999_v13 }
 0x11b   : > { %v3008_v1 = vsub.f32 %v2840_v20, %v555_v22  ;;  %v3011_v17 = vsub.f32 %v2843_v21, %v556_v23  ;;  %v665_v30 = vsel %vm447_vm0, %v617_v0, 0.0  ;;  %v668_v35 = vsel %vm447_vm0, %v618_v16, 0.0 }
 0x11c   : > { %663 = vadd.xlane.f32.xlu1 %v662_v19  ;;  %666 = vadd.xlane.f32.xlu0 %v665_v30  ;;  %v486_v31 = vpop.xlane.xlu0 %485  ;;  %v489_v34 = vpop.xlane.xlu1 %488 }
 0x11d   : > { %v557_v38 = vmul.f32 0.125, %v486_v31  ;;  %v558_v39 = vmul.f32 0.125, %v489_v34  ;;  %v619_v42 = vmul.f32 %v3008_v1, %v3008_v1  ;;  %v620_v20 = vmul.f32 %v3011_v17, %v3011_v17 }
 0x11f   : > { %v3020_v43 = vsub.f32 %v2850_v24, %v557_v38  ;;  %v3023_v21 = vsub.f32 %v2853_v25, %v558_v39  ;;  %v671_v46 = vsel %vm447_vm0, %v619_v42, 0.0  ;;  %v674_v51 = vsel %vm447_vm0, %v620_v20, 0.0 }
 0x120   : > { %669 = vadd.xlane.f32.xlu1 %v668_v35  ;;  %672 = vadd.xlane.f32.xlu0 %v671_v46  ;;  %v492_v47 = vpop.xlane.xlu0 %491  ;;  %v495_v50 = vpop.xlane.xlu1 %494 }
 0x121   : > { %v559_v54 = vmul.f32 0.125, %v492_v47  ;;  %v560_v8 = vmul.f32 0.125, %v495_v50  ;;  %v621_v58 = vmul.f32 %v3020_v43, %v3020_v43  ;;  %v622_v24 = vmul.f32 %v3023_v21, %v3023_v21 }
 0x123   : > { %v3032_v59 = vsub.f32 %v2860_v28, %v559_v54  ;;  %v3035_v25 = vsub.f32 %v2863_v29, %v560_v8  ;;  %v677_v62 = vsel %vm447_vm0, %v621_v58, 0.0  ;;  %v680_v4 = vsel %vm447_vm0, %v622_v24, 0.0 }
 0x124   : > { %675 = vadd.xlane.f32.xlu1 %v674_v51  ;;  %678 = vadd.xlane.f32.xlu0 %v677_v62  ;;  %v498_v63 = vpop.xlane.xlu0 %497  ;;  %v501_v3 = vpop.xlane.xlu1 %500 }
 0x125   : > { %v561_v6 = vmul.f32 0.125, %v498_v63  ;;  %v562_v12 = vmul.f32 0.125, %v501_v3  ;;  %v623_v14 = vmul.f32 %v3032_v59, %v3032_v59  ;;  %v624_v28 = vmul.f32 %v3035_v25, %v3035_v25 }
 0x127   : > { %v3044_v15 = vsub.f32 %v2870_v32, %v561_v6  ;;  %v3047_v29 = vsub.f32 %v2873_v33, %v562_v12  ;;  %v683_v18 = vsel %vm447_vm0, %v623_v14, 0.0  ;;  %v686_v23 = vsel %vm447_vm0, %v624_v28, 0.0 }
 0x128   : > { %681 = vadd.xlane.f32.xlu1 %v680_v4  ;;  %684 = vadd.xlane.f32.xlu0 %v683_v18  ;;  %v504_v19 = vpop.xlane.xlu0 %503  ;;  %v507_v22 = vpop.xlane.xlu1 %506 }
 0x129   : > { %v563_v0 = vmul.f32 0.125, %v504_v19  ;;  %v564_v16 = vmul.f32 0.125, %v507_v22  ;;  %v625_v30 = vmul.f32 %v3044_v15, %v3044_v15  ;;  %v626_v32 = vmul.f32 %v3047_v29, %v3047_v29  ;;  %v1485_v19 = vld [vmem:[%s3568_s5] sm:$0xf] }
 0x12a   : > { %2337 = vmatprep.subr.msk.bf16.mxu1 %vm1160_vm1, %v1485_v19 }
 0x12b   : > { %v3056_v31 = vsub.f32 %v2880_v36, %v563_v0  ;;  %v3059_v33 = vsub.f32 %v2883_v37, %v564_v16  ;;  %v689_v34 = vsel %vm447_vm0, %v625_v30, 0.0  ;;  %v692_v39 = vsel %vm447_vm0, %v626_v32, 0.0 }
 0x12c   : > { %687 = vadd.xlane.f32.xlu1 %v686_v23  ;;  %690 = vadd.xlane.f32.xlu0 %v689_v34  ;;  %v510_v35 = vpop.xlane.xlu0 %509  ;;  %v513_v38 = vpop.xlane.xlu1 %512 }
 0x12d   : > { %v565_v42 = vmul.f32 0.125, %v510_v35  ;;  %v566_v20 = vmul.f32 0.125, %v513_v38  ;;  %v627_v46 = vmul.f32 %v3056_v31, %v3056_v31  ;;  %v628_v36 = vmul.f32 %v3059_v33, %v3059_v33 }
 0x12e   : > { %v1494_v35 = vsel %vm1160_vm1, %v1485_v19, 0 }
 0x12f   : > { %v3068_v47 = vsub.f32 %v2890_v40, %v565_v42  ;;  %v3071_v37 = vsub.f32 %v2893_v41, %v566_v20  ;;  %v695_v50 = vsel %vm447_vm0, %v627_v46, 0.0  ;;  %v698_v8 = vsel %vm447_vm0, %v628_v36, 0.0  ;;  %2303 = vmatpush3.bf16.msra.mxu1 %v1494_v35 }
 0x130   : > { %693 = vadd.xlane.f32.xlu1 %v692_v39  ;;  %696 = vadd.xlane.f32.xlu0 %v695_v50  ;;  %v516_v51 = vpop.xlane.xlu0 %515  ;;  %v519_v54 = vpop.xlane.xlu1 %518 }
 0x131   : > { %v567_v58 = vmul.f32 0.125, %v516_v51  ;;  %v568_v24 = vmul.f32 0.125, %v519_v54  ;;  %v629_v62 = vmul.f32 %v3068_v47, %v3068_v47  ;;  %v630_v40 = vmul.f32 %v3071_v37, %v3071_v37 }
 0x133   : > { %v3080_v63 = vsub.f32 %v2900_v44, %v567_v58  ;;  %v3083_v41 = vsub.f32 %v2903_v45, %v568_v24  ;;  %v701_v3 = vsel %vm447_vm0, %v629_v62, 0.0  ;;  %v704_v12 = vsel %vm447_vm0, %v630_v40, 0.0  ;;  %v1104_v45 = vld [vmem:[%s3566_s3] sm:$0xf] }
 0x134   : > { %699 = vadd.xlane.f32.xlu1 %v698_v8  ;;  %702 = vadd.xlane.f32.xlu0 %v701_v3  ;;  %v522_v4 = vpop.xlane.xlu0 %521  ;;  %v525_v6 = vpop.xlane.xlu1 %524  ;;  %v1162_v34 = vsel %vm1160_vm1, %v1104_v45, 0 }
 0x135   : > { %v569_v14 = vmul.f32 0.125, %v522_v4  ;;  %v570_v28 = vmul.f32 0.125, %v525_v6  ;;  %v631_v18 = vmul.f32 %v3080_v63, %v3080_v63  ;;  %v632_v44 = vmul.f32 %v3083_v41, %v3083_v41  ;;  %2336 = vmatprep.subr.msk.bf16.mxu0 %vm1160_vm1, %v1104_v45 }
 0x136   : > { %2269 = vmatpush3.bf16.msra.mxu0 %v1162_v34 }
 0x137   : > { %v3098_v22 = vsub.f32 %v2910_v48, %v569_v14  ;;  %v3101_v23 = vsub.f32 %v2913_v49, %v570_v28  ;;  %v707_v0 = vsel %vm447_vm0, %v631_v18, 0.0  ;;  %v710_v32 = vsel %vm447_vm0, %v632_v44, 0.0 }
 0x138   : > { %705 = vadd.xlane.f32.xlu1 %v704_v12  ;;  %708 = vadd.xlane.f32.xlu0 %v707_v0  ;;  %v528_v16 = vpop.xlane.xlu0 %527  ;;  %v531_v30 = vpop.xlane.xlu1 %530 }
 0x139   : > { %v571_v38 = vmul.f32 0.125, %v528_v16  ;;  %v572_v39 = vmul.f32 0.125, %v531_v30  ;;  %v633_v48 = vmul.f32 %v3098_v22, %v3098_v22  ;;  %v634_v49 = vmul.f32 %v3101_v23, %v3101_v23 }
 0x13b   : > { %v3110_v42 = vsub.f32 %v2920_v52, %v571_v38  ;;  %v3113_v20 = vsub.f32 %v2923_v53, %v572_v39  ;;  %v713_v46 = vsel %vm447_vm0, %v633_v48, 0.0  ;;  %v716_v51 = vsel %vm447_vm0, %v634_v49, 0.0 }
 0x13c   : > { %711 = vadd.xlane.f32.xlu1 %v710_v32  ;;  %714 = vadd.xlane.f32.xlu0 %v713_v46  ;;  %v534_v36 = vpop.xlane.xlu0 %533  ;;  %v537_v50 = vpop.xlane.xlu1 %536 }
 0x13d   : > { %v573_v54 = vmul.f32 0.125, %v534_v36  ;;  %v574_v8 = vmul.f32 0.125, %v537_v50  ;;  %v635_v58 = vmul.f32 %v3110_v42, %v3110_v42  ;;  %v636_v52 = vmul.f32 %v3113_v20, %v3113_v20 }
 0x13f   : > { %v3122_v24 = vsub.f32 %v2930_v56, %v573_v54  ;;  %v3125_v53 = vsub.f32 %v2933_v57, %v574_v8  ;;  %v719_v62 = vsel %vm447_vm0, %v635_v58, 0.0  ;;  %v722_v4 = vsel %vm447_vm0, %v636_v52, 0.0 }
 0x140   : > { %717 = vadd.xlane.f32.xlu1 %v716_v51  ;;  %720 = vadd.xlane.f32.xlu0 %v719_v62  ;;  %v540_v40 = vpop.xlane.xlu0 %539  ;;  %v543_v3 = vpop.xlane.xlu1 %542 }
 0x141   : > { %v575_v6 = vmul.f32 0.125, %v540_v40  ;;  %v576_v12 = vmul.f32 0.125, %v543_v3  ;;  %v637_v14 = vmul.f32 %v3122_v24, %v3122_v24  ;;  %v638_v56 = vmul.f32 %v3125_v53, %v3125_v53 }
 0x143   : > { %v3134_v28 = vsub.f32 %v2940_v60, %v575_v6  ;;  %v3137_v57 = vsub.f32 %v2943_v61, %v576_v12  ;;  %v725_v18 = vsel %vm447_vm0, %v637_v14, 0.0  ;;  %v728_v44 = vsel %vm447_vm0, %v638_v56, 0.0  ;;  %v3147_v6 = vld [vmem:[#allocation2] ss:$0 sm:$0xff] }
 0x144   : > { %723 = vadd.xlane.f32.xlu1 %v722_v4  ;;  %726 = vadd.xlane.f32.xlu0 %v725_v18 }
 0x145   : > { %v639_v45 = vmul.f32 %v3134_v28, %v3134_v28  ;;  %v640_v19 = vmul.f32 %v3137_v57, %v3137_v57 }
 0x147   : > { %v731_v0 = vsel %vm447_vm0, %v639_v45, 0.0  ;;  %v734_v60 = vsel %vm447_vm0, %v640_v19, 0.0  ;;  %v3150_v45 = vld [vmem:[#allocation4] ss:$0 sm:$0xff] }
 0x148   : > { %729 = vadd.xlane.f32.xlu1 %v728_v44  ;;  %732 = vadd.xlane.f32.xlu0 %v731_v0 }
 0x14c   : > { %735 = vadd.xlane.f32.xlu1 %v734_v60 }
 0x199   : > { %v643_v61 = vpop.xlane.xlu0 %642 }
 0x19a   : > { %v737_v16 = vmul.f32 0.125, %v643_v61 }
 0x19c   : > { %v769_v30 = vadd.f32 1e-06, %v737_v16 }
 0x19d   : > { %v646_v32 = vpop.xlane.xlu1 %645  ;;  %v649_v34 = vpop.xlane.xlu0 %648 }
 0x19e   : > { %2387 = vrsqrt.f32 %v769_v30  ;;  %v738_v35 = vmul.f32 0.125, %v646_v32  ;;  %v739_v38 = vmul.f32 0.125, %v649_v34 }
 0x1a0   : > { %v770_v39 = vadd.f32 1e-06, %v738_v35  ;;  %v771_v48 = vadd.f32 1e-06, %v739_v38 }
 0x1a1   : > { %v652_v49 = vpop.xlane.xlu1 %651  ;;  %v655_v46 = vpop.xlane.xlu0 %654 }
 0x1a2   : > { %2389 = vrsqrt.f32 %v770_v39  ;;  %v740_v36 = vmul.f32 0.125, %v652_v49  ;;  %v741_v50 = vmul.f32 0.125, %v655_v46 }
 0x1a3   : > { %2391 = vrsqrt.f32 %v771_v48 }
 0x1a4   : > { %v772_v51 = vadd.f32 1e-06, %v740_v36  ;;  %v773_v54 = vadd.f32 1e-06, %v741_v50 }
 0x1a5   : > { %v658_v8 = vpop.xlane.xlu1 %657  ;;  %v661_v58 = vpop.xlane.xlu0 %660 }
 0x1a6   : > { %2393 = vrsqrt.f32 %v772_v51  ;;  %v742_v52 = vmul.f32 0.125, %v658_v8  ;;  %v743_v62 = vmul.f32 0.125, %v661_v58 }
 0x1a7   : > { %2395 = vrsqrt.f32 %v773_v54 }
 0x1a8   : > { %v2388_v40 = vpop.eup %2387  ;;  %v774_v3 = vadd.f32 1e-06, %v742_v52  ;;  %v775_v4 = vadd.f32 1e-06, %v743_v62 }
 0x1a9   : > { %v664_v12 = vpop.xlane.xlu1 %663  ;;  %v667_v14 = vpop.xlane.xlu0 %666  ;;  %v833_v56 = vmul.f32 %v2388_v40, %v2950_v10 }
 0x1aa   : > { %2397 = vrsqrt.f32 %v774_v3  ;;  %v744_v18 = vmul.f32 0.125, %v664_v12  ;;  %v745_v44 = vmul.f32 0.125, %v667_v14 }
 0x1ab   : > { %2399 = vrsqrt.f32 %v775_v4  ;;  %v872_v19 = vmul.f32 %v3147_v6, %v833_v56 }
 0x1ac   : > { %v2390_v0 = vpop.eup %2389  ;;  %v776_v60 = vadd.f32 1e-06, %v744_v18  ;;  %v777_v61 = vadd.f32 1e-06, %v745_v44 }
 0x1ad   : > { %v2392_v16 = vpop.eup %2391  ;;  %v670_v30 = vpop.xlane.xlu1 %669  ;;  %v834_v34 = vmul.f32 %v2390_v0, %v2960_v26  ;;  %v911_v10 = vadd.f32 %v3150_v45, %v872_v19 }
 0x1ae   : > { %v673_v32 = vpop.xlane.xlu0 %672  ;;  %v835_v35 = vmul.f32 %v2392_v16, %v2953_v11  ;;  %2401 = vrsqrt.f32 %v776_v60  ;;  %v746_v38 = vmul.f32 0.125, %v670_v30 }
 0x1af   : > { %v747_v39 = vmul.f32 0.125, %v673_v32  ;;  %2403 = vrsqrt.f32 %v777_v61  ;;  %v873_v48 = vmul.f32 %v3147_v6, %v834_v34  ;;  %v2138_v49 = vpack.c.bf16 %v911_v10, %v911_v10 }
 0x1b0   : > { %v2394_v46 = vpop.eup %2393  ;;  %v778_v26 = vadd.f32 1e-06, %v746_v38  ;;  %v874_v50 = vmul.f32 %v3147_v6, %v835_v35 }
 0x1b1   : > { %v779_v36 = vadd.f32 1e-06, %v747_v39  ;;  %v2396_v51 = vpop.eup %2395  ;;  %v836_v11 = vmul.f32 %v2394_v46, %v2963_v27  ;;  %v676_v54 = vpop.xlane.xlu1 %675  ;;  %v912_v58 = vadd.f32 %v3150_v45, %v873_v48  ;;  %1072 = vst.msk [vmem:[%s3163_s22] sm:$0xf] %vm1071_vm2, %v2138_v49 }
 0x1b2   : > { %v679_v8 = vpop.xlane.xlu0 %678  ;;  %v837_v52 = vmul.f32 %v2396_v51, %v2972_v2  ;;  %2405 = vrsqrt.f32 %v778_v26  ;;  %v748_v62 = vmul.f32 0.125, %v676_v54  ;;  %v913_v18 = vadd.f32 %v3150_v45, %v874_v50 }
 0x1b3   : > { %v749_v40 = vmul.f32 0.125, %v679_v8  ;;  %2407 = vrsqrt.f32 %v779_v36  ;;  %v943_v3 = vpack.c.bf16 %v912_v58, %v911_v10  ;;  %v2139_v4 = vpack.c.bf16 %v912_v58, %v912_v58 }
 0x1b4   : > { %v875_v12 = vmul.f32 %v3147_v6, %v836_v11  ;;  %v2398_v14 = vpop.eup %2397  ;;  %v780_v56 = vadd.f32 1e-06, %v748_v62  ;;  %v876_v44 = vmul.f32 %v3147_v6, %v837_v52 }
 0x1b5   : > { %v781_v27 = vadd.f32 1e-06, %v749_v40  ;;  %v2400_v19 = vpop.eup %2399  ;;  %v838_v0 = vmul.f32 %v2398_v14, %v2975_v5  ;;  %v682_v2 = vpop.xlane.xlu1 %681  ;;  %1073 = vst.msk [vmem:[%s3163_s22 + $0x4] sm:$0xf] %vm1071_vm2, %v2139_v4  ;;  %2270 = vmatprep.mubr.msk.bf16.mxu0 %vm447_vm0, %v943_v3  ;;  %2304 = vmatprep.mubr.msk.bf16.mxu1 %vm447_vm0, %v943_v3  ;;  %v2140_v5 = vpack.c.bf16 %v913_v18, %v913_v18 }
 0x1b6   : > { %v685_v60 = vpop.xlane.xlu0 %684  ;;  %v914_v61 = vadd.f32 %v3150_v45, %v875_v12  ;;  %v839_v16 = vmul.f32 %v2400_v19, %v2984_v55  ;;  %2409 = vrsqrt.f32 %v780_v56  ;;  %v750_v30 = vmul.f32 0.125, %v682_v2 }
 0x1b7   : > { %v751_v32 = vmul.f32 0.125, %v685_v60  ;;  %2411 = vrsqrt.f32 %v781_v27  ;;  %v877_v48 = vmul.f32 %v3147_v6, %v838_v0  ;;  %v915_v49 = vadd.f32 %v3150_v45, %v876_v44  ;;  %1074 = vst.msk [vmem:[%s3163_s22 + $0x8] sm:$0xf] %vm1071_vm2, %v2140_v5 }
 0x1b8   : > { %v944_v34 = vpack.c.bf16 %v914_v61, %v913_v18  ;;  %v2141_v10 = vpack.c.bf16 %v914_v61, %v914_v61  ;;  %v2402_v35 = vpop.eup %2401  ;;  %v782_v38 = vadd.f32 1e-06, %v750_v30  ;;  %v878_v50 = vmul.f32 %v3147_v6, %v839_v16 }
 0x1b9   : > { %v783_v39 = vadd.f32 1e-06, %v751_v32  ;;  %v2404_v46 = vpop.eup %2403  ;;  %v840_v26 = vmul.f32 %v2402_v35, %v2987_v9  ;;  %v688_v55 = vpop.xlane.xlu1 %687  ;;  %v916_v9 = vadd.f32 %v3150_v45, %v877_v48  ;;  %v2142_v8 = vpack.c.bf16 %v915_v49, %v915_v49 }
 0x1ba   : > { %1075 = vst.msk [vmem:[%s3163_s22 + $0xc] sm:$0xf] %vm1071_vm2, %v2141_v10  ;;  %2271 = vmatmul.mubr.msk.bf16.vlgmr.msra.gmra.mrb[0].mxu0 %vm447_vm0, %v944_v34  ;;  %2305 = vmatmul.mubr.msk.bf16.vlgmr.msra.gmra.mrb[0].mxu1 %vm447_vm0, %v944_v34  ;;  %v691_v36 = vpop.xlane.xlu0 %690  ;;  %v841_v51 = vmul.f32 %v2404_v46, %v2996_v7  ;;  %2413 = vrsqrt.f32 %v782_v38  ;;  %v752_v11 = vmul.f32 0.125, %v688_v55  ;;  %v917_v3 = vadd.f32 %v3150_v45, %v878_v50 }
 0x1bb   : > { %v753_v54 = vmul.f32 0.125, %v691_v36  ;;  %2415 = vrsqrt.f32 %v783_v39  ;;  %v879_v58 = vmul.f32 %v3147_v6, %v840_v26  ;;  %v945_v56 = vpack.c.bf16 %v916_v9, %v915_v49  ;;  %1076 = vst.msk [vmem:[%s3163_s22 + $0x10] sm:$0xf] %vm1071_vm2, %v2142_v8 }
 0x1bc   : > { %v2406_v52 = vpop.eup %2405  ;;  %v784_v62 = vadd.f32 1e-06, %v752_v11  ;;  %v880_v4 = vmul.f32 %v3147_v6, %v841_v51  ;;  %v2143_v27 = vpack.c.bf16 %v916_v9, %v916_v9  ;;  %v2144_v60 = vpack.c.bf16 %v917_v3, %v917_v3 }
 0x1bd   : > { %v785_v40 = vadd.f32 1e-06, %v753_v54  ;;  %v2408_v12 = vpop.eup %2407  ;;  %v842_v7 = vmul.f32 %v2406_v52, %v2999_v13  ;;  %v694_v14 = vpop.xlane.xlu1 %693  ;;  %v918_v44 = vadd.f32 %v3150_v45, %v879_v58  ;;  %2274 = vmatprep.mubr.msk.bf16.mxu0 %vm447_vm0, %v945_v56  ;;  %2308 = vmatprep.mubr.msk.bf16.mxu1 %vm447_vm0, %v945_v56 }
 0x1be   : > { %v697_v18 = vpop.xlane.xlu0 %696  ;;  %v843_v19 = vmul.f32 %v2408_v12, %v3008_v1  ;;  %2417 = vrsqrt.f32 %v784_v62  ;;  %v754_v0 = vmul.f32 0.125, %v694_v14  ;;  %1077 = vst.msk [vmem:[%s3163_s22 + $0x14] sm:$0xf] %vm1071_vm2, %v2143_v27  ;;  %v919_v34 = vadd.f32 %v3150_v45, %v880_v4  ;;  %1078 = vst.msk [vmem:[%s3163_s22 + $0x18] sm:$0xf] %vm1071_vm2, %v2144_v60 }
 0x1bf   : > { %v755_v2 = vmul.f32 0.125, %v697_v18  ;;  %2419 = vrsqrt.f32 %v785_v40  ;;  %v946_v13 = vpack.c.bf16 %v918_v44, %v917_v3  ;;  %v2145_v61 = vpack.c.bf16 %v918_v44, %v918_v44 }
 0x1c0   : > { %v2410_v16 = vpop.eup %2409  ;;  %v786_v30 = vadd.f32 1e-06, %v754_v0  ;;  %v881_v1 = vmul.f32 %v3147_v6, %v842_v7  ;;  %v882_v39 = vmul.f32 %v3147_v6, %v843_v19  ;;  %v2146_v26 = vpack.c.bf16 %v919_v34, %v919_v34 }
 0x1c1   : > { %v787_v32 = vadd.f32 1e-06, %v755_v2  ;;  %v2412_v5 = vpop.eup %2411  ;;  %v844_v10 = vmul.f32 %v2410_v16, %v3011_v17  ;;  %v700_v35 = vpop.xlane.xlu1 %699  ;;  %1079 = vst.msk [vmem:[%s3163_s22 + $0x1c] sm:$0xf] %vm1071_vm2, %v2145_v61 }
 0x1c2   : > { %2275 = vmatmul.mubr.msk.bf16.gmra.mrb[4].mxu0 %vm447_vm0, %v946_v13  ;;  %2309 = vmatmul.mubr.msk.bf16.gmra.mrb[4].mxu1 %vm447_vm0, %v946_v13  ;;  %v703_v38 = vpop.xlane.xlu0 %702  ;;  %v845_v48 = vmul.f32 %v2412_v5, %v3020_v43  ;;  %2421 = vrsqrt.f32 %v786_v30  ;;  %v756_v49 = vmul.f32 0.125, %v700_v35  ;;  %v920_v17 = vadd.f32 %v3150_v45, %v881_v1  ;;  %1080 = vst.msk [vmem:[%s3163_s22 + $0x20] sm:$0xf] %vm1071_vm2, %v2146_v26 }
 0x1c3   : > { %v757_v46 = vmul.f32 0.125, %v703_v38  ;;  %2423 = vrsqrt.f32 %v787_v32  ;;  %v883_v55 = vmul.f32 %v3147_v6, %v844_v10  ;;  %v921_v11 = vadd.f32 %v3150_v45, %v882_v39 }
 0x1c4   : > { %v2414_v36 = vpop.eup %2413  ;;  %v788_v50 = vadd.f32 1e-06, %v756_v49  ;;  %v884_v54 = vmul.f32 %v3147_v6, %v845_v48  ;;  %v947_v58 = vpack.c.bf16 %v920_v17, %v919_v34  ;;  %v2147_v52 = vpack.c.bf16 %v920_v17, %v920_v17 }
 0x1c5   : > { %v789_v51 = vadd.f32 1e-06, %v757_v46  ;;  %v2416_v9 = vpop.eup %2415  ;;  %v846_v43 = vmul.f32 %v2414_v36, %v3023_v21  ;;  %v706_v8 = vpop.xlane.xlu1 %705  ;;  %v922_v40 = vadd.f32 %v3150_v45, %v883_v55  ;;  %v2148_v7 = vpack.c.bf16 %v921_v11, %v921_v11 }
 0x1c6   : > { %v709_v62 = vpop.xlane.xlu0 %708  ;;  %v847_v3 = vmul.f32 %v2416_v9, %v3032_v59  ;;  %2425 = vrsqrt.f32 %v788_v50  ;;  %v758_v4 = vmul.f32 0.125, %v706_v8  ;;  %1081 = vst.msk [vmem:[%s3163_s22 + $0x24] sm:$0xf] %vm1071_vm2, %v2147_v52  ;;  %2278 = vmatprep.mubr.msk.bf16.mxu0 %vm447_vm0, %v947_v58  ;;  %2312 = vmatprep.mubr.msk.bf16.mxu1 %vm447_vm0, %v947_v58  ;;  %v923_v44 = vadd.f32 %v3150_v45, %v884_v54 }
 0x1c7   : > { %v759_v12 = vmul.f32 0.125, %v709_v62  ;;  %2427 = vrsqrt.f32 %v789_v51  ;;  %v948_v21 = vpack.c.bf16 %v922_v40, %v921_v11  ;;  %v2149_v14 = vpack.c.bf16 %v922_v40, %v922_v40  ;;  %1082 = vst.msk [vmem:[%s3163_s22 + $0x28] sm:$0xf] %vm1071_vm2, %v2148_v7 }
 0x1c8   : > { %v2418_v56 = vpop.eup %2417  ;;  %v790_v27 = vadd.f32 1e-06, %v758_v4  ;;  %v885_v59 = vmul.f32 %v3147_v6, %v846_v43  ;;  %v886_v60 = vmul.f32 %v3147_v6, %v847_v3  ;;  %v2150_v32 = vpack.c.bf16 %v923_v44, %v923_v44 }
 0x1c9   : > { %v791_v18 = vadd.f32 1e-06, %v759_v12  ;;  %v2420_v19 = vpop.eup %2419  ;;  %v848_v0 = vmul.f32 %v2418_v56, %v3035_v25  ;;  %v712_v2 = vpop.xlane.xlu1 %711  ;;  %1083 = vst.msk [vmem:[%s3163_s22 + $0x2c] sm:$0xf] %vm1071_vm2, %v2149_v14 }
 0x1ca   : > { %2279 = vmatmul.mubr.msk.bf16.gmra.mrb[8].mxu0 %vm447_vm0, %v948_v21  ;;  %2313 = vmatmul.mubr.msk.bf16.gmra.mrb[8].mxu1 %vm447_vm0, %v948_v21  ;;  %v715_v13 = vpop.xlane.xlu0 %714  ;;  %v849_v61 = vmul.f32 %v2420_v19, %v3044_v15  ;;  %2429 = vrsqrt.f32 %v790_v27  ;;  %v760_v16 = vmul.f32 0.125, %v712_v2  ;;  %v924_v25 = vadd.f32 %v3150_v45, %v885_v59  ;;  %1084 = vst.msk [vmem:[%s3163_s22 + $0x30] sm:$0xf] %vm1071_vm2, %v2150_v32 }
 0x1cb   : > { %v761_v30 = vmul.f32 0.125, %v715_v13  ;;  %2431 = vrsqrt.f32 %v791_v18  ;;  %v887_v1 = vmul.f32 %v3147_v6, %v848_v0  ;;  %v925_v35 = vadd.f32 %v3150_v45, %v886_v60 }
 0x1cc   : > { %v2422_v34 = vpop.eup %2421  ;;  %v792_v5 = vadd.f32 1e-06, %v760_v16  ;;  %v888_v38 = vmul.f32 %v3147_v6, %v849_v61  ;;  %v949_v49 = vpack.c.bf16 %v924_v25, %v923_v44  ;;  %v2151_v46 = vpack.c.bf16 %v924_v25, %v924_v25 }
 0x1cd   : > { %v793_v10 = vadd.f32 1e-06, %v761_v30  ;;  %v2424_v39 = vpop.eup %2423  ;;  %v850_v15 = vmul.f32 %v2422_v34, %v3047_v29  ;;  %v718_v48 = vpop.xlane.xlu1 %717  ;;  %v926_v26 = vadd.f32 %v3150_v45, %v887_v1  ;;  %v2152_v51 = vpack.c.bf16 %v925_v35, %v925_v35 }
 0x1ce   : > { %v721_v17 = vpop.xlane.xlu0 %720  ;;  %v851_v55 = vmul.f32 %v2424_v39, %v3056_v31  ;;  %2433 = vrsqrt.f32 %v792_v5  ;;  %v762_v36 = vmul.f32 0.125, %v718_v48  ;;  %1085 = vst.msk [vmem:[%s3163_s22 + $0x34] sm:$0xf] %vm1071_vm2, %v2151_v46  ;;  %2282 = vmatprep.mubr.msk.bf16.mxu0 %vm447_vm0, %v949_v49  ;;  %2316 = vmatprep.mubr.msk.bf16.mxu1 %vm447_vm0, %v949_v49  ;;  %v927_v8 = vadd.f32 %v3150_v45, %v888_v38 }
 0x1cf   : > { %v763_v50 = vmul.f32 0.125, %v721_v17  ;;  %2435 = vrsqrt.f32 %v793_v10  ;;  %v950_v29 = vpack.c.bf16 %v926_v26, %v925_v35  ;;  %v2153_v11 = vpack.c.bf16 %v926_v26, %v926_v26  ;;  %1086 = vst.msk [vmem:[%s3163_s22 + $0x38] sm:$0xf] %vm1071_vm2, %v2152_v51 }
 0x1d0   : > { %v2426_v54 = vpop.eup %2425  ;;  %v794_v9 = vadd.f32 1e-06, %v762_v36  ;;  %v889_v31 = vmul.f32 %v3147_v6, %v850_v15  ;;  %v890_v3 = vmul.f32 %v3147_v6, %v851_v55  ;;  %v2154_v7 = vpack.c.bf16 %v927_v8, %v927_v8 }
 0x1d1   : > { %v795_v43 = vadd.f32 1e-06, %v763_v50  ;;  %v2428_v58 = vpop.eup %2427  ;;  %v852_v52 = vmul.f32 %v2426_v54, %v3059_v33  ;;  %v724_v62 = vpop.xlane.xlu1 %723  ;;  %1087 = vst.msk [vmem:[%s3163_s22 + $0x3c] sm:$0xf] %vm1071_vm2, %v2153_v11 }
 0x1d2   : > { %2283 = vmatmul.mubr.msk.bf16.gmra.mrb[12].mxu0 %vm447_vm0, %v950_v29  ;;  %2317 = vmatmul.mubr.msk.bf16.gmra.mrb[12].mxu1 %vm447_vm0, %v950_v29  ;;  %v727_v40 = vpop.xlane.xlu0 %726  ;;  %v853_v4 = vmul.f32 %v2428_v58, %v3068_v47  ;;  %2437 = vrsqrt.f32 %v794_v9  ;;  %v764_v12 = vmul.f32 0.125, %v724_v62  ;;  %v928_v33 = vadd.f32 %v3150_v45, %v889_v31  ;;  %1088 = vst.msk [vmem:[%s3163_s22 + $0x40] sm:$0xf] %vm1071_vm2, %v2154_v7 }
 0x1d3   : > { %v765_v21 = vmul.f32 0.125, %v727_v40  ;;  %2439 = vrsqrt.f32 %v795_v43  ;;  %v891_v14 = vmul.f32 %v3147_v6, %v852_v52  ;;  %v929_v59 = vadd.f32 %v3150_v45, %v890_v3 }
 0x1d4   : > { %v2430_v56 = vpop.eup %2429  ;;  %v796_v27 = vadd.f32 1e-06, %v764_v12  ;;  %v892_v44 = vmul.f32 %v3147_v6, %v853_v4  ;;  %v951_v2 = vpack.c.bf16 %v928_v33, %v927_v8  ;;  %v2155_v13 = vpack.c.bf16 %v928_v33, %v928_v33 }
 0x1d5   : > { %v797_v18 = vadd.f32 1e-06, %v765_v21  ;;  %v2432_v19 = vpop.eup %2431  ;;  %v854_v47 = vmul.f32 %v2430_v56, %v3071_v37  ;;  %v730_v0 = vpop.xlane.xlu1 %729  ;;  %v930_v61 = vadd.f32 %v3150_v45, %v891_v14  ;;  %v2156_v32 = vpack.c.bf16 %v929_v59, %v929_v59 }
 0x1d6   : > { %v733_v60 = vpop.xlane.xlu0 %732  ;;  %v855_v16 = vmul.f32 %v2432_v19, %v3080_v63  ;;  %2441 = vrsqrt.f32 %v796_v27  ;;  %v766_v30 = vmul.f32 0.125, %v730_v0  ;;  %1089 = vst.msk [vmem:[%s3163_s22 + $0x44] sm:$0xf] %vm1071_vm2, %v2155_v13  ;;  %2286 = vmatprep.mubr.msk.bf16.mxu0 %vm447_vm0, %v951_v2  ;;  %2320 = vmatprep.mubr.msk.bf16.mxu1 %vm447_vm0, %v951_v2  ;;  %v931_v35 = vadd.f32 %v3150_v45, %v892_v44 }
 0x1d7   : > { %v767_v25 = vmul.f32 0.125, %v733_v60  ;;  %2443 = vrsqrt.f32 %v797_v18  ;;  %v952_v37 = vpack.c.bf16 %v930_v61, %v929_v59  ;;  %v2157_v1 = vpack.c.bf16 %v930_v61, %v930_v61  ;;  %1090 = vst.msk [vmem:[%s3163_s22 + $0x48] sm:$0xf] %vm1071_vm2, %v2156_v32 }
 0x1d8   : > { %v2434_v34 = vpop.eup %2433  ;;  %v798_v5 = vadd.f32 1e-06, %v766_v30  ;;  %v893_v63 = vmul.f32 %v3147_v6, %v854_v47  ;;  %v894_v48 = vmul.f32 %v3147_v6, %v855_v16 }
 0x1d9   : > { %v799_v10 = vadd.f32 1e-06, %v767_v25  ;;  %v2436_v38 = vpop.eup %2435  ;;  %v856_v39 = vmul.f32 %v2434_v34, %v3083_v41  ;;  %v736_v15 = vpop.xlane.xlu1 %735  ;;  %1091 = vst.msk [vmem:[%s3163_s22 + $0x4c] sm:$0xf] %vm1071_vm2, %v2157_v1  ;;  %v2158_v41 = vpack.c.bf16 %v931_v35, %v931_v35 }
 0x1da   : > { %2287 = vmatmul.mubr.msk.bf16.gmra.mrb[16].mxu0 %vm447_vm0, %v952_v37  ;;  %2321 = vmatmul.mubr.msk.bf16.gmra.mrb[16].mxu1 %vm447_vm0, %v952_v37  ;;  %v857_v49 = vmul.f32 %v2436_v38, %v3098_v22  ;;  %2445 = vrsqrt.f32 %v798_v5  ;;  %v768_v46 = vmul.f32 0.125, %v736_v15  ;;  %v932_v17 = vadd.f32 %v3150_v45, %v893_v63 }
 0x1db   : > { %2447 = vrsqrt.f32 %v799_v10  ;;  %v895_v26 = vmul.f32 %v3147_v6, %v856_v39  ;;  %v933_v55 = vadd.f32 %v3150_v45, %v894_v48  ;;  %1092 = vst.msk [vmem:[%s3163_s22 + $0x50] sm:$0xf] %vm1071_vm2, %v2158_v41  ;;  %v3354_v10 = vld [vmem:[#allocation7] ss:$0 sm:$0xff] }
 0x1dc   : > { %v2438_v36 = vpop.eup %2437  ;;  %v800_v50 = vadd.f32 1e-06, %v768_v46  ;;  %v953_v29 = vpack.c.bf16 %v932_v17, %v931_v35  ;;  %v2159_v51 = vpack.c.bf16 %v932_v17, %v932_v17  ;;  %v896_v11 = vmul.f32 %v3147_v6, %v857_v49 }
 0x1dd   : > { %v2440_v54 = vpop.eup %2439  ;;  %v858_v22 = vmul.f32 %v2438_v36, %v3101_v23  ;;  %v934_v9 = vadd.f32 %v3150_v45, %v895_v26  ;;  %v2160_v43 = vpack.c.bf16 %v933_v55, %v933_v55 }
 0x1de   : > { %v859_v31 = vmul.f32 %v2440_v54, %v3110_v42  ;;  %2449 = vrsqrt.f32 %v800_v50  ;;  %1093 = vst.msk [vmem:[%s3163_s22 + $0x54] sm:$0xf] %vm1071_vm2, %v2159_v51  ;;  %2290 = vmatprep.mubr.msk.bf16.mxu0 %vm447_vm0, %v953_v29  ;;  %2324 = vmatprep.mubr.msk.bf16.mxu1 %vm447_vm0, %v953_v29  ;;  %v935_v8 = vadd.f32 %v3150_v45, %v896_v11 }
 0x1df   : > { %v954_v58 = vpack.c.bf16 %v934_v9, %v933_v55  ;;  %v2161_v23 = vpack.c.bf16 %v934_v9, %v934_v9  ;;  %1094 = vst.msk [vmem:[%s3163_s22 + $0x58] sm:$0xf] %vm1071_vm2, %v2160_v43  ;;  %v897_v52 = vmul.f32 %v3147_v6, %v858_v22 }
 0x1e0   : > { %v2442_v62 = vpop.eup %2441  ;;  %v2162_v40 = vpack.c.bf16 %v935_v8, %v935_v8  ;;  %v898_v42 = vmul.f32 %v3147_v6, %v859_v31 }
 0x1e1   : > { %v2444_v3 = vpop.eup %2443  ;;  %v860_v4 = vmul.f32 %v2442_v62, %v3113_v20  ;;  %1095 = vst.msk [vmem:[%s3163_s22 + $0x5c] sm:$0xf] %vm1071_vm2, %v2161_v23  ;;  %v936_v12 = vadd.f32 %v3150_v45, %v897_v52 }
 0x1e2   : > { %2291 = vmatmul.mubr.msk.bf16.gmra.mrb[20].mxu0 %vm447_vm0, %v954_v58  ;;  %2325 = vmatmul.mubr.msk.bf16.gmra.mrb[20].mxu1 %vm447_vm0, %v954_v58  ;;  %v861_v21 = vmul.f32 %v2444_v3, %v3122_v24  ;;  %1096 = vst.msk [vmem:[%s3163_s22 + $0x60] sm:$0xf] %vm1071_vm2, %v2162_v40  ;;  %v937_v33 = vadd.f32 %v3150_v45, %v898_v42 }
 0x1e3   : > { %v955_v7 = vpack.c.bf16 %v936_v12, %v935_v8  ;;  %v2163_v14 = vpack.c.bf16 %v936_v12, %v936_v12  ;;  %v899_v20 = vmul.f32 %v3147_v6, %v860_v4 }
 0x1e4   : > { %v2446_v56 = vpop.eup %2445  ;;  %v2164_v27 = vpack.c.bf16 %v937_v33, %v937_v33  ;;  %v900_v18 = vmul.f32 %v3147_v6, %v861_v21 }
 0x1e5   : > { %v2448_v59 = vpop.eup %2447  ;;  %v862_v44 = vmul.f32 %v2446_v56, %v3125_v53  ;;  %1097 = vst.msk [vmem:[%s3163_s22 + $0x64] sm:$0xf] %vm1071_vm2, %v2163_v14  ;;  %2294 = vmatprep.mubr.msk.bf16.mxu0 %vm447_vm0, %v955_v7  ;;  %2328 = vmatprep.mubr.msk.bf16.mxu1 %vm447_vm0, %v955_v7  ;;  %v938_v24 = vadd.f32 %v3150_v45, %v899_v20 }
 0x1e6   : > { %v863_v19 = vmul.f32 %v2448_v59, %v3134_v28  ;;  %1098 = vst.msk [vmem:[%s3163_s22 + $0x68] sm:$0xf] %vm1071_vm2, %v2164_v27  ;;  %v939_v47 = vadd.f32 %v3150_v45, %v900_v18 }
 0x1e7   : > { %v956_v0 = vpack.c.bf16 %v938_v24, %v937_v33  ;;  %v2165_v2 = vpack.c.bf16 %v938_v24, %v938_v24  ;;  %v901_v53 = vmul.f32 %v3147_v6, %v862_v44 }
 0x1e8   : > { %v2450_v13 = vpop.eup %2449  ;;  %v2166_v60 = vpack.c.bf16 %v939_v47, %v939_v47  ;;  %v902_v61 = vmul.f32 %v3147_v6, %v863_v19 }
 0x1e9   : > { %v864_v16 = vmul.f32 %v2450_v13, %v3137_v57  ;;  %1099 = vst.msk [vmem:[%s3163_s22 + $0x6c] sm:$0xf] %vm1071_vm2, %v2165_v2  ;;  %v940_v28 = vadd.f32 %v3150_v45, %v901_v53 }
 0x1ea   : > { %2295 = vmatmul.mubr.msk.bf16.gmra.mrb[24].mxu0 %vm447_vm0, %v956_v0  ;;  %2329 = vmatmul.mubr.msk.bf16.gmra.mrb[24].mxu1 %vm447_vm0, %v956_v0  ;;  %1100 = vst.msk [vmem:[%s3163_s22 + $0x70] sm:$0xf] %vm1071_vm2, %v2166_v60  ;;  %v941_v30 = vadd.f32 %v3150_v45, %v902_v61 }
 0x1eb   : > { %v957_v25 = vpack.c.bf16 %v940_v28, %v939_v47  ;;  %v2167_v37 = vpack.c.bf16 %v940_v28, %v940_v28  ;;  %v903_v32 = vmul.f32 %v3147_v6, %v864_v16  ;;  %v3352_v6 = vld [vmem:[#allocation6] ss:$0 sm:$0xff] }
 0x1ec   : > { %v2168_v1 = vpack.c.bf16 %v941_v30, %v941_v30 }
 0x1ed   : > { %1101 = vst.msk [vmem:[%s3163_s22 + $0x74] sm:$0xf] %vm1071_vm2, %v2167_v37  ;;  %2298 = vmatprep.mubr.msk.bf16.mxu0 %vm447_vm0, %v957_v25  ;;  %2332 = vmatprep.mubr.msk.bf16.mxu1 %vm447_vm0, %v957_v25  ;;  %v942_v57 = vadd.f32 %v3150_v45, %v903_v32 }
 0x1ee   : > { %1102 = vst.msk [vmem:[%s3163_s22 + $0x78] sm:$0xf] %vm1071_vm2, %v2168_v1 }
 0x1ef   : > { %v958_v34 = vpack.c.bf16 %v942_v57, %v941_v30  ;;  %v2169_v5 = vpack.c.bf16 %v942_v57, %v942_v57 }
 0x1f1   : > { %1103 = vst.msk [vmem:[%s3163_s22 + $0x7c] sm:$0xf] %vm1071_vm2, %v2169_v5 }
 0x1f2   : > { %2299 = vmatmul.mubr.msk.bf16.gmra.mrb[28].mxu0 %vm447_vm0, %v958_v34  ;;  %2333 = vmatmul.mubr.msk.bf16.gmra.mrb[28].mxu1 %vm447_vm0, %v958_v34 }
 0x28d   : > { %v2272_v63 = vpop.f32.mrb[0].mxu0  ;;  %v2306_v35 = vpop.f32.mrb[0].mxu1 }
 0x28e   : > { %v1207_v38 = vadd.f32 %v2272_v63, %v3352_v6  ;;  %v1539_v45 = vadd.f32 %v2306_v35, %v3354_v10  ;;  %v1198_v39 = vpop.f32.mrb[1].mxu0  ;;  %v1530_v15 = vpop.f32.mrb[1].mxu1 }
 0x28f   : > { %v1199_v48 = vadd.f32 %v3352_v6, %v1198_v39  ;;  %v1531_v49 = vadd.f32 %v3354_v10, %v1530_v15  ;;  %v2273_v46 = vpop.f32.mrb[2].mxu0  ;;  %v2307_v17 = vpop.f32.mrb[2].mxu1 }
 0x290   : > { %v2172_v41 = vpack.c.bf16 %v1207_v38, %v1207_v38  ;;  %v2204_v26 = vpack.c.bf16 %v1539_v45, %v1539_v45  ;;  %v1210_v55 = vadd.f32 %v2273_v46, %v3352_v6  ;;  %v1542_v36 = vadd.f32 %v2307_v17, %v3354_v10  ;;  %v1201_v50 = vpop.f32.mrb[3].mxu0  ;;  %v1533_v29 = vpop.f32.mrb[3].mxu1 }
 0x291   : > { %v2170_v51 = vpack.c.bf16 %v1199_v48, %v1199_v48  ;;  %v2202_v11 = vpack.c.bf16 %v1531_v49, %v1531_v49  ;;  %v1202_v54 = vadd.f32 %v3352_v6, %v1201_v50  ;;  %v1534_v22 = vadd.f32 %v3354_v10, %v1533_v29 }
 0x292   : > { %1455 = vst.msk [vmem:[%s3362_s25 + $0x8] sm:$0xf] %vm1071_vm2, %v2172_v41  ;;  %v2173_v9 = vpack.c.bf16 %v1210_v55, %v1210_v55  ;;  %v2205_v43 = vpack.c.bf16 %v1542_v36, %v1542_v36 }
 0x293   : > { %1788 = vst.msk [vmem:[%s3368_s28 + $0x8] sm:$0xf] %vm1785_vm3, %v2204_v26  ;;  %1786 = vst.msk [vmem:[%s3368_s28] sm:$0xf] %vm1785_vm3, %v2202_v11  ;;  %v2171_v31 = vpack.c.bf16 %v1202_v54, %v1202_v54  ;;  %v2203_v8 = vpack.c.bf16 %v1534_v22, %v1534_v22 }
 0x294   : > { %1453 = vst.msk [vmem:[%s3362_s25] sm:$0xf] %vm1071_vm2, %v2170_v51  ;;  %1456 = vst.msk [vmem:[%s3362_s25 + $0xc] sm:$0xf] %vm1071_vm2, %v2173_v9 }
 0x295   : > { %1789 = vst.msk [vmem:[%s3368_s28 + $0xc] sm:$0xf] %vm1785_vm3, %v2205_v43  ;;  %1787 = vst.msk [vmem:[%s3368_s28 + $0x4] sm:$0xf] %vm1785_vm3, %v2203_v8  ;;  %v2276_v58 = vpop.f32.mrb[4].mxu0  ;;  %v2310_v23 = vpop.f32.mrb[4].mxu1 }
 0x296   : > { %1454 = vst.msk [vmem:[%s3362_s25 + $0x4] sm:$0xf] %vm1071_vm2, %v2171_v31  ;;  %v1223_v52 = vadd.f32 %v2276_v58, %v3352_v6  ;;  %v1555_v62 = vadd.f32 %v2310_v23, %v3354_v10  ;;  %v1214_v40 = vpop.f32.mrb[5].mxu0  ;;  %v1546_v42 = vpop.f32.mrb[5].mxu1 }
 0x297   : > { %v1215_v3 = vadd.f32 %v3352_v6, %v1214_v40  ;;  %v1547_v4 = vadd.f32 %v3354_v10, %v1546_v42  ;;  %v2277_v12 = vpop.f32.mrb[6].mxu0  ;;  %v2311_v21 = vpop.f32.mrb[6].mxu1 }
 0x298   : > { %v2176_v33 = vpack.c.bf16 %v1223_v52, %v1223_v52  ;;  %v2208_v7 = vpack.c.bf16 %v1555_v62, %v1555_v62  ;;  %v1226_v14 = vadd.f32 %v2277_v12, %v3352_v6  ;;  %v1558_v20 = vadd.f32 %v2311_v21, %v3354_v10  ;;  %v1217_v56 = vpop.f32.mrb[7].mxu0  ;;  %v1549_v27 = vpop.f32.mrb[7].mxu1 }
 0x299   : > { %v2174_v18 = vpack.c.bf16 %v1215_v3, %v1215_v3  ;;  %v2206_v59 = vpack.c.bf16 %v1547_v4, %v1547_v4  ;;  %v1218_v44 = vadd.f32 %v3352_v6, %v1217_v56  ;;  %v1550_v24 = vadd.f32 %v3354_v10, %v1549_v27 }
 0x29a   : > { %1459 = vst.msk [vmem:[%s3362_s25 + $0x18] sm:$0xf] %vm1071_vm2, %v2176_v33  ;;  %v2177_v19 = vpack.c.bf16 %v1226_v14, %v1226_v14  ;;  %v2209_v47 = vpack.c.bf16 %v1558_v20, %v1558_v20 }
 0x29b   : > { %1792 = vst.msk [vmem:[%s3368_s28 + $0x18] sm:$0xf] %vm1785_vm3, %v2208_v7  ;;  %1790 = vst.msk [vmem:[%s3368_s28 + $0x10] sm:$0xf] %vm1785_vm3, %v2206_v59  ;;  %v2175_v0 = vpack.c.bf16 %v1218_v44, %v1218_v44  ;;  %v2207_v2 = vpack.c.bf16 %v1550_v24, %v1550_v24 }
 0x29c   : > { %1457 = vst.msk [vmem:[%s3362_s25 + $0x10] sm:$0xf] %vm1071_vm2, %v2174_v18  ;;  %1460 = vst.msk [vmem:[%s3362_s25 + $0x1c] sm:$0xf] %vm1071_vm2, %v2177_v19 }
 0x29d   : > { %1793 = vst.msk [vmem:[%s3368_s28 + $0x1c] sm:$0xf] %vm1785_vm3, %v2209_v47  ;;  %1791 = vst.msk [vmem:[%s3368_s28 + $0x14] sm:$0xf] %vm1785_vm3, %v2207_v2  ;;  %v2280_v53 = vpop.f32.mrb[8].mxu0  ;;  %v2314_v13 = vpop.f32.mrb[8].mxu1 }
 0x29e   : > { %1458 = vst.msk [vmem:[%s3362_s25 + $0x14] sm:$0xf] %vm1071_vm2, %v2175_v0  ;;  %v1239_v60 = vadd.f32 %v2280_v53, %v3352_v6  ;;  %v1571_v61 = vadd.f32 %v2314_v13, %v3354_v10  ;;  %v1230_v16 = vpop.f32.mrb[9].mxu0  ;;  %v1562_v28 = vpop.f32.mrb[9].mxu1 }
 0x29f   : > { %v1231_v30 = vadd.f32 %v3352_v6, %v1230_v16  ;;  %v1563_v25 = vadd.f32 %v3354_v10, %v1562_v28  ;;  %v2281_v37 = vpop.f32.mrb[10].mxu0  ;;  %v2315_v32 = vpop.f32.mrb[10].mxu1 }
 0x2a0   : > { %v2180_v1 = vpack.c.bf16 %v1239_v60, %v1239_v60  ;;  %v2212_v57 = vpack.c.bf16 %v1571_v61, %v1571_v61  ;;  %v1242_v34 = vadd.f32 %v2281_v37, %v3352_v6  ;;  %v1574_v5 = vadd.f32 %v2315_v32, %v3354_v10  ;;  %v1233_v63 = vpop.f32.mrb[11].mxu0  ;;  %v1565_v35 = vpop.f32.mrb[11].mxu1 }
 0x2a1   : > { %v2178_v38 = vpack.c.bf16 %v1231_v30, %v1231_v30  ;;  %v2210_v45 = vpack.c.bf16 %v1563_v25, %v1563_v25  ;;  %v1234_v39 = vadd.f32 %v3352_v6, %v1233_v63  ;;  %v1566_v15 = vadd.f32 %v3354_v10, %v1565_v35 }
 0x2a2   : > { %1463 = vst.msk [vmem:[%s3362_s25 + $0x28] sm:$0xf] %vm1071_vm2, %v2180_v1  ;;  %v2181_v48 = vpack.c.bf16 %v1242_v34, %v1242_v34  ;;  %v2213_v49 = vpack.c.bf16 %v1574_v5, %v1574_v5 }
 0x2a3   : > { %1796 = vst.msk [vmem:[%s3368_s28 + $0x28] sm:$0xf] %vm1785_vm3, %v2212_v57  ;;  %1794 = vst.msk [vmem:[%s3368_s28 + $0x20] sm:$0xf] %vm1785_vm3, %v2210_v45  ;;  %v2179_v46 = vpack.c.bf16 %v1234_v39, %v1234_v39  ;;  %v2211_v17 = vpack.c.bf16 %v1566_v15, %v1566_v15 }
 0x2a4   : > { %1461 = vst.msk [vmem:[%s3362_s25 + $0x20] sm:$0xf] %vm1071_vm2, %v2178_v38  ;;  %1464 = vst.msk [vmem:[%s3362_s25 + $0x2c] sm:$0xf] %vm1071_vm2, %v2181_v48 }
 0x2a5   : > { %1797 = vst.msk [vmem:[%s3368_s28 + $0x2c] sm:$0xf] %vm1785_vm3, %v2213_v49  ;;  %1795 = vst.msk [vmem:[%s3368_s28 + $0x24] sm:$0xf] %vm1785_vm3, %v2211_v17  ;;  %v2284_v41 = vpop.f32.mrb[12].mxu0  ;;  %v2318_v26 = vpop.f32.mrb[12].mxu1 }
 0x2a6   : > { %1462 = vst.msk [vmem:[%s3362_s25 + $0x24] sm:$0xf] %vm1071_vm2, %v2179_v46  ;;  %v1255_v55 = vadd.f32 %v2284_v41, %v3352_v6  ;;  %v1587_v36 = vadd.f32 %v2318_v26, %v3354_v10  ;;  %v1246_v50 = vpop.f32.mrb[13].mxu0  ;;  %v1578_v29 = vpop.f32.mrb[13].mxu1 }
 0x2a7   : > { %v1247_v51 = vadd.f32 %v3352_v6, %v1246_v50  ;;  %v1579_v11 = vadd.f32 %v3354_v10, %v1578_v29  ;;  %v2285_v54 = vpop.f32.mrb[14].mxu0  ;;  %v2319_v22 = vpop.f32.mrb[14].mxu1 }
 0x2a8   : > { %v2184_v9 = vpack.c.bf16 %v1255_v55, %v1255_v55  ;;  %v2216_v43 = vpack.c.bf16 %v1587_v36, %v1587_v36  ;;  %v1258_v31 = vadd.f32 %v2285_v54, %v3352_v6  ;;  %v1590_v8 = vadd.f32 %v2319_v22, %v3354_v10  ;;  %v1249_v58 = vpop.f32.mrb[15].mxu0  ;;  %v1581_v23 = vpop.f32.mrb[15].mxu1 }
 0x2a9   : > { %v2182_v52 = vpack.c.bf16 %v1247_v51, %v1247_v51  ;;  %v2214_v62 = vpack.c.bf16 %v1579_v11, %v1579_v11  ;;  %v1250_v40 = vadd.f32 %v3352_v6, %v1249_v58  ;;  %v1582_v42 = vadd.f32 %v3354_v10, %v1581_v23 }
 0x2aa   : > { %1467 = vst.msk [vmem:[%s3362_s25 + $0x38] sm:$0xf] %vm1071_vm2, %v2184_v9  ;;  %v2185_v3 = vpack.c.bf16 %v1258_v31, %v1258_v31  ;;  %v2217_v4 = vpack.c.bf16 %v1590_v8, %v1590_v8 }
 0x2ab   : > { %1800 = vst.msk [vmem:[%s3368_s28 + $0x38] sm:$0xf] %vm1785_vm3, %v2216_v43  ;;  %1798 = vst.msk [vmem:[%s3368_s28 + $0x30] sm:$0xf] %vm1785_vm3, %v2214_v62  ;;  %v2183_v12 = vpack.c.bf16 %v1250_v40, %v1250_v40  ;;  %v2215_v21 = vpack.c.bf16 %v1582_v42, %v1582_v42 }
 0x2ac   : > { %1465 = vst.msk [vmem:[%s3362_s25 + $0x30] sm:$0xf] %vm1071_vm2, %v2182_v52  ;;  %1468 = vst.msk [vmem:[%s3362_s25 + $0x3c] sm:$0xf] %vm1071_vm2, %v2185_v3 }
 0x2ad   : > { %1801 = vst.msk [vmem:[%s3368_s28 + $0x3c] sm:$0xf] %vm1785_vm3, %v2217_v4  ;;  %1799 = vst.msk [vmem:[%s3368_s28 + $0x34] sm:$0xf] %vm1785_vm3, %v2215_v21  ;;  %v2288_v33 = vpop.f32.mrb[16].mxu0  ;;  %v2322_v7 = vpop.f32.mrb[16].mxu1 }
 0x2ae   : > { %1466 = vst.msk [vmem:[%s3362_s25 + $0x34] sm:$0xf] %vm1071_vm2, %v2183_v12  ;;  %v1271_v14 = vadd.f32 %v2288_v33, %v3352_v6  ;;  %v1603_v20 = vadd.f32 %v2322_v7, %v3354_v10  ;;  %v1262_v56 = vpop.f32.mrb[17].mxu0  ;;  %v1594_v27 = vpop.f32.mrb[17].mxu1 }
 0x2af   : > { %v1263_v18 = vadd.f32 %v3352_v6, %v1262_v56  ;;  %v1595_v59 = vadd.f32 %v3354_v10, %v1594_v27  ;;  %v2289_v44 = vpop.f32.mrb[18].mxu0  ;;  %v2323_v24 = vpop.f32.mrb[18].mxu1 }
 0x2b0   : > { %v2188_v19 = vpack.c.bf16 %v1271_v14, %v1271_v14  ;;  %v2220_v47 = vpack.c.bf16 %v1603_v20, %v1603_v20  ;;  %v1274_v0 = vadd.f32 %v2289_v44, %v3352_v6  ;;  %v1606_v2 = vadd.f32 %v2323_v24, %v3354_v10  ;;  %v1265_v53 = vpop.f32.mrb[19].mxu0  ;;  %v1597_v13 = vpop.f32.mrb[19].mxu1 }
 0x2b1   : > { %v2186_v60 = vpack.c.bf16 %v1263_v18, %v1263_v18  ;;  %v2218_v61 = vpack.c.bf16 %v1595_v59, %v1595_v59  ;;  %v1266_v16 = vadd.f32 %v3352_v6, %v1265_v53  ;;  %v1598_v28 = vadd.f32 %v3354_v10, %v1597_v13 }
 0x2b2   : > { %1471 = vst.msk [vmem:[%s3362_s25 + $0x48] sm:$0xf] %vm1071_vm2, %v2188_v19  ;;  %v2189_v30 = vpack.c.bf16 %v1274_v0, %v1274_v0  ;;  %v2221_v25 = vpack.c.bf16 %v1606_v2, %v1606_v2 }
 0x2b3   : > { %1804 = vst.msk [vmem:[%s3368_s28 + $0x48] sm:$0xf] %vm1785_vm3, %v2220_v47  ;;  %1802 = vst.msk [vmem:[%s3368_s28 + $0x40] sm:$0xf] %vm1785_vm3, %v2218_v61  ;;  %v2187_v37 = vpack.c.bf16 %v1266_v16, %v1266_v16  ;;  %v2219_v32 = vpack.c.bf16 %v1598_v28, %v1598_v28 }
 0x2b4   : > { %1469 = vst.msk [vmem:[%s3362_s25 + $0x40] sm:$0xf] %vm1071_vm2, %v2186_v60  ;;  %1472 = vst.msk [vmem:[%s3362_s25 + $0x4c] sm:$0xf] %vm1071_vm2, %v2189_v30 }
 0x2b5   : > { %1805 = vst.msk [vmem:[%s3368_s28 + $0x4c] sm:$0xf] %vm1785_vm3, %v2221_v25  ;;  %1803 = vst.msk [vmem:[%s3368_s28 + $0x44] sm:$0xf] %vm1785_vm3, %v2219_v32  ;;  %v2292_v1 = vpop.f32.mrb[20].mxu0  ;;  %v2326_v57 = vpop.f32.mrb[20].mxu1 }
 0x2b6   : > { %1470 = vst.msk [vmem:[%s3362_s25 + $0x44] sm:$0xf] %vm1071_vm2, %v2187_v37  ;;  %v1287_v34 = vadd.f32 %v2292_v1, %v3352_v6  ;;  %v1619_v5 = vadd.f32 %v2326_v57, %v3354_v10  ;;  %v1278_v63 = vpop.f32.mrb[21].mxu0  ;;  %v1610_v35 = vpop.f32.mrb[21].mxu1 }
 0x2b7   : > { %v1279_v38 = vadd.f32 %v3352_v6, %v1278_v63  ;;  %v1611_v45 = vadd.f32 %v3354_v10, %v1610_v35  ;;  %v2293_v39 = vpop.f32.mrb[22].mxu0  ;;  %v2327_v15 = vpop.f32.mrb[22].mxu1 }
 0x2b8   : > { %v2192_v48 = vpack.c.bf16 %v1287_v34, %v1287_v34  ;;  %v2224_v49 = vpack.c.bf16 %v1619_v5, %v1619_v5  ;;  %v1290_v46 = vadd.f32 %v2293_v39, %v3352_v6  ;;  %v1622_v17 = vadd.f32 %v2327_v15, %v3354_v10  ;;  %v1281_v41 = vpop.f32.mrb[23].mxu0  ;;  %v1613_v26 = vpop.f32.mrb[23].mxu1 }
 0x2b9   : > { %v2190_v55 = vpack.c.bf16 %v1279_v38, %v1279_v38  ;;  %v2222_v36 = vpack.c.bf16 %v1611_v45, %v1611_v45  ;;  %v1282_v50 = vadd.f32 %v3352_v6, %v1281_v41  ;;  %v1614_v29 = vadd.f32 %v3354_v10, %v1613_v26 }
 0x2ba   : > { %1475 = vst.msk [vmem:[%s3362_s25 + $0x58] sm:$0xf] %vm1071_vm2, %v2192_v48  ;;  %v2193_v51 = vpack.c.bf16 %v1290_v46, %v1290_v46  ;;  %v2225_v11 = vpack.c.bf16 %v1622_v17, %v1622_v17 }
 0x2bb   : > { %1808 = vst.msk [vmem:[%s3368_s28 + $0x58] sm:$0xf] %vm1785_vm3, %v2224_v49  ;;  %1806 = vst.msk [vmem:[%s3368_s28 + $0x50] sm:$0xf] %vm1785_vm3, %v2222_v36  ;;  %v2191_v54 = vpack.c.bf16 %v1282_v50, %v1282_v50  ;;  %v2223_v22 = vpack.c.bf16 %v1614_v29, %v1614_v29 }
 0x2bc   : > { %1473 = vst.msk [vmem:[%s3362_s25 + $0x50] sm:$0xf] %vm1071_vm2, %v2190_v55  ;;  %1476 = vst.msk [vmem:[%s3362_s25 + $0x5c] sm:$0xf] %vm1071_vm2, %v2193_v51 }
 0x2bd   : > { %1809 = vst.msk [vmem:[%s3368_s28 + $0x5c] sm:$0xf] %vm1785_vm3, %v2225_v11  ;;  %1807 = vst.msk [vmem:[%s3368_s28 + $0x54] sm:$0xf] %vm1785_vm3, %v2223_v22  ;;  %v2296_v9 = vpop.f32.mrb[24].mxu0  ;;  %v2330_v43 = vpop.f32.mrb[24].mxu1 }
 0x2be   : > { %1474 = vst.msk [vmem:[%s3362_s25 + $0x54] sm:$0xf] %vm1071_vm2, %v2191_v54  ;;  %v1303_v31 = vadd.f32 %v2296_v9, %v3352_v6  ;;  %v1635_v8 = vadd.f32 %v2330_v43, %v3354_v10  ;;  %v1294_v58 = vpop.f32.mrb[25].mxu0  ;;  %v1626_v23 = vpop.f32.mrb[25].mxu1 }
 0x2bf   : > { %v1295_v52 = vadd.f32 %v3352_v6, %v1294_v58  ;;  %v1627_v62 = vadd.f32 %v3354_v10, %v1626_v23  ;;  %v2297_v40 = vpop.f32.mrb[26].mxu0  ;;  %v2331_v42 = vpop.f32.mrb[26].mxu1 }
 0x2c0   : > { %v2196_v3 = vpack.c.bf16 %v1303_v31, %v1303_v31  ;;  %v2228_v4 = vpack.c.bf16 %v1635_v8, %v1635_v8  ;;  %v1306_v12 = vadd.f32 %v2297_v40, %v3352_v6  ;;  %v1638_v21 = vadd.f32 %v2331_v42, %v3354_v10  ;;  %v1297_v33 = vpop.f32.mrb[27].mxu0  ;;  %v1629_v7 = vpop.f32.mrb[27].mxu1 }
 0x2c1   : > { %v2194_v14 = vpack.c.bf16 %v1295_v52, %v1295_v52  ;;  %v2226_v20 = vpack.c.bf16 %v1627_v62, %v1627_v62  ;;  %v1298_v56 = vadd.f32 %v3352_v6, %v1297_v33  ;;  %v1630_v27 = vadd.f32 %v3354_v10, %v1629_v7 }
 0x2c2   : > { %1479 = vst.msk [vmem:[%s3362_s25 + $0x68] sm:$0xf] %vm1071_vm2, %v2196_v3  ;;  %v2197_v18 = vpack.c.bf16 %v1306_v12, %v1306_v12  ;;  %v2229_v59 = vpack.c.bf16 %v1638_v21, %v1638_v21 }
 0x2c3   : > { %1812 = vst.msk [vmem:[%s3368_s28 + $0x68] sm:$0xf] %vm1785_vm3, %v2228_v4  ;;  %1810 = vst.msk [vmem:[%s3368_s28 + $0x60] sm:$0xf] %vm1785_vm3, %v2226_v20  ;;  %v2195_v44 = vpack.c.bf16 %v1298_v56, %v1298_v56  ;;  %v2227_v24 = vpack.c.bf16 %v1630_v27, %v1630_v27 }
 0x2c4   : > { %1477 = vst.msk [vmem:[%s3362_s25 + $0x60] sm:$0xf] %vm1071_vm2, %v2194_v14  ;;  %1480 = vst.msk [vmem:[%s3362_s25 + $0x6c] sm:$0xf] %vm1071_vm2, %v2197_v18 }
 0x2c5   : > { %1813 = vst.msk [vmem:[%s3368_s28 + $0x6c] sm:$0xf] %vm1785_vm3, %v2229_v59  ;;  %1811 = vst.msk [vmem:[%s3368_s28 + $0x64] sm:$0xf] %vm1785_vm3, %v2227_v24  ;;  %v2300_v19 = vpop.f32.mrb[28].mxu0  ;;  %v2334_v47 = vpop.f32.mrb[28].mxu1 }
 0x2c6   : > { %1478 = vst.msk [vmem:[%s3362_s25 + $0x64] sm:$0xf] %vm1071_vm2, %v2195_v44  ;;  %v1319_v0 = vadd.f32 %v2300_v19, %v3352_v6  ;;  %v1651_v2 = vadd.f32 %v2334_v47, %v3354_v10  ;;  %v1310_v53 = vpop.f32.mrb[29].mxu0  ;;  %v1642_v13 = vpop.f32.mrb[29].mxu1 }
 0x2c7   : > { %v1311_v60 = vadd.f32 %v3352_v6, %v1310_v53  ;;  %v1643_v61 = vadd.f32 %v3354_v10, %v1642_v13  ;;  %v2301_v16 = vpop.f32.mrb[30].mxu0  ;;  %v2335_v28 = vpop.f32.mrb[30].mxu1 }
 0x2c8   : > { %v2200_v30 = vpack.c.bf16 %v1319_v0, %v1319_v0  ;;  %v2232_v25 = vpack.c.bf16 %v1651_v2, %v1651_v2  ;;  %v1322_v37 = vadd.f32 %v2301_v16, %v3352_v6  ;;  %v1654_v32 = vadd.f32 %v2335_v28, %v3354_v10  ;;  %v1313_v1 = vpop.f32.mrb[31].mxu0  ;;  %v1645_v57 = vpop.f32.mrb[31].mxu1 }
 0x2c9   : > { %v2198_v34 = vpack.c.bf16 %v1311_v60, %v1311_v60  ;;  %v2230_v5 = vpack.c.bf16 %v1643_v61, %v1643_v61  ;;  %v1314_v63 = vadd.f32 %v3352_v6, %v1313_v1  ;;  %v1646_v35 = vadd.f32 %v3354_v10, %v1645_v57 }
 0x2ca   : > { %1483 = vst.msk [vmem:[%s3362_s25 + $0x78] sm:$0xf] %vm1071_vm2, %v2200_v30  ;;  %v2201_v38 = vpack.c.bf16 %v1322_v37, %v1322_v37  ;;  %v2233_v45 = vpack.c.bf16 %v1654_v32, %v1654_v32 }
 0x2cb   : > { %1816 = vst.msk [vmem:[%s3368_s28 + $0x78] sm:$0xf] %vm1785_vm3, %v2232_v25  ;;  %1814 = vst.msk [vmem:[%s3368_s28 + $0x70] sm:$0xf] %vm1785_vm3, %v2230_v5  ;;  %v2199_v39 = vpack.c.bf16 %v1314_v63, %v1314_v63  ;;  %v2231_v15 = vpack.c.bf16 %v1646_v35, %v1646_v35 }
 0x2cc   : > { %1481 = vst.msk [vmem:[%s3362_s25 + $0x70] sm:$0xf] %vm1071_vm2, %v2198_v34  ;;  %1484 = vst.msk [vmem:[%s3362_s25 + $0x7c] sm:$0xf] %vm1071_vm2, %v2201_v38 }
 0x2cd   : > { %1817 = vst.msk [vmem:[%s3368_s28 + $0x7c] sm:$0xf] %vm1785_vm3, %v2233_v45  ;;  %1815 = vst.msk [vmem:[%s3368_s28 + $0x74] sm:$0xf] %vm1785_vm3, %v2231_v15 }
 0x2ce   : > { %1482 = vst.msk [vmem:[%s3362_s25 + $0x74] sm:$0xf] %vm1071_vm2, %v2199_v39 }
 0x2cf PF: > { %s23_s30 = sadd.s32 1, %s2581_s30  }
 0x2d0   : > { %p20_p8 = scmp.ge.s32.totalorder %s23_s30, 4  }
 0x2d2   :  { %22 = sbr.rel (!%p20_p8) target bundleno = 3 (0x3), region = 119 }
 0x2d9   :  { %1874 = vsyncpa [#allocation3], 1 }
 0x2da   :  { %1876 = vsyncpa [#allocation3 + $0x1], 1 }
 0x2db   :  { %1877 = vsyncpa [#allocation5], 1 }
 0x2dc   :  { %1878 = vsyncpa [#allocation8], 1 }

// kernel: kbblock_forward.4
= control target key start
LH: loop header
LB: loop body
LE: loop exit
PB: predicated region body
PF: predicated region fallthrough
CT: control target
= control target key end

     0   :  { %s944_s12 = smov 0   ;;  %s1108_s0 = inlined_call_operand.vmem [shape: bf16[512,16], index: 0, kind: input, shape index: {}]   ;;  %s1109_s1 = inlined_call_operand.vmem [shape: bf16[16,8], index: 1, kind: input, shape index: {}]   ;;  %s1110_s2 = inlined_call_operand.vmem [shape: f32[1,8], index: 2, kind: input, shape index: {}]   ;;  %s1111_s3 = inlined_call_operand.vmem [shape: bf16[512,8], index: 3, kind: output, shape index: {}]  }
   0x1 LB: > { %s729_s13 = sadd.s32 4294967295, %s922_s12   ;;  %p733_p0 = scmp.ge.s32.totalorder %s922_s12, 1  ;;  %s922_s12 = sphi %s944_s12, %s13_s12  }
   0x2   : > { %p138_p1 = scmp.lt.s32.totalorder %s922_s12, 3 }
   0x4   : > { %p139_p2 = pnand %p733_p0, %p138_p1 }
   0x5   : > { %v899_v0 = vld [vmem:[%s1109_s1] sm:$0xff] (!%p139_p2)   ;;  %s734_s16 = sshll.u32 (!%p139_p2), %s729_s13, 5  ;;  %vm302_vm0 = vcmask (!%p139_p2), 130048   ;;  %vm640_vm1 = vcmask (!%p139_p2), 60416  }
   0x6   : > { %142 = sbr.rel (%p139_p2) target bundleno = 263 (0x107), region = 32  ;;  %p163_p3 = scmp.lt.s32.totalorder (!%p139_p2), %s734_s16, 63  ;;  %855 = vmatprep.subr.bf16.mxu0 (!%p139_p2), %v899_v0  ;;  %889 = vmatprep.subr.bf16.mxu1 (!%p139_p2), %v899_v0  ;;  %v1000_v17 = vld [vmem:[%s1110_s2] ss:$0 sm:$0xff] (!%p139_p2) }
   0x7   : > { %856 = vmatpush3.bf16.msra.mxu0 (!%p139_p2), %v899_v0  ;;  %890 = vmatpush3.bf16.msra.mxu1 (!%p139_p2), %v899_v0 }
   0xd   : > { %s1113_s16 = smov (!%p163_p3, %s734_s16), 63 }
   0xe   : > { %s735_s17 = sshll.u32 %s1113_s16, 2 }
   0xf   : > { %s963_s20 = scalar_lea.vmem %s1108_s0, %s735_s17  ;;  %s1008_s25 = scalar_lea.vmem %s1111_s3, %s735_s17 }
  0x10   : > { %v900_v1 = vld [vmem:[%s963_s20] sm:$0xff]   ;;  %v902_v3 = vld [vmem:[%s963_s20 + $0x8] sm:$0xff]   ;;  %v904_v5 = vld [vmem:[%s963_s20 + $0x10] sm:$0xff]  }
  0x11   : > { %v901_v2 = vld [vmem:[%s963_s20 + $0x40] sm:$0xff]   ;;  %857 = vmatprep.mubr.msk.bf16.mxu0 %vm302_vm0, %v900_v1  ;;  %v903_v4 = vld [vmem:[%s963_s20 + $0x48] sm:$0xff]   ;;  %v905_v6 = vld [vmem:[%s963_s20 + $0x50] sm:$0xff]  }
  0x12   : > { %873 = vmatprep.mubr.msk.bf16.mxu1 %vm302_vm0, %v901_v2  ;;  %858 = vmatmul.mubr.msk.bf16.vlgmr.msra.gmra.mrb[0].mxu0 %vm302_vm0, %v902_v3  ;;  %v906_v7 = vld [vmem:[%s963_s20 + $0x18] sm:$0xff]   ;;  %v908_v9 = vld [vmem:[%s963_s20 + $0x20] sm:$0xff]   ;;  %v910_v11 = vld [vmem:[%s963_s20 + $0x28] sm:$0xff]  }
  0x13   : > { %874 = vmatmul.mubr.msk.bf16.vlgmr.msra.gmra.mrb[0].mxu1 %vm302_vm0, %v903_v4  ;;  %861 = vmatprep.mubr.msk.bf16.mxu0 %vm302_vm0, %v904_v5  ;;  %v907_v8 = vld [vmem:[%s963_s20 + $0x58] sm:$0xff]   ;;  %v909_v10 = vld [vmem:[%s963_s20 + $0x60] sm:$0xff]   ;;  %v911_v12 = vld [vmem:[%s963_s20 + $0x68] sm:$0xff]  }
  0x14   : > { %877 = vmatprep.mubr.msk.bf16.mxu1 %vm302_vm0, %v905_v6  ;;  %v912_v13 = vld [vmem:[%s963_s20 + $0x30] sm:$0xff]   ;;  %v914_v15 = vld [vmem:[%s963_s20 + $0x38] sm:$0xff]  }
  0x15   : > { %v913_v14 = vld [vmem:[%s963_s20 + $0x70] sm:$0xff]   ;;  %v915_v16 = vld [vmem:[%s963_s20 + $0x78] sm:$0xff]  }
  0x1a   : > { %862 = vmatmul.mubr.msk.bf16.gmra.mrb[4].mxu0 %vm302_vm0, %v906_v7 }
  0x1b   : > { %878 = vmatmul.mubr.msk.bf16.gmra.mrb[4].mxu1 %vm302_vm0, %v907_v8  ;;  %865 = vmatprep.mubr.msk.bf16.mxu0 %vm302_vm0, %v908_v9 }
  0x1c   : > { %881 = vmatprep.mubr.msk.bf16.mxu1 %vm302_vm0, %v909_v10 }
  0x22   : > { %866 = vmatmul.mubr.msk.bf16.gmra.mrb[8].mxu0 %vm302_vm0, %v910_v11 }
  0x23   : > { %882 = vmatmul.mubr.msk.bf16.gmra.mrb[8].mxu1 %vm302_vm0, %v911_v12  ;;  %869 = vmatprep.mubr.msk.bf16.mxu0 %vm302_vm0, %v912_v13 }
  0x24   : > { %885 = vmatprep.mubr.msk.bf16.mxu1 %vm302_vm0, %v913_v14 }
  0x2a   : > { %870 = vmatmul.mubr.msk.bf16.gmra.mrb[12].mxu0 %vm302_vm0, %v914_v15 }
  0x2b   : > { %886 = vmatmul.mubr.msk.bf16.gmra.mrb[12].mxu1 %vm302_vm0, %v915_v16 }
  0xe5   : > { %v859_v18 = vpop.f32.mrb[0].mxu0 }
  0xe6   : > { %v394_v19 = vadd.f32 %v859_v18, %v1000_v17  ;;  %v875_v20 = vpop.f32.mrb[0].mxu1  ;;  %v385_v21 = vpop.f32.mrb[1].mxu0 }
  0xe7   : > { %v458_v22 = vadd.f32 %v875_v20, %v1000_v17  ;;  %v386_v23 = vadd.f32 %v1000_v17, %v385_v21  ;;  %v449_v24 = vpop.f32.mrb[1].mxu1  ;;  %v860_v25 = vpop.f32.mrb[2].mxu0 }
  0xe8   : > { %v808_v26 = vpack.c.bf16 %v394_v19, %v394_v19  ;;  %v450_v27 = vadd.f32 %v1000_v17, %v449_v24  ;;  %v397_v28 = vadd.f32 %v860_v25, %v1000_v17  ;;  %v876_v29 = vpop.f32.mrb[2].mxu1  ;;  %v388_v30 = vpop.f32.mrb[3].mxu0 }
  0xe9   : > { %v824_v31 = vpack.c.bf16 %v458_v22, %v458_v22  ;;  %v806_v32 = vpack.c.bf16 %v386_v23, %v386_v23  ;;  %v461_v33 = vadd.f32 %v876_v29, %v1000_v17  ;;  %v389_v34 = vadd.f32 %v1000_v17, %v388_v30  ;;  %v452_v35 = vpop.f32.mrb[3].mxu1 }
  0xea   : > { %643 = vst.msk [vmem:[%s1008_s25 + $0x8] sm:$0xf] %vm640_vm1, %v808_v26  ;;  %v822_v36 = vpack.c.bf16 %v450_v27, %v450_v27  ;;  %v809_v37 = vpack.c.bf16 %v397_v28, %v397_v28  ;;  %v453_v38 = vadd.f32 %v1000_v17, %v452_v35 }
  0xeb   : > { %659 = vst.msk [vmem:[%s1008_s25 + $0x48] sm:$0xf] %vm640_vm1, %v824_v31  ;;  %641 = vst.msk [vmem:[%s1008_s25] sm:$0xf] %vm640_vm1, %v806_v32  ;;  %v825_v39 = vpack.c.bf16 %v461_v33, %v461_v33  ;;  %v807_v40 = vpack.c.bf16 %v389_v34, %v389_v34 }
  0xec   : > { %657 = vst.msk [vmem:[%s1008_s25 + $0x40] sm:$0xf] %vm640_vm1, %v822_v36  ;;  %644 = vst.msk [vmem:[%s1008_s25 + $0xc] sm:$0xf] %vm640_vm1, %v809_v37  ;;  %v823_v41 = vpack.c.bf16 %v453_v38, %v453_v38 }
  0xed   : > { %660 = vst.msk [vmem:[%s1008_s25 + $0x4c] sm:$0xf] %vm640_vm1, %v825_v39  ;;  %642 = vst.msk [vmem:[%s1008_s25 + $0x4] sm:$0xf] %vm640_vm1, %v807_v40  ;;  %v863_v42 = vpop.f32.mrb[4].mxu0 }
  0xee   : > { %658 = vst.msk [vmem:[%s1008_s25 + $0x44] sm:$0xf] %vm640_vm1, %v823_v41  ;;  %v410_v43 = vadd.f32 %v863_v42, %v1000_v17  ;;  %v879_v44 = vpop.f32.mrb[4].mxu1  ;;  %v401_v45 = vpop.f32.mrb[5].mxu0 }
  0xef   : > { %v474_v46 = vadd.f32 %v879_v44, %v1000_v17  ;;  %v402_v47 = vadd.f32 %v1000_v17, %v401_v45  ;;  %v465_v48 = vpop.f32.mrb[5].mxu1  ;;  %v864_v49 = vpop.f32.mrb[6].mxu0 }
  0xf0   : > { %v812_v50 = vpack.c.bf16 %v410_v43, %v410_v43  ;;  %v466_v51 = vadd.f32 %v1000_v17, %v465_v48  ;;  %v413_v52 = vadd.f32 %v864_v49, %v1000_v17  ;;  %v880_v53 = vpop.f32.mrb[6].mxu1  ;;  %v404_v54 = vpop.f32.mrb[7].mxu0 }
  0xf1   : > { %v828_v55 = vpack.c.bf16 %v474_v46, %v474_v46  ;;  %v810_v56 = vpack.c.bf16 %v402_v47, %v402_v47  ;;  %v477_v57 = vadd.f32 %v880_v53, %v1000_v17  ;;  %v405_v58 = vadd.f32 %v1000_v17, %v404_v54  ;;  %v468_v59 = vpop.f32.mrb[7].mxu1 }
  0xf2   : > { %647 = vst.msk [vmem:[%s1008_s25 + $0x18] sm:$0xf] %vm640_vm1, %v812_v50  ;;  %v826_v60 = vpack.c.bf16 %v466_v51, %v466_v51  ;;  %v813_v61 = vpack.c.bf16 %v413_v52, %v413_v52  ;;  %v469_v62 = vadd.f32 %v1000_v17, %v468_v59 }
  0xf3   : > { %663 = vst.msk [vmem:[%s1008_s25 + $0x58] sm:$0xf] %vm640_vm1, %v828_v55  ;;  %645 = vst.msk [vmem:[%s1008_s25 + $0x10] sm:$0xf] %vm640_vm1, %v810_v56  ;;  %v829_v63 = vpack.c.bf16 %v477_v57, %v477_v57  ;;  %v811_v0 = vpack.c.bf16 %v405_v58, %v405_v58 }
  0xf4   : > { %661 = vst.msk [vmem:[%s1008_s25 + $0x50] sm:$0xf] %vm640_vm1, %v826_v60  ;;  %648 = vst.msk [vmem:[%s1008_s25 + $0x1c] sm:$0xf] %vm640_vm1, %v813_v61  ;;  %v827_v1 = vpack.c.bf16 %v469_v62, %v469_v62 }
  0xf5   : > { %664 = vst.msk [vmem:[%s1008_s25 + $0x5c] sm:$0xf] %vm640_vm1, %v829_v63  ;;  %646 = vst.msk [vmem:[%s1008_s25 + $0x14] sm:$0xf] %vm640_vm1, %v811_v0  ;;  %v867_v2 = vpop.f32.mrb[8].mxu0 }
  0xf6   : > { %662 = vst.msk [vmem:[%s1008_s25 + $0x54] sm:$0xf] %vm640_vm1, %v827_v1  ;;  %v426_v3 = vadd.f32 %v867_v2, %v1000_v17  ;;  %v883_v4 = vpop.f32.mrb[8].mxu1  ;;  %v417_v5 = vpop.f32.mrb[9].mxu0 }
  0xf7   : > { %v490_v6 = vadd.f32 %v883_v4, %v1000_v17  ;;  %v418_v7 = vadd.f32 %v1000_v17, %v417_v5  ;;  %v481_v8 = vpop.f32.mrb[9].mxu1  ;;  %v868_v9 = vpop.f32.mrb[10].mxu0 }
  0xf8   : > { %v816_v10 = vpack.c.bf16 %v426_v3, %v426_v3  ;;  %v482_v11 = vadd.f32 %v1000_v17, %v481_v8  ;;  %v429_v12 = vadd.f32 %v868_v9, %v1000_v17  ;;  %v884_v13 = vpop.f32.mrb[10].mxu1  ;;  %v420_v14 = vpop.f32.mrb[11].mxu0 }
  0xf9   : > { %v832_v15 = vpack.c.bf16 %v490_v6, %v490_v6  ;;  %v814_v16 = vpack.c.bf16 %v418_v7, %v418_v7  ;;  %v493_v18 = vadd.f32 %v884_v13, %v1000_v17  ;;  %v421_v19 = vadd.f32 %v1000_v17, %v420_v14  ;;  %v484_v20 = vpop.f32.mrb[11].mxu1 }
  0xfa   : > { %651 = vst.msk [vmem:[%s1008_s25 + $0x28] sm:$0xf] %vm640_vm1, %v816_v10  ;;  %v830_v21 = vpack.c.bf16 %v482_v11, %v482_v11  ;;  %v817_v22 = vpack.c.bf16 %v429_v12, %v429_v12  ;;  %v485_v23 = vadd.f32 %v1000_v17, %v484_v20 }
  0xfb   : > { %667 = vst.msk [vmem:[%s1008_s25 + $0x68] sm:$0xf] %vm640_vm1, %v832_v15  ;;  %649 = vst.msk [vmem:[%s1008_s25 + $0x20] sm:$0xf] %vm640_vm1, %v814_v16  ;;  %v833_v24 = vpack.c.bf16 %v493_v18, %v493_v18  ;;  %v815_v25 = vpack.c.bf16 %v421_v19, %v421_v19 }
  0xfc   : > { %665 = vst.msk [vmem:[%s1008_s25 + $0x60] sm:$0xf] %vm640_vm1, %v830_v21  ;;  %652 = vst.msk [vmem:[%s1008_s25 + $0x2c] sm:$0xf] %vm640_vm1, %v817_v22  ;;  %v831_v26 = vpack.c.bf16 %v485_v23, %v485_v23 }
  0xfd   : > { %668 = vst.msk [vmem:[%s1008_s25 + $0x6c] sm:$0xf] %vm640_vm1, %v833_v24  ;;  %650 = vst.msk [vmem:[%s1008_s25 + $0x24] sm:$0xf] %vm640_vm1, %v815_v25  ;;  %v871_v27 = vpop.f32.mrb[12].mxu0 }
  0xfe   : > { %666 = vst.msk [vmem:[%s1008_s25 + $0x64] sm:$0xf] %vm640_vm1, %v831_v26  ;;  %v442_v28 = vadd.f32 %v871_v27, %v1000_v17  ;;  %v887_v29 = vpop.f32.mrb[12].mxu1  ;;  %v433_v30 = vpop.f32.mrb[13].mxu0 }
  0xff   : > { %v506_v31 = vadd.f32 %v887_v29, %v1000_v17  ;;  %v434_v32 = vadd.f32 %v1000_v17, %v433_v30  ;;  %v497_v33 = vpop.f32.mrb[13].mxu1  ;;  %v872_v34 = vpop.f32.mrb[14].mxu0 }
 0x100   : > { %v820_v35 = vpack.c.bf16 %v442_v28, %v442_v28  ;;  %v498_v36 = vadd.f32 %v1000_v17, %v497_v33  ;;  %v445_v37 = vadd.f32 %v872_v34, %v1000_v17  ;;  %v888_v38 = vpop.f32.mrb[14].mxu1  ;;  %v436_v39 = vpop.f32.mrb[15].mxu0 }
 0x101   : > { %v836_v40 = vpack.c.bf16 %v506_v31, %v506_v31  ;;  %v818_v41 = vpack.c.bf16 %v434_v32, %v434_v32  ;;  %v509_v42 = vadd.f32 %v888_v38, %v1000_v17  ;;  %v437_v43 = vadd.f32 %v1000_v17, %v436_v39  ;;  %v500_v44 = vpop.f32.mrb[15].mxu1 }
 0x102   : > { %655 = vst.msk [vmem:[%s1008_s25 + $0x38] sm:$0xf] %vm640_vm1, %v820_v35  ;;  %v834_v45 = vpack.c.bf16 %v498_v36, %v498_v36  ;;  %v821_v46 = vpack.c.bf16 %v445_v37, %v445_v37  ;;  %v501_v47 = vadd.f32 %v1000_v17, %v500_v44 }
 0x103   : > { %671 = vst.msk [vmem:[%s1008_s25 + $0x78] sm:$0xf] %vm640_vm1, %v836_v40  ;;  %653 = vst.msk [vmem:[%s1008_s25 + $0x30] sm:$0xf] %vm640_vm1, %v818_v41  ;;  %v837_v48 = vpack.c.bf16 %v509_v42, %v509_v42  ;;  %v819_v49 = vpack.c.bf16 %v437_v43, %v437_v43 }
 0x104   : > { %669 = vst.msk [vmem:[%s1008_s25 + $0x70] sm:$0xf] %vm640_vm1, %v834_v45  ;;  %656 = vst.msk [vmem:[%s1008_s25 + $0x3c] sm:$0xf] %vm640_vm1, %v821_v46  ;;  %v835_v50 = vpack.c.bf16 %v501_v47, %v501_v47 }
 0x105   : > { %672 = vst.msk [vmem:[%s1008_s25 + $0x7c] sm:$0xf] %vm640_vm1, %v837_v48  ;;  %654 = vst.msk [vmem:[%s1008_s25 + $0x34] sm:$0xf] %vm640_vm1, %v819_v49 }
 0x106   : > { %670 = vst.msk [vmem:[%s1008_s25 + $0x74] sm:$0xf] %vm640_vm1, %v835_v50 }
 0x107 PF: > { %s13_s12 = sadd.s32 1, %s922_s12  }
 0x108   : > { %p10_p4 = scmp.ge.s32.totalorder %s13_s12, 4  }
 0x10a   :  { %12 = sbr.rel (!%p10_p4) target bundleno = 1 (0x1), region = 62 }

// kernel: mul.33
= control target key start
LH: loop header
LB: loop body
LE: loop exit
PB: predicated region body
PF: predicated region fallthrough
CT: control target
= control target key end

     0   :  { %vm9_vm0 = vcmask 31744   ;;  %vm23_vm1 = vcmask 162816   ;;  %s87_s14 = smov 124   ;;  %s88_s15 = smov 88   ;;  %vm3_vm2 = vcmask 293888   ;;  %vm13_vm3 = vcmask 261120   ;;  %s137_s0 = inlined_call_operand.vmem [shape: f32[8,36], index: 0, kind: input, shape index: {}]   ;;  %s138_s1 = inlined_call_operand.vmem [shape: f32[288], index: 1, kind: output, shape index: {}]  }
   0x1   :  { %v71_v0 = vld [vmem:[%s137_s0 + $0x7] sm:$0x1]   ;;  %v75_v3 = vld [vmem:[%s137_s0 + $0x6] sm:$0x1]   ;;  %v73_v4 = vld [vmem:[%s137_s0 + $0x3] sm:$0x1]  }
   0x2   :  { %v72_v1 = vld [vmem:[%s137_s0 + $0x7] sm:$0x1]   ;;  %34 = vrot.lane.b32.xlu1 %v75_v3, %s88_s15  ;;  %v74_v5 = vld [vmem:[%s137_s0 + $0x3] sm:$0x1]   ;;  %v76_v7 = vld [vmem:[%s137_s0 + $0x2] sm:$0x1]  }
   0x3   :  { %v10_v2 = vsel %vm9_vm0, %v72_v1, %v71_v0  ;;  %v24_v6 = vsel %vm23_vm1, %v74_v5, %v73_v4  ;;  %v2_v8 = vld [vmem:[%s137_s0] sm:$0x1]   ;;  %s89_s22 = smov 108   ;;  %s90_s23 = smov 72   ;;  %v77_v9 = vld [vmem:[%s137_s0 + $0x5] sm:$0x1]  }
   0x4   :  { %11 = vrot.lane.b32.xlu0 %v10_v2, %s87_s14  ;;  %4 = vst.msk [vmem:[#allocation0] sm:$0x1] %vm3_vm2, %v2_v8   ;;  %v78_v10 = vld [vmem:[%s137_s0 + $0x1] sm:$0x1]   ;;  %s91_s28 = smov 52   ;;  %s92_s29 = smov 36  }
   0x5   :  { %v79_v11 = vld [vmem:[%s137_s0 + $0x4] sm:$0x1]   ;;  %s93_s0 = smov 16   ;;  %vm16_vm4 = vcmask 1048544   ;;  %vm27_vm5 = vcmask 130048   ;;  %vm30_vm6 = vcmask 1048416  }
   0x6   :  { %41 = vrot.lane.b32.xlu1 %v76_v7, %s90_s23  ;;  %vm36_vm7 = vcmask 1015488   ;;  %vm43_vm8 = vcmask 884288   ;;  %vm49_vm9 = vcmask 720288   ;;  %vm56_vm10 = vcmask 589088  }
   0x7   :  { %vm62_vm11 = vcmask 425088  }
   0x8   :  { %25 = vrot.lane.b32.xlu0 %v24_v6, %s89_s22 }
   0xa   :  { %54 = vrot.lane.b32.xlu1 %v78_v10, %s92_s29 }
   0xc   :  { %47 = vrot.lane.b32.xlu0 %v77_v9, %s91_s28 }
  0x10   :  { %60 = vrot.lane.b32.xlu0 %v79_v11, %s93_s0 }
  0x74   :  { %v35_v13 = vpop.permute.xlu1 %34  }
  0x76   :  { %v12_v12 = vpop.permute.xlu0 %11  }
  0x77   :  { %15 = vst.msk [vmem:[#allocation0 + $0x2] sm:$0x1] %vm13_vm3, %v12_v12  }
  0x78   :  { %18 = vst.msk [vmem:[#allocation0 + $0x1] sm:$0x1] %vm16_vm4, %v12_v12   ;;  %v42_v15 = vpop.permute.xlu1 %41  }
  0x7a   :  { %v26_v14 = vpop.permute.xlu0 %25  }
  0x7b   :  { %29 = vst.msk [vmem:[#allocation0 + $0x1] sm:$0x1] %vm27_vm5, %v26_v14  }
  0x7c   :  { %31 = vst.msk [vmem:[#allocation0] sm:$0x1] %vm30_vm6, %v26_v14   ;;  %v55_v17 = vpop.permute.xlu1 %54  }
  0x7d   :  { %38 = vst.msk [vmem:[#allocation0 + $0x1] sm:$0x1] %vm36_vm7, %v35_v13  }
  0x7e   :  { %44 = vst.msk [vmem:[#allocation0] sm:$0x1] %vm43_vm8, %v42_v15   ;;  %v48_v16 = vpop.permute.xlu0 %47  }
  0x7f   :  { %51 = vst.msk [vmem:[#allocation0 + $0x1] sm:$0x1] %vm49_vm9, %v48_v16  }
  0x80   :  { %57 = vst.msk [vmem:[#allocation0] sm:$0x1] %vm56_vm10, %v55_v17  }
  0x82   :  { %v61_v18 = vpop.permute.xlu0 %60  }
  0x83   :  { %64 = vst.msk [vmem:[#allocation0 + $0x1] sm:$0x1] %vm62_vm11, %v61_v18  }
  0x8a   :  { %v68_v19 = vld [vmem:[#allocation0] sm:$0xf] }
  0x8b   :  { %70 = vst [vmem:[%s138_s1] sm:$0xf] %v68_v19 }

// kernel: kbblock_forward.5
= control target key start
LH: loop header
LB: loop body
LE: loop exit
PB: predicated region body
PF: predicated region fallthrough
CT: control target
= control target key end

     0   :  { %s7432_s0 = inlined_call_operand.vmem [shape: bf16[512,4], index: 0, kind: input, shape index: {}]   ;;  %s7433_s1 = inlined_call_operand.vmem [shape: bf16[512,4], index: 1, kind: input, shape index: {}]   ;;  %s7434_s2 = inlined_call_operand.vmem [shape: bf16[512,32], index: 2, kind: input, shape index: {}]   ;;  %s7435_s3 = inlined_call_operand.vmem [shape: bf16[512,288], index: 3, kind: input, shape index: {}]   ;;  %s7436_s4 = inlined_call_operand.vmem [shape: bf16[512,8], index: 4, kind: input, shape index: {}]   ;;  %s7437_s5 = inlined_call_operand.vmem [shape: bf16[512,8], index: 5, kind: input, shape index: {}]   ;;  %s7438_s6 = inlined_call_operand.vmem [shape: f32[512,8], index: 6, kind: input, shape index: {}]   ;;  %s7439_s7 = inlined_call_operand.vmem [shape: bf16[4,32], index: 7, kind: input, shape index: {}]   ;;  %s7440_s8 = inlined_call_operand.vmem [shape: f32[1,32], index: 8, kind: input, shape index: {}]   ;;  %s7441_s9 = inlined_call_operand.vmem [shape: bf16[32,288], index: 9, kind: input, shape index: {}]   ;;  %s7442_s10 = inlined_call_operand.vmem [shape: bf16[32,8], index: 10, kind: input, shape index: {}]   ;;  %s7443_s11 = inlined_call_operand.vmem [shape: bf16[288,8], index: 11, kind: input, shape index: {}]   ;;  %s7444_s12 = inlined_call_operand.vmem [shape: bf16[8,8], index: 12, kind: input, shape index: {}]   ;;  %s7445_s13 = inlined_call_operand.vmem [shape: f32[1,8], index: 13, kind: input, shape index: {}]   ;;  %s7446_s14 = inlined_call_operand.vmem [shape: f32[1,8], index: 14, kind: input, shape index: {}]   ;;  %s7447_s15 = inlined_call_operand.vmem [shape: f32[1,8], index: 15, kind: input, shape index: {}]   ;;  %s7448_s16 = inlined_call_operand.vmem [shape: bf16[8,8], index: 16, kind: input, shape index: {}]   ;;  %s7449_s17 = inlined_call_operand.vmem [shape: f32[1,8], index: 17, kind: input, shape index: {}]   ;;  %s7450_s18 = inlined_call_operand.vmem [shape: bf16[8,8], index: 18, kind: input, shape index: {}]   ;;  %s7451_s19 = inlined_call_operand.vmem [shape: f32[1,8], index: 19, kind: input, shape index: {}]   ;;  %s7452_s20 = inlined_call_operand.vmem [shape: bf16[8,8], index: 20, kind: input, shape index: {}]   ;;  %s7453_s21 = inlined_call_operand.vmem [shape: f32[1,8], index: 21, kind: input, shape index: {}]   ;;  %s7454_s22 = inlined_call_operand.vmem [shape: f32[512,8], index: 22, kind: output, shape index: {}]  }
   0x1   :  { %7471 = sst [smem:[#allocation18_spill]] %s7432_s0 }
   0x2   :  { %7472 = sst [smem:[#allocation19_spill]] %s7433_s1 }
   0x3   :  { %7473 = sst [smem:[#allocation20_spill]] %s7434_s2 }
   0x4   :  { %7474 = sst [smem:[#allocation21_spill]] %s7435_s3  ;;  %s6111_s3 = smov 0  }
   0x5   :  { %7475 = sst [smem:[#allocation22_spill]] %s7436_s4 }
   0x6   :  { %7476 = sst [smem:[#allocation23_spill]] %s7437_s5 }
   0x7   :  { %7477 = sst [smem:[#allocation24_spill]] %s7438_s6 }
   0x8 LB: > { %s4692_s28 = sadd.s32 4294967295, %s5993_s3   ;;  %p4696_p0 = scmp.ge.s32.totalorder %s5993_s3, 1  ;;  %s5993_s3 = sphi %s6111_s3, %s32_s3  }
   0x9   : > { %p680_p1 = scmp.lt.s32.totalorder %s5993_s3, 3 }
   0xb   : > { %p681_p2 = pnand %p4696_p0, %p680_p1 }
   0xd   : > { %684 = sbr.rel (%p681_p2) target bundleno = 1802 (0x70a), region = 108 }
  0x14   : > { %v999_v0 = vld [vmem:[%s7439_s7] sm:$0x3]  ;;  %vm1056_vm0 = vcmask 1041408   ;;  %s4697_s4 = sshll.u32 %s4692_s28, 5  ;;  %s7478_s5 = sld [smem:[#allocation18_spill]]  ;;  %vm1007_vm1 = vcmask 31744  }
  0x15   : > { %5880 = vmatprep.subr.msk.bf16.mxu0 %vm1056_vm0, %v999_v0  ;;  %v1058_v1 = vsel %vm1056_vm0, %v999_v0, 0  ;;  %p774_p3 = scmp.lt.s32.totalorder %s4697_s4, 63  ;;  %s7479_s26 = sld [smem:[#allocation19_spill]]  ;;  %vm1373_vm2 = vcmask 261120   ;;  %vm3061_vm3 = vcmask 1043456   ;;  %vm3012_vm4 = vcmask 64512  }
  0x16   : > { %5539 = vmatpush3.bf16.msra.mxu0 %v1058_v1  ;;  %s7481_s30 = sld [smem:[#allocation21_spill]]  ;;  %s7482_s25 = sld [smem:[#allocation22_spill]] }
  0x17   : > { %s7518_s4 = smov (!%p774_p3, %s4697_s4), 63  ;;  %s7483_s28 = sld [smem:[#allocation23_spill]] }
  0x18   : > { %s6125_s0 = sshll.u32 %s7518_s4, 2  ;;  %s5885_s27 = smul.u32 12, %s7518_s4 }
  0x19   : > { %s7484_s1 = sld [smem:[#allocation24_spill]] }
  0x1a   : > { %s6131_s24 = scalar_lea.vmem %s7478_s5, %s6125_s0  ;;  %s7480_s5 = sld [smem:[#allocation20_spill]] }
  0x1b   : > { %s6137_s2 = scalar_lea.vmem %s7479_s26, %s6125_s0  ;;  %v4893_v2 = vld [vmem:[%s6131_s24] sm:$0xff]   ;;  %v5212_v4 = vld [vmem:[%s6131_s24 + $0x8] sm:$0xff]   ;;  %v5213_v10 = vld [vmem:[%s6131_s24 + $0x10] sm:$0xff]  }
  0x1c   : > { %v4957_v3 = vld [vmem:[%s6137_s2] sm:$0xff]   ;;  %v4894_v5 = vunpack.c.l.bf16 %v4893_v2  ;;  %v4895_v6 = vunpack.c.h.bf16 %v4893_v2  ;;  %v5227_v9 = vld [vmem:[%s6137_s2 + $0x8] sm:$0xff]   ;;  %v5228_v11 = vld [vmem:[%s6137_s2 + $0x10] sm:$0xff]   ;;  %v4898_v12 = vunpack.c.l.bf16 %v5212_v4  ;;  %v4899_v13 = vunpack.c.h.bf16 %v5212_v4  ;;  %s6452_s23 = scalar_lea.vmem %s7481_s30, %s5885_s27  ;;  %s6527_s26 = scalar_lea.vmem %s7482_s25, %s6125_s0 }
  0x1d   : > { %v4958_v7 = vunpack.c.l.bf16 %v4957_v3  ;;  %v4959_v8 = vunpack.c.h.bf16 %v4957_v3  ;;  %v4962_v14 = vunpack.c.l.bf16 %v5227_v9  ;;  %v4963_v15 = vunpack.c.h.bf16 %v5227_v9  ;;  %v5214_v16 = vld [vmem:[%s6131_s24 + $0x18] sm:$0xff]   ;;  %v5215_v26 = vld [vmem:[%s6131_s24 + $0x20] sm:$0xff]   ;;  %v5216_v43 = vld [vmem:[%s6131_s24 + $0x28] sm:$0xff]   ;;  %s6534_s29 = scalar_lea.vmem %s7483_s28, %s6125_s0 }
  0x1e   : > { %v5229_v17 = vld [vmem:[%s6137_s2 + $0x18] sm:$0xff]   ;;  %v4902_v20 = vunpack.c.l.bf16 %v5213_v10  ;;  %v4903_v21 = vunpack.c.h.bf16 %v5213_v10  ;;  %v4966_v24 = vunpack.c.l.bf16 %v5228_v11  ;;  %v4967_v25 = vunpack.c.h.bf16 %v5228_v11  ;;  %v5230_v27 = vld [vmem:[%s6137_s2 + $0x20] sm:$0xff]   ;;  %v5231_v45 = vld [vmem:[%s6137_s2 + $0x28] sm:$0xff]  }
  0x1f   : > { %v951_v18 = vmul.f32 %v4958_v7, %v4894_v5  ;;  %v952_v19 = vmul.f32 %v4959_v8, %v4895_v6  ;;  %v953_v22 = vmul.f32 %v4962_v14, %v4898_v12  ;;  %v954_v23 = vmul.f32 %v4963_v15, %v4899_v13  ;;  %v5217_v46 = vld [vmem:[%s6131_s24 + $0x30] sm:$0xff]   ;;  %v5218_v59 = vld [vmem:[%s6131_s24 + $0x38] sm:$0xff]   ;;  %v5219_v61 = vld [vmem:[%s6131_s24 + $0x40] sm:$0xff]  }
  0x20   : > { %v4906_v29 = vunpack.c.l.bf16 %v5214_v16  ;;  %v4907_v30 = vunpack.c.h.bf16 %v5214_v16  ;;  %v4970_v31 = vunpack.c.l.bf16 %v5229_v17  ;;  %v955_v33 = vmul.f32 %v4966_v24, %v4902_v20  ;;  %v5232_v48 = vld [vmem:[%s6137_s2 + $0x30] sm:$0xff]   ;;  %v5233_v60 = vld [vmem:[%s6137_s2 + $0x38] sm:$0xff]   ;;  %v5234_v0 = vld [vmem:[%s6137_s2 + $0x40] sm:$0xff]  }
  0x21   : > { %v983_v28 = vpack.c.bf16 %v952_v19, %v951_v18  ;;  %v984_v32 = vpack.c.bf16 %v954_v23, %v953_v22  ;;  %v956_v34 = vmul.f32 %v4967_v25, %v4903_v21  ;;  %v4971_v35 = vunpack.c.h.bf16 %v5229_v17  ;;  %v5220_v15 = vld [vmem:[%s6131_s24 + $0x48] sm:$0xff]   ;;  %v5221_v19 = vld [vmem:[%s6131_s24 + $0x50] sm:$0xff]  }
  0x22   : > { %v4910_v36 = vunpack.c.l.bf16 %v5215_v26  ;;  %v4911_v37 = vunpack.c.h.bf16 %v5215_v26  ;;  %v4974_v38 = vunpack.c.l.bf16 %v5230_v27  ;;  %v957_v40 = vmul.f32 %v4970_v31, %v4906_v29  ;;  %v5235_v18 = vld [vmem:[%s6137_s2 + $0x48] sm:$0xff]   ;;  %v5236_v20 = vld [vmem:[%s6137_s2 + $0x50] sm:$0xff]  }
  0x23   : > { %5540 = vmatprep.mubr.msk.bf16.mxu0 %vm1007_vm1, %v983_v28  ;;  %v985_v39 = vpack.c.bf16 %v956_v34, %v955_v33  ;;  %v958_v41 = vmul.f32 %v4971_v35, %v4907_v30  ;;  %v4975_v42 = vunpack.c.h.bf16 %v5230_v27  ;;  %v4914_v49 = vunpack.c.l.bf16 %v5216_v43  ;;  %v5222_v33 = vld [vmem:[%s6131_s24 + $0x58] sm:$0xff]  }
  0x24   : > { %5541 = vmatmul.mubr.msk.bf16.vlgmr.msra.gmra.mrb[0].mxu0 %vm1007_vm1, %v984_v32  ;;  %v959_v44 = vmul.f32 %v4974_v38, %v4910_v36  ;;  %v4915_v50 = vunpack.c.h.bf16 %v5216_v43  ;;  %v4978_v52 = vunpack.c.l.bf16 %v5231_v45  ;;  %v4979_v53 = vunpack.c.h.bf16 %v5231_v45  ;;  %v5237_v36 = vld [vmem:[%s6137_s2 + $0x58] sm:$0xff]   ;;  %v5238_v38 = vld [vmem:[%s6137_s2 + $0x60] sm:$0xff]  }
  0x25   : > { %5544 = vmatprep.mubr.msk.bf16.mxu0 %vm1007_vm1, %v985_v39  ;;  %v960_v47 = vmul.f32 %v4975_v42, %v4911_v37  ;;  %v986_v51 = vpack.c.bf16 %v958_v41, %v957_v40  ;;  %v4918_v54 = vunpack.c.l.bf16 %v5217_v46  ;;  %v4919_v56 = vunpack.c.h.bf16 %v5217_v46  ;;  %v5223_v37 = vld [vmem:[%s6131_s24 + $0x60] sm:$0xff]  }
  0x26   : > { %v4982_v57 = vunpack.c.l.bf16 %v5232_v48  ;;  %v4983_v58 = vunpack.c.h.bf16 %v5232_v48  ;;  %v961_v62 = vmul.f32 %v4978_v52, %v4914_v49  ;;  %v962_v63 = vmul.f32 %v4979_v53, %v4915_v50 }
  0x27   : > { %v987_v55 = vpack.c.bf16 %v960_v47, %v959_v44  ;;  %v4922_v3 = vunpack.c.l.bf16 %v5218_v59  ;;  %v4923_v4 = vunpack.c.h.bf16 %v5218_v59  ;;  %v4986_v6 = vunpack.c.l.bf16 %v5233_v60 }
  0x28   : > { %v963_v1 = vmul.f32 %v4982_v57, %v4918_v54  ;;  %v964_v2 = vmul.f32 %v4983_v58, %v4919_v56  ;;  %v988_v5 = vpack.c.bf16 %v962_v63, %v961_v62  ;;  %v4987_v7 = vunpack.c.h.bf16 %v5233_v60  ;;  %v5239_v54 = vld [vmem:[%s6137_s2 + $0x68] sm:$0xff]   ;;  %v5240_v56 = vld [vmem:[%s6137_s2 + $0x70] sm:$0xff]  }
  0x29   : > { %v4926_v8 = vunpack.c.l.bf16 %v5219_v61  ;;  %v4927_v10 = vunpack.c.h.bf16 %v5219_v61  ;;  %v4990_v11 = vunpack.c.l.bf16 %v5234_v0  ;;  %v4991_v12 = vunpack.c.h.bf16 %v5234_v0 }
  0x2a   : > { %v989_v9 = vpack.c.bf16 %v964_v2, %v963_v1  ;;  %v965_v13 = vmul.f32 %v4986_v6, %v4922_v3  ;;  %v966_v14 = vmul.f32 %v4987_v7, %v4923_v4  ;;  %v4930_v21 = vunpack.c.l.bf16 %v5220_v15 }
  0x2b   : > { %v967_v16 = vmul.f32 %v4990_v11, %v4926_v8  ;;  %v968_v17 = vmul.f32 %v4991_v12, %v4927_v10  ;;  %v4931_v22 = vunpack.c.h.bf16 %v5220_v15  ;;  %v4994_v24 = vunpack.c.l.bf16 %v5235_v18  ;;  %v5241_v8 = vld [vmem:[%s6137_s2 + $0x78] sm:$0xff]  }
  0x2c   : > { %5545 = vmatmul.mubr.msk.bf16.gmra.mrb[4].mxu0 %vm1007_vm1, %v986_v51  ;;  %v990_v23 = vpack.c.bf16 %v966_v14, %v965_v13  ;;  %v4995_v25 = vunpack.c.h.bf16 %v5235_v18  ;;  %v4934_v26 = vunpack.c.l.bf16 %v5221_v19  ;;  %v4935_v28 = vunpack.c.h.bf16 %v5221_v19  ;;  %v5224_v51 = vld [vmem:[%s6131_s24 + $0x68] sm:$0xff]   ;;  %v5895_v18 = vld [vmem:[%s7441_s9 + $0x4] ss:$12 sps:$4 sm:$0xff]  }
  0x2d   : > { %5548 = vmatprep.mubr.msk.bf16.mxu0 %vm1007_vm1, %v987_v55  ;;  %v991_v27 = vpack.c.bf16 %v968_v17, %v967_v16  ;;  %v4998_v29 = vunpack.c.l.bf16 %v5236_v20  ;;  %v4999_v30 = vunpack.c.h.bf16 %v5236_v20  ;;  %v969_v31 = vmul.f32 %v4994_v24, %v4930_v21  ;;  %v5225_v55 = vld [vmem:[%s6131_s24 + $0x70] sm:$0xff]   ;;  %v5897_v19 = vld [vmem:[%s7441_s9] ss:$12 sps:$4 sm:$0xff]   ;;  %1422 = vmatprep.subr.bf16.mxu1 %v5895_v18  ;;  %v5899_v21 = vld [vmem:[%s7441_s9 + $0x1c] ss:$12 sps:$4 sm:$0xff]  }
  0x2e   : > { %v970_v32 = vmul.f32 %v4995_v25, %v4931_v22  ;;  %v4938_v39 = vunpack.c.l.bf16 %v5222_v33  ;;  %v4939_v40 = vunpack.c.h.bf16 %v5222_v33  ;;  %v5002_v42 = vunpack.c.l.bf16 %v5237_v36  ;;  %v5898_v20 = vld [vmem:[%s7441_s9 + $0x8] ss:$12 sps:$4 sm:$0xff]   ;;  %1423 = vmatpush1.bf16.msra.mxu1 %v5897_v19  ;;  %v5901_v22 = vld [vmem:[%s7441_s9 + $0x18] ss:$12 sps:$4 sm:$0xff]  }
  0x2f   : > { %v971_v34 = vmul.f32 %v4998_v29, %v4934_v26  ;;  %v972_v35 = vmul.f32 %v4999_v30, %v4935_v28  ;;  %v5003_v43 = vunpack.c.h.bf16 %v5237_v36  ;;  %v4942_v44 = vunpack.c.l.bf16 %v5223_v37  ;;  %5572 = vmatprep.subr.bf16.mxu0 %v5898_v20  ;;  %1424 = vmatprep.subr.bf16.mxu1 %v5899_v21  ;;  %v5903_v25 = vld [vmem:[%s7442_s10] sm:$0xff]   ;;  %v5911_v18 = vld [vmem:[%s7443_s11 + $0x58] sm:$0xff]  }
  0x30   : > { %v992_v41 = vpack.c.bf16 %v970_v32, %v969_v31  ;;  %v4943_v46 = vunpack.c.h.bf16 %v5223_v37  ;;  %v5006_v47 = vunpack.c.l.bf16 %v5238_v38  ;;  %v5007_v48 = vunpack.c.h.bf16 %v5238_v38  ;;  %5573 = vmatpush3.bf16.msra.mxu0 %v5898_v20  ;;  %v5905_v26 = vld [vmem:[%s7443_s11 + $0x40] sm:$0xff]  }
  0x31   : > { %v993_v45 = vpack.c.bf16 %v972_v35, %v971_v34  ;;  %v973_v49 = vmul.f32 %v5002_v42, %v4938_v39  ;;  %v974_v50 = vmul.f32 %v5003_v43, %v4939_v40  ;;  %v4946_v57 = vunpack.c.l.bf16 %v5224_v51 }
  0x32   : > { %v975_v52 = vmul.f32 %v5006_v47, %v4942_v44  ;;  %v976_v53 = vmul.f32 %v5007_v48, %v4943_v46  ;;  %v4947_v58 = vunpack.c.h.bf16 %v5224_v51  ;;  %v5010_v60 = vunpack.c.l.bf16 %v5239_v54  ;;  %1425 = vmatpush1.bf16.msra.mxu1 %v5901_v22 }
  0x33   : > { %v994_v59 = vpack.c.bf16 %v974_v50, %v973_v49  ;;  %v5011_v61 = vunpack.c.h.bf16 %v5239_v54  ;;  %v4950_v62 = vunpack.c.l.bf16 %v5225_v55  ;;  %v4951_v0 = vunpack.c.h.bf16 %v5225_v55  ;;  %5340 = vmatprep.subr.bf16.mxu1 %v5905_v26 }
  0x34   : > { %5549 = vmatmul.mubr.msk.bf16.gmra.mrb[8].mxu0 %vm1007_vm1, %v988_v5  ;;  %v995_v63 = vpack.c.bf16 %v976_v53, %v975_v52  ;;  %v5014_v1 = vunpack.c.l.bf16 %v5240_v56  ;;  %v5015_v2 = vunpack.c.h.bf16 %v5240_v56  ;;  %v977_v3 = vmul.f32 %v5010_v60, %v4946_v57  ;;  %v5226_v5 = vld [vmem:[%s6131_s24 + $0x78] sm:$0xff]   ;;  %s6216_s24 = scalar_lea.vmem %s7480_s5, %s6125_s0  ;;  %v5906_v53 = vld [vmem:[%s7443_s11] sm:$0xff]   ;;  %v5904_v57 = vld [vmem:[%s7442_s10 + $0x8] sm:$0xff]   ;;  %s4710_s0 = sshll.u32 %s7518_s4, 3 }
  0x35   : > { %5552 = vmatprep.mubr.msk.bf16.mxu0 %vm1007_vm1, %v989_v9  ;;  %v978_v4 = vmul.f32 %v5011_v61, %v4947_v58  ;;  %v4954_v9 = vunpack.c.l.bf16 %v5226_v5  ;;  %v4955_v11 = vunpack.c.h.bf16 %v5226_v5  ;;  %v5018_v12 = vunpack.c.l.bf16 %v5241_v8  ;;  %v5242_v28 = vld [vmem:[%s6216_s24 + $0x8] sm:$0xff]   ;;  %v5021_v29 = vld [vmem:[%s6216_s24] sm:$0xff]   ;;  %v5244_v42 = vld [vmem:[%s6216_s24 + $0x18] sm:$0xff]   ;;  %s6655_s5 = scalar_lea.vmem %s7484_s1, %s4710_s0  ;;  %s7300_s30 = scalar_lea.vmem %s7454_s22, %s4710_s0 }
  0x36   : > { %v979_v6 = vmul.f32 %v5014_v1, %v4950_v62  ;;  %v980_v7 = vmul.f32 %v5015_v2, %v4951_v0  ;;  %v5019_v13 = vunpack.c.h.bf16 %v5241_v8  ;;  %v5995_v24 = vmov 0   ;;  %v5907_v58 = vld [vmem:[%s7443_s11 + $0x48] sm:$0xff]  }
  0x37   : > { %v996_v10 = vpack.c.bf16 %v978_v4, %v977_v3  ;;  %v981_v15 = vmul.f32 %v5018_v12, %v4954_v9  ;;  %1454 = vmatprep.mubr.bf16.mxu1 %v5995_v24  ;;  %v5026_v32 = vunpack.c.l.bf16 %v5242_v28  ;;  %v5027_v34 = vunpack.c.h.bf16 %v5242_v28  ;;  %v5246_v3 = vld [vmem:[%s6216_s24 + $0x28] sm:$0xff]  }
  0x38   : > { %v997_v14 = vpack.c.bf16 %v980_v7, %v979_v6  ;;  %v982_v16 = vmul.f32 %v5019_v13, %v4955_v11  ;;  %v5022_v36 = vunpack.c.l.bf16 %v5021_v29  ;;  %v5023_v38 = vunpack.c.h.bf16 %v5021_v29  ;;  %v5908_v4 = vld [vmem:[%s7443_s11 + $0x8] sm:$0xff]   ;;  %v5245_v6 = vld [vmem:[%s6216_s24 + $0x20] sm:$0xff]   ;;  %v5909_v7 = vld [vmem:[%s7443_s11 + $0x50] sm:$0xff]  }
  0x39   : > { %v5034_v49 = vunpack.c.l.bf16 %v5244_v42  ;;  %v5035_v56 = vunpack.c.h.bf16 %v5244_v42  ;;  %v5038_v13 = vunpack.c.l.bf16 %v5245_v6  ;;  %v5039_v21 = vunpack.c.h.bf16 %v5245_v6  ;;  %v5248_v29 = vld [vmem:[%s6216_s24 + $0x38] sm:$0xff]  }
  0x3a   : > { %v998_v17 = vpack.c.bf16 %v982_v16, %v981_v15  ;;  %v5919_v6 = vld [vmem:[%s7443_s11 + $0x78] sm:$0xff]  }
  0x3c   : > { %5553 = vmatmul.mubr.msk.bf16.gmra.mrb[12].mxu0 %vm1007_vm1, %v990_v23  ;;  %v5902_v23 = vld [vmem:[%s7441_s9 + $0x20] ss:$12 sps:$4 sm:$0xff]  }
  0x3d   : > { %5556 = vmatprep.mubr.msk.bf16.mxu0 %vm1007_vm1, %v991_v27  ;;  %5574 = vmatprep.subr.bf16.mxu0 %v5902_v23  ;;  %v6221_v27 = vld [vmem:[%s7440_s8] ss:$0 sm:$0xff] }
  0x3e   : > { %5575 = vmatpush3.bf16.msra.mxu0 %v5902_v23 }
  0x3f   : > { %5608 = vmatprep.subr.bf16.mxu0 %v5903_v25 }
  0x44   : > { %5557 = vmatmul.mubr.msk.bf16.gmra.mrb[16].mxu0 %vm1007_vm1, %v992_v41 }
  0x45   : > { %5560 = vmatprep.mubr.msk.bf16.mxu0 %vm1007_vm1, %v993_v45  ;;  %v5243_v45 = vld [vmem:[%s6216_s24 + $0x10] sm:$0xff]  }
  0x46   : > { %v5030_v52 = vunpack.c.l.bf16 %v5243_v45  ;;  %v5031_v61 = vunpack.c.h.bf16 %v5243_v45 }
  0x4c   : > { %5561 = vmatmul.mubr.msk.bf16.gmra.mrb[20].mxu0 %vm1007_vm1, %v994_v59 }
  0x4d   : > { %5564 = vmatprep.mubr.msk.bf16.mxu0 %vm1007_vm1, %v995_v63 }
  0x54   : > { %5565 = vmatmul.mubr.msk.bf16.gmra.mrb[24].mxu0 %vm1007_vm1, %v996_v10  ;;  %v5042_v10 = vunpack.c.l.bf16 %v5246_v3 }
  0x55   : > { %5568 = vmatprep.mubr.msk.bf16.mxu0 %vm1007_vm1, %v997_v14  ;;  %v5910_v14 = vld [vmem:[%s7443_s11 + $0x10] sm:$0xff]  }
  0x5c   : > { %5569 = vmatmul.mubr.msk.bf16.gmra.mrb[28].mxu0 %vm1007_vm1, %v998_v17  ;;  %v5043_v17 = vunpack.c.h.bf16 %v5246_v3 }
  0xf7   : > { %v5542_v30 = vpop.f32.mrb[0].mxu0 }
  0xf8   : > { %v1103_v31 = vadd.f32 %v5542_v30, %v6221_v27  ;;  %v1094_v33 = vpop.f32.mrb[1].mxu0  ;;  %v5912_v30 = vld [vmem:[%s7443_s11 + $0x18] sm:$0xff]  }
  0xf9   : > { %v1095_v35 = vadd.f32 %v6221_v27, %v1094_v33  ;;  %v5543_v37 = vpop.f32.mrb[2].mxu0  ;;  %v5913_v33 = vld [vmem:[%s7443_s11 + $0x60] sm:$0xff]  }
  0xfa   : > { %v1106_v39 = vadd.f32 %v5543_v37, %v6221_v27  ;;  %v1097_v40 = vpop.f32.mrb[3].mxu0  ;;  %v1287_v43 = vadd.f32 %v5026_v32, %v1103_v31  ;;  %v5247_v32 = vld [vmem:[%s6216_s24 + $0x30] sm:$0xff]  }
  0xfb   : > { %v1098_v41 = vadd.f32 %v6221_v27, %v1097_v40  ;;  %v1285_v46 = vadd.f32 %v5022_v36, %v1095_v35  ;;  %v5050_v36 = vunpack.c.l.bf16 %v5248_v29  ;;  %v5914_v40 = vld [vmem:[%s7443_s11 + $0x20] sm:$0xff]  }
  0xfc   : > { %v1288_v44 = vadd.f32 %v5027_v34, %v1106_v39  ;;  %v5046_v39 = vunpack.c.l.bf16 %v5247_v32 }
  0xfd   : > { %v1286_v47 = vadd.f32 %v5023_v38, %v1098_v41 }
  0xfe   : > { %v6231_v48 = vpack.c.bf16 %v1288_v44, %v1287_v43  ;;  %v5051_v43 = vunpack.c.h.bf16 %v5248_v29  ;;  %v5915_v44 = vld [vmem:[%s7443_s11 + $0x68] sm:$0xff]  }
  0xff   : > { %v6233_v50 = vpack.c.bf16 %v1286_v47, %v1285_v46  ;;  %v5546_v51 = vpop.f32.mrb[4].mxu0  ;;  %v5047_v47 = vunpack.c.h.bf16 %v5247_v32 }
 0x100   : > { %v1119_v54 = vadd.f32 %v5546_v51, %v6221_v27  ;;  %v1110_v55 = vpop.f32.mrb[5].mxu0 }
 0x101   : > { %v1111_v59 = vadd.f32 %v6221_v27, %v1110_v55  ;;  %v5547_v60 = vpop.f32.mrb[6].mxu0  ;;  %4736 = vmatmul.mubr.msk.bf16.vlgmr.msra.gmra.mrb[0].mxu1 %vm1373_vm2, %v6233_v50  ;;  %5576 = vmatprep.mubr.msk.bf16.mxu0 %vm1373_vm2, %v6233_v50  ;;  %v5250_v55 = vld [vmem:[%s6216_s24 + $0x48] sm:$0xff]  }
 0x102   : > { %v1291_v62 = vadd.f32 %v5034_v49, %v1119_v54  ;;  %v1122_v63 = vadd.f32 %v5547_v60, %v6221_v27  ;;  %v1113_v0 = vpop.f32.mrb[7].mxu0  ;;  %5577 = vmatmul.mubr.msk.bf16.vlgmr.msra.gmra.mrb[32].mxu0 %vm1373_vm2, %v6231_v48  ;;  %1464 = vmatprep.mubr.bf16.mxu1 %v5995_v24 }
 0x103   : > { %v1289_v1 = vadd.f32 %v5030_v52, %v1111_v59  ;;  %v1114_v2 = vadd.f32 %v6221_v27, %v1113_v0  ;;  %5609 = vmatpush3.bf16.msra.mxu0 %v5903_v25  ;;  %5341 = vmatpush3.bf16.msra.mxu1 %v5906_v53  ;;  %v5917_v59 = vld [vmem:[%s7443_s11 + $0x70] sm:$0xff]  }
 0x104   : > { %v1292_v5 = vadd.f32 %v5035_v56, %v1122_v63  ;;  %5610 = vmatprep.subr.bf16.mxu0 %v5904_v57  ;;  %5342 = vmatprep.subr.bf16.mxu1 %v5907_v58  ;;  %v5916_v56 = vld [vmem:[%s7443_s11 + $0x28] sm:$0xff]   ;;  %v5249_v58 = vld [vmem:[%s6216_s24 + $0x40] sm:$0xff]  }
 0x105   : > { %v1290_v8 = vadd.f32 %v5031_v61, %v1114_v2  ;;  %v5918_v2 = vld [vmem:[%s7443_s11 + $0x30] sm:$0xff]  }
 0x106   : > { %v6263_v9 = vpack.c.bf16 %v1292_v5, %v1291_v62  ;;  %v5058_v62 = vunpack.c.l.bf16 %v5250_v55  ;;  %v5059_v5 = vunpack.c.h.bf16 %v5250_v55 }
 0x107   : > { %v6265_v11 = vpack.c.bf16 %v1290_v8, %v1289_v1  ;;  %v5550_v12 = vpop.f32.mrb[8].mxu0  ;;  %5611 = vmatpush3.bf16.msra.mxu0 %v5904_v57  ;;  %5343 = vmatpush3.bf16.msra.mxu1 %v5908_v4  ;;  %v5054_v1 = vunpack.c.l.bf16 %v5249_v58 }
 0x108   : > { %v1135_v15 = vadd.f32 %v5550_v12, %v6221_v27  ;;  %v1126_v16 = vpop.f32.mrb[9].mxu0  ;;  %5344 = vmatprep.subr.bf16.mxu1 %v5909_v7 }
 0x109   : > { %v1127_v19 = vadd.f32 %v6221_v27, %v1126_v16  ;;  %v5551_v20 = vpop.f32.mrb[10].mxu0  ;;  %4737 = vmatmul.mubr.msk.bf16.gmra.mrb[4].mxu1 %vm1373_vm2, %v6231_v48  ;;  %5580 = vmatprep.mubr.msk.bf16.mxu0 %vm1373_vm2, %v6265_v11 }
 0x10a   : > { %v1295_v22 = vadd.f32 %v5042_v10, %v1135_v15  ;;  %v1138_v23 = vadd.f32 %v5551_v20, %v6221_v27  ;;  %v1129_v25 = vpop.f32.mrb[11].mxu0  ;;  %5581 = vmatmul.mubr.msk.bf16.gmra.mrb[36].mxu0 %vm1373_vm2, %v6263_v9  ;;  %1474 = vmatprep.mubr.bf16.mxu1 %v5995_v24  ;;  %v5055_v10 = vunpack.c.h.bf16 %v5249_v58  ;;  %v5251_v20 = vld [vmem:[%s6216_s24 + $0x50] sm:$0xff]  }
 0x10b   : > { %v1293_v26 = vadd.f32 %v5038_v13, %v1127_v19  ;;  %v1130_v28 = vadd.f32 %v6221_v27, %v1129_v25  ;;  %5345 = vmatpush3.bf16.msra.mxu1 %v5910_v14 }
 0x10c   : > { %v1296_v31 = vadd.f32 %v5043_v17, %v1138_v23  ;;  %5346 = vmatprep.subr.bf16.mxu1 %v5911_v18  ;;  %v5252_v17 = vld [vmem:[%s6216_s24 + $0x58] sm:$0xff]  }
 0x10d   : > { %v1294_v34 = vadd.f32 %v5039_v21, %v1130_v28  ;;  %v5920_v18 = vld [vmem:[%s7443_s11 + $0x38] sm:$0xff]   ;;  %v5066_v23 = vunpack.c.l.bf16 %v5252_v17  ;;  %v5062_v28 = vunpack.c.l.bf16 %v5251_v20 }
 0x10e   : > { %v6292_v35 = vpack.c.bf16 %v1296_v31, %v1295_v22  ;;  %v5067_v31 = vunpack.c.h.bf16 %v5252_v17 }
 0x10f   : > { %v6294_v37 = vpack.c.bf16 %v1294_v34, %v1293_v26  ;;  %v5554_v38 = vpop.f32.mrb[12].mxu0  ;;  %5347 = vmatpush3.bf16.msra.mxu1 %v5912_v30  ;;  %v5063_v34 = vunpack.c.h.bf16 %v5251_v20 }
 0x110   : > { %v1151_v41 = vadd.f32 %v5554_v38, %v6221_v27  ;;  %v1142_v42 = vpop.f32.mrb[13].mxu0  ;;  %5348 = vmatprep.subr.bf16.mxu1 %v5913_v33 }
 0x111   : > { %v1143_v45 = vadd.f32 %v6221_v27, %v1142_v42  ;;  %v5555_v46 = vpop.f32.mrb[14].mxu0  ;;  %4738 = vmatmul.mubr.msk.bf16.gmra.mrb[8].mxu1 %vm1373_vm2, %v6265_v11  ;;  %5584 = vmatprep.mubr.msk.bf16.mxu0 %vm1373_vm2, %v6294_v37  ;;  %v5254_v42 = vld [vmem:[%s6216_s24 + $0x68] sm:$0xff]  }
 0x112   : > { %v1299_v49 = vadd.f32 %v5050_v36, %v1151_v41  ;;  %v1154_v51 = vadd.f32 %v5555_v46, %v6221_v27  ;;  %v1145_v52 = vpop.f32.mrb[15].mxu0  ;;  %5585 = vmatmul.mubr.msk.bf16.gmra.mrb[40].mxu0 %vm1373_vm2, %v6292_v35  ;;  %1484 = vmatprep.mubr.bf16.mxu1 %v5995_v24  ;;  %v5075_v55 = vunpack.c.h.bf16 %v5254_v42 }
 0x113   : > { %v1297_v53 = vadd.f32 %v5046_v39, %v1143_v45  ;;  %v1146_v54 = vadd.f32 %v6221_v27, %v1145_v52  ;;  %5349 = vmatpush3.bf16.msra.mxu1 %v5914_v40 }
 0x114   : > { %v1300_v57 = vadd.f32 %v5051_v43, %v1154_v51  ;;  %5350 = vmatprep.subr.bf16.mxu1 %v5915_v44  ;;  %v5253_v44 = vld [vmem:[%s6216_s24 + $0x60] sm:$0xff]  }
 0x115   : > { %v1298_v60 = vadd.f32 %v5047_v47, %v1146_v54  ;;  %v5074_v47 = vunpack.c.l.bf16 %v5254_v42  ;;  %v5070_v52 = vunpack.c.l.bf16 %v5253_v44  ;;  %v5071_v58 = vunpack.c.h.bf16 %v5253_v44 }
 0x116   : > { %v6321_v61 = vpack.c.bf16 %v1300_v57, %v1299_v49 }
 0x117   : > { %v6323_v63 = vpack.c.bf16 %v1298_v60, %v1297_v53  ;;  %v5558_v0 = vpop.f32.mrb[16].mxu0  ;;  %5351 = vmatpush3.bf16.msra.mxu1 %v5916_v56 }
 0x118   : > { %v1167_v3 = vadd.f32 %v5558_v0, %v6221_v27  ;;  %v1158_v4 = vpop.f32.mrb[17].mxu0  ;;  %5352 = vmatprep.subr.bf16.mxu1 %v5917_v59 }
 0x119   : > { %v1159_v7 = vadd.f32 %v6221_v27, %v1158_v4  ;;  %v5559_v8 = vpop.f32.mrb[18].mxu0  ;;  %4739 = vmatmul.mubr.msk.bf16.gmra.mrb[12].mxu1 %vm1373_vm2, %v6263_v9  ;;  %5588 = vmatprep.mubr.msk.bf16.mxu0 %vm1373_vm2, %v6323_v63  ;;  %v5255_v4 = vld [vmem:[%s6216_s24 + $0x70] sm:$0xff]  }
 0x11a   : > { %v1303_v12 = vadd.f32 %v5058_v62, %v1167_v3  ;;  %v1170_v13 = vadd.f32 %v5559_v8, %v6221_v27  ;;  %v1161_v14 = vpop.f32.mrb[19].mxu0  ;;  %5589 = vmatmul.mubr.msk.bf16.gmra.mrb[44].mxu0 %vm1373_vm2, %v6321_v61  ;;  %1494 = vmatprep.mubr.bf16.mxu1 %v5995_v24 }
 0x11b   : > { %v1301_v15 = vadd.f32 %v5054_v1, %v1159_v7  ;;  %v1162_v16 = vadd.f32 %v6221_v27, %v1161_v14  ;;  %5353 = vmatpush3.bf16.msra.mxu1 %v5918_v2  ;;  %v5256_v2 = vld [vmem:[%s6216_s24 + $0x78] sm:$0xff]  }
 0x11c   : > { %v1304_v19 = vadd.f32 %v5059_v5, %v1170_v13  ;;  %5354 = vmatprep.subr.bf16.mxu1 %v5919_v6  ;;  %v5082_v7 = vunpack.c.l.bf16 %v5256_v2 }
 0x11d   : > { %v1302_v21 = vadd.f32 %v5055_v10, %v1162_v16 }
 0x11e   : > { %v6347_v22 = vpack.c.bf16 %v1304_v19, %v1303_v12  ;;  %v5078_v12 = vunpack.c.l.bf16 %v5255_v4 }
 0x11f   : > { %v6349_v25 = vpack.c.bf16 %v1302_v21, %v1301_v15  ;;  %v5562_v26 = vpop.f32.mrb[20].mxu0  ;;  %5355 = vmatpush3.bf16.msra.mxu1 %v5920_v18  ;;  %v5083_v15 = vunpack.c.h.bf16 %v5256_v2  ;;  %v5079_v18 = vunpack.c.h.bf16 %v5255_v4 }
 0x120   : > { %v1183_v29 = vadd.f32 %v5562_v26, %v6221_v27  ;;  %v1174_v30 = vpop.f32.mrb[21].mxu0 }
 0x121   : > { %v1175_v32 = vadd.f32 %v6221_v27, %v1174_v30  ;;  %v5563_v33 = vpop.f32.mrb[22].mxu0  ;;  %4740 = vmatmul.mubr.msk.bf16.gmra.mrb[16].mxu1 %vm1373_vm2, %v6294_v37  ;;  %5592 = vmatprep.mubr.msk.bf16.mxu0 %vm1373_vm2, %v6349_v25 }
 0x122   : > { %v1307_v36 = vadd.f32 %v5066_v23, %v1183_v29  ;;  %v1186_v38 = vadd.f32 %v5563_v33, %v6221_v27  ;;  %v1177_v39 = vpop.f32.mrb[23].mxu0  ;;  %5593 = vmatmul.mubr.msk.bf16.gmra.mrb[48].mxu0 %vm1373_vm2, %v6347_v22  ;;  %1504 = vmatprep.mubr.bf16.mxu1 %v5995_v24 }
 0x123   : > { %v1305_v40 = vadd.f32 %v5062_v28, %v1175_v32  ;;  %v1178_v41 = vadd.f32 %v6221_v27, %v1177_v39 }
 0x124   : > { %v1308_v43 = vadd.f32 %v5067_v31, %v1186_v38 }
 0x125   : > { %v1306_v45 = vadd.f32 %v5063_v34, %v1178_v41 }
 0x126   : > { %v6364_v46 = vpack.c.bf16 %v1308_v43, %v1307_v36 }
 0x127   : > { %v6366_v49 = vpack.c.bf16 %v1306_v45, %v1305_v40  ;;  %v5566_v51 = vpop.f32.mrb[24].mxu0  ;;  %v1966_v45 = vld [vmem:[%s6452_s23 + $0x38] ss:$24 sps:$4 sm:$0xff]  }
 0x128   : > { %v1199_v53 = vadd.f32 %v5566_v51, %v6221_v27  ;;  %v1190_v54 = vpop.f32.mrb[25].mxu0 }
 0x129   : > { %v1191_v56 = vadd.f32 %v6221_v27, %v1190_v54  ;;  %v5567_v57 = vpop.f32.mrb[26].mxu0  ;;  %4741 = vmatmul.mubr.msk.bf16.gmra.mrb[20].mxu1 %vm1373_vm2, %v6292_v35  ;;  %5596 = vmatprep.mubr.msk.bf16.mxu0 %vm1373_vm2, %v6366_v49  ;;  %v1959_v54 = vld [vmem:[%s6452_s23 + $0x24] sm:$0xff] }
 0x12a   : > { %v1311_v59 = vadd.f32 %v5074_v47, %v1199_v53  ;;  %v1202_v60 = vadd.f32 %v5567_v57, %v6221_v27  ;;  %v1193_v62 = vpop.f32.mrb[27].mxu0  ;;  %5597 = vmatmul.mubr.msk.bf16.gmra.mrb[52].mxu0 %vm1373_vm2, %v6364_v46  ;;  %1514 = vmatprep.mubr.bf16.mxu1 %v5995_v24  ;;  %v1957_v53 = vld [vmem:[%s6452_s23 + $0x18] sm:$0xff]  ;;  %v2026_v2 = vunpack.c.l.bf16 %v1959_v54 }
 0x12b   : > { %v1309_v0 = vadd.f32 %v5070_v52, %v1191_v56  ;;  %v1194_v1 = vadd.f32 %v6221_v27, %v1193_v62  ;;  %v2037_v62 = vunpack.c.h.bf16 %v1966_v45 }
 0x12c   : > { %v1312_v3 = vadd.f32 %v5075_v55, %v1202_v60 }
 0x12d   : > { %v1310_v5 = vadd.f32 %v5071_v58, %v1194_v1  ;;  %v1968_v58 = vld [vmem:[%s6452_s23 + $0x44] ss:$24 sps:$4 sm:$0xff]   ;;  %v2023_v1 = vunpack.c.l.bf16 %v1957_v53 }
 0x12e   : > { %v1330_v6 = vpack.c.bf16 %v1312_v3, %v1311_v59  ;;  %v2031_v3 = vunpack.c.l.bf16 %v1966_v45 }
 0x12f   : > { %v1329_v8 = vpack.c.bf16 %v1310_v5, %v1309_v0  ;;  %v5570_v10 = vpop.f32.mrb[28].mxu0  ;;  %v2024_v5 = vunpack.c.h.bf16 %v1957_v53 }
 0x130   : > { %v1215_v13 = vadd.f32 %v5570_v10, %v6221_v27  ;;  %v1206_v14 = vpop.f32.mrb[29].mxu0 }
 0x131   : > { %v1207_v16 = vadd.f32 %v6221_v27, %v1206_v14  ;;  %v5571_v17 = vpop.f32.mrb[30].mxu0  ;;  %4742 = vmatmul.mubr.msk.bf16.gmra.mrb[24].mxu1 %vm1373_vm2, %v6323_v63  ;;  %5600 = vmatprep.mubr.msk.bf16.mxu0 %vm1373_vm2, %v1329_v8 }
 0x132   : > { %v1315_v19 = vadd.f32 %v5082_v7, %v1215_v13  ;;  %v1218_v20 = vadd.f32 %v5571_v17, %v6221_v27  ;;  %v1209_v21 = vpop.f32.mrb[31].mxu0  ;;  %5601 = vmatmul.mubr.msk.bf16.gmra.mrb[56].mxu0 %vm1373_vm2, %v1330_v6  ;;  %1524 = vmatprep.mubr.bf16.mxu1 %v5995_v24  ;;  %v2040_v7 = vunpack.c.h.bf16 %v1968_v58 }
 0x133   : > { %v1313_v23 = vadd.f32 %v5078_v12, %v1207_v16  ;;  %v1210_v26 = vadd.f32 %v6221_v27, %v1209_v21  ;;  %v5921_v27 = vld [vmem:[%s7443_s11 + $0x80] sm:$0xff]   ;;  %v2034_v12 = vunpack.c.l.bf16 %v1968_v58 }
 0x134   : > { %v1316_v28 = vadd.f32 %v5083_v15, %v1218_v20  ;;  %5644 = vmatprep.subr.bf16.mxu0 %v5921_v27  ;;  %v1974_v21 = vld [vmem:[%s6452_s23 + $0x68] ss:$24 sps:$4 sm:$0xff]   ;;  %v1984_v58 = vld [vmem:[%s6452_s23 + $0xa4] ss:$24 sps:$4 sm:$0xff]  }
 0x135   : > { %v1314_v29 = vadd.f32 %v5079_v18, %v1210_v26 }
 0x136   : > { %v1332_v30 = vpack.c.bf16 %v1316_v28, %v1315_v19 }
 0x137   : > { %v1331_v31 = vpack.c.bf16 %v1314_v29, %v1313_v23 }
 0x139   : > { %4743 = vmatmul.mubr.msk.bf16.gmra.mrb[28].mxu1 %vm1373_vm2, %v6321_v61  ;;  %5604 = vmatprep.mubr.msk.bf16.mxu0 %vm1373_vm2, %v1331_v31 }
 0x13a   : > { %5605 = vmatmul.mubr.msk.bf16.gmra.mrb[60].mxu0 %vm1373_vm2, %v1332_v30  ;;  %1534 = vmatprep.mubr.bf16.mxu1 %v5995_v24 }
 0x13b   : > { %5612 = vmatprep.mubr.msk.bf16.mxu0 %vm1373_vm2, %v6233_v50  ;;  %v1953_v50 = vld [vmem:[%s6452_s23] sm:$0xff] }
 0x141   : > { %4744 = vmatmul.mubr.msk.bf16.gmra.mrb[32].mxu1 %vm1373_vm2, %v6349_v25 }
 0x142   : > { %5613 = vmatmul.mubr.msk.bf16.vlgmr.msra.gmra.mrb[64].mxu0 %vm1373_vm2, %v6231_v48  ;;  %1544 = vmatprep.mubr.bf16.mxu1 %v5995_v24  ;;  %v5922_v48 = vld [vmem:[%s7443_s11 + $0x88] sm:$0xff]  }
 0x143   : > { %5616 = vmatprep.mubr.msk.bf16.mxu0 %vm1373_vm2, %v6265_v11  ;;  %5645 = vmatpush3.bf16.msra.mxu0 %v5921_v27  ;;  %v1958_v11 = vld [vmem:[%s6452_s23 + $0x8] ss:$24 sps:$4 sm:$0xff]  }
 0x144   : > { %5646 = vmatprep.subr.bf16.mxu0 %v5922_v48  ;;  %v2019_v36 = vunpack.c.l.bf16 %v1958_v11 }
 0x147   : > { %5647 = vmatpush3.bf16.msra.mxu0 %v5922_v48 }
 0x149   : > { %4745 = vmatmul.mubr.msk.bf16.gmra.mrb[36].mxu1 %vm1373_vm2, %v6347_v22 }
 0x14a   : > { %5617 = vmatmul.mubr.msk.bf16.gmra.mrb[68].mxu0 %vm1373_vm2, %v6263_v9  ;;  %1554 = vmatprep.mubr.bf16.mxu1 %v5995_v24  ;;  %v1955_v9 = vld [vmem:[%s6452_s23 + $0xc] sm:$0xff] }
 0x14b   : > { %5620 = vmatprep.mubr.msk.bf16.mxu0 %vm1373_vm2, %v6294_v37  ;;  %v2020_v37 = vunpack.c.l.bf16 %v1955_v9 }
 0x151   : > { %4746 = vmatmul.mubr.msk.bf16.gmra.mrb[40].mxu1 %vm1373_vm2, %v6366_v49 }
 0x152   : > { %5621 = vmatmul.mubr.msk.bf16.gmra.mrb[72].mxu0 %vm1373_vm2, %v6292_v35  ;;  %1564 = vmatprep.mubr.bf16.mxu1 %v5995_v24  ;;  %v2017_v35 = vunpack.c.l.bf16 %v1953_v50 }
 0x153   : > { %5624 = vmatprep.mubr.msk.bf16.mxu0 %vm1373_vm2, %v6323_v63  ;;  %v2018_v63 = vunpack.c.h.bf16 %v1953_v50  ;;  %v1976_v50 = vld [vmem:[%s6452_s23 + $0x74] ss:$24 sps:$4 sm:$0xff]  }
 0x159   : > { %4747 = vmatmul.mubr.msk.bf16.gmra.mrb[44].mxu1 %vm1373_vm2, %v6364_v46 }
 0x15a   : > { %5625 = vmatmul.mubr.msk.bf16.gmra.mrb[76].mxu0 %vm1373_vm2, %v6321_v61  ;;  %1574 = vmatprep.mubr.bf16.mxu1 %v5995_v24 }
 0x15b   : > { %5628 = vmatprep.mubr.msk.bf16.mxu0 %vm1373_vm2, %v6349_v25  ;;  %v2021_v25 = vunpack.c.h.bf16 %v1955_v9 }
 0x161   : > { %4748 = vmatmul.mubr.msk.bf16.gmra.mrb[48].mxu1 %vm1373_vm2, %v1329_v8 }
 0x162   : > { %5629 = vmatmul.mubr.msk.bf16.gmra.mrb[80].mxu0 %vm1373_vm2, %v6347_v22  ;;  %1584 = vmatprep.mubr.bf16.mxu1 %v5995_v24  ;;  %v2025_v22 = vunpack.c.h.bf16 %v1958_v11 }
 0x163   : > { %5632 = vmatprep.mubr.msk.bf16.mxu0 %vm1373_vm2, %v6366_v49 }
 0x169   : > { %4749 = vmatmul.mubr.msk.bf16.gmra.mrb[52].mxu1 %vm1373_vm2, %v1330_v6 }
 0x16a   : > { %5633 = vmatmul.mubr.msk.bf16.gmra.mrb[84].mxu0 %vm1373_vm2, %v6364_v46  ;;  %1594 = vmatprep.mubr.bf16.mxu1 %v5995_v24 }
 0x16b   : > { %5636 = vmatprep.mubr.msk.bf16.mxu0 %vm1373_vm2, %v1329_v8 }
 0x171   : > { %4750 = vmatmul.mubr.msk.bf16.gmra.mrb[56].mxu1 %vm1373_vm2, %v1331_v31 }
 0x172   : > { %5637 = vmatmul.mubr.msk.bf16.gmra.mrb[88].mxu0 %vm1373_vm2, %v1330_v6  ;;  %1604 = vmatprep.mubr.bf16.mxu1 %v5995_v24  ;;  %v1960_v24 = vld [vmem:[%s6452_s23 + $0x14] ss:$24 sps:$4 sm:$0xff]   ;;  %v2027_v6 = vunpack.c.h.bf16 %v1959_v54 }
 0x173   : > { %5640 = vmatprep.mubr.msk.bf16.mxu0 %vm1373_vm2, %v1331_v31  ;;  %v2028_v32 = vunpack.c.h.bf16 %v1960_v24  ;;  %v2022_v38 = vunpack.c.l.bf16 %v1960_v24  ;;  %v1963_v31 = vld [vmem:[%s6452_s23 + $0x3c] sm:$0xff]  ;;  %v2049_v24 = vunpack.c.h.bf16 %v1974_v21  ;;  %v1965_v54 = vld [vmem:[%s6452_s23 + $0x48] sm:$0xff] }
 0x179   : > { %4751 = vmatmul.mubr.msk.bf16.gmra.mrb[60].mxu1 %vm1373_vm2, %v1332_v30 }
 0x17a   : > { %5641 = vmatmul.mubr.msk.bf16.gmra.mrb[92].mxu0 %vm1373_vm2, %v1332_v30  ;;  %v1961_v30 = vld [vmem:[%s6452_s23 + $0x30] sm:$0xff] }
 0x1d4   : > { %v1456_v61 = vpop.f32.mrb[0].mxu1 }
 0x1d5   : > { %v1458_v33 = vpop.f32.mrb[1].mxu1  ;;  %v5578_v34 = vpop.f32.mrb[32].mxu0  ;;  %v2113_v41 = vmul.f32 %v2017_v35, %v1456_v61  ;;  %v2032_v61 = vunpack.c.l.bf16 %v1963_v31 }
 0x1d6   : > { %v1460_v39 = vpop.f32.mrb[2].mxu1  ;;  %v1649_v40 = vpop.f32.mrb[33].mxu0  ;;  %v2114_v46 = vmul.f32 %v2018_v63, %v1458_v33  ;;  %v2121_v47 = vmul.f32 %v5578_v34, %v2025_v22  ;;  %v2043_v63 = vunpack.c.l.bf16 %v1974_v21  ;;  %v2052_v33 = vunpack.c.h.bf16 %v1976_v50  ;;  %v1990_v21 = vld [vmem:[%s6452_s23 + $0xc8] ss:$24 sps:$4 sm:$0xff]  }
 0x1d7   : > { %v2116_v42 = vmul.f32 %v2020_v37, %v1460_v39  ;;  %v1462_v43 = vpop.f32.mrb[3].mxu1  ;;  %v5579_v44 = vpop.f32.mrb[34].mxu0  ;;  %v2115_v56 = vmul.f32 %v2019_v36, %v1649_v40  ;;  %v2029_v37 = vunpack.c.l.bf16 %v1961_v30 }
 0x1d8   : > { %v2117_v49 = vmul.f32 %v2021_v25, %v1462_v43  ;;  %v2124_v51 = vmul.f32 %v5579_v44, %v2028_v32  ;;  %v1652_v52 = vpop.f32.mrb[35].mxu0  ;;  %v2030_v25 = vunpack.c.h.bf16 %v1961_v30  ;;  %v2033_v32 = vunpack.c.h.bf16 %v1963_v31  ;;  %v1969_v30 = vld [vmem:[%s6452_s23 + $0x60] sm:$0xff]  ;;  %v1971_v31 = vld [vmem:[%s6452_s23 + $0x6c] sm:$0xff] }
 0x1d9   : > { %v2209_v55 = vpack.c.bf16 %v2116_v42, %v2113_v41  ;;  %v2118_v57 = vmul.f32 %v2022_v38, %v1652_v52  ;;  %v2046_v38 = vunpack.c.l.bf16 %v1976_v50  ;;  %v1992_v50 = vld [vmem:[%s6452_s23 + $0xd4] ss:$24 sps:$4 sm:$0xff]  }
 0x1da   : > { %v2210_v59 = vpack.c.bf16 %v2117_v49, %v2114_v46  ;;  %v2214_v60 = vpack.c.bf16 %v2124_v51, %v2121_v47  ;;  %v1982_v47 = vld [vmem:[%s6452_s23 + $0x98] ss:$24 sps:$4 sm:$0xff]  }
 0x1db   : > { %v2211_v0 = vpack.c.bf16 %v2118_v57, %v2115_v56 }
 0x1dc   : > { %v1466_v4 = vpop.f32.mrb[4].mxu1  ;;  %2481 = vmatprep.mubr.bf16.mxu1 %v2210_v59 }
 0x1dd   : > { %v1468_v8 = vpop.f32.mrb[5].mxu1  ;;  %v5582_v10 = vpop.f32.mrb[36].mxu0  ;;  %2482 = vmatmul.mubr.bf16.vlgmr.msra.gmra.mrb[64].mxu1 %v2209_v55  ;;  %5648 = vmatprep.mubr.msk.bf16.mxu0 %vm1373_vm2, %v2211_v0  ;;  %v2119_v16 = vmul.f32 %v2023_v1, %v1466_v4  ;;  %v1967_v55 = vld [vmem:[%s6452_s23 + $0x54] sm:$0xff]  ;;  %v2035_v1 = vunpack.c.l.bf16 %v1965_v54 }
 0x1de   : > { %v2133_v13 = vmul.f32 %v5582_v10, %v2037_v62  ;;  %v1470_v14 = vpop.f32.mrb[6].mxu1  ;;  %v1665_v15 = vpop.f32.mrb[37].mxu0  ;;  %5649 = vmatmul.mubr.msk.bf16.vlgmr.msra.gmra.mrb[64].mxu0 %vm1373_vm2, %v2214_v60  ;;  %v2120_v23 = vmul.f32 %v2024_v5, %v1468_v8  ;;  %v2061_v62 = vunpack.c.h.bf16 %v1982_v47  ;;  %v2036_v5 = vunpack.c.h.bf16 %v1965_v54  ;;  %v1973_v54 = vld [vmem:[%s6452_s23 + $0x78] sm:$0xff] }
 0x1df   : > { %v2122_v17 = vmul.f32 %v2026_v2, %v1470_v14  ;;  %v2127_v18 = vmul.f32 %v2031_v3, %v1665_v15  ;;  %v1472_v19 = vpop.f32.mrb[7].mxu1  ;;  %v5583_v20 = vpop.f32.mrb[38].mxu0  ;;  %v2038_v2 = vunpack.c.l.bf16 %v1967_v55  ;;  %v2055_v3 = vunpack.c.l.bf16 %v1982_v47  ;;  %v1998_v47 = vld [vmem:[%s6452_s23 + $0xf8] ss:$24 sps:$4 sm:$0xff]  }
 0x1e0   : > { %v2123_v26 = vmul.f32 %v2027_v6, %v1472_v19  ;;  %v2136_v28 = vmul.f32 %v5583_v20, %v2040_v7  ;;  %v1668_v29 = vpop.f32.mrb[39].mxu0  ;;  %v2039_v6 = vunpack.c.h.bf16 %v1967_v55  ;;  %v2064_v7 = vunpack.c.h.bf16 %v1984_v58  ;;  %v1975_v55 = vld [vmem:[%s6452_s23 + $0x84] sm:$0xff] }
 0x1e1   : > { %v2212_v27 = vpack.c.bf16 %v2122_v17, %v2119_v16  ;;  %v2130_v48 = vmul.f32 %v2034_v12, %v1668_v29  ;;  %v2058_v12 = vunpack.c.l.bf16 %v1984_v58  ;;  %v2000_v58 = vld [vmem:[%s6452_s23 + $0x104] ss:$24 sps:$4 sm:$0xff]  }
 0x1e2   : > { %v2213_v9 = vpack.c.bf16 %v2123_v26, %v2120_v23  ;;  %v2220_v11 = vpack.c.bf16 %v2136_v28, %v2133_v13 }
 0x1e3   : > { %v2217_v35 = vpack.c.bf16 %v2130_v48, %v2127_v18 }
 0x1e4   : > { %v1476_v22 = vpop.f32.mrb[8].mxu1  ;;  %2489 = vmatprep.mubr.bf16.mxu1 %v2213_v9 }
 0x1e5   : > { %v1478_v34 = vpop.f32.mrb[9].mxu1  ;;  %v5586_v36 = vpop.f32.mrb[40].mxu0  ;;  %2490 = vmatmul.mubr.bf16.gmra.mrb[68].mxu1 %v2212_v27  ;;  %5652 = vmatprep.mubr.msk.bf16.mxu0 %vm1373_vm2, %v2217_v35  ;;  %v2125_v42 = vmul.f32 %v2029_v37, %v1476_v22  ;;  %v2041_v37 = vunpack.c.l.bf16 %v1969_v30 }
 0x1e6   : > { %v2145_v39 = vmul.f32 %v5586_v36, %v2049_v24  ;;  %v1480_v40 = vpop.f32.mrb[10].mxu1  ;;  %v1681_v41 = vpop.f32.mrb[41].mxu0  ;;  %5653 = vmatmul.mubr.msk.bf16.gmra.mrb[68].mxu0 %vm1373_vm2, %v2220_v11  ;;  %v2126_v49 = vmul.f32 %v2030_v25, %v1478_v34  ;;  %v2073_v24 = vunpack.c.h.bf16 %v1990_v21  ;;  %v2042_v25 = vunpack.c.h.bf16 %v1969_v30  ;;  %v1977_v30 = vld [vmem:[%s6452_s23 + $0x90] sm:$0xff] }
 0x1e7   : > { %v2128_v43 = vmul.f32 %v2032_v61, %v1480_v40  ;;  %v2139_v44 = vmul.f32 %v2043_v63, %v1681_v41  ;;  %v1482_v45 = vpop.f32.mrb[11].mxu1  ;;  %v5587_v46 = vpop.f32.mrb[42].mxu0  ;;  %v2044_v61 = vunpack.c.l.bf16 %v1971_v31  ;;  %v2067_v63 = vunpack.c.l.bf16 %v1990_v21  ;;  %v2006_v21 = vld [vmem:[%s6452_s23 + $0x128] ss:$24 sps:$4 sm:$0xff]  }
 0x1e8   : > { %v2129_v51 = vmul.f32 %v2033_v32, %v1482_v45  ;;  %v2148_v52 = vmul.f32 %v5587_v46, %v2052_v33  ;;  %v1684_v53 = vpop.f32.mrb[43].mxu0  ;;  %v2045_v32 = vunpack.c.h.bf16 %v1971_v31  ;;  %v2076_v33 = vunpack.c.h.bf16 %v1992_v50  ;;  %v1979_v31 = vld [vmem:[%s6452_s23 + $0x9c] sm:$0xff] }
 0x1e9   : > { %v2215_v56 = vpack.c.bf16 %v2128_v43, %v2125_v42  ;;  %v2142_v57 = vmul.f32 %v2046_v38, %v1684_v53  ;;  %v2070_v38 = vunpack.c.l.bf16 %v1992_v50  ;;  %v2008_v50 = vld [vmem:[%s6452_s23 + $0x134] ss:$24 sps:$4 sm:$0xff]  }
 0x1ea   : > { %v2216_v59 = vpack.c.bf16 %v2129_v51, %v2126_v49  ;;  %v2226_v60 = vpack.c.bf16 %v2148_v52, %v2145_v39 }
 0x1eb   : > { %v2223_v0 = vpack.c.bf16 %v2142_v57, %v2139_v44 }
 0x1ec   : > { %v1486_v4 = vpop.f32.mrb[12].mxu1  ;;  %2497 = vmatprep.mubr.bf16.mxu1 %v2216_v59 }
 0x1ed   : > { %v1488_v8 = vpop.f32.mrb[13].mxu1  ;;  %v5590_v10 = vpop.f32.mrb[44].mxu0  ;;  %2498 = vmatmul.mubr.bf16.gmra.mrb[72].mxu1 %v2215_v56  ;;  %5656 = vmatprep.mubr.msk.bf16.mxu0 %vm1373_vm2, %v2223_v0  ;;  %v2131_v16 = vmul.f32 %v2035_v1, %v1486_v4  ;;  %v2047_v1 = vunpack.c.l.bf16 %v1973_v54 }
 0x1ee   : > { %v2157_v13 = vmul.f32 %v5590_v10, %v2061_v62  ;;  %v1490_v14 = vpop.f32.mrb[14].mxu1  ;;  %v1697_v15 = vpop.f32.mrb[45].mxu0  ;;  %5657 = vmatmul.mubr.msk.bf16.gmra.mrb[72].mxu0 %vm1373_vm2, %v2226_v60  ;;  %v2132_v23 = vmul.f32 %v2036_v5, %v1488_v8  ;;  %v2085_v62 = vunpack.c.h.bf16 %v1998_v47  ;;  %v2048_v5 = vunpack.c.h.bf16 %v1973_v54  ;;  %v1981_v54 = vld [vmem:[%s6452_s23 + $0xa8] sm:$0xff] }
 0x1ef   : > { %v2134_v17 = vmul.f32 %v2038_v2, %v1490_v14  ;;  %v2151_v18 = vmul.f32 %v2055_v3, %v1697_v15  ;;  %v1492_v19 = vpop.f32.mrb[15].mxu1  ;;  %v5591_v20 = vpop.f32.mrb[46].mxu0  ;;  %v2050_v2 = vunpack.c.l.bf16 %v1975_v55  ;;  %v2079_v3 = vunpack.c.l.bf16 %v1998_v47  ;;  %v2014_v47 = vld [vmem:[%s6452_s23 + $0x158] ss:$24 sps:$4 sm:$0xff]  }
 0x1f0   : > { %v2135_v26 = vmul.f32 %v2039_v6, %v1492_v19  ;;  %v2160_v28 = vmul.f32 %v5591_v20, %v2064_v7  ;;  %v1700_v29 = vpop.f32.mrb[47].mxu0  ;;  %v2051_v6 = vunpack.c.h.bf16 %v1975_v55  ;;  %v2088_v7 = vunpack.c.h.bf16 %v2000_v58  ;;  %v1983_v55 = vld [vmem:[%s6452_s23 + $0xb4] sm:$0xff] }
 0x1f1   : > { %v2218_v27 = vpack.c.bf16 %v2134_v17, %v2131_v16  ;;  %v2154_v48 = vmul.f32 %v2058_v12, %v1700_v29  ;;  %v2082_v12 = vunpack.c.l.bf16 %v2000_v58  ;;  %v2016_v58 = vld [vmem:[%s6452_s23 + $0x164] ss:$24 sps:$4 sm:$0xff]  }
 0x1f2   : > { %v2219_v9 = vpack.c.bf16 %v2135_v26, %v2132_v23  ;;  %v2232_v11 = vpack.c.bf16 %v2160_v28, %v2157_v13 }
 0x1f3   : > { %v2229_v35 = vpack.c.bf16 %v2154_v48, %v2151_v18 }
 0x1f4   : > { %v1496_v22 = vpop.f32.mrb[16].mxu1  ;;  %2505 = vmatprep.mubr.bf16.mxu1 %v2219_v9 }
 0x1f5   : > { %v1498_v34 = vpop.f32.mrb[17].mxu1  ;;  %v5594_v36 = vpop.f32.mrb[48].mxu0  ;;  %2506 = vmatmul.mubr.bf16.gmra.mrb[76].mxu1 %v2218_v27  ;;  %5660 = vmatprep.mubr.msk.bf16.mxu0 %vm1373_vm2, %v2229_v35  ;;  %v2137_v42 = vmul.f32 %v2041_v37, %v1496_v22  ;;  %v2053_v37 = vunpack.c.l.bf16 %v1977_v30 }
 0x1f6   : > { %v2169_v39 = vmul.f32 %v5594_v36, %v2073_v24  ;;  %v1500_v40 = vpop.f32.mrb[18].mxu1  ;;  %v1713_v41 = vpop.f32.mrb[49].mxu0  ;;  %5661 = vmatmul.mubr.msk.bf16.gmra.mrb[76].mxu0 %vm1373_vm2, %v2232_v11  ;;  %v2138_v49 = vmul.f32 %v2042_v25, %v1498_v34  ;;  %v2097_v24 = vunpack.c.h.bf16 %v2006_v21  ;;  %v2054_v25 = vunpack.c.h.bf16 %v1977_v30  ;;  %v1987_v30 = vld [vmem:[%s6452_s23 + $0xcc] sm:$0xff] }
 0x1f7   : > { %v2140_v43 = vmul.f32 %v2044_v61, %v1500_v40  ;;  %v2163_v44 = vmul.f32 %v2067_v63, %v1713_v41  ;;  %v1502_v45 = vpop.f32.mrb[19].mxu1  ;;  %v5595_v46 = vpop.f32.mrb[50].mxu0  ;;  %v2056_v61 = vunpack.c.l.bf16 %v1979_v31  ;;  %v2091_v63 = vunpack.c.l.bf16 %v2006_v21 }
 0x1f8   : > { %v2141_v51 = vmul.f32 %v2045_v32, %v1502_v45  ;;  %v2172_v52 = vmul.f32 %v5595_v46, %v2076_v33  ;;  %v1716_v53 = vpop.f32.mrb[51].mxu0  ;;  %v2057_v32 = vunpack.c.h.bf16 %v1979_v31  ;;  %v2100_v33 = vunpack.c.h.bf16 %v2008_v50 }
 0x1f9   : > { %v2221_v56 = vpack.c.bf16 %v2140_v43, %v2137_v42  ;;  %v2166_v57 = vmul.f32 %v2070_v38, %v1716_v53  ;;  %v2094_v38 = vunpack.c.l.bf16 %v2008_v50 }
 0x1fa   : > { %v2222_v59 = vpack.c.bf16 %v2141_v51, %v2138_v49  ;;  %v2238_v60 = vpack.c.bf16 %v2172_v52, %v2169_v39 }
 0x1fb   : > { %v2235_v0 = vpack.c.bf16 %v2166_v57, %v2163_v44 }
 0x1fc   : > { %v1506_v4 = vpop.f32.mrb[20].mxu1  ;;  %2513 = vmatprep.mubr.bf16.mxu1 %v2222_v59 }
 0x1fd   : > { %v1508_v8 = vpop.f32.mrb[21].mxu1  ;;  %v5598_v10 = vpop.f32.mrb[52].mxu0  ;;  %2514 = vmatmul.mubr.bf16.gmra.mrb[80].mxu1 %v2221_v56  ;;  %5664 = vmatprep.mubr.msk.bf16.mxu0 %vm1373_vm2, %v2235_v0  ;;  %v2143_v16 = vmul.f32 %v2047_v1, %v1506_v4  ;;  %v2059_v1 = vunpack.c.l.bf16 %v1981_v54 }
 0x1fe   : > { %v2181_v13 = vmul.f32 %v5598_v10, %v2085_v62  ;;  %v1510_v14 = vpop.f32.mrb[22].mxu1  ;;  %v1729_v15 = vpop.f32.mrb[53].mxu0  ;;  %5665 = vmatmul.mubr.msk.bf16.gmra.mrb[80].mxu0 %vm1373_vm2, %v2238_v60  ;;  %v2144_v23 = vmul.f32 %v2048_v5, %v1508_v8  ;;  %v2109_v62 = vunpack.c.h.bf16 %v2014_v47  ;;  %v2060_v5 = vunpack.c.h.bf16 %v1981_v54 }
 0x1ff   : > { %v2146_v17 = vmul.f32 %v2050_v2, %v1510_v14  ;;  %v2175_v18 = vmul.f32 %v2079_v3, %v1729_v15  ;;  %v1512_v19 = vpop.f32.mrb[23].mxu1  ;;  %v5599_v20 = vpop.f32.mrb[54].mxu0  ;;  %v2062_v2 = vunpack.c.l.bf16 %v1983_v55  ;;  %v2103_v3 = vunpack.c.l.bf16 %v2014_v47 }
 0x200   : > { %v2147_v26 = vmul.f32 %v2051_v6, %v1512_v19  ;;  %v2184_v28 = vmul.f32 %v5599_v20, %v2088_v7  ;;  %v1732_v29 = vpop.f32.mrb[55].mxu0  ;;  %v2063_v6 = vunpack.c.h.bf16 %v1983_v55  ;;  %v2112_v7 = vunpack.c.h.bf16 %v2016_v58 }
 0x201   : > { %v2224_v27 = vpack.c.bf16 %v2146_v17, %v2143_v16  ;;  %v2178_v48 = vmul.f32 %v2082_v12, %v1732_v29  ;;  %v2106_v12 = vunpack.c.l.bf16 %v2016_v58  ;;  %v1985_v29 = vld [vmem:[%s6452_s23 + $0xc0] sm:$0xff] }
 0x202   : > { %v2225_v9 = vpack.c.bf16 %v2147_v26, %v2144_v23  ;;  %v2244_v11 = vpack.c.bf16 %v2184_v28, %v2181_v13 }
 0x203   : > { %v2241_v35 = vpack.c.bf16 %v2178_v48, %v2175_v18 }
 0x204   : > { %v1516_v22 = vpop.f32.mrb[24].mxu1  ;;  %2521 = vmatprep.mubr.bf16.mxu1 %v2225_v9 }
 0x205   : > { %v1518_v34 = vpop.f32.mrb[25].mxu1  ;;  %v5602_v36 = vpop.f32.mrb[56].mxu0  ;;  %2522 = vmatmul.mubr.bf16.gmra.mrb[84].mxu1 %v2224_v27  ;;  %5668 = vmatprep.mubr.msk.bf16.mxu0 %vm1373_vm2, %v2241_v35  ;;  %v2149_v42 = vmul.f32 %v2053_v37, %v1516_v22  ;;  %v2066_v37 = vunpack.c.h.bf16 %v1985_v29 }
 0x206   : > { %v2193_v39 = vmul.f32 %v5602_v36, %v2097_v24  ;;  %v1520_v40 = vpop.f32.mrb[26].mxu1  ;;  %v1745_v41 = vpop.f32.mrb[57].mxu0  ;;  %5669 = vmatmul.mubr.msk.bf16.gmra.mrb[84].mxu0 %vm1373_vm2, %v2244_v11  ;;  %v2150_v49 = vmul.f32 %v2054_v25, %v1518_v34  ;;  %v2065_v11 = vunpack.c.l.bf16 %v1985_v29  ;;  %v2068_v24 = vunpack.c.l.bf16 %v1987_v30 }
 0x207   : > { %v2152_v43 = vmul.f32 %v2056_v61, %v1520_v40  ;;  %v2187_v44 = vmul.f32 %v2091_v63, %v1745_v41  ;;  %v1522_v45 = vpop.f32.mrb[27].mxu1  ;;  %v5603_v46 = vpop.f32.mrb[58].mxu0  ;;  %v2069_v61 = vunpack.c.h.bf16 %v1987_v30 }
 0x208   : > { %v2153_v51 = vmul.f32 %v2057_v32, %v1522_v45  ;;  %v2196_v52 = vmul.f32 %v5603_v46, %v2100_v33  ;;  %v1748_v53 = vpop.f32.mrb[59].mxu0 }
 0x209   : > { %v2227_v56 = vpack.c.bf16 %v2152_v43, %v2149_v42  ;;  %v2190_v57 = vmul.f32 %v2094_v38, %v1748_v53  ;;  %v1989_v38 = vld [vmem:[%s6452_s23 + $0xd8] sm:$0xff] }
 0x20a   : > { %v2228_v59 = vpack.c.bf16 %v2153_v51, %v2150_v49  ;;  %v2250_v60 = vpack.c.bf16 %v2196_v52, %v2193_v39  ;;  %v1991_v39 = vld [vmem:[%s6452_s23 + $0xe4] sm:$0xff]  ;;  %v2071_v42 = vunpack.c.l.bf16 %v1989_v38  ;;  %v2072_v45 = vunpack.c.h.bf16 %v1989_v38  ;;  %v2005_v38 = vld [vmem:[%s6452_s23 + $0x138] sm:$0xff] }
 0x20b   : > { %v2247_v0 = vpack.c.bf16 %v2190_v57, %v2187_v44  ;;  %v2074_v43 = vunpack.c.l.bf16 %v1991_v39  ;;  %v2075_v46 = vunpack.c.h.bf16 %v1991_v39  ;;  %v1995_v57 = vld [vmem:[%s6452_s23 + $0xfc] sm:$0xff]  ;;  %v2007_v39 = vld [vmem:[%s6452_s23 + $0x144] sm:$0xff] }
 0x20c   : > { %v1526_v4 = vpop.f32.mrb[28].mxu1  ;;  %2529 = vmatprep.mubr.bf16.mxu1 %v2228_v59 }
 0x20d   : > { %v1528_v8 = vpop.f32.mrb[29].mxu1  ;;  %v5606_v10 = vpop.f32.mrb[60].mxu0  ;;  %2530 = vmatmul.mubr.bf16.gmra.mrb[88].mxu1 %v2227_v56  ;;  %5672 = vmatprep.mubr.msk.bf16.mxu0 %vm1373_vm2, %v2247_v0  ;;  %v2155_v16 = vmul.f32 %v2059_v1, %v1526_v4  ;;  %v1993_v56 = vld [vmem:[%s6452_s23 + $0xf0] sm:$0xff] }
 0x20e   : > { %v2205_v13 = vmul.f32 %v5606_v10, %v2109_v62  ;;  %v1530_v14 = vpop.f32.mrb[30].mxu1  ;;  %v1761_v15 = vpop.f32.mrb[61].mxu0  ;;  %5673 = vmatmul.mubr.msk.bf16.gmra.mrb[88].mxu0 %vm1373_vm2, %v2250_v60  ;;  %v2156_v21 = vmul.f32 %v2060_v5, %v1528_v8  ;;  %v2077_v60 = vunpack.c.l.bf16 %v1993_v56  ;;  %v2080_v62 = vunpack.c.l.bf16 %v1995_v57 }
 0x20f   : > { %v2158_v17 = vmul.f32 %v2062_v2, %v1530_v14  ;;  %v2199_v18 = vmul.f32 %v2103_v3, %v1761_v15  ;;  %v1532_v19 = vpop.f32.mrb[31].mxu1  ;;  %v5607_v20 = vpop.f32.mrb[62].mxu0  ;;  %v2078_v1 = vunpack.c.h.bf16 %v1993_v56  ;;  %v2081_v2 = vunpack.c.h.bf16 %v1995_v57  ;;  %v2009_v56 = vld [vmem:[%s6452_s23 + $0x150] sm:$0xff]  ;;  %v2011_v57 = vld [vmem:[%s6452_s23 + $0x15c] sm:$0xff] }
 0x210   : > { %v2159_v23 = vmul.f32 %v2063_v6, %v1532_v19  ;;  %v2208_v26 = vmul.f32 %v5607_v20, %v2112_v7  ;;  %v1764_v28 = vpop.f32.mrb[63].mxu0 }
 0x211   : > { %v2230_v31 = vpack.c.bf16 %v2158_v17, %v2155_v16  ;;  %v2202_v27 = vmul.f32 %v2106_v12, %v1764_v28  ;;  %v1997_v12 = vld [vmem:[%s6452_s23 + $0x108] sm:$0xff] }
 0x212   : > { %v2231_v48 = vpack.c.bf16 %v2159_v23, %v2156_v21  ;;  %v2256_v50 = vpack.c.bf16 %v2208_v26, %v2205_v13  ;;  %v1999_v13 = vld [vmem:[%s6452_s23 + $0x114] sm:$0xff]  ;;  %v2083_v16 = vunpack.c.l.bf16 %v1997_v12  ;;  %v2084_v19 = vunpack.c.h.bf16 %v1997_v12 }
 0x213   : > { %v2253_v9 = vpack.c.bf16 %v2202_v27, %v2199_v18  ;;  %v2086_v17 = vunpack.c.l.bf16 %v1999_v13  ;;  %v2087_v20 = vunpack.c.h.bf16 %v1999_v13  ;;  %v2001_v27 = vld [vmem:[%s6452_s23 + $0x120] sm:$0xff] }
 0x214   : > { %v1536_v35 = vpop.f32.mrb[32].mxu1  ;;  %2537 = vmatprep.mubr.bf16.mxu1 %v2231_v48  ;;  %v2003_v48 = vld [vmem:[%s6452_s23 + $0x12c] sm:$0xff] }
 0x215   : > { %v1538_v63 = vpop.f32.mrb[33].mxu1  ;;  %2538 = vmatmul.mubr.bf16.gmra.mrb[92].mxu1 %v2230_v31  ;;  %5676 = vmatprep.mubr.msk.bf16.mxu0 %vm1373_vm2, %v2253_v9  ;;  %v2161_v25 = vmul.f32 %v2065_v11, %v1536_v35  ;;  %v2089_v11 = vunpack.c.l.bf16 %v2001_v27 }
 0x216   : > { %v1540_v22 = vpop.f32.mrb[34].mxu1  ;;  %5677 = vmatmul.mubr.msk.bf16.gmra.mrb[92].mxu0 %vm1373_vm2, %v2256_v50  ;;  %v2162_v34 = vmul.f32 %v2066_v37, %v1538_v63  ;;  %v2090_v37 = vunpack.c.h.bf16 %v2001_v27 }
 0x217   : > { %v2164_v32 = vmul.f32 %v2068_v24, %v1540_v22  ;;  %v1542_v33 = vpop.f32.mrb[35].mxu1  ;;  %v2092_v24 = vunpack.c.l.bf16 %v2003_v48 }
 0x218   : > { %v2165_v36 = vmul.f32 %v2069_v61, %v1542_v33  ;;  %v2093_v61 = vunpack.c.h.bf16 %v2003_v48 }
 0x219   : > { %v2233_v40 = vpack.c.bf16 %v2164_v32, %v2161_v25 }
 0x21a   : > { %v2234_v41 = vpack.c.bf16 %v2165_v36, %v2162_v34 }
 0x21c   : > { %v1546_v44 = vpop.f32.mrb[36].mxu1  ;;  %2545 = vmatprep.mubr.bf16.mxu1 %v2234_v41 }
 0x21d   : > { %v1548_v47 = vpop.f32.mrb[37].mxu1  ;;  %2546 = vmatmul.mubr.bf16.gmra.mrb[96].mxu1 %v2233_v40  ;;  %v2167_v51 = vmul.f32 %v2071_v42, %v1546_v44  ;;  %v2095_v42 = vunpack.c.l.bf16 %v2005_v38 }
 0x21e   : > { %v1550_v49 = vpop.f32.mrb[38].mxu1  ;;  %v2168_v54 = vmul.f32 %v2072_v45, %v1548_v47  ;;  %v2096_v45 = vunpack.c.h.bf16 %v2005_v38 }
 0x21f   : > { %v2170_v52 = vmul.f32 %v2074_v43, %v1550_v49  ;;  %v1552_v53 = vpop.f32.mrb[39].mxu1  ;;  %v2098_v43 = vunpack.c.l.bf16 %v2007_v39 }
 0x220   : > { %v2171_v55 = vmul.f32 %v2075_v46, %v1552_v53  ;;  %v2099_v46 = vunpack.c.h.bf16 %v2007_v39 }
 0x221   : > { %v2236_v58 = vpack.c.bf16 %v2170_v52, %v2167_v51 }
 0x222   : > { %v2237_v59 = vpack.c.bf16 %v2171_v55, %v2168_v54 }
 0x224   : > { %v1556_v0 = vpop.f32.mrb[40].mxu1  ;;  %2553 = vmatprep.mubr.bf16.mxu1 %v2237_v59  ;;  %v3011_v59 = vld [vmem:[%s7444_s12] sm:$0xf] }
 0x225   : > { %v1558_v3 = vpop.f32.mrb[41].mxu1  ;;  %2554 = vmatmul.mubr.bf16.gmra.mrb[100].mxu1 %v2236_v58  ;;  %v2173_v5 = vmul.f32 %v2077_v60, %v1556_v0  ;;  %5881 = vmatprep.subr.msk.bf16.mxu0 %vm3061_vm3, %v3011_v59  ;;  %v2101_v0 = vunpack.c.l.bf16 %v2009_v56 }
 0x226   : > { %v1560_v4 = vpop.f32.mrb[42].mxu1  ;;  %v2174_v8 = vmul.f32 %v2078_v1, %v1558_v3  ;;  %v2104_v1 = vunpack.c.l.bf16 %v2011_v57  ;;  %v2102_v3 = vunpack.c.h.bf16 %v2009_v56 }
 0x227   : > { %v2176_v6 = vmul.f32 %v2080_v62, %v1560_v4  ;;  %v1562_v7 = vpop.f32.mrb[43].mxu1  ;;  %v3063_v62 = vsel %vm3061_vm3, %v3011_v59, 0  ;;  %v2105_v4 = vunpack.c.h.bf16 %v2011_v57 }
 0x228   : > { %v2177_v10 = vmul.f32 %v2081_v2, %v1562_v7  ;;  %5681 = vmatpush3.bf16.msra.mxu0 %v3063_v62 }
 0x229   : > { %v2239_v14 = vpack.c.bf16 %v2176_v6, %v2173_v5 }
 0x22a   : > { %v2240_v15 = vpack.c.bf16 %v2177_v10, %v2174_v8 }
 0x22c   : > { %v1566_v18 = vpop.f32.mrb[44].mxu1  ;;  %2561 = vmatprep.mubr.bf16.mxu1 %v2240_v15  ;;  %v2015_v15 = vld [vmem:[%s6452_s23 + $0x174] sm:$0xff] }
 0x22d   : > { %v1568_v21 = vpop.f32.mrb[45].mxu1  ;;  %2562 = vmatmul.mubr.bf16.gmra.mrb[104].mxu1 %v2239_v14  ;;  %v2179_v26 = vmul.f32 %v2083_v16, %v1566_v18  ;;  %v2013_v14 = vld [vmem:[%s6452_s23 + $0x168] sm:$0xff] }
 0x22e   : > { %v1570_v23 = vpop.f32.mrb[46].mxu1  ;;  %v2180_v30 = vmul.f32 %v2084_v19, %v1568_v21  ;;  %v2107_v18 = vunpack.c.l.bf16 %v2013_v14  ;;  %v2110_v19 = vunpack.c.l.bf16 %v2015_v15  ;;  %v2108_v21 = vunpack.c.h.bf16 %v2013_v14 }
 0x22f   : > { %v2182_v28 = vmul.f32 %v2086_v17, %v1570_v23  ;;  %v1572_v29 = vpop.f32.mrb[47].mxu1  ;;  %v2111_v23 = vunpack.c.h.bf16 %v2015_v15 }
 0x230   : > { %v2183_v31 = vmul.f32 %v2087_v20, %v1572_v29 }
 0x231   : > { %v2242_v50 = vpack.c.bf16 %v2182_v28, %v2179_v26 }
 0x232   : > { %v2243_v9 = vpack.c.bf16 %v2183_v31, %v2180_v30 }
 0x234   : > { %v1576_v35 = vpop.f32.mrb[48].mxu1  ;;  %2569 = vmatprep.mubr.bf16.mxu1 %v2243_v9 }
 0x235   : > { %v1578_v63 = vpop.f32.mrb[49].mxu1  ;;  %2570 = vmatmul.mubr.bf16.gmra.mrb[108].mxu1 %v2242_v50  ;;  %v2185_v25 = vmul.f32 %v2089_v11, %v1576_v35  ;;  %v5085_v11 = vld [vmem:[%s6527_s26] sm:$0xff]  }
 0x236   : > { %v1580_v22 = vpop.f32.mrb[50].mxu1  ;;  %v2186_v34 = vmul.f32 %v2090_v37, %v1578_v63 }
 0x237   : > { %v2188_v32 = vmul.f32 %v2092_v24, %v1580_v22  ;;  %v1582_v33 = vpop.f32.mrb[51].mxu1 }
 0x238   : > { %v2189_v36 = vmul.f32 %v2093_v61, %v1582_v33 }
 0x239   : > { %v2245_v40 = vpack.c.bf16 %v2188_v32, %v2185_v25  ;;  %v5086_v25 = vunpack.c.l.bf16 %v5085_v11  ;;  %v5149_v32 = vld [vmem:[%s6534_s29] sm:$0xff]  }
 0x23a   : > { %v2246_v41 = vpack.c.bf16 %v2189_v36, %v2186_v34 }
 0x23c   : > { %v1586_v44 = vpop.f32.mrb[52].mxu1  ;;  %2577 = vmatprep.mubr.bf16.mxu1 %v2246_v41 }
 0x23d   : > { %v1588_v47 = vpop.f32.mrb[53].mxu1  ;;  %2578 = vmatmul.mubr.bf16.gmra.mrb[112].mxu1 %v2245_v40  ;;  %v2191_v51 = vmul.f32 %v2095_v42, %v1586_v44  ;;  %v5087_v40 = vunpack.c.h.bf16 %v5085_v11  ;;  %v5150_v42 = vunpack.c.l.bf16 %v5149_v32  ;;  %v5151_v44 = vunpack.c.h.bf16 %v5149_v32 }
 0x23e   : > { %v1590_v49 = vpop.f32.mrb[54].mxu1  ;;  %v2192_v54 = vmul.f32 %v2096_v45, %v1588_v47  ;;  %v5257_v45 = vld [vmem:[%s6527_s26 + $0x8] sm:$0xff]  }
 0x23f   : > { %v2194_v52 = vmul.f32 %v2098_v43, %v1590_v49  ;;  %v1592_v53 = vpop.f32.mrb[55].mxu1 }
 0x240   : > { %v2195_v55 = vmul.f32 %v2099_v46, %v1592_v53 }
 0x241   : > { %v2248_v58 = vpack.c.bf16 %v2194_v52, %v2191_v51 }
 0x242   : > { %v2249_v60 = vpack.c.bf16 %v2195_v55, %v2192_v54  ;;  %v5090_v55 = vunpack.c.l.bf16 %v5257_v45 }
 0x244   : > { %v1596_v2 = vpop.f32.mrb[56].mxu1  ;;  %2585 = vmatprep.mubr.bf16.mxu1 %v2249_v60 }
 0x245   : > { %v1598_v5 = vpop.f32.mrb[57].mxu1  ;;  %2586 = vmatmul.mubr.bf16.gmra.mrb[116].mxu1 %v2248_v58  ;;  %v2197_v7 = vmul.f32 %v2101_v0, %v1596_v2  ;;  %v5272_v58 = vld [vmem:[%s6534_s29 + $0x8] sm:$0xff]   ;;  %v5091_v2 = vunpack.c.h.bf16 %v5257_v45 }
 0x246   : > { %v1600_v6 = vpop.f32.mrb[58].mxu1  ;;  %v2198_v12 = vmul.f32 %v2102_v3, %v1598_v5  ;;  %v5154_v5 = vunpack.c.l.bf16 %v5272_v58 }
 0x247   : > { %v2200_v8 = vmul.f32 %v2104_v1, %v1600_v6  ;;  %v1602_v10 = vpop.f32.mrb[59].mxu1 }
 0x248   : > { %v2201_v13 = vmul.f32 %v2105_v4, %v1602_v10 }
 0x249   : > { %v2251_v16 = vpack.c.bf16 %v2200_v8, %v2197_v7  ;;  %v5155_v7 = vunpack.c.h.bf16 %v5272_v58  ;;  %v5258_v8 = vld [vmem:[%s6527_s26 + $0x10] sm:$0xff]  }
 0x24a   : > { %v2252_v17 = vpack.c.bf16 %v2201_v13, %v2198_v12 }
 0x24c   : > { %v1606_v20 = vpop.f32.mrb[60].mxu1  ;;  %2593 = vmatprep.mubr.bf16.mxu1 %v2252_v17 }
 0x24d   : > { %v1608_v26 = vpop.f32.mrb[61].mxu1  ;;  %2594 = vmatmul.mubr.bf16.gmra.mrb[120].mxu1 %v2251_v16  ;;  %v2203_v29 = vmul.f32 %v2107_v18, %v1606_v20  ;;  %v5094_v18 = vunpack.c.l.bf16 %v5258_v8 }
 0x24e   : > { %v1610_v28 = vpop.f32.mrb[62].mxu1  ;;  %v2204_v27 = vmul.f32 %v2108_v21, %v1608_v26  ;;  %v5273_v21 = vld [vmem:[%s6534_s29 + $0x10] sm:$0xff]  }
 0x24f   : > { %v2206_v30 = vmul.f32 %v2110_v19, %v1610_v28  ;;  %v1612_v31 = vpop.f32.mrb[63].mxu1  ;;  %v5159_v11 = vunpack.c.h.bf16 %v5273_v21 }
 0x250   : > { %v2207_v48 = vmul.f32 %v2111_v23, %v1612_v31  ;;  %v5095_v31 = vunpack.c.h.bf16 %v5258_v8 }
 0x251   : > { %v2254_v50 = vpack.c.bf16 %v2206_v30, %v2203_v29 }
 0x252   : > { %v2255_v9 = vpack.c.bf16 %v2207_v48, %v2204_v27 }
 0x254   : > { %2601 = vmatprep.mubr.bf16.mxu1 %v2255_v9 }
 0x255   : > { %2602 = vmatmul.mubr.bf16.gmra.mrb[124].mxu1 %v2254_v50  ;;  %v5158_v50 = vunpack.c.l.bf16 %v5273_v21 }
 0x2b0   : > { %v5356_v24 = vpop.f32.mrb[64].mxu1 }
 0x2b1   : > { %v5357_v35 = vpop.f32.mrb[65].mxu1  ;;  %v5650_v37 = vpop.f32.mrb[64].mxu0 }
 0x2b2   : > { %v5358_v61 = vadd.f32 %v5357_v35, %v5356_v24  ;;  %v5359_v63 = vpop.f32.mrb[66].mxu1  ;;  %v2644_v22 = vpop.f32.mrb[65].mxu0  ;;  %v5259_v24 = vld [vmem:[%s6527_s26 + $0x18] sm:$0xff]  }
 0x2b3   : > { %v5360_v33 = vpop.f32.mrb[67].mxu1  ;;  %v5651_v34 = vpop.f32.mrb[66].mxu0 }
 0x2b4   : > { %v5817_v36 = vadd.f32 %v5358_v61, %v2644_v22  ;;  %v5361_v38 = vadd.f32 %v5360_v33, %v5359_v63  ;;  %v2647_v39 = vpop.f32.mrb[67].mxu0  ;;  %v5098_v33 = vunpack.c.l.bf16 %v5259_v24 }
 0x2b6   : > { %v2835_v41 = vadd.f32 %v5817_v36, %v5086_v25  ;;  %v5819_v43 = vadd.f32 %v5361_v38, %v2647_v39  ;;  %v5274_v38 = vld [vmem:[%s6534_s29 + $0x18] sm:$0xff]  }
 0x2b8   : > { %v2836_v46 = vadd.f32 %v5819_v43, %v5087_v40  ;;  %v5362_v47 = vpop.f32.mrb[68].mxu1  ;;  %v2931_v52 = vmul.f32 %v5150_v42, %v2835_v41  ;;  %v5099_v43 = vunpack.c.h.bf16 %v5259_v24 }
 0x2b9   : > { %v5363_v49 = vpop.f32.mrb[69].mxu1  ;;  %v5654_v51 = vpop.f32.mrb[68].mxu0 }
 0x2ba   : > { %v2932_v53 = vmul.f32 %v5151_v44, %v2836_v46  ;;  %v5364_v54 = vadd.f32 %v5363_v49, %v5362_v47  ;;  %v5365_v56 = vpop.f32.mrb[70].mxu1  ;;  %v2660_v57 = vpop.f32.mrb[69].mxu0  ;;  %v5162_v47 = vunpack.c.l.bf16 %v5274_v38 }
 0x2bb   : > { %v5366_v59 = vpop.f32.mrb[71].mxu1  ;;  %v5655_v60 = vpop.f32.mrb[70].mxu0 }
 0x2bc   : > { %v2963_v62 = vpack.c.bf16 %v2932_v53, %v2931_v52  ;;  %v5816_v0 = vadd.f32 %v5650_v37, %v5364_v54  ;;  %v5367_v1 = vadd.f32 %v5366_v59, %v5365_v56  ;;  %v2663_v3 = vpop.f32.mrb[71].mxu0  ;;  %v5163_v52 = vunpack.c.h.bf16 %v5274_v38  ;;  %v5260_v53 = vld [vmem:[%s6527_s26 + $0x20] sm:$0xff]  }
 0x2be   : > { %v2837_v4 = vadd.f32 %v5816_v0, %v5090_v55  ;;  %v5818_v6 = vadd.f32 %v5651_v34, %v5367_v1  ;;  %5682 = vmatprep.mubr.msk.bf16.mxu0 %vm3012_vm4, %v2963_v62  ;;  %v5102_v62 = vunpack.c.l.bf16 %v5260_v53 }
 0x2c0   : > { %v2838_v10 = vadd.f32 %v5818_v6, %v5091_v2  ;;  %v5368_v12 = vpop.f32.mrb[72].mxu1  ;;  %v2933_v15 = vmul.f32 %v5154_v5, %v2837_v4  ;;  %v5275_v2 = vld [vmem:[%s6534_s29 + $0x20] sm:$0xff]   ;;  %v5103_v6 = vunpack.c.h.bf16 %v5260_v53 }
 0x2c1   : > { %v5369_v13 = vpop.f32.mrb[73].mxu1  ;;  %v6541_v14 = vpop.f32.mrb[72].mxu0 }
 0x2c2   : > { %v2934_v16 = vmul.f32 %v5155_v7, %v2838_v10  ;;  %v5370_v17 = vadd.f32 %v5369_v13, %v5368_v12  ;;  %v5371_v19 = vpop.f32.mrb[74].mxu1  ;;  %v2676_v20 = vpop.f32.mrb[73].mxu0  ;;  %v5166_v12 = vunpack.c.l.bf16 %v5275_v2 }
 0x2c3   : > { %v5372_v23 = vpop.f32.mrb[75].mxu1  ;;  %v6544_v26 = vpop.f32.mrb[74].mxu0 }
 0x2c4   : > { %v2964_v28 = vpack.c.bf16 %v2934_v16, %v2933_v15  ;;  %v5821_v29 = vadd.f32 %v5370_v17, %v2660_v57  ;;  %v5373_v30 = vadd.f32 %v5372_v23, %v5371_v19  ;;  %v2679_v27 = vpop.f32.mrb[75].mxu0  ;;  %v5167_v15 = vunpack.c.h.bf16 %v5275_v2  ;;  %v5261_v16 = vld [vmem:[%s6527_s26 + $0x28] sm:$0xff]   ;;  %v5263_v2 = vld [vmem:[%s6527_s26 + $0x38] sm:$0xff]  }
 0x2c5   : > { %v5107_v24 = vunpack.c.h.bf16 %v5261_v16 }
 0x2c6   : > { %v2839_v48 = vadd.f32 %v5821_v29, %v5094_v18  ;;  %v5823_v9 = vadd.f32 %v5373_v30, %v2663_v3  ;;  %5683 = vmatmul.mubr.msk.bf16.vlgmr.msra.gmra.mrb[96].mxu0 %vm3012_vm4, %v2964_v28  ;;  %v5106_v29 = vunpack.c.l.bf16 %v5261_v16  ;;  %v5278_v16 = vld [vmem:[%s6534_s29 + $0x38] sm:$0xff]  }
 0x2c8   : > { %v2840_v35 = vadd.f32 %v5823_v9, %v5095_v31  ;;  %v5374_v37 = vpop.f32.mrb[76].mxu1  ;;  %v2935_v22 = vmul.f32 %v5158_v50, %v2839_v48  ;;  %v5276_v48 = vld [vmem:[%s6534_s29 + $0x28] sm:$0xff]  }
 0x2c9   : > { %v5375_v61 = vpop.f32.mrb[77].mxu1  ;;  %v6548_v63 = vpop.f32.mrb[76].mxu0 }
 0x2ca   : > { %v2936_v25 = vmul.f32 %v5159_v11, %v2840_v35  ;;  %v5376_v32 = vadd.f32 %v5375_v61, %v5374_v37  ;;  %v5377_v34 = vpop.f32.mrb[78].mxu1  ;;  %v6550_v36 = vpop.f32.mrb[77].mxu0 }
 0x2cb   : > { %v5378_v39 = vpop.f32.mrb[79].mxu1  ;;  %v6553_v40 = vpop.f32.mrb[78].mxu0 }
 0x2cc   : > { %v5820_v41 = vadd.f32 %v5654_v51, %v5376_v32  ;;  %v5379_v42 = vadd.f32 %v5378_v39, %v5377_v34  ;;  %v6555_v44 = vpop.f32.mrb[79].mxu0  ;;  %v2965_v45 = vpack.c.bf16 %v2936_v25, %v2935_v22  ;;  %v5170_v22 = vunpack.c.l.bf16 %v5276_v48 }
 0x2cd   : > { %v5171_v32 = vunpack.c.h.bf16 %v5276_v48 }
 0x2ce   : > { %v2841_v46 = vadd.f32 %v5820_v41, %v5098_v33  ;;  %v5822_v49 = vadd.f32 %v5655_v60, %v5379_v42  ;;  %5686 = vmatprep.mubr.msk.bf16.mxu0 %vm3012_vm4, %v2965_v45  ;;  %v5262_v33 = vld [vmem:[%s6527_s26 + $0x30] sm:$0xff]  }
 0x2cf   : > { %v5110_v45 = vunpack.c.l.bf16 %v5262_v33 }
 0x2d0   : > { %v2842_v54 = vadd.f32 %v5822_v49, %v5099_v43  ;;  %v5380_v55 = vpop.f32.mrb[80].mxu1  ;;  %v2937_v58 = vmul.f32 %v5162_v47, %v2841_v46  ;;  %v5277_v49 = vld [vmem:[%s6534_s29 + $0x30] sm:$0xff]  }
 0x2d1   : > { %v5381_v56 = vpop.f32.mrb[81].mxu1  ;;  %v6559_v57 = vpop.f32.mrb[80].mxu0 }
 0x2d2   : > { %v2938_v51 = vmul.f32 %v5163_v52, %v2842_v54  ;;  %v5382_v59 = vadd.f32 %v5381_v56, %v5380_v55  ;;  %v5383_v0 = vpop.f32.mrb[82].mxu1  ;;  %v6561_v1 = vpop.f32.mrb[81].mxu0  ;;  %v5111_v55 = vunpack.c.h.bf16 %v5262_v33  ;;  %v5279_v33 = vld [vmem:[%s6534_s29 + $0x40] sm:$0xff]  }
 0x2d3   : > { %v5384_v3 = vpop.f32.mrb[83].mxu1  ;;  %v6564_v60 = vpop.f32.mrb[82].mxu0 }
 0x2d4   : > { %v5825_v4 = vadd.f32 %v5382_v59, %v2676_v20  ;;  %v5385_v5 = vadd.f32 %v5384_v3, %v5383_v0  ;;  %v6566_v7 = vpop.f32.mrb[83].mxu0  ;;  %v2966_v8 = vpack.c.bf16 %v2938_v51, %v2937_v58  ;;  %v5174_v59 = vunpack.c.l.bf16 %v5277_v49 }
 0x2d5   : > { %v5175_v0 = vunpack.c.h.bf16 %v5277_v49  ;;  %v5265_v49 = vld [vmem:[%s6527_s26 + $0x48] sm:$0xff]  }
 0x2d6   : > { %v2843_v10 = vadd.f32 %v5825_v4, %v5102_v62  ;;  %v5827_v13 = vadd.f32 %v5385_v5, %v2679_v27  ;;  %5687 = vmatmul.mubr.msk.bf16.gmra.mrb[100].mxu0 %vm3012_vm4, %v2966_v8 }
 0x2d8   : > { %v2844_v17 = vadd.f32 %v5827_v13, %v5103_v6  ;;  %v5386_v18 = vpop.f32.mrb[84].mxu1  ;;  %v2939_v23 = vmul.f32 %v5166_v12, %v2843_v10  ;;  %v5114_v12 = vunpack.c.l.bf16 %v5263_v2 }
 0x2d9   : > { %v5387_v19 = vpop.f32.mrb[85].mxu1  ;;  %v6570_v21 = vpop.f32.mrb[84].mxu0 }
 0x2da   : > { %v2940_v20 = vmul.f32 %v5167_v15, %v2844_v17  ;;  %v5388_v28 = vadd.f32 %v5387_v19, %v5386_v18  ;;  %v5389_v30 = vpop.f32.mrb[86].mxu1  ;;  %v6572_v31 = vpop.f32.mrb[85].mxu0 }
 0x2db   : > { %v5390_v50 = vpop.f32.mrb[87].mxu1  ;;  %v6575_v27 = vpop.f32.mrb[86].mxu0 }
 0x2dc   : > { %v5824_v9 = vadd.f32 %v6541_v14, %v5388_v28  ;;  %v5391_v11 = vadd.f32 %v5390_v50, %v5389_v30  ;;  %v6578_v35 = vpop.f32.mrb[87].mxu0  ;;  %v2967_v37 = vpack.c.bf16 %v2940_v20, %v2939_v23  ;;  %v5115_v23 = vunpack.c.h.bf16 %v5263_v2 }
 0x2dd   : > { %v5178_v30 = vunpack.c.l.bf16 %v5278_v16  ;;  %v5179_v50 = vunpack.c.h.bf16 %v5278_v16 }
 0x2de   : > { %v2845_v61 = vadd.f32 %v5824_v9, %v5106_v29  ;;  %v5826_v25 = vadd.f32 %v6544_v26, %v5391_v11  ;;  %5690 = vmatprep.mubr.msk.bf16.mxu0 %vm3012_vm4, %v2967_v37  ;;  %v5264_v9 = vld [vmem:[%s6527_s26 + $0x40] sm:$0xff]  }
 0x2e0   : > { %v2846_v34 = vadd.f32 %v5826_v25, %v5107_v24  ;;  %v5392_v38 = vpop.f32.mrb[88].mxu1  ;;  %v2941_v14 = vmul.f32 %v5170_v22, %v2845_v61  ;;  %v5118_v25 = vunpack.c.l.bf16 %v5264_v9 }
 0x2e1   : > { %v5393_v39 = vpop.f32.mrb[89].mxu1  ;;  %v6583_v41 = vpop.f32.mrb[88].mxu0 }
 0x2e2   : > { %v2942_v42 = vmul.f32 %v5171_v32, %v2846_v34  ;;  %v5394_v43 = vadd.f32 %v5393_v39, %v5392_v38  ;;  %v5395_v46 = vpop.f32.mrb[90].mxu1  ;;  %v6585_v47 = vpop.f32.mrb[89].mxu0 }
 0x2e3   : > { %v5396_v52 = vpop.f32.mrb[91].mxu1  ;;  %v6588_v26 = vpop.f32.mrb[90].mxu0 }
 0x2e4   : > { %v5829_v53 = vadd.f32 %v5394_v43, %v6550_v36  ;;  %v5397_v54 = vadd.f32 %v5396_v52, %v5395_v46  ;;  %v6591_v56 = vpop.f32.mrb[91].mxu0  ;;  %v2968_v58 = vpack.c.bf16 %v2942_v42, %v2941_v14  ;;  %v5119_v14 = vunpack.c.h.bf16 %v5264_v9 }
 0x2e5   : > { %v5182_v43 = vunpack.c.l.bf16 %v5279_v33  ;;  %v5183_v46 = vunpack.c.h.bf16 %v5279_v33 }
 0x2e6   : > { %v2847_v51 = vadd.f32 %v5829_v53, %v5110_v45  ;;  %v5831_v62 = vadd.f32 %v5397_v54, %v6555_v44  ;;  %5691 = vmatmul.mubr.msk.bf16.gmra.mrb[104].mxu0 %vm3012_vm4, %v2968_v58 }
 0x2e8   : > { %v2848_v3 = vadd.f32 %v5831_v62, %v5111_v55  ;;  %v5398_v4 = vpop.f32.mrb[92].mxu1  ;;  %v2943_v36 = vmul.f32 %v5174_v59, %v2847_v51  ;;  %v5280_v62 = vld [vmem:[%s6534_s29 + $0x48] sm:$0xff]  }
 0x2e9   : > { %v5399_v5 = vpop.f32.mrb[93].mxu1  ;;  %v6596_v6 = vpop.f32.mrb[92].mxu0 }
 0x2ea   : > { %v2944_v8 = vmul.f32 %v5175_v0, %v2848_v3  ;;  %v5400_v10 = vadd.f32 %v5399_v5, %v5398_v4  ;;  %v5401_v13 = vpop.f32.mrb[94].mxu1  ;;  %v6598_v15 = vpop.f32.mrb[93].mxu0  ;;  %v5123_v4 = vunpack.c.h.bf16 %v5265_v49 }
 0x2eb   : > { %v5402_v17 = vpop.f32.mrb[95].mxu1  ;;  %v6601_v44 = vpop.f32.mrb[94].mxu0 }
 0x2ec   : > { %v5828_v18 = vadd.f32 %v6548_v63, %v5400_v10  ;;  %v5403_v19 = vadd.f32 %v5402_v17, %v5401_v13  ;;  %v6604_v20 = vpop.f32.mrb[95].mxu0  ;;  %v2969_v28 = vpack.c.bf16 %v2944_v8, %v2943_v36  ;;  %v5186_v36 = vunpack.c.l.bf16 %v5280_v62 }
 0x2ed   : > { %v5187_v10 = vunpack.c.h.bf16 %v5280_v62 }
 0x2ee   : > { %v2849_v29 = vadd.f32 %v5828_v18, %v5114_v12  ;;  %v5830_v48 = vadd.f32 %v6553_v40, %v5403_v19  ;;  %5694 = vmatprep.mubr.msk.bf16.mxu0 %vm3012_vm4, %v2969_v28  ;;  %v5266_v12 = vld [vmem:[%s6527_s26 + $0x50] sm:$0xff]  }
 0x2ef   : > { %v5127_v9 = vunpack.c.h.bf16 %v5266_v12 }
 0x2f0   : > { %v2850_v11 = vadd.f32 %v5830_v48, %v5115_v23  ;;  %v5404_v24 = vpop.f32.mrb[96].mxu1  ;;  %v2945_v61 = vmul.f32 %v5178_v30, %v2849_v29  ;;  %v5281_v29 = vld [vmem:[%s6534_s29 + $0x50] sm:$0xff]  }
 0x2f1   : > { %v5405_v37 = vpop.f32.mrb[97].mxu1 }
 0x2f2   : > { %v2946_v63 = vmul.f32 %v5179_v50, %v2850_v11  ;;  %v5406_v22 = vadd.f32 %v5405_v37, %v5404_v24  ;;  %v5407_v32 = vpop.f32.mrb[98].mxu1  ;;  %v5190_v24 = vunpack.c.l.bf16 %v5281_v29 }
 0x2f3   : > { %v5408_v34 = vpop.f32.mrb[99].mxu1 }
 0x2f4   : > { %v5833_v38 = vadd.f32 %v5406_v22, %v6561_v1  ;;  %v5409_v39 = vadd.f32 %v5408_v34, %v5407_v32  ;;  %v2970_v40 = vpack.c.bf16 %v2946_v63, %v2945_v61  ;;  %v5122_v1 = vunpack.c.l.bf16 %v5265_v49  ;;  %v5267_v63 = vld [vmem:[%s6527_s26 + $0x58] sm:$0xff]  }
 0x2f5   : > { %v5191_v61 = vunpack.c.h.bf16 %v5281_v29  ;;  %v5284_v29 = vld [vmem:[%s6534_s29 + $0x68] sm:$0xff]  }
 0x2f6   : > { %v2851_v42 = vadd.f32 %v5833_v38, %v5118_v25  ;;  %v5835_v45 = vadd.f32 %v5409_v39, %v6566_v7  ;;  %5695 = vmatmul.mubr.msk.bf16.gmra.mrb[108].mxu0 %vm3012_vm4, %v2970_v40 }
 0x2f8   : > { %v2852_v52 = vadd.f32 %v5835_v45, %v5119_v14  ;;  %v5410_v53 = vpop.f32.mrb[100].mxu1  ;;  %v2947_v55 = vmul.f32 %v5182_v43, %v2851_v42  ;;  %v5282_v14 = vld [vmem:[%s6534_s29 + $0x58] sm:$0xff]   ;;  %v5131_v45 = vunpack.c.h.bf16 %v5267_v63 }
 0x2f9   : > { %v5411_v54 = vpop.f32.mrb[101].mxu1  ;;  %v5194_v49 = vunpack.c.l.bf16 %v5282_v14 }
 0x2fa   : > { %v2948_v58 = vmul.f32 %v5183_v46, %v2852_v52  ;;  %v5412_v51 = vadd.f32 %v5411_v54, %v5410_v53  ;;  %v5413_v59 = vpop.f32.mrb[102].mxu1  ;;  %v5195_v53 = vunpack.c.h.bf16 %v5282_v14  ;;  %v5268_v54 = vld [vmem:[%s6527_s26 + $0x60] sm:$0xff]  }
 0x2fb   : > { %v5414_v0 = vpop.f32.mrb[103].mxu1 }
 0x2fc   : > { %v5832_v2 = vadd.f32 %v6559_v57, %v5412_v51  ;;  %v5415_v3 = vadd.f32 %v5414_v0, %v5413_v59  ;;  %v2971_v7 = vpack.c.bf16 %v2948_v58, %v2947_v55  ;;  %v5126_v57 = vunpack.c.l.bf16 %v5266_v12 }
 0x2fe   : > { %v2853_v5 = vadd.f32 %v5832_v2, %v5122_v1  ;;  %v5834_v8 = vadd.f32 %v6564_v60, %v5415_v3  ;;  %5698 = vmatprep.mubr.msk.bf16.mxu0 %vm3012_vm4, %v2971_v7  ;;  %v5283_v2 = vld [vmem:[%s6534_s29 + $0x60] sm:$0xff]  }
 0x2ff   : > { %v5199_v12 = vunpack.c.h.bf16 %v5283_v2 }
 0x300   : > { %v2854_v13 = vadd.f32 %v5834_v8, %v5123_v4  ;;  %v5416_v16 = vpop.f32.mrb[104].mxu1  ;;  %v2949_v18 = vmul.f32 %v5186_v36, %v2853_v5  ;;  %v5135_v5 = vunpack.c.h.bf16 %v5268_v54  ;;  %v5198_v8 = vunpack.c.l.bf16 %v5283_v2 }
 0x301   : > { %v5417_v17 = vpop.f32.mrb[105].mxu1 }
 0x302   : > { %v2950_v19 = vmul.f32 %v5187_v10, %v2854_v13  ;;  %v5418_v23 = vadd.f32 %v5417_v17, %v5416_v16  ;;  %v5419_v28 = vpop.f32.mrb[106].mxu1  ;;  %v5269_v13 = vld [vmem:[%s6527_s26 + $0x68] sm:$0xff]  }
 0x303   : > { %v5420_v30 = vpop.f32.mrb[107].mxu1 }
 0x304   : > { %v5837_v48 = vadd.f32 %v5418_v23, %v6572_v31  ;;  %v5421_v50 = vadd.f32 %v5420_v30, %v5419_v28  ;;  %v2972_v60 = vpack.c.bf16 %v2950_v19, %v2949_v18  ;;  %v5130_v31 = vunpack.c.l.bf16 %v5267_v63 }
 0x306   : > { %v2855_v11 = vadd.f32 %v5837_v48, %v5126_v57  ;;  %v5839_v37 = vadd.f32 %v5421_v50, %v6578_v35  ;;  %5699 = vmatmul.mubr.msk.bf16.gmra.mrb[112].mxu0 %vm3012_vm4, %v2972_v60 }
 0x308   : > { %v2856_v22 = vadd.f32 %v5839_v37, %v5127_v9  ;;  %v5422_v25 = vpop.f32.mrb[108].mxu1  ;;  %v2951_v33 = vmul.f32 %v5190_v24, %v2855_v11  ;;  %v5139_v9 = vunpack.c.h.bf16 %v5269_v13  ;;  %v5202_v11 = vunpack.c.l.bf16 %v5284_v29 }
 0x309   : > { %v5423_v32 = vpop.f32.mrb[109].mxu1  ;;  %v5203_v37 = vunpack.c.h.bf16 %v5284_v29 }
 0x30a   : > { %v2952_v34 = vmul.f32 %v5191_v61, %v2856_v22  ;;  %v5424_v38 = vadd.f32 %v5423_v32, %v5422_v25  ;;  %v5425_v39 = vpop.f32.mrb[110].mxu1  ;;  %v5270_v61 = vld [vmem:[%s6527_s26 + $0x70] sm:$0xff]  }
 0x30b   : > { %v5426_v40 = vpop.f32.mrb[111].mxu1 }
 0x30c   : > { %v5836_v42 = vadd.f32 %v6570_v21, %v5424_v38  ;;  %v5427_v43 = vadd.f32 %v5426_v40, %v5425_v39  ;;  %v2973_v35 = vpack.c.bf16 %v2952_v34, %v2951_v33  ;;  %v5134_v21 = vunpack.c.l.bf16 %v5268_v54 }
 0x30e   : > { %v2857_v46 = vadd.f32 %v5836_v42, %v5130_v31  ;;  %v5838_v52 = vadd.f32 %v6575_v27, %v5427_v43  ;;  %5702 = vmatprep.mubr.msk.bf16.mxu0 %vm3012_vm4, %v2973_v35  ;;  %v5285_v31 = vld [vmem:[%s6534_s29 + $0x70] sm:$0xff]   ;;  %v5143_v42 = vunpack.c.h.bf16 %v5270_v61 }
 0x310   : > { %v2858_v55 = vadd.f32 %v5838_v52, %v5131_v45  ;;  %v5428_v58 = vpop.f32.mrb[112].mxu1  ;;  %v2953_v1 = vmul.f32 %v5194_v49, %v2857_v46  ;;  %v5206_v45 = vunpack.c.l.bf16 %v5285_v31  ;;  %v5207_v46 = vunpack.c.h.bf16 %v5285_v31  ;;  %v5271_v49 = vld [vmem:[%s6527_s26 + $0x78] sm:$0xff]  }
 0x311   : > { %v5429_v51 = vpop.f32.mrb[113].mxu1 }
 0x312   : > { %v2954_v59 = vmul.f32 %v5195_v53, %v2858_v55  ;;  %v5430_v62 = vadd.f32 %v5429_v51, %v5428_v58  ;;  %v5431_v0 = vpop.f32.mrb[114].mxu1 }
 0x313   : > { %v5432_v3 = vpop.f32.mrb[115].mxu1 }
 0x314   : > { %v5841_v4 = vadd.f32 %v5430_v62, %v6585_v47  ;;  %v5433_v7 = vadd.f32 %v5432_v3, %v5431_v0  ;;  %v2974_v27 = vpack.c.bf16 %v2954_v59, %v2953_v1  ;;  %v5138_v47 = vunpack.c.l.bf16 %v5269_v13  ;;  %v5286_v59 = vld [vmem:[%s6534_s29 + $0x78] sm:$0xff]   ;;  %v6662_v13 = vld [vmem:[%s7445_s13] ss:$0 sm:$0xff] }
 0x315   : > { %v5146_v1 = vunpack.c.l.bf16 %v5271_v49 }
 0x316   : > { %v2859_v36 = vadd.f32 %v5841_v4, %v5134_v21  ;;  %v5843_v10 = vadd.f32 %v5433_v7, %v6591_v56  ;;  %5703 = vmatmul.mubr.msk.bf16.gmra.mrb[116].mxu0 %vm3012_vm4, %v2974_v27  ;;  %v5210_v4 = vunpack.c.l.bf16 %v5286_v59 }
 0x318   : > { %v2860_v16 = vadd.f32 %v5843_v10, %v5135_v5  ;;  %v5434_v17 = vpop.f32.mrb[116].mxu1  ;;  %v2955_v19 = vmul.f32 %v5198_v8, %v2859_v36  ;;  %v5211_v5 = vunpack.c.h.bf16 %v5286_v59 }
 0x319   : > { %v5435_v18 = vpop.f32.mrb[117].mxu1 }
 0x31a   : > { %v2956_v23 = vmul.f32 %v5199_v12, %v2860_v16  ;;  %v5436_v57 = vadd.f32 %v5435_v18, %v5434_v17  ;;  %v5437_v28 = vpop.f32.mrb[118].mxu1  ;;  %v2982_v16 = vld [vmem:[%s6655_s5 + $0x18] sm:$0xff] }
 0x31b   : > { %v5438_v30 = vpop.f32.mrb[119].mxu1 }
 0x31c   : > { %v5840_v48 = vadd.f32 %v6583_v41, %v5436_v57  ;;  %v5439_v50 = vadd.f32 %v5438_v30, %v5437_v28  ;;  %v2975_v56 = vpack.c.bf16 %v2956_v23, %v2955_v19  ;;  %v5142_v41 = vunpack.c.l.bf16 %v5270_v61  ;;  %v2980_v19 = vld [vmem:[%s6655_s5 + $0x8] sm:$0xff]  ;;  %v2983_v61 = vld [vmem:[%s6655_s5 + $0x20] sm:$0xff] }
 0x31e   : > { %v2861_v60 = vadd.f32 %v5840_v48, %v5138_v47  ;;  %v5842_v24 = vadd.f32 %v6588_v26, %v5439_v50  ;;  %5706 = vmatprep.mubr.msk.bf16.mxu0 %vm3012_vm4, %v2975_v56 }
 0x320   : > { %v2862_v63 = vadd.f32 %v5842_v24, %v5139_v9  ;;  %v5440_v22 = vpop.f32.mrb[120].mxu1  ;;  %v2957_v32 = vmul.f32 %v5202_v11, %v2861_v60 }
 0x321   : > { %v5441_v25 = vpop.f32.mrb[121].mxu1 }
 0x322   : > { %v2958_v33 = vmul.f32 %v5203_v37, %v2862_v63  ;;  %v5442_v34 = vadd.f32 %v5441_v25, %v5440_v22  ;;  %v5443_v38 = vpop.f32.mrb[122].mxu1  ;;  %v2985_v37 = vld [vmem:[%s6655_s5 + $0x30] sm:$0xff]  ;;  %v2986_v25 = vld [vmem:[%s6655_s5 + $0x38] sm:$0xff] }
 0x323   : > { %v5444_v39 = vpop.f32.mrb[123].mxu1 }
 0x324   : > { %v5845_v14 = vadd.f32 %v5442_v34, %v6598_v15  ;;  %v5445_v40 = vadd.f32 %v5444_v39, %v5443_v38  ;;  %v2976_v26 = vpack.c.bf16 %v2958_v33, %v2957_v32  ;;  %v2984_v32 = vld [vmem:[%s6655_s5 + $0x28] sm:$0xff] }
 0x326   : > { %v2863_v43 = vadd.f32 %v5845_v14, %v5142_v41  ;;  %v5847_v35 = vadd.f32 %v5445_v40, %v6604_v20  ;;  %5707 = vmatmul.mubr.msk.bf16.gmra.mrb[120].mxu0 %vm3012_vm4, %v2976_v26  ;;  %v5147_v20 = vunpack.c.h.bf16 %v5271_v49  ;;  %v2989_v49 = vld [vmem:[%s6655_s5 + $0x50] sm:$0xff] }
 0x328   : > { %v2864_v52 = vadd.f32 %v5847_v35, %v5143_v42  ;;  %v5446_v53 = vpop.f32.mrb[124].mxu1  ;;  %v2959_v55 = vmul.f32 %v5206_v45, %v2863_v43 }
 0x329   : > { %v5447_v54 = vpop.f32.mrb[125].mxu1 }
 0x32a   : > { %v2960_v58 = vmul.f32 %v5207_v46, %v2864_v52  ;;  %v5448_v51 = vadd.f32 %v5447_v54, %v5446_v53  ;;  %v5449_v15 = vpop.f32.mrb[126].mxu1  ;;  %v2987_v52 = vld [vmem:[%s6655_s5 + $0x40] sm:$0xff] }
 0x32b   : > { %v5450_v62 = vpop.f32.mrb[127].mxu1 }
 0x32c   : > { %v5844_v21 = vadd.f32 %v6596_v6, %v5448_v51  ;;  %v5451_v0 = vadd.f32 %v5450_v62, %v5449_v15  ;;  %v2977_v2 = vpack.c.bf16 %v2960_v58, %v2959_v55  ;;  %v2981_v6 = vld [vmem:[%s6655_s5 + $0x10] sm:$0xff]  ;;  %v2990_v55 = vld [vmem:[%s6655_s5 + $0x58] sm:$0xff]  ;;  %v2988_v58 = vld [vmem:[%s6655_s5 + $0x48] sm:$0xff] }
 0x32e   : > { %v2865_v3 = vadd.f32 %v5844_v21, %v5146_v1  ;;  %v5846_v7 = vadd.f32 %v6601_v44, %v5451_v0  ;;  %5710 = vmatprep.mubr.msk.bf16.mxu0 %vm3012_vm4, %v2977_v2  ;;  %v2979_v44 = vld [vmem:[%s6655_s5] sm:$0xff] }
 0x330   : > { %v2866_v27 = vadd.f32 %v5846_v7, %v5147_v20  ;;  %v2961_v36 = vmul.f32 %v5210_v4, %v2865_v3 }
 0x332   : > { %v2962_v8 = vmul.f32 %v5211_v5, %v2866_v27 }
 0x334   : > { %v2978_v10 = vpack.c.bf16 %v2962_v8, %v2961_v36  ;;  %v2993_v36 = vld [vmem:[%s6655_s5 + $0x70] sm:$0xff]  ;;  %v2991_v8 = vld [vmem:[%s6655_s5 + $0x60] sm:$0xff] }
 0x336   : > { %5711 = vmatmul.mubr.msk.bf16.gmra.mrb[124].mxu0 %vm3012_vm4, %v2978_v10 }
 0x399   : > { %v5684_v12 = vpop.f32.mrb[96].mxu0 }
 0x39a   : > { %v3228_v17 = vadd.f32 %v5684_v12, %v2981_v6  ;;  %v3099_v18 = vpop.f32.mrb[97].mxu0  ;;  %v2992_v12 = vld [vmem:[%s6655_s5 + $0x68] sm:$0xff] }
 0x39b   : > { %v3226_v23 = vadd.f32 %v3099_v18, %v2979_v44  ;;  %v5685_v57 = vpop.f32.mrb[98].mxu0  ;;  %v2994_v44 = vld [vmem:[%s6655_s5 + $0x78] sm:$0xff] }
 0x39c   : > { %v6667_v47 = vadd.f32 %v6662_v13, %v3228_v17  ;;  %v3229_v28 = vadd.f32 %v5685_v57, %v2982_v16  ;;  %v3102_v29 = vpop.f32.mrb[99].mxu0 }
 0x39d   : > { %v6670_v30 = vadd.f32 %v6662_v13, %v3226_v23  ;;  %v3227_v48 = vadd.f32 %v3102_v29, %v2980_v19 }
 0x39e   : > { %v6673_v50 = vadd.f32 %v6662_v13, %v3229_v28  ;;  %v3303_v9 = vsel %vm3012_vm4, %v6667_v47, 0.0 }
 0x39f   : > { %v6678_v56 = vadd.f32 %v6662_v13, %v3227_v48  ;;  %3304 = vadd.xlane.f32.xlu1 %v3303_v9  ;;  %v3297_v60 = vsel %vm3012_vm4, %v6670_v30, 0.0 }
 0x3a0   : > { %3298 = vadd.xlane.f32.xlu0 %v3297_v60  ;;  %v3306_v11 = vsel %vm3012_vm4, %v6673_v50, 0.0 }
 0x3a1   : > { %v3300_v24 = vsel %vm3012_vm4, %v6678_v56, 0.0 }
 0x3a3   : > { %3307 = vadd.xlane.f32.xlu1 %v3306_v11 }
 0x3a4   : > { %3301 = vadd.xlane.f32.xlu0 %v3300_v24 }
 0x3a9   : > { %v5688_v63 = vpop.f32.mrb[100].mxu0 }
 0x3aa   : > { %v3115_v22 = vpop.f32.mrb[101].mxu0  ;;  %v3232_v33 = vadd.f32 %v5688_v63, %v2985_v37  ;;  %v2995_v63 = vld [vmem:[%s6655_s5 + $0x80] sm:$0xff] }
 0x3ab   : > { %v3230_v34 = vadd.f32 %v3115_v22, %v2983_v61  ;;  %v5689_v41 = vpop.f32.mrb[102].mxu0  ;;  %v2997_v61 = vld [vmem:[%s6655_s5 + $0x90] sm:$0xff] }
 0x3ac   : > { %v3118_v38 = vpop.f32.mrb[103].mxu0  ;;  %v3233_v39 = vadd.f32 %v5689_v41, %v2986_v25  ;;  %v6694_v40 = vadd.f32 %v6662_v13, %v3232_v33  ;;  %v2996_v33 = vld [vmem:[%s6655_s5 + $0x88] sm:$0xff] }
 0x3ad   : > { %v6691_v31 = vadd.f32 %v6662_v13, %v3230_v34  ;;  %v3231_v14 = vadd.f32 %v3118_v38, %v2984_v32  ;;  %v2998_v32 = vld [vmem:[%s6655_s5 + $0x98] sm:$0xff] }
 0x3ae   : > { %v6702_v43 = vadd.f32 %v6662_v13, %v3233_v39  ;;  %v3315_v35 = vsel %vm3012_vm4, %v6694_v40, 0.0 }
 0x3af   : > { %v6697_v42 = vadd.f32 %v6662_v13, %v3231_v14  ;;  %v3309_v26 = vsel %vm3012_vm4, %v6691_v31, 0.0 }
 0x3b0   : > { %3310 = vadd.xlane.f32.xlu0 %v3309_v26  ;;  %v3318_v46 = vsel %vm3012_vm4, %v6702_v43, 0.0 }
 0x3b1   : > { %v3312_v45 = vsel %vm3012_vm4, %v6697_v42, 0.0 }
 0x3b2   : > { %3313 = vadd.xlane.f32.xlu1 %v3312_v45 }
 0x3b4   : > { %3316 = vadd.xlane.f32.xlu0 %v3315_v35 }
 0x3b6   : > { %3319 = vadd.xlane.f32.xlu1 %v3318_v46 }
 0x3b9   : > { %v5692_v53 = vpop.f32.mrb[104].mxu0 }
 0x3ba   : > { %v3131_v54 = vpop.f32.mrb[105].mxu0  ;;  %v3236_v51 = vadd.f32 %v5692_v53, %v2989_v49 }
 0x3bb   : > { %v3234_v1 = vadd.f32 %v3131_v54, %v2987_v52  ;;  %v5693_v15 = vpop.f32.mrb[106].mxu0 }
 0x3bc   : > { %v3134_v59 = vpop.f32.mrb[107].mxu0  ;;  %v3237_v21 = vadd.f32 %v5693_v15, %v2990_v55  ;;  %v6718_v20 = vadd.f32 %v6662_v13, %v3236_v51  ;;  %v2999_v51 = vld [vmem:[%s6655_s5 + $0xa0] sm:$0xff] }
 0x3bd   : > { %v6715_v62 = vadd.f32 %v6662_v13, %v3234_v1  ;;  %v3235_v0 = vadd.f32 %v3134_v59, %v2988_v58  ;;  %v3001_v58 = vld [vmem:[%s6655_s5 + $0xb0] sm:$0xff]  ;;  %v3002_v59 = vld [vmem:[%s6655_s5 + $0xb8] sm:$0xff] }
 0x3be   : > { %v6726_v4 = vadd.f32 %v6662_v13, %v3237_v21  ;;  %v3327_v5 = vsel %vm3012_vm4, %v6718_v20, 0.0  ;;  %v3000_v21 = vld [vmem:[%s6655_s5 + $0xa8] sm:$0xff] }
 0x3bf   : > { %v6721_v2 = vadd.f32 %v6662_v13, %v3235_v0  ;;  %v3321_v3 = vsel %vm3012_vm4, %v6715_v62, 0.0 }
 0x3c0   : > { %3322 = vadd.xlane.f32.xlu0 %v3321_v3  ;;  %v3330_v27 = vsel %vm3012_vm4, %v6726_v4, 0.0 }
 0x3c1   : > { %v3324_v7 = vsel %vm3012_vm4, %v6721_v2, 0.0 }
 0x3c2   : > { %3325 = vadd.xlane.f32.xlu1 %v3324_v7 }
 0x3c4   : > { %3328 = vadd.xlane.f32.xlu0 %v3327_v5 }
 0x3c6   : > { %3331 = vadd.xlane.f32.xlu1 %v3330_v27 }
 0x3c9   : > { %v5696_v10 = vpop.f32.mrb[108].mxu0 }
 0x3ca   : > { %v3147_v6 = vpop.f32.mrb[109].mxu0  ;;  %v3240_v16 = vadd.f32 %v5696_v10, %v2993_v36 }
 0x3cb   : > { %v3238_v17 = vadd.f32 %v3147_v6, %v2991_v8  ;;  %v5697_v18 = vpop.f32.mrb[110].mxu0 }
 0x3cc   : > { %v3150_v19 = vpop.f32.mrb[111].mxu0  ;;  %v3241_v57 = vadd.f32 %v5697_v18, %v2994_v44  ;;  %v6742_v29 = vadd.f32 %v6662_v13, %v3240_v16 }
 0x3cd   : > { %v6739_v23 = vadd.f32 %v6662_v13, %v3238_v17  ;;  %v3239_v28 = vadd.f32 %v3150_v19, %v2992_v12  ;;  %v3005_v19 = vld [vmem:[%s6655_s5 + $0xd0] sm:$0xff] }
 0x3ce   : > { %v6750_v60 = vadd.f32 %v6662_v13, %v3241_v57  ;;  %v3339_v24 = vsel %vm3012_vm4, %v6742_v29, 0.0  ;;  %v3003_v57 = vld [vmem:[%s6655_s5 + $0xc0] sm:$0xff] }
 0x3cf   : > { %v6745_v48 = vadd.f32 %v6662_v13, %v3239_v28  ;;  %v3333_v9 = vsel %vm3012_vm4, %v6739_v23, 0.0 }
 0x3d0   : > { %3334 = vadd.xlane.f32.xlu0 %v3333_v9  ;;  %v3342_v37 = vsel %vm3012_vm4, %v6750_v60, 0.0 }
 0x3d1   : > { %v3336_v11 = vsel %vm3012_vm4, %v6745_v48, 0.0 }
 0x3d2   : > { %3337 = vadd.xlane.f32.xlu1 %v3336_v11  ;;  %v3006_v11 = vld [vmem:[%s6655_s5 + $0xd8] sm:$0xff] }
 0x3d4   : > { %3340 = vadd.xlane.f32.xlu0 %v3339_v24  ;;  %v3004_v24 = vld [vmem:[%s6655_s5 + $0xc8] sm:$0xff] }
 0x3d6   : > { %3343 = vadd.xlane.f32.xlu1 %v3342_v37 }
 0x3d9   : > { %v5700_v22 = vpop.f32.mrb[112].mxu0 }
 0x3da   : > { %v3163_v25 = vpop.f32.mrb[113].mxu0  ;;  %v3244_v34 = vadd.f32 %v5700_v22, %v2997_v61 }
 0x3db   : > { %v3242_v41 = vadd.f32 %v3163_v25, %v2995_v63  ;;  %v5701_v38 = vpop.f32.mrb[114].mxu0 }
 0x3dc   : > { %v3166_v39 = vpop.f32.mrb[115].mxu0  ;;  %v3245_v26 = vadd.f32 %v5701_v38, %v2998_v32  ;;  %v6766_v35 = vadd.f32 %v6662_v13, %v3244_v34 }
 0x3dd   : > { %v6763_v14 = vadd.f32 %v6662_v13, %v3242_v41  ;;  %v3243_v45 = vadd.f32 %v3166_v39, %v2996_v33 }
 0x3de   : > { %7486 = vst [vmem:[#allocation3_spill] sm:$0xff] %v6766_v35  ;;  %v6774_v52 = vadd.f32 %v6662_v13, %v3245_v26  ;;  %v3351_v54 = vsel %vm3012_vm4, %v6766_v35, 0.0 }
 0x3df   : > { %7485 = vst [vmem:[#allocation2_spill] sm:$0xff] %v6763_v14  ;;  %v6769_v46 = vadd.f32 %v6662_v13, %v3243_v45  ;;  %v3345_v49 = vsel %vm3012_vm4, %v6763_v14, 0.0 }
 0x3e0   : > { %3346 = vadd.xlane.f32.xlu0 %v3345_v49  ;;  %7488 = vst [vmem:[#allocation5_spill] sm:$0xff] %v6774_v52  ;;  %v3354_v55 = vsel %vm3012_vm4, %v6774_v52, 0.0 }
 0x3e1   : > { %7487 = vst [vmem:[#allocation4_spill] sm:$0xff] %v6769_v46  ;;  %v3348_v53 = vsel %vm3012_vm4, %v6769_v46, 0.0 }
 0x3e2   : > { %3349 = vadd.xlane.f32.xlu1 %v3348_v53  ;;  %v3009_v53 = vld [vmem:[%s6655_s5 + $0xf0] sm:$0xff] }
 0x3e4   : > { %3352 = vadd.xlane.f32.xlu0 %v3351_v54  ;;  %v3007_v54 = vld [vmem:[%s6655_s5 + $0xe0] sm:$0xff] }
 0x3e6   : > { %3355 = vadd.xlane.f32.xlu1 %v3354_v55 }
 0x3e9   : > { %v5704_v1 = vpop.f32.mrb[116].mxu0 }
 0x3ea   : > { %v3179_v15 = vpop.f32.mrb[117].mxu0  ;;  %v3248_v0 = vadd.f32 %v5704_v1, %v3001_v58  ;;  %v3008_v1 = vld [vmem:[%s6655_s5 + $0xe8] sm:$0xff] }
 0x3eb   : > { %v3246_v3 = vadd.f32 %v3179_v15, %v2999_v51  ;;  %v5705_v7 = vpop.f32.mrb[118].mxu0  ;;  %v3010_v51 = vld [vmem:[%s6655_s5 + $0xf8] sm:$0xff] }
 0x3ec   : > { %v3182_v5 = vpop.f32.mrb[119].mxu0  ;;  %v3249_v36 = vadd.f32 %v5705_v7, %v3002_v59  ;;  %v6790_v10 = vadd.f32 %v6662_v13, %v3248_v0 }
 0x3ed   : > { %v6787_v27 = vadd.f32 %v6662_v13, %v3246_v3  ;;  %v3247_v8 = vadd.f32 %v3182_v5, %v3000_v21 }
 0x3ee   : > { %7490 = vst [vmem:[#allocation7_spill] sm:$0xff] %v6790_v10  ;;  %v6798_v12 = vadd.f32 %v6662_v13, %v3249_v36  ;;  %v3363_v17 = vsel %vm3012_vm4, %v6790_v10, 0.0 }
 0x3ef   : > { %7489 = vst [vmem:[#allocation6_spill] sm:$0xff] %v6787_v27  ;;  %v6793_v6 = vadd.f32 %v6662_v13, %v3247_v8  ;;  %v3357_v44 = vsel %vm3012_vm4, %v6787_v27, 0.0 }
 0x3f0   : > { %3358 = vadd.xlane.f32.xlu0 %v3357_v44  ;;  %7492 = vst [vmem:[#allocation9_spill] sm:$0xff] %v6798_v12  ;;  %v3366_v18 = vsel %vm3012_vm4, %v6798_v12, 0.0 }
 0x3f1   : > { %7491 = vst [vmem:[#allocation8_spill] sm:$0xff] %v6793_v6  ;;  %v3360_v16 = vsel %vm3012_vm4, %v6793_v6, 0.0 }
 0x3f2   : > { %3361 = vadd.xlane.f32.xlu1 %v3360_v16 }
 0x3f4   : > { %3364 = vadd.xlane.f32.xlu0 %v3363_v17 }
 0x3f6   : > { %3367 = vadd.xlane.f32.xlu1 %v3366_v18 }
 0x3f9   : > { %v5708_v28 = vpop.f32.mrb[120].mxu0 }
 0x3fa   : > { %v3195_v9 = vpop.f32.mrb[121].mxu0  ;;  %v3252_v37 = vadd.f32 %v5708_v28, %v3005_v19 }
 0x3fb   : > { %v3250_v61 = vadd.f32 %v3195_v9, %v3003_v57  ;;  %v5709_v63 = vpop.f32.mrb[122].mxu0  ;;  %v3808_v57 = vld [vmem:[%s7448_s16] sm:$0xf] }
 0x3fc   : > { %v3198_v22 = vpop.f32.mrb[123].mxu0  ;;  %v3253_v32 = vadd.f32 %v5709_v63, %v3006_v11  ;;  %v6814_v34 = vadd.f32 %v6662_v13, %v3252_v37  ;;  %5882 = vmatprep.subr.msk.bf16.mxu1 %vm3061_vm3, %v3808_v57 }
 0x3fd   : > { %v6811_v25 = vadd.f32 %v6662_v13, %v3250_v61  ;;  %v3251_v33 = vadd.f32 %v3198_v22, %v3004_v24 }
 0x3fe   : > { %7494 = vst [vmem:[#allocation11_spill] sm:$0xff] %v6814_v34  ;;  %v6822_v39 = vadd.f32 %v6662_v13, %v3253_v32  ;;  %v3375_v45 = vsel %vm3012_vm4, %v6814_v34, 0.0 }
 0x3ff   : > { %7493 = vst [vmem:[#allocation10_spill] sm:$0xff] %v6811_v25  ;;  %v6817_v41 = vadd.f32 %v6662_v13, %v3251_v33  ;;  %v3369_v38 = vsel %vm3012_vm4, %v6811_v25, 0.0 }
 0x400   : > { %3370 = vadd.xlane.f32.xlu0 %v3369_v38  ;;  %7496 = vst [vmem:[#allocation13_spill] sm:$0xff] %v6822_v39  ;;  %v3378_v49 = vsel %vm3012_vm4, %v6822_v39, 0.0 }
 0x401   : > { %7495 = vst [vmem:[#allocation12_spill] sm:$0xff] %v6817_v41  ;;  %v3372_v26 = vsel %vm3012_vm4, %v6817_v41, 0.0 }
 0x402   : > { %3373 = vadd.xlane.f32.xlu1 %v3372_v26 }
 0x404   : > { %3376 = vadd.xlane.f32.xlu0 %v3375_v45 }
 0x406   : > { %3379 = vadd.xlane.f32.xlu1 %v3378_v49 }
 0x409   : > { %v5712_v55 = vpop.f32.mrb[124].mxu0 }
 0x40a   : > { %v3211_v58 = vpop.f32.mrb[125].mxu0  ;;  %v3256_v15 = vadd.f32 %v5712_v55, %v3009_v53 }
 0x40b   : > { %v3254_v59 = vadd.f32 %v3211_v58, %v3007_v54  ;;  %v5713_v21 = vpop.f32.mrb[126].mxu0 }
 0x40c   : > { %v3214_v0 = vpop.f32.mrb[127].mxu0  ;;  %v3257_v7 = vadd.f32 %v5713_v21, %v3010_v51  ;;  %v6838_v36 = vadd.f32 %v6662_v13, %v3256_v15 }
 0x40d   : > { %v6835_v3 = vadd.f32 %v6662_v13, %v3254_v59  ;;  %v3255_v5 = vadd.f32 %v3214_v0, %v3008_v1 }
 0x40e   : > { %7498 = vst [vmem:[#allocation15_spill] sm:$0xff] %v6838_v36  ;;  %v6846_v16 = vadd.f32 %v6662_v13, %v3257_v7  ;;  %v3387_v18 = vsel %vm3012_vm4, %v6838_v36, 0.0 }
 0x40f   : > { %7497 = vst [vmem:[#allocation14_spill] sm:$0xff] %v6835_v3  ;;  %v6841_v8 = vadd.f32 %v6662_v13, %v3255_v5  ;;  %v3381_v44 = vsel %vm3012_vm4, %v6835_v3, 0.0  ;;  %v3865_v13 = vsel %vm3061_vm3, %v3808_v57, 0 }
 0x410   : > { %3382 = vadd.xlane.f32.xlu0 %v3381_v44  ;;  %7500 = vst [vmem:[#allocation17_spill] sm:$0xff] %v6846_v16  ;;  %v3390_v19 = vsel %vm3012_vm4, %v6846_v16, 0.0  ;;  %5715 = vmatpush3.bf16.msra.mxu1 %v3865_v13 }
 0x411   : > { %7499 = vst [vmem:[#allocation16_spill] sm:$0xff] %v6841_v8  ;;  %v3384_v17 = vsel %vm3012_vm4, %v6841_v8, 0.0 }
 0x412   : > { %3385 = vadd.xlane.f32.xlu1 %v3384_v17 }
 0x414   : > { %3388 = vadd.xlane.f32.xlu0 %v3387_v18 }
 0x416   : > { %3391 = vadd.xlane.f32.xlu1 %v3390_v19 }
 0x42c   : > { %v3305_v28 = vpop.xlane.xlu1 %3304 }
 0x42d   : > { %v3396_v9 = vmul.f32 0.125, %v3305_v28  ;;  %v3299_v11 = vpop.xlane.xlu0 %3298 }
 0x42e   : > { %v3394_v24 = vmul.f32 0.125, %v3299_v11 }
 0x42f   : > { %v6860_v37 = vsub.f32 %v6667_v47, %v3396_v9 }
 0x430   : > { %v6863_v61 = vsub.f32 %v6670_v30, %v3394_v24  ;;  %v3308_v63 = vpop.xlane.xlu1 %3307 }
 0x431   : > { %v3397_v22 = vmul.f32 0.125, %v3308_v63  ;;  %v3302_v32 = vpop.xlane.xlu0 %3301  ;;  %v3460_v53 = vmul.f32 %v6860_v37, %v6860_v37 }
 0x432   : > { %v3395_v33 = vmul.f32 0.125, %v3302_v32  ;;  %v3458_v38 = vmul.f32 %v6863_v61, %v6863_v61 }
 0x433   : > { %v6868_v26 = vsub.f32 %v6673_v50, %v3397_v22  ;;  %v3496_v55 = vsel %vm3012_vm4, %v3460_v53, 0.0 }
 0x434   : > { %v6871_v45 = vsub.f32 %v6678_v56, %v3395_v33  ;;  %v3490_v49 = vsel %vm3012_vm4, %v3458_v38, 0.0 }
 0x435   : > { %3491 = vadd.xlane.f32.xlu0 %v3490_v49  ;;  %v3461_v51 = vmul.f32 %v6868_v26, %v6868_v26 }
 0x436   : > { %v3459_v54 = vmul.f32 %v6871_v45, %v6871_v45 }
 0x437   : > { %v3499_v1 = vsel %vm3012_vm4, %v3461_v51, 0.0 }
 0x438   : > { %v3493_v58 = vsel %vm3012_vm4, %v3459_v54, 0.0 }
 0x439   : > { %3497 = vadd.xlane.f32.xlu0 %v3496_v55  ;;  %3494 = vadd.xlane.f32.xlu1 %v3493_v58 }
 0x43d   : > { %v3311_v15 = vpop.xlane.xlu0 %3310  ;;  %3500 = vadd.xlane.f32.xlu1 %v3499_v1 }
 0x43e   : > { %v3398_v59 = vmul.f32 0.125, %v3311_v15 }
 0x43f   : > { %v3314_v21 = vpop.xlane.xlu1 %3313 }
 0x440   : > { %v6884_v0 = vsub.f32 %v6691_v31, %v3398_v59  ;;  %v3399_v7 = vmul.f32 0.125, %v3314_v21 }
 0x441   : > { %v3317_v5 = vpop.xlane.xlu0 %3316 }
 0x442   : > { %v6887_v44 = vsub.f32 %v6697_v42, %v3399_v7  ;;  %v3400_v17 = vmul.f32 0.125, %v3317_v5  ;;  %v3462_v18 = vmul.f32 %v6884_v0, %v6884_v0 }
 0x443   : > { %v3320_v19 = vpop.xlane.xlu1 %3319 }
 0x444   : > { %v6892_v57 = vsub.f32 %v6694_v40, %v3400_v17  ;;  %v3401_v13 = vmul.f32 0.125, %v3320_v19  ;;  %v3502_v28 = vsel %vm3012_vm4, %v3462_v18, 0.0  ;;  %v3463_v9 = vmul.f32 %v6887_v44, %v6887_v44 }
 0x445   : > { %3503 = vadd.xlane.f32.xlu0 %v3502_v28 }
 0x446   : > { %v6898_v11 = vsub.f32 %v6702_v43, %v3401_v13  ;;  %v3505_v24 = vsel %vm3012_vm4, %v3463_v9, 0.0  ;;  %v3464_v63 = vmul.f32 %v6892_v57, %v6892_v57 }
 0x447   : > { %3506 = vadd.xlane.f32.xlu1 %v3505_v24 }
 0x448   : > { %v3508_v22 = vsel %vm3012_vm4, %v3464_v63, 0.0  ;;  %v3465_v32 = vmul.f32 %v6898_v11, %v6898_v11 }
 0x449   : > { %3509 = vadd.xlane.f32.xlu0 %v3508_v22 }
 0x44a   : > { %v3511_v33 = vsel %vm3012_vm4, %v3465_v32, 0.0  ;;  %v4028_v32 = vld [vmem:[%s7450_s18] sm:$0xf] }
 0x44b   : > { %3512 = vadd.xlane.f32.xlu1 %v3511_v33  ;;  %5883 = vmatprep.subr.msk.bf16.mxu0 %vm3061_vm3, %v4028_v32 }
 0x44d   : > { %v3323_v38 = vpop.xlane.xlu0 %3322 }
 0x44e   : > { %v3402_v49 = vmul.f32 0.125, %v3323_v38  ;;  %v4037_v38 = vsel %vm3061_vm3, %v4028_v32, 0 }
 0x44f   : > { %v3326_v53 = vpop.xlane.xlu1 %3325  ;;  %5749 = vmatpush3.bf16.msra.mxu0 %v4037_v38 }
 0x450   : > { %v6908_v54 = vsub.f32 %v6715_v62, %v3402_v49  ;;  %v3403_v55 = vmul.f32 0.125, %v3326_v53 }
 0x451   : > { %v3329_v58 = vpop.xlane.xlu0 %3328 }
 0x452   : > { %v6911_v51 = vsub.f32 %v6721_v2, %v3403_v55  ;;  %v3404_v1 = vmul.f32 0.125, %v3329_v58  ;;  %v3466_v15 = vmul.f32 %v6908_v54, %v6908_v54 }
 0x453   : > { %v3332_v59 = vpop.xlane.xlu1 %3331 }
 0x454   : > { %v6916_v21 = vsub.f32 %v6718_v20, %v3404_v1  ;;  %v3405_v7 = vmul.f32 0.125, %v3332_v59  ;;  %v3514_v5 = vsel %vm3012_vm4, %v3466_v15, 0.0  ;;  %v3467_v17 = vmul.f32 %v6911_v51, %v6911_v51 }
 0x455   : > { %3515 = vadd.xlane.f32.xlu0 %v3514_v5 }
 0x456   : > { %v6922_v18 = vsub.f32 %v6726_v4, %v3405_v7  ;;  %v3517_v19 = vsel %vm3012_vm4, %v3467_v17, 0.0  ;;  %v3468_v13 = vmul.f32 %v6916_v21, %v6916_v21 }
 0x457   : > { %3518 = vadd.xlane.f32.xlu1 %v3517_v19 }
 0x458   : > { %v3520_v28 = vsel %vm3012_vm4, %v3468_v13, 0.0  ;;  %v3469_v9 = vmul.f32 %v6922_v18, %v6922_v18 }
 0x459   : > { %3521 = vadd.xlane.f32.xlu0 %v3520_v28 }
 0x45a   : > { %v3523_v24 = vsel %vm3012_vm4, %v3469_v9, 0.0 }
 0x45b   : > { %3524 = vadd.xlane.f32.xlu1 %v3523_v24 }
 0x45d   : > { %v3335_v63 = vpop.xlane.xlu0 %3334 }
 0x45e   : > { %v3406_v22 = vmul.f32 0.125, %v3335_v63 }
 0x45f   : > { %v3338_v33 = vpop.xlane.xlu1 %3337 }
 0x460   : > { %v6937_v49 = vsub.f32 %v6739_v23, %v3406_v22  ;;  %v3407_v53 = vmul.f32 0.125, %v3338_v33 }
 0x461   : > { %v3341_v55 = vpop.xlane.xlu0 %3340 }
 0x462   : > { %v6940_v58 = vsub.f32 %v6745_v48, %v3407_v53  ;;  %v3408_v1 = vmul.f32 0.125, %v3341_v55  ;;  %v3470_v15 = vmul.f32 %v6937_v49, %v6937_v49 }
 0x463   : > { %v3344_v59 = vpop.xlane.xlu1 %3343 }
 0x464   : > { %v6945_v7 = vsub.f32 %v6742_v29, %v3408_v1  ;;  %v3409_v5 = vmul.f32 0.125, %v3344_v59  ;;  %v3526_v17 = vsel %vm3012_vm4, %v3470_v15, 0.0  ;;  %v3471_v19 = vmul.f32 %v6940_v58, %v6940_v58 }
 0x465   : > { %3527 = vadd.xlane.f32.xlu0 %v3526_v17 }
 0x466   : > { %v6951_v13 = vsub.f32 %v6750_v60, %v3409_v5  ;;  %v3529_v28 = vsel %vm3012_vm4, %v3471_v19, 0.0  ;;  %v3472_v9 = vmul.f32 %v6945_v7, %v6945_v7 }
 0x467   : > { %3530 = vadd.xlane.f32.xlu1 %v3529_v28 }
 0x468   : > { %v3532_v24 = vsel %vm3012_vm4, %v3472_v9, 0.0  ;;  %v3473_v63 = vmul.f32 %v6951_v13, %v6951_v13 }
 0x469   : > { %3533 = vadd.xlane.f32.xlu0 %v3532_v24 }
 0x46a   : > { %v3535_v22 = vsel %vm3012_vm4, %v3473_v63, 0.0 }
 0x46b   : > { %3536 = vadd.xlane.f32.xlu1 %v3535_v22 }
 0x46d   : > { %v3347_v32 = vpop.xlane.xlu0 %3346 }
 0x46e   : > { %v3410_v33 = vmul.f32 0.125, %v3347_v32 }
 0x46f   : > { %v3350_v38 = vpop.xlane.xlu1 %3349 }
 0x470   : > { %v6961_v53 = vsub.f32 %v6763_v14, %v3410_v33  ;;  %v3411_v55 = vmul.f32 0.125, %v3350_v38 }
 0x471   : > { %v3353_v1 = vpop.xlane.xlu0 %3352 }
 0x472   : > { %v6964_v15 = vsub.f32 %v6769_v46, %v3411_v55  ;;  %v3412_v59 = vmul.f32 0.125, %v3353_v1  ;;  %v3474_v5 = vmul.f32 %v6961_v53, %v6961_v53 }
 0x473   : > { %v3356_v17 = vpop.xlane.xlu1 %3355 }
 0x474   : > { %v6969_v19 = vsub.f32 %v6766_v35, %v3412_v59  ;;  %v3413_v28 = vmul.f32 0.125, %v3356_v17  ;;  %v3538_v9 = vsel %vm3012_vm4, %v3474_v5, 0.0  ;;  %v3475_v24 = vmul.f32 %v6964_v15, %v6964_v15 }
 0x475   : > { %3539 = vadd.xlane.f32.xlu0 %v3538_v9 }
 0x476   : > { %v6975_v63 = vsub.f32 %v6774_v52, %v3413_v28  ;;  %v3541_v22 = vsel %vm3012_vm4, %v3475_v24, 0.0  ;;  %v3476_v32 = vmul.f32 %v6969_v19, %v6969_v19 }
 0x477   : > { %3542 = vadd.xlane.f32.xlu1 %v3541_v22 }
 0x478   : > { %v3544_v33 = vsel %vm3012_vm4, %v3476_v32, 0.0  ;;  %v3477_v38 = vmul.f32 %v6975_v63, %v6975_v63 }
 0x479   : > { %3545 = vadd.xlane.f32.xlu0 %v3544_v33 }
 0x47a   : > { %v3547_v55 = vsel %vm3012_vm4, %v3477_v38, 0.0 }
 0x47b   : > { %3548 = vadd.xlane.f32.xlu1 %v3547_v55 }
 0x47d   : > { %v3359_v1 = vpop.xlane.xlu0 %3358 }
 0x47e   : > { %v3414_v59 = vmul.f32 0.125, %v3359_v1 }
 0x47f   : > { %v3362_v5 = vpop.xlane.xlu1 %3361 }
 0x480   : > { %v6985_v17 = vsub.f32 %v6787_v27, %v3414_v59  ;;  %v3415_v28 = vmul.f32 0.125, %v3362_v5 }
 0x481   : > { %v3365_v9 = vpop.xlane.xlu0 %3364 }
 0x482   : > { %v6988_v24 = vsub.f32 %v6793_v6, %v3415_v28  ;;  %v3416_v22 = vmul.f32 0.125, %v3365_v9  ;;  %v3478_v32 = vmul.f32 %v6985_v17, %v6985_v17 }
 0x483   : > { %v3368_v46 = vpop.xlane.xlu1 %3367 }
 0x484   : > { %v6993_v33 = vsub.f32 %v6790_v10, %v3416_v22  ;;  %v3417_v38 = vmul.f32 0.125, %v3368_v46  ;;  %v3550_v55 = vsel %vm3012_vm4, %v3478_v32, 0.0  ;;  %v3479_v1 = vmul.f32 %v6988_v24, %v6988_v24 }
 0x485   : > { %3551 = vadd.xlane.f32.xlu0 %v3550_v55 }
 0x486   : > { %v6999_v59 = vsub.f32 %v6798_v12, %v3417_v38  ;;  %v3553_v5 = vsel %vm3012_vm4, %v3479_v1, 0.0  ;;  %v3480_v28 = vmul.f32 %v6993_v33, %v6993_v33 }
 0x487   : > { %3554 = vadd.xlane.f32.xlu1 %v3553_v5 }
 0x488   : > { %v3556_v9 = vsel %vm3012_vm4, %v3480_v28, 0.0  ;;  %v3481_v46 = vmul.f32 %v6999_v59, %v6999_v59 }
 0x489   : > { %3557 = vadd.xlane.f32.xlu0 %v3556_v9 }
 0x48a   : > { %v3559_v22 = vsel %vm3012_vm4, %v3481_v46, 0.0 }
 0x48b   : > { %3560 = vadd.xlane.f32.xlu1 %v3559_v22 }
 0x48d   : > { %v3371_v32 = vpop.xlane.xlu0 %3370 }
 0x48e   : > { %v3418_v55 = vmul.f32 0.125, %v3371_v32 }
 0x48f   : > { %v3374_v6 = vpop.xlane.xlu1 %3373 }
 0x490   : > { %v7009_v38 = vsub.f32 %v6811_v25, %v3418_v55  ;;  %v3419_v1 = vmul.f32 0.125, %v3374_v6 }
 0x491   : > { %v3377_v12 = vpop.xlane.xlu0 %3376 }
 0x492   : > { %v7012_v27 = vsub.f32 %v6817_v41, %v3419_v1  ;;  %v3420_v5 = vmul.f32 0.125, %v3377_v12  ;;  %v3482_v28 = vmul.f32 %v7009_v38, %v7009_v38 }
 0x493   : > { %v3380_v10 = vpop.xlane.xlu1 %3379 }
 0x494   : > { %v7017_v9 = vsub.f32 %v6814_v34, %v3420_v5  ;;  %v3421_v46 = vmul.f32 0.125, %v3380_v10  ;;  %v3562_v22 = vsel %vm3012_vm4, %v3482_v28, 0.0  ;;  %v3483_v32 = vmul.f32 %v7012_v27, %v7012_v27 }
 0x495   : > { %3563 = vadd.xlane.f32.xlu0 %v3562_v22 }
 0x496   : > { %v7023_v6 = vsub.f32 %v6822_v39, %v3421_v46  ;;  %v3565_v55 = vsel %vm3012_vm4, %v3483_v32, 0.0  ;;  %v3484_v12 = vmul.f32 %v7017_v9, %v7017_v9 }
 0x497   : > { %3566 = vadd.xlane.f32.xlu1 %v3565_v55 }
 0x498   : > { %v3568_v1 = vsel %vm3012_vm4, %v3484_v12, 0.0  ;;  %v3485_v10 = vmul.f32 %v7023_v6, %v7023_v6 }
 0x499   : > { %3569 = vadd.xlane.f32.xlu0 %v3568_v1 }
 0x49a   : > { %v3571_v5 = vsel %vm3012_vm4, %v3485_v10, 0.0 }
 0x49b   : > { %3572 = vadd.xlane.f32.xlu1 %v3571_v5 }
 0x49d   : > { %v3383_v28 = vpop.xlane.xlu0 %3382 }
 0x49e   : > { %v3422_v22 = vmul.f32 0.125, %v3383_v28 }
 0x49f   : > { %v3386_v41 = vpop.xlane.xlu1 %3385 }
 0x4a0   : > { %v7033_v46 = vsub.f32 %v6835_v3, %v3422_v22  ;;  %v3423_v32 = vmul.f32 0.125, %v3386_v41 }
 0x4a1   : > { %v3389_v39 = vpop.xlane.xlu0 %3388 }
 0x4a2   : > { %v7036_v25 = vsub.f32 %v6841_v8, %v3423_v32  ;;  %v3424_v55 = vmul.f32 0.125, %v3389_v39  ;;  %v3486_v12 = vmul.f32 %v7033_v46, %v7033_v46 }
 0x4a3   : > { %v3392_v34 = vpop.xlane.xlu1 %3391 }
 0x4a4   : > { %v7041_v1 = vsub.f32 %v6838_v36, %v3424_v55  ;;  %v3425_v10 = vmul.f32 0.125, %v3392_v34  ;;  %v3574_v5 = vsel %vm3012_vm4, %v3486_v12, 0.0  ;;  %v3487_v28 = vmul.f32 %v7036_v25, %v7036_v25 }
 0x4a5   : > { %3575 = vadd.xlane.f32.xlu0 %v3574_v5 }
 0x4a6   : > { %v7047_v41 = vsub.f32 %v6846_v16, %v3425_v10  ;;  %v3577_v22 = vsel %vm3012_vm4, %v3487_v28, 0.0  ;;  %v3488_v39 = vmul.f32 %v7041_v1, %v7041_v1 }
 0x4a7   : > { %3578 = vadd.xlane.f32.xlu1 %v3577_v22 }
 0x4a8   : > { %v3580_v32 = vsel %vm3012_vm4, %v3488_v39, 0.0  ;;  %v3489_v34 = vmul.f32 %v7047_v41, %v7047_v41 }
 0x4a9   : > { %3581 = vadd.xlane.f32.xlu0 %v3580_v32 }
 0x4aa   : > { %v3583_v55 = vsel %vm3012_vm4, %v3489_v34, 0.0 }
 0x4ab   : > { %3584 = vadd.xlane.f32.xlu1 %v3583_v55 }
 0x4c2   : > { %v3492_v12 = vpop.xlane.xlu0 %3491 }
 0x4c3   : > { %v3586_v5 = vmul.f32 0.125, %v3492_v12  ;;  %v7060_v12 = vld [vmem:[%s7446_s14] ss:$0 sm:$0xff] }
 0x4c5   : > { %v3618_v8 = vadd.f32 1e-06, %v3586_v5 }
 0x4c6   : > { %v3498_v10 = vpop.xlane.xlu0 %3497  ;;  %v3495_v16 = vpop.xlane.xlu1 %3494 }
 0x4c7   : > { %5923 = vrsqrt.f32 %v3618_v8  ;;  %v3588_v28 = vmul.f32 0.125, %v3498_v10  ;;  %v3587_v3 = vmul.f32 0.125, %v3495_v16 }
 0x4c9   : > { %v3620_v36 = vadd.f32 1e-06, %v3588_v28  ;;  %v3619_v52 = vadd.f32 1e-06, %v3587_v3 }
 0x4ca   : > { %v3501_v22 = vpop.xlane.xlu1 %3500 }
 0x4cb   : > { %5925 = vrsqrt.f32 %v3620_v36  ;;  %v3589_v39 = vmul.f32 0.125, %v3501_v22 }
 0x4cc   : > { %5927 = vrsqrt.f32 %v3619_v52 }
 0x4cd   : > { %v3621_v14 = vadd.f32 1e-06, %v3589_v39 }
 0x4cf   : > { %5929 = vrsqrt.f32 %v3621_v14 }
 0x4d1   : > { %v5924_v32 = vpop.eup %5923 }
 0x4d2   : > { %v3682_v34 = vmul.f32 %v5924_v32, %v6863_v61  ;;  %v3504_v55 = vpop.xlane.xlu0 %3503  ;;  %v7068_v32 = vld [vmem:[%s7447_s15] ss:$0 sm:$0xff] }
 0x4d3   : > { %v3590_v8 = vmul.f32 0.125, %v3504_v55 }
 0x4d4   : > { %v3507_v5 = vpop.xlane.xlu1 %3506  ;;  %v3721_v14 = vmul.f32 %v7060_v12, %v3682_v34 }
 0x4d5   : > { %v5926_v16 = vpop.eup %5925  ;;  %v3622_v10 = vadd.f32 1e-06, %v3590_v8  ;;  %v3591_v3 = vmul.f32 0.125, %v3507_v5 }
 0x4d6   : > { %v5928_v28 = vpop.eup %5927  ;;  %v3684_v36 = vmul.f32 %v5926_v16, %v6860_v37  ;;  %v3510_v52 = vpop.xlane.xlu0 %3509 }
 0x4d7   : > { %v3683_v22 = vmul.f32 %v5928_v28, %v6871_v45  ;;  %5931 = vrsqrt.f32 %v3622_v10  ;;  %v3623_v61 = vadd.f32 1e-06, %v3591_v3  ;;  %v3592_v39 = vmul.f32 0.125, %v3510_v52 }
 0x4d8   : > { %v3513_v55 = vpop.xlane.xlu1 %3512  ;;  %v3723_v16 = vmul.f32 %v7060_v12, %v3684_v36  ;;  %v3760_v10 = vadd.f32 %v7068_v32, %v3721_v14 }
 0x4d9   : > { %v5930_v35 = vpop.eup %5929  ;;  %5933 = vrsqrt.f32 %v3623_v61  ;;  %v3624_v8 = vadd.f32 1e-06, %v3592_v39  ;;  %v3593_v5 = vmul.f32 0.125, %v3513_v55  ;;  %v3722_v37 = vmul.f32 %v7060_v12, %v3683_v22 }
 0x4da   : > { %v3685_v34 = vmul.f32 %v5930_v35, %v6868_v26  ;;  %v3762_v61 = vadd.f32 %v7068_v32, %v3723_v16 }
 0x4db   : > { %5935 = vrsqrt.f32 %v3624_v8  ;;  %v3625_v45 = vadd.f32 1e-06, %v3593_v5  ;;  %v3761_v3 = vadd.f32 %v7068_v32, %v3722_v37 }
 0x4dc   : > { %v3724_v28 = vmul.f32 %v7060_v12, %v3685_v34 }
 0x4dd   : > { %5937 = vrsqrt.f32 %v3625_v45  ;;  %v3792_v52 = vpack.c.bf16 %v3761_v3, %v3760_v10 }
 0x4de   : > { %v3763_v39 = vadd.f32 %v7068_v32, %v3724_v28 }
 0x4df   : > { %5716 = vmatprep.mubr.msk.bf16.mxu1 %vm3012_vm4, %v3792_v52  ;;  %5750 = vmatprep.mubr.msk.bf16.mxu0 %vm3012_vm4, %v3792_v52 }
 0x4e0   : > { %v3793_v36 = vpack.c.bf16 %v3763_v39, %v3762_v61 }
 0x4e1   : > { %v5932_v35 = vpop.eup %5931 }
 0x4e2   : > { %v3686_v26 = vmul.f32 %v5932_v35, %v6884_v0  ;;  %v3516_v22 = vpop.xlane.xlu0 %3515  ;;  %5717 = vmatmul.mubr.msk.bf16.vlgmr.msra.gmra.mrb[128].mxu1 %vm3012_vm4, %v3793_v36  ;;  %5751 = vmatmul.mubr.msk.bf16.vlgmr.msra.gmra.mrb[128].mxu0 %vm3012_vm4, %v3793_v36 }
 0x4e3   : > { %v5934_v14 = vpop.eup %5933  ;;  %v3594_v55 = vmul.f32 0.125, %v3516_v22 }
 0x4e4   : > { %v3687_v8 = vmul.f32 %v5934_v14, %v6887_v44  ;;  %v3519_v5 = vpop.xlane.xlu1 %3518  ;;  %v3725_v37 = vmul.f32 %v7060_v12, %v3686_v26 }
 0x4e5   : > { %v5936_v16 = vpop.eup %5935  ;;  %v3626_v34 = vadd.f32 1e-06, %v3594_v55  ;;  %v3595_v45 = vmul.f32 0.125, %v3519_v5 }
 0x4e6   : > { %v3688_v10 = vmul.f32 %v5936_v16, %v6892_v57  ;;  %v3522_v3 = vpop.xlane.xlu0 %3521  ;;  %v3726_v0 = vmul.f32 %v7060_v12, %v3687_v8  ;;  %v3764_v44 = vadd.f32 %v7068_v32, %v3725_v37 }
 0x4e7   : > { %v5938_v28 = vpop.eup %5937  ;;  %5939 = vrsqrt.f32 %v3626_v34  ;;  %v3627_v52 = vadd.f32 1e-06, %v3595_v45  ;;  %v3596_v61 = vmul.f32 0.125, %v3522_v3 }
 0x4e8   : > { %v3689_v39 = vmul.f32 %v5938_v28, %v6898_v11  ;;  %v3525_v36 = vpop.xlane.xlu1 %3524  ;;  %v3765_v35 = vadd.f32 %v7068_v32, %v3726_v0  ;;  %v3727_v26 = vmul.f32 %v7060_v12, %v3688_v10 }
 0x4e9   : > { %5941 = vrsqrt.f32 %v3627_v52  ;;  %v3628_v22 = vadd.f32 1e-06, %v3596_v61  ;;  %v3597_v14 = vmul.f32 0.125, %v3525_v36 }
 0x4ea   : > { %v3794_v57 = vpack.c.bf16 %v3765_v35, %v3764_v44  ;;  %v3728_v55 = vmul.f32 %v7060_v12, %v3689_v39  ;;  %v3766_v11 = vadd.f32 %v7068_v32, %v3727_v26 }
 0x4eb   : > { %5943 = vrsqrt.f32 %v3628_v22  ;;  %v3629_v8 = vadd.f32 1e-06, %v3597_v14 }
 0x4ec   : > { %5720 = vmatprep.mubr.msk.bf16.mxu1 %vm3012_vm4, %v3794_v57  ;;  %5754 = vmatprep.mubr.msk.bf16.mxu0 %vm3012_vm4, %v3794_v57  ;;  %v3767_v5 = vadd.f32 %v7068_v32, %v3728_v55 }
 0x4ed   : > { %5945 = vrsqrt.f32 %v3629_v8 }
 0x4ee   : > { %v3795_v37 = vpack.c.bf16 %v3767_v5, %v3766_v11 }
 0x4f0   : > { %5721 = vmatmul.mubr.msk.bf16.gmra.mrb[132].mxu1 %vm3012_vm4, %v3795_v37  ;;  %5755 = vmatmul.mubr.msk.bf16.gmra.mrb[132].mxu0 %vm3012_vm4, %v3795_v37 }
 0x4f1   : > { %v5940_v16 = vpop.eup %5939 }
 0x4f2   : > { %v3690_v34 = vmul.f32 %v5940_v16, %v6908_v54  ;;  %v3528_v45 = vpop.xlane.xlu0 %3527 }
 0x4f3   : > { %v5942_v10 = vpop.eup %5941  ;;  %v3598_v3 = vmul.f32 0.125, %v3528_v45 }
 0x4f4   : > { %v3691_v0 = vmul.f32 %v5942_v10, %v6911_v51  ;;  %v3531_v28 = vpop.xlane.xlu1 %3530  ;;  %v3729_v52 = vmul.f32 %v7060_v12, %v3690_v34 }
 0x4f5   : > { %v5944_v61 = vpop.eup %5943  ;;  %v3630_v39 = vadd.f32 1e-06, %v3598_v3  ;;  %v3599_v36 = vmul.f32 0.125, %v3531_v28 }
 0x4f6   : > { %v3692_v44 = vmul.f32 %v5944_v61, %v6916_v21  ;;  %v3534_v35 = vpop.xlane.xlu0 %3533  ;;  %v3730_v26 = vmul.f32 %v7060_v12, %v3691_v0  ;;  %v3768_v51 = vadd.f32 %v7068_v32, %v3729_v52 }
 0x4f7   : > { %v5946_v22 = vpop.eup %5945  ;;  %5947 = vrsqrt.f32 %v3630_v39  ;;  %v3631_v14 = vadd.f32 1e-06, %v3599_v36  ;;  %v3600_v54 = vmul.f32 0.125, %v3534_v35 }
 0x4f8   : > { %v3693_v57 = vmul.f32 %v5946_v22, %v6922_v18  ;;  %v3537_v55 = vpop.xlane.xlu1 %3536  ;;  %v3769_v8 = vadd.f32 %v7068_v32, %v3730_v26  ;;  %v3731_v11 = vmul.f32 %v7060_v12, %v3692_v44 }
 0x4f9   : > { %5949 = vrsqrt.f32 %v3631_v14  ;;  %v3632_v5 = vadd.f32 1e-06, %v3600_v54  ;;  %v3601_v37 = vmul.f32 0.125, %v3537_v55 }
 0x4fa   : > { %v3796_v21 = vpack.c.bf16 %v3769_v8, %v3768_v51  ;;  %v3732_v16 = vmul.f32 %v7060_v12, %v3693_v57  ;;  %v3770_v18 = vadd.f32 %v7068_v32, %v3731_v11 }
 0x4fb   : > { %5951 = vrsqrt.f32 %v3632_v5  ;;  %v3633_v34 = vadd.f32 1e-06, %v3601_v37 }
 0x4fc   : > { %5724 = vmatprep.mubr.msk.bf16.mxu1 %vm3012_vm4, %v3796_v21  ;;  %5758 = vmatprep.mubr.msk.bf16.mxu0 %vm3012_vm4, %v3796_v21  ;;  %v3771_v45 = vadd.f32 %v7068_v32, %v3732_v16 }
 0x4fd   : > { %5953 = vrsqrt.f32 %v3633_v34 }
 0x4fe   : > { %v3797_v10 = vpack.c.bf16 %v3771_v45, %v3770_v18 }
 0x500   : > { %5725 = vmatmul.mubr.msk.bf16.gmra.mrb[136].mxu1 %vm3012_vm4, %v3797_v10  ;;  %5759 = vmatmul.mubr.msk.bf16.gmra.mrb[136].mxu0 %vm3012_vm4, %v3797_v10 }
 0x501   : > { %v5948_v3 = vpop.eup %5947 }
 0x502   : > { %v3694_v0 = vmul.f32 %v5948_v3, %v6937_v49  ;;  %v3540_v28 = vpop.xlane.xlu0 %3539 }
 0x503   : > { %v5950_v52 = vpop.eup %5949  ;;  %v3602_v61 = vmul.f32 0.125, %v3540_v28 }
 0x504   : > { %v3695_v39 = vmul.f32 %v5950_v52, %v6940_v58  ;;  %v3543_v36 = vpop.xlane.xlu1 %3542  ;;  %v3733_v44 = vmul.f32 %v7060_v12, %v3694_v0 }
 0x505   : > { %v5952_v35 = vpop.eup %5951  ;;  %v3634_v26 = vadd.f32 1e-06, %v3602_v61  ;;  %v3603_v22 = vmul.f32 0.125, %v3543_v36 }
 0x506   : > { %v3696_v14 = vmul.f32 %v5952_v35, %v6945_v7  ;;  %v3546_v54 = vpop.xlane.xlu0 %3545  ;;  %v3734_v57 = vmul.f32 %v7060_v12, %v3695_v39  ;;  %v3772_v58 = vadd.f32 %v7068_v32, %v3733_v44 }
 0x507   : > { %v5954_v55 = vpop.eup %5953  ;;  %5955 = vrsqrt.f32 %v3634_v26  ;;  %v3635_v51 = vadd.f32 1e-06, %v3603_v22  ;;  %v3604_v49 = vmul.f32 0.125, %v3546_v54 }
 0x508   : > { %v3697_v8 = vmul.f32 %v5954_v55, %v6951_v13  ;;  %v3549_v11 = vpop.xlane.xlu1 %3548  ;;  %v3773_v5 = vadd.f32 %v7068_v32, %v3734_v57  ;;  %v3735_v37 = vmul.f32 %v7060_v12, %v3696_v14 }
 0x509   : > { %5957 = vrsqrt.f32 %v3635_v51  ;;  %v3636_v21 = vadd.f32 1e-06, %v3604_v49  ;;  %v3605_v16 = vmul.f32 0.125, %v3549_v11 }
 0x50a   : > { %v3798_v7 = vpack.c.bf16 %v3773_v5, %v3772_v58  ;;  %v3736_v34 = vmul.f32 %v7060_v12, %v3697_v8  ;;  %v3774_v13 = vadd.f32 %v7068_v32, %v3735_v37 }
 0x50b   : > { %5959 = vrsqrt.f32 %v3636_v21  ;;  %v3637_v18 = vadd.f32 1e-06, %v3605_v16 }
 0x50c   : > { %5728 = vmatprep.mubr.msk.bf16.mxu1 %vm3012_vm4, %v3798_v7  ;;  %5762 = vmatprep.mubr.msk.bf16.mxu0 %vm3012_vm4, %v3798_v7  ;;  %v3775_v45 = vadd.f32 %v7068_v32, %v3736_v34 }
 0x50d   : > { %5961 = vrsqrt.f32 %v3637_v18 }
 0x50e   : > { %v3799_v10 = vpack.c.bf16 %v3775_v45, %v3774_v13 }
 0x510   : > { %5729 = vmatmul.mubr.msk.bf16.gmra.mrb[140].mxu1 %vm3012_vm4, %v3799_v10  ;;  %5763 = vmatmul.mubr.msk.bf16.gmra.mrb[140].mxu0 %vm3012_vm4, %v3799_v10 }
 0x511   : > { %v5956_v3 = vpop.eup %5955 }
 0x512   : > { %v3698_v0 = vmul.f32 %v5956_v3, %v6961_v53  ;;  %v3552_v28 = vpop.xlane.xlu0 %3551 }
 0x513   : > { %v5958_v52 = vpop.eup %5957  ;;  %v3606_v61 = vmul.f32 0.125, %v3552_v28 }
 0x514   : > { %v3699_v39 = vmul.f32 %v5958_v52, %v6964_v15  ;;  %v3555_v36 = vpop.xlane.xlu1 %3554  ;;  %v3737_v44 = vmul.f32 %v7060_v12, %v3698_v0 }
 0x515   : > { %v5960_v35 = vpop.eup %5959  ;;  %v3638_v26 = vadd.f32 1e-06, %v3606_v61  ;;  %v3607_v22 = vmul.f32 0.125, %v3555_v36 }
 0x516   : > { %v3700_v14 = vmul.f32 %v5960_v35, %v6969_v19  ;;  %v3558_v54 = vpop.xlane.xlu0 %3557  ;;  %v3738_v57 = vmul.f32 %v7060_v12, %v3699_v39  ;;  %v3776_v15 = vadd.f32 %v7068_v32, %v3737_v44 }
 0x517   : > { %v5962_v55 = vpop.eup %5961  ;;  %5963 = vrsqrt.f32 %v3638_v26  ;;  %v3639_v51 = vadd.f32 1e-06, %v3607_v22  ;;  %v3608_v53 = vmul.f32 0.125, %v3558_v54 }
 0x518   : > { %v3701_v49 = vmul.f32 %v5962_v55, %v6975_v63  ;;  %v3561_v8 = vpop.xlane.xlu1 %3560  ;;  %v3777_v11 = vadd.f32 %v7068_v32, %v3738_v57  ;;  %v3739_v58 = vmul.f32 %v7060_v12, %v3700_v14 }
 0x519   : > { %5965 = vrsqrt.f32 %v3639_v51  ;;  %v3640_v5 = vadd.f32 1e-06, %v3608_v53  ;;  %v3609_v37 = vmul.f32 0.125, %v3561_v8 }
 0x51a   : > { %v3800_v19 = vpack.c.bf16 %v3777_v11, %v3776_v15  ;;  %v3740_v21 = vmul.f32 %v7060_v12, %v3701_v49  ;;  %v3778_v63 = vadd.f32 %v7068_v32, %v3739_v58 }
 0x51b   : > { %5967 = vrsqrt.f32 %v3640_v5  ;;  %v3641_v16 = vadd.f32 1e-06, %v3609_v37 }
 0x51c   : > { %5732 = vmatprep.mubr.msk.bf16.mxu1 %vm3012_vm4, %v3800_v19  ;;  %5766 = vmatprep.mubr.msk.bf16.mxu0 %vm3012_vm4, %v3800_v19  ;;  %v3779_v7 = vadd.f32 %v7068_v32, %v3740_v21 }
 0x51d   : > { %5969 = vrsqrt.f32 %v3641_v16 }
 0x51e   : > { %v3801_v34 = vpack.c.bf16 %v3779_v7, %v3778_v63 }
 0x520   : > { %5733 = vmatmul.mubr.msk.bf16.gmra.mrb[144].mxu1 %vm3012_vm4, %v3801_v34  ;;  %5767 = vmatmul.mubr.msk.bf16.gmra.mrb[144].mxu0 %vm3012_vm4, %v3801_v34 }
 0x521   : > { %v5964_v18 = vpop.eup %5963 }
 0x522   : > { %v3702_v13 = vmul.f32 %v5964_v18, %v6985_v17  ;;  %v3564_v45 = vpop.xlane.xlu0 %3563 }
 0x523   : > { %v5966_v10 = vpop.eup %5965  ;;  %v3610_v3 = vmul.f32 0.125, %v3564_v45 }
 0x524   : > { %v3703_v0 = vmul.f32 %v5966_v10, %v6988_v24  ;;  %v3567_v28 = vpop.xlane.xlu1 %3566  ;;  %v3741_v52 = vmul.f32 %v7060_v12, %v3702_v13 }
 0x525   : > { %v5968_v61 = vpop.eup %5967  ;;  %v3642_v39 = vadd.f32 1e-06, %v3610_v3  ;;  %v3611_v36 = vmul.f32 0.125, %v3567_v28 }
 0x526   : > { %v3704_v44 = vmul.f32 %v5968_v61, %v6993_v33  ;;  %v3570_v35 = vpop.xlane.xlu0 %3569  ;;  %v3742_v26 = vmul.f32 %v7060_v12, %v3703_v0  ;;  %v3780_v24 = vadd.f32 %v7068_v32, %v3741_v52 }
 0x527   : > { %v5970_v22 = vpop.eup %5969  ;;  %5971 = vrsqrt.f32 %v3642_v39  ;;  %v3643_v14 = vadd.f32 1e-06, %v3611_v36  ;;  %v3612_v17 = vmul.f32 0.125, %v3570_v35 }
 0x528   : > { %v3705_v54 = vmul.f32 %v5970_v22, %v6999_v59  ;;  %v3573_v57 = vpop.xlane.xlu1 %3572  ;;  %v3781_v55 = vadd.f32 %v7068_v32, %v3742_v26  ;;  %v3743_v51 = vmul.f32 %v7060_v12, %v3704_v44 }
 0x529   : > { %5973 = vrsqrt.f32 %v3643_v14  ;;  %v3644_v53 = vadd.f32 1e-06, %v3612_v17  ;;  %v3613_v49 = vmul.f32 0.125, %v3573_v57 }
 0x52a   : > { %v3802_v33 = vpack.c.bf16 %v3781_v55, %v3780_v24  ;;  %v3744_v8 = vmul.f32 %v7060_v12, %v3705_v54  ;;  %v3782_v59 = vadd.f32 %v7068_v32, %v3743_v51 }
 0x52b   : > { %5975 = vrsqrt.f32 %v3644_v53  ;;  %v3645_v15 = vadd.f32 1e-06, %v3613_v49 }
 0x52c   : > { %5736 = vmatprep.mubr.msk.bf16.mxu1 %vm3012_vm4, %v3802_v33  ;;  %5770 = vmatprep.mubr.msk.bf16.mxu0 %vm3012_vm4, %v3802_v33  ;;  %v3783_v11 = vadd.f32 %v7068_v32, %v3744_v8 }
 0x52d   : > { %5977 = vrsqrt.f32 %v3645_v15 }
 0x52e   : > { %v3803_v58 = vpack.c.bf16 %v3783_v11, %v3782_v59 }
 0x530   : > { %5737 = vmatmul.mubr.msk.bf16.gmra.mrb[148].mxu1 %vm3012_vm4, %v3803_v58  ;;  %5771 = vmatmul.mubr.msk.bf16.gmra.mrb[148].mxu0 %vm3012_vm4, %v3803_v58 }
 0x531   : > { %v5972_v5 = vpop.eup %5971 }
 0x532   : > { %v3706_v37 = vmul.f32 %v5972_v5, %v7009_v38  ;;  %v3576_v19 = vpop.xlane.xlu0 %3575 }
 0x533   : > { %v5974_v21 = vpop.eup %5973  ;;  %v3614_v16 = vmul.f32 0.125, %v3576_v19 }
 0x534   : > { %v3707_v63 = vmul.f32 %v5974_v21, %v7012_v27  ;;  %v3579_v7 = vpop.xlane.xlu1 %3578  ;;  %v3745_v34 = vmul.f32 %v7060_v12, %v3706_v37 }
 0x535   : > { %v5976_v18 = vpop.eup %5975  ;;  %v3646_v13 = vadd.f32 1e-06, %v3614_v16  ;;  %v3615_v45 = vmul.f32 0.125, %v3579_v7 }
 0x536   : > { %v3708_v10 = vmul.f32 %v5976_v18, %v7017_v9  ;;  %v3582_v3 = vpop.xlane.xlu0 %3581  ;;  %v3746_v0 = vmul.f32 %v7060_v12, %v3707_v63  ;;  %v3784_v27 = vadd.f32 %v7068_v32, %v3745_v34  ;;  %v4248_v9 = vld [vmem:[%s7452_s20] sm:$0xf] }
 0x537   : > { %v5978_v28 = vpop.eup %5977  ;;  %5979 = vrsqrt.f32 %v3646_v13  ;;  %v3647_v52 = vadd.f32 1e-06, %v3615_v45  ;;  %v3616_v38 = vmul.f32 0.125, %v3582_v3  ;;  %5884 = vmatprep.subr.msk.bf16.mxu1 %vm3061_vm3, %v4248_v9  ;;  %v4298_v22 = vsel %vm3061_vm3, %v4248_v9, 0 }
 0x538   : > { %v3709_v61 = vmul.f32 %v5978_v28, %v7023_v6  ;;  %v3585_v39 = vpop.xlane.xlu1 %3584  ;;  %v3785_v36 = vadd.f32 %v7068_v32, %v3746_v0  ;;  %v3747_v44 = vmul.f32 %v7060_v12, %v3708_v10  ;;  %5783 = vmatpush3.bf16.msra.mxu1 %v4298_v22 }
 0x539   : > { %5981 = vrsqrt.f32 %v3647_v52  ;;  %v3648_v35 = vadd.f32 1e-06, %v3616_v38  ;;  %v3617_v26 = vmul.f32 0.125, %v3585_v39 }
 0x53a   : > { %v3804_v14 = vpack.c.bf16 %v3785_v36, %v3784_v27  ;;  %v3748_v6 = vmul.f32 %v7060_v12, %v3709_v61  ;;  %v3786_v54 = vadd.f32 %v7068_v32, %v3747_v44 }
 0x53b   : > { %5983 = vrsqrt.f32 %v3648_v35  ;;  %v3649_v17 = vadd.f32 1e-06, %v3617_v26 }
 0x53c   : > { %5740 = vmatprep.mubr.msk.bf16.mxu1 %vm3012_vm4, %v3804_v14  ;;  %5774 = vmatprep.mubr.msk.bf16.mxu0 %vm3012_vm4, %v3804_v14  ;;  %v3787_v57 = vadd.f32 %v7068_v32, %v3748_v6 }
 0x53d   : > { %5985 = vrsqrt.f32 %v3649_v17 }
 0x53e   : > { %v3805_v24 = vpack.c.bf16 %v3787_v57, %v3786_v54 }
 0x540   : > { %5741 = vmatmul.mubr.msk.bf16.gmra.mrb[152].mxu1 %vm3012_vm4, %v3805_v24  ;;  %5775 = vmatmul.mubr.msk.bf16.gmra.mrb[152].mxu0 %vm3012_vm4, %v3805_v24 }
 0x541   : > { %v5980_v55 = vpop.eup %5979 }
 0x542   : > { %v3710_v51 = vmul.f32 %v5980_v55, %v7033_v46 }
 0x543   : > { %v5982_v53 = vpop.eup %5981 }
 0x544   : > { %v3711_v49 = vmul.f32 %v5982_v53, %v7036_v25  ;;  %v3749_v33 = vmul.f32 %v7060_v12, %v3710_v51 }
 0x545   : > { %v5984_v8 = vpop.eup %5983 }
 0x546   : > { %v3712_v15 = vmul.f32 %v5984_v8, %v7041_v1  ;;  %v3750_v59 = vmul.f32 %v7060_v12, %v3711_v49  ;;  %v3788_v5 = vadd.f32 %v7068_v32, %v3749_v33 }
 0x547   : > { %v5986_v11 = vpop.eup %5985 }
 0x548   : > { %v3713_v58 = vmul.f32 %v5986_v11, %v7047_v41  ;;  %v3789_v37 = vadd.f32 %v7068_v32, %v3750_v59  ;;  %v3751_v19 = vmul.f32 %v7060_v12, %v3712_v15  ;;  %v7202_v41 = vld [vmem:[%s7449_s17] ss:$0 sm:$0xff] }
 0x54a   : > { %v3806_v46 = vpack.c.bf16 %v3789_v37, %v3788_v5  ;;  %v3752_v21 = vmul.f32 %v7060_v12, %v3713_v58  ;;  %v3790_v25 = vadd.f32 %v7068_v32, %v3751_v19  ;;  %v7207_v12 = vld [vmem:[%s7451_s19] ss:$0 sm:$0xff] }
 0x54c   : > { %5744 = vmatprep.mubr.msk.bf16.mxu1 %vm3012_vm4, %v3806_v46  ;;  %5778 = vmatprep.mubr.msk.bf16.mxu0 %vm3012_vm4, %v3806_v46  ;;  %v3791_v1 = vadd.f32 %v7068_v32, %v3752_v21 }
 0x54e   : > { %v3807_v16 = vpack.c.bf16 %v3791_v1, %v3790_v25 }
 0x550   : > { %5745 = vmatmul.mubr.msk.bf16.gmra.mrb[156].mxu1 %vm3012_vm4, %v3807_v16  ;;  %5779 = vmatmul.mubr.msk.bf16.gmra.mrb[156].mxu0 %vm3012_vm4, %v3807_v16 }
 0x5b5   : > { %v5718_v63 = vpop.f32.mrb[128].mxu1  ;;  %v5752_v7 = vpop.f32.mrb[128].mxu0 }
 0x5b6   : > { %v3910_v34 = vadd.f32 %v5718_v63, %v7202_v41  ;;  %v4082_v32 = vadd.f32 %v5752_v7, %v7207_v12  ;;  %v3901_v18 = vpop.f32.mrb[129].mxu1  ;;  %v4073_v13 = vpop.f32.mrb[129].mxu0 }
 0x5b7   : > { %v3902_v45 = vadd.f32 %v7202_v41, %v3901_v18  ;;  %v4074_v10 = vadd.f32 %v7207_v12, %v4073_v13  ;;  %v5719_v3 = vpop.f32.mrb[130].mxu1  ;;  %v5753_v0 = vpop.f32.mrb[130].mxu0 }
 0x5b8   : > { %v4202_v28 = vmul.f32 %v4082_v32, %v3910_v34  ;;  %v3913_v52 = vadd.f32 %v5719_v3, %v7202_v41  ;;  %v4085_v38 = vadd.f32 %v5753_v0, %v7207_v12  ;;  %v3904_v61 = vpop.f32.mrb[131].mxu1  ;;  %v4076_v39 = vpop.f32.mrb[131].mxu0 }
 0x5b9   : > { %v4200_v27 = vmul.f32 %v4074_v10, %v3902_v45  ;;  %v3905_v36 = vadd.f32 %v7202_v41, %v3904_v61  ;;  %v4077_v44 = vadd.f32 %v7207_v12, %v4076_v39 }
 0x5ba   : > { %v4203_v9 = vmul.f32 %v4085_v38, %v3913_v52 }
 0x5bb   : > { %v4201_v35 = vmul.f32 %v4077_v44, %v3905_v36 }
 0x5bc   : > { %v4233_v26 = vpack.c.bf16 %v4203_v9, %v4202_v28 }
 0x5bd   : > { %v4232_v22 = vpack.c.bf16 %v4201_v35, %v4200_v27 }
 0x5bf   : > { %5784 = vmatprep.mubr.msk.bf16.mxu1 %vm3012_vm4, %v4232_v22 }
 0x5c0   : > { %5785 = vmatmul.mubr.msk.bf16.vlgmr.msra.gmra.mrb[160].mxu1 %vm3012_vm4, %v4233_v26 }
 0x5c3   : > { %v5722_v14 = vpop.f32.mrb[132].mxu1  ;;  %v5756_v6 = vpop.f32.mrb[132].mxu0 }
 0x5c4   : > { %v3926_v17 = vadd.f32 %v5722_v14, %v7202_v41  ;;  %v4098_v54 = vadd.f32 %v5756_v6, %v7207_v12  ;;  %v3917_v57 = vpop.f32.mrb[133].mxu1  ;;  %v4089_v24 = vpop.f32.mrb[133].mxu0 }
 0x5c5   : > { %v3918_v55 = vadd.f32 %v7202_v41, %v3917_v57  ;;  %v4090_v51 = vadd.f32 %v7207_v12, %v4089_v24  ;;  %v5723_v53 = vpop.f32.mrb[134].mxu1  ;;  %v5757_v49 = vpop.f32.mrb[134].mxu0 }
 0x5c6   : > { %v4206_v33 = vmul.f32 %v4098_v54, %v3926_v17  ;;  %v3929_v8 = vadd.f32 %v5723_v53, %v7202_v41  ;;  %v4101_v15 = vadd.f32 %v5757_v49, %v7207_v12  ;;  %v3920_v59 = vpop.f32.mrb[135].mxu1  ;;  %v4092_v11 = vpop.f32.mrb[135].mxu0 }
 0x5c7   : > { %v4204_v58 = vmul.f32 %v4090_v51, %v3918_v55  ;;  %v3921_v5 = vadd.f32 %v7202_v41, %v3920_v59  ;;  %v4093_v37 = vadd.f32 %v7207_v12, %v4092_v11 }
 0x5c8   : > { %v4207_v19 = vmul.f32 %v4101_v15, %v3929_v8 }
 0x5c9   : > { %v4205_v46 = vmul.f32 %v4093_v37, %v3921_v5 }
 0x5ca   : > { %v4235_v21 = vpack.c.bf16 %v4207_v19, %v4206_v33 }
 0x5cb   : > { %v4234_v25 = vpack.c.bf16 %v4205_v46, %v4204_v58 }
 0x5cd   : > { %5788 = vmatprep.mubr.msk.bf16.mxu1 %vm3012_vm4, %v4234_v25 }
 0x5ce   : > { %5789 = vmatmul.mubr.msk.bf16.gmra.mrb[164].mxu1 %vm3012_vm4, %v4235_v21 }
 0x5d3   : > { %v5726_v1 = vpop.f32.mrb[136].mxu1  ;;  %v5760_v16 = vpop.f32.mrb[136].mxu0 }
 0x5d4   : > { %v3942_v63 = vadd.f32 %v5726_v1, %v7202_v41  ;;  %v4114_v7 = vadd.f32 %v5760_v16, %v7207_v12  ;;  %v3933_v34 = vpop.f32.mrb[137].mxu1  ;;  %v4105_v32 = vpop.f32.mrb[137].mxu0 }
 0x5d5   : > { %v3934_v18 = vadd.f32 %v7202_v41, %v3933_v34  ;;  %v4106_v13 = vadd.f32 %v7207_v12, %v4105_v32  ;;  %v5727_v45 = vpop.f32.mrb[138].mxu1  ;;  %v5761_v10 = vpop.f32.mrb[138].mxu0 }
 0x5d6   : > { %v4210_v3 = vmul.f32 %v4114_v7, %v3942_v63  ;;  %v3945_v0 = vadd.f32 %v5727_v45, %v7202_v41  ;;  %v4117_v28 = vadd.f32 %v5761_v10, %v7207_v12  ;;  %v3936_v52 = vpop.f32.mrb[139].mxu1  ;;  %v4108_v38 = vpop.f32.mrb[139].mxu0 }
 0x5d7   : > { %v4208_v61 = vmul.f32 %v4106_v13, %v3934_v18  ;;  %v3937_v39 = vadd.f32 %v7202_v41, %v3936_v52  ;;  %v4109_v27 = vadd.f32 %v7207_v12, %v4108_v38 }
 0x5d8   : > { %v4211_v36 = vmul.f32 %v4117_v28, %v3945_v0 }
 0x5d9   : > { %v4209_v44 = vmul.f32 %v4109_v27, %v3937_v39 }
 0x5da   : > { %v4237_v9 = vpack.c.bf16 %v4211_v36, %v4210_v3 }
 0x5db   : > { %v4236_v35 = vpack.c.bf16 %v4209_v44, %v4208_v61 }
 0x5dd   : > { %5792 = vmatprep.mubr.msk.bf16.mxu1 %vm3012_vm4, %v4236_v35 }
 0x5de   : > { %5793 = vmatmul.mubr.msk.bf16.gmra.mrb[168].mxu1 %vm3012_vm4, %v4237_v9 }
 0x5e3   : > { %v5730_v26 = vpop.f32.mrb[140].mxu1  ;;  %v5764_v22 = vpop.f32.mrb[140].mxu0 }
 0x5e4   : > { %v3958_v14 = vadd.f32 %v5730_v26, %v7202_v41  ;;  %v4130_v6 = vadd.f32 %v5764_v22, %v7207_v12  ;;  %v3949_v17 = vpop.f32.mrb[141].mxu1  ;;  %v4121_v54 = vpop.f32.mrb[141].mxu0 }
 0x5e5   : > { %v3950_v57 = vadd.f32 %v7202_v41, %v3949_v17  ;;  %v4122_v24 = vadd.f32 %v7207_v12, %v4121_v54  ;;  %v5731_v55 = vpop.f32.mrb[142].mxu1  ;;  %v5765_v51 = vpop.f32.mrb[142].mxu0 }
 0x5e6   : > { %v4214_v53 = vmul.f32 %v4130_v6, %v3958_v14  ;;  %v3961_v49 = vadd.f32 %v5731_v55, %v7202_v41  ;;  %v4133_v33 = vadd.f32 %v5765_v51, %v7207_v12  ;;  %v3952_v8 = vpop.f32.mrb[143].mxu1  ;;  %v4124_v15 = vpop.f32.mrb[143].mxu0 }
 0x5e7   : > { %v4212_v59 = vmul.f32 %v4122_v24, %v3950_v57  ;;  %v3953_v11 = vadd.f32 %v7202_v41, %v3952_v8  ;;  %v4125_v58 = vadd.f32 %v7207_v12, %v4124_v15 }
 0x5e8   : > { %v4215_v5 = vmul.f32 %v4133_v33, %v3961_v49 }
 0x5e9   : > { %v4213_v37 = vmul.f32 %v4125_v58, %v3953_v11 }
 0x5ea   : > { %v4239_v19 = vpack.c.bf16 %v4215_v5, %v4214_v53 }
 0x5eb   : > { %v4238_v46 = vpack.c.bf16 %v4213_v37, %v4212_v59 }
 0x5ed   : > { %5796 = vmatprep.mubr.msk.bf16.mxu1 %vm3012_vm4, %v4238_v46 }
 0x5ee   : > { %5797 = vmatmul.mubr.msk.bf16.gmra.mrb[172].mxu1 %vm3012_vm4, %v4239_v19 }
 0x5f3   : > { %v5734_v21 = vpop.f32.mrb[144].mxu1  ;;  %v5768_v25 = vpop.f32.mrb[144].mxu0 }
 0x5f4   : > { %v3974_v1 = vadd.f32 %v5734_v21, %v7202_v41  ;;  %v4146_v16 = vadd.f32 %v5768_v25, %v7207_v12  ;;  %v3965_v63 = vpop.f32.mrb[145].mxu1  ;;  %v4137_v7 = vpop.f32.mrb[145].mxu0 }
 0x5f5   : > { %v3966_v34 = vadd.f32 %v7202_v41, %v3965_v63  ;;  %v4138_v32 = vadd.f32 %v7207_v12, %v4137_v7  ;;  %v5735_v18 = vpop.f32.mrb[146].mxu1  ;;  %v5769_v13 = vpop.f32.mrb[146].mxu0 }
 0x5f6   : > { %v4218_v45 = vmul.f32 %v4146_v16, %v3974_v1  ;;  %v3977_v10 = vadd.f32 %v5735_v18, %v7202_v41  ;;  %v4149_v3 = vadd.f32 %v5769_v13, %v7207_v12  ;;  %v3968_v0 = vpop.f32.mrb[147].mxu1  ;;  %v4140_v28 = vpop.f32.mrb[147].mxu0 }
 0x5f7   : > { %v4216_v52 = vmul.f32 %v4138_v32, %v3966_v34  ;;  %v3969_v38 = vadd.f32 %v7202_v41, %v3968_v0  ;;  %v4141_v61 = vadd.f32 %v7207_v12, %v4140_v28 }
 0x5f8   : > { %v4219_v39 = vmul.f32 %v4149_v3, %v3977_v10 }
 0x5f9   : > { %v4217_v27 = vmul.f32 %v4141_v61, %v3969_v38 }
 0x5fa   : > { %v4241_v36 = vpack.c.bf16 %v4219_v39, %v4218_v45 }
 0x5fb   : > { %v4240_v44 = vpack.c.bf16 %v4217_v27, %v4216_v52 }
 0x5fd   : > { %5800 = vmatprep.mubr.msk.bf16.mxu1 %vm3012_vm4, %v4240_v44 }
 0x5fe   : > { %5801 = vmatmul.mubr.msk.bf16.gmra.mrb[176].mxu1 %vm3012_vm4, %v4241_v36 }
 0x603   : > { %v5738_v9 = vpop.f32.mrb[148].mxu1  ;;  %v5772_v35 = vpop.f32.mrb[148].mxu0 }
 0x604   : > { %v3990_v26 = vadd.f32 %v5738_v9, %v7202_v41  ;;  %v4162_v22 = vadd.f32 %v5772_v35, %v7207_v12  ;;  %v3981_v14 = vpop.f32.mrb[149].mxu1  ;;  %v4153_v6 = vpop.f32.mrb[149].mxu0 }
 0x605   : > { %v3982_v17 = vadd.f32 %v7202_v41, %v3981_v14  ;;  %v4154_v54 = vadd.f32 %v7207_v12, %v4153_v6  ;;  %v5739_v57 = vpop.f32.mrb[150].mxu1  ;;  %v5773_v24 = vpop.f32.mrb[150].mxu0 }
 0x606   : > { %v4222_v55 = vmul.f32 %v4162_v22, %v3990_v26  ;;  %v3993_v51 = vadd.f32 %v5739_v57, %v7202_v41  ;;  %v4165_v53 = vadd.f32 %v5773_v24, %v7207_v12  ;;  %v3984_v49 = vpop.f32.mrb[151].mxu1  ;;  %v4156_v33 = vpop.f32.mrb[151].mxu0 }
 0x607   : > { %v4220_v8 = vmul.f32 %v4154_v54, %v3982_v17  ;;  %v3985_v15 = vadd.f32 %v7202_v41, %v3984_v49  ;;  %v4157_v59 = vadd.f32 %v7207_v12, %v4156_v33 }
 0x608   : > { %v4223_v11 = vmul.f32 %v4165_v53, %v3993_v51 }
 0x609   : > { %v4221_v58 = vmul.f32 %v4157_v59, %v3985_v15 }
 0x60a   : > { %v4243_v5 = vpack.c.bf16 %v4223_v11, %v4222_v55 }
 0x60b   : > { %v4242_v37 = vpack.c.bf16 %v4221_v58, %v4220_v8 }
 0x60d   : > { %5804 = vmatprep.mubr.msk.bf16.mxu1 %vm3012_vm4, %v4242_v37  ;;  %v7292_v37 = vld [vmem:[%s7453_s21] ss:$0 sm:$0xff] }
 0x60e   : > { %5805 = vmatmul.mubr.msk.bf16.gmra.mrb[180].mxu1 %vm3012_vm4, %v4243_v5 }
 0x613   : > { %v5742_v19 = vpop.f32.mrb[152].mxu1  ;;  %v5776_v46 = vpop.f32.mrb[152].mxu0 }
 0x614   : > { %v4006_v21 = vadd.f32 %v5742_v19, %v7202_v41  ;;  %v4178_v25 = vadd.f32 %v5776_v46, %v7207_v12  ;;  %v3997_v1 = vpop.f32.mrb[153].mxu1  ;;  %v4169_v16 = vpop.f32.mrb[153].mxu0 }
 0x615   : > { %v3998_v63 = vadd.f32 %v7202_v41, %v3997_v1  ;;  %v4170_v7 = vadd.f32 %v7207_v12, %v4169_v16  ;;  %v5743_v34 = vpop.f32.mrb[154].mxu1  ;;  %v5777_v32 = vpop.f32.mrb[154].mxu0 }
 0x616   : > { %v4226_v18 = vmul.f32 %v4178_v25, %v4006_v21  ;;  %v4009_v13 = vadd.f32 %v5743_v34, %v7202_v41  ;;  %v4181_v45 = vadd.f32 %v5777_v32, %v7207_v12  ;;  %v4000_v10 = vpop.f32.mrb[155].mxu1  ;;  %v4172_v3 = vpop.f32.mrb[155].mxu0 }
 0x617   : > { %v4224_v0 = vmul.f32 %v4170_v7, %v3998_v63  ;;  %v4001_v28 = vadd.f32 %v7202_v41, %v4000_v10  ;;  %v4173_v52 = vadd.f32 %v7207_v12, %v4172_v3 }
 0x618   : > { %v4227_v38 = vmul.f32 %v4181_v45, %v4009_v13 }
 0x619   : > { %v4225_v61 = vmul.f32 %v4173_v52, %v4001_v28 }
 0x61a   : > { %v4245_v39 = vpack.c.bf16 %v4227_v38, %v4226_v18 }
 0x61b   : > { %v4244_v27 = vpack.c.bf16 %v4225_v61, %v4224_v0 }
 0x61d   : > { %5808 = vmatprep.mubr.msk.bf16.mxu1 %vm3012_vm4, %v4244_v27 }
 0x61e   : > { %5809 = vmatmul.mubr.msk.bf16.gmra.mrb[184].mxu1 %vm3012_vm4, %v4245_v39 }
 0x623   : > { %v5746_v36 = vpop.f32.mrb[156].mxu1  ;;  %v5780_v44 = vpop.f32.mrb[156].mxu0 }
 0x624   : > { %v4022_v9 = vadd.f32 %v5746_v36, %v7202_v41  ;;  %v4194_v35 = vadd.f32 %v5780_v44, %v7207_v12  ;;  %v4013_v26 = vpop.f32.mrb[157].mxu1  ;;  %v4185_v22 = vpop.f32.mrb[157].mxu0 }
 0x625   : > { %v4014_v14 = vadd.f32 %v7202_v41, %v4013_v26  ;;  %v4186_v6 = vadd.f32 %v7207_v12, %v4185_v22  ;;  %v5747_v17 = vpop.f32.mrb[158].mxu1  ;;  %v5781_v54 = vpop.f32.mrb[158].mxu0 }
 0x626   : > { %v4230_v57 = vmul.f32 %v4194_v35, %v4022_v9  ;;  %v4025_v24 = vadd.f32 %v5747_v17, %v7202_v41  ;;  %v4197_v55 = vadd.f32 %v5781_v54, %v7207_v12  ;;  %v4016_v51 = vpop.f32.mrb[159].mxu1  ;;  %v4188_v53 = vpop.f32.mrb[159].mxu0 }
 0x627   : > { %v4228_v49 = vmul.f32 %v4186_v6, %v4014_v14  ;;  %v4017_v33 = vadd.f32 %v7202_v41, %v4016_v51  ;;  %v4189_v8 = vadd.f32 %v7207_v12, %v4188_v53 }
 0x628   : > { %v4231_v15 = vmul.f32 %v4197_v55, %v4025_v24  ;;  %v7502_v24 = vld [vmem:[#allocation2_spill] sm:$0xff] }
 0x629   : > { %v4229_v59 = vmul.f32 %v4189_v8, %v4017_v33 }
 0x62a   : > { %v4247_v11 = vpack.c.bf16 %v4231_v15, %v4230_v57 }
 0x62b   : > { %v4246_v58 = vpack.c.bf16 %v4229_v59, %v4228_v49  ;;  %v7503_v49 = vld [vmem:[#allocation5_spill] sm:$0xff]  ;;  %v7504_v59 = vld [vmem:[#allocation4_spill] sm:$0xff] }
 0x62d   : > { %5812 = vmatprep.mubr.msk.bf16.mxu1 %vm3012_vm4, %v4246_v58 }
 0x62e   : > { %5813 = vmatmul.mubr.msk.bf16.gmra.mrb[188].mxu1 %vm3012_vm4, %v4247_v11 }
 0x693   : > { %v5786_v5 = vpop.f32.mrb[160].mxu1 }
 0x694   : > { %v4463_v19 = vadd.f32 %v5786_v5, %v6667_v47  ;;  %v4334_v46 = vpop.f32.mrb[161].mxu1 }
 0x695   : > { %v4461_v41 = vadd.f32 %v4334_v46, %v6670_v30  ;;  %v5787_v12 = vpop.f32.mrb[162].mxu1  ;;  %v7505_v46 = vld [vmem:[#allocation7_spill] sm:$0xff] }
 0x696   : > { %v4502_v21 = vadd.f32 %v7292_v37, %v4463_v19  ;;  %v4464_v25 = vadd.f32 %v5787_v12, %v6673_v50  ;;  %v4337_v1 = vpop.f32.mrb[163].mxu1 }
 0x697   : > { %v4500_v47 = vadd.f32 %v7292_v37, %v4461_v41  ;;  %v4462_v16 = vadd.f32 %v4337_v1, %v6678_v56 }
 0x698   : > { %4534 = vst.msk [vmem:[%s7300_s30 + $0x10] sm:$0xff] %vm3012_vm4, %v4502_v21  ;;  %v4503_v63 = vadd.f32 %v7292_v37, %v4464_v25  ;;  %v7506_v21 = vld [vmem:[#allocation6_spill] sm:$0xff] }
 0x699   : > { %4532 = vst.msk [vmem:[%s7300_s30] sm:$0xff] %vm3012_vm4, %v4500_v47  ;;  %v4501_v30 = vadd.f32 %v7292_v37, %v4462_v16  ;;  %v7507_v16 = vld [vmem:[#allocation9_spill] sm:$0xff] }
 0x69a   : > { %4535 = vst.msk [vmem:[%s7300_s30 + $0x18] sm:$0xff] %vm3012_vm4, %v4503_v63 }
 0x69b   : > { %4533 = vst.msk [vmem:[%s7300_s30 + $0x8] sm:$0xff] %vm3012_vm4, %v4501_v30 }
 0x6a1   : > { %v5790_v50 = vpop.f32.mrb[164].mxu1 }
 0x6a2   : > { %v4467_v7 = vadd.f32 %v5790_v50, %v6694_v40  ;;  %v4350_v56 = vpop.f32.mrb[165].mxu1 }
 0x6a3   : > { %v4465_v34 = vadd.f32 %v4350_v56, %v6691_v31  ;;  %v5791_v32 = vpop.f32.mrb[166].mxu1 }
 0x6a4   : > { %v4506_v18 = vadd.f32 %v7292_v37, %v4467_v7  ;;  %v4468_v13 = vadd.f32 %v5791_v32, %v6702_v43  ;;  %v4353_v45 = vpop.f32.mrb[167].mxu1  ;;  %v7508_v7 = vld [vmem:[#allocation8_spill] sm:$0xff] }
 0x6a5   : > { %v4504_v10 = vadd.f32 %v7292_v37, %v4465_v34  ;;  %v4466_v3 = vadd.f32 %v4353_v45, %v6697_v42 }
 0x6a6   : > { %4538 = vst.msk [vmem:[%s7300_s30 + $0x30] sm:$0xff] %vm3012_vm4, %v4506_v18  ;;  %v4507_v0 = vadd.f32 %v7292_v37, %v4468_v13  ;;  %v7509_v13 = vld [vmem:[#allocation11_spill] sm:$0xff] }
 0x6a7   : > { %4536 = vst.msk [vmem:[%s7300_s30 + $0x20] sm:$0xff] %vm3012_vm4, %v4504_v10  ;;  %v4505_v31 = vadd.f32 %v7292_v37, %v4466_v3  ;;  %v7510_v3 = vld [vmem:[#allocation10_spill] sm:$0xff] }
 0x6a8   : > { %4539 = vst.msk [vmem:[%s7300_s30 + $0x38] sm:$0xff] %vm3012_vm4, %v4507_v0 }
 0x6a9   : > { %4537 = vst.msk [vmem:[%s7300_s30 + $0x28] sm:$0xff] %vm3012_vm4, %v4505_v31 }
 0x6b1   : > { %v5794_v40 = vpop.f32.mrb[168].mxu1 }
 0x6b2   : > { %v4471_v43 = vadd.f32 %v5794_v40, %v6718_v20  ;;  %v4366_v42 = vpop.f32.mrb[169].mxu1 }
 0x6b3   : > { %v4469_v28 = vadd.f32 %v4366_v42, %v6715_v62  ;;  %v5795_v52 = vpop.f32.mrb[170].mxu1 }
 0x6b4   : > { %v4510_v38 = vadd.f32 %v7292_v37, %v4471_v43  ;;  %v4472_v61 = vadd.f32 %v5795_v52, %v6726_v4  ;;  %v4369_v39 = vpop.f32.mrb[171].mxu1  ;;  %v7511_v43 = vld [vmem:[#allocation13_spill] sm:$0xff] }
 0x6b5   : > { %v4508_v27 = vadd.f32 %v7292_v37, %v4469_v28  ;;  %v4470_v36 = vadd.f32 %v4369_v39, %v6721_v2 }
 0x6b6   : > { %4542 = vst.msk [vmem:[%s7300_s30 + $0x50] sm:$0xff] %vm3012_vm4, %v4510_v38  ;;  %v4511_v44 = vadd.f32 %v7292_v37, %v4472_v61  ;;  %v7512_v38 = vld [vmem:[#allocation12_spill] sm:$0xff] }
 0x6b7   : > { %4540 = vst.msk [vmem:[%s7300_s30 + $0x40] sm:$0xff] %vm3012_vm4, %v4508_v27  ;;  %v4509_v62 = vadd.f32 %v7292_v37, %v4470_v36 }
 0x6b8   : > { %4543 = vst.msk [vmem:[%s7300_s30 + $0x58] sm:$0xff] %vm3012_vm4, %v4511_v44  ;;  %v7513_v44 = vld [vmem:[#allocation15_spill] sm:$0xff] }
 0x6b9   : > { %4541 = vst.msk [vmem:[%s7300_s30 + $0x48] sm:$0xff] %vm3012_vm4, %v4509_v62 }
 0x6c1   : > { %v5798_v20 = vpop.f32.mrb[172].mxu1 }
 0x6c2   : > { %v4475_v4 = vadd.f32 %v5798_v20, %v6742_v29  ;;  %v4382_v2 = vpop.f32.mrb[173].mxu1 }
 0x6c3   : > { %v4473_v9 = vadd.f32 %v4382_v2, %v6739_v23  ;;  %v5799_v35 = vpop.f32.mrb[174].mxu1 }
 0x6c4   : > { %v4514_v26 = vadd.f32 %v7292_v37, %v4475_v4  ;;  %v4476_v22 = vadd.f32 %v5799_v35, %v6750_v60  ;;  %v4385_v14 = vpop.f32.mrb[175].mxu1  ;;  %v7501_v60 = vld [vmem:[#allocation3_spill] sm:$0xff]  ;;  %v7514_v4 = vld [vmem:[#allocation14_spill] sm:$0xff] }
 0x6c5   : > { %v4512_v6 = vadd.f32 %v7292_v37, %v4473_v9  ;;  %v4474_v17 = vadd.f32 %v4385_v14, %v6745_v48 }
 0x6c6   : > { %4546 = vst.msk [vmem:[%s7300_s30 + $0x70] sm:$0xff] %vm3012_vm4, %v4514_v26  ;;  %v4515_v54 = vadd.f32 %v7292_v37, %v4476_v22  ;;  %v7515_v26 = vld [vmem:[#allocation17_spill] sm:$0xff] }
 0x6c7   : > { %4544 = vst.msk [vmem:[%s7300_s30 + $0x60] sm:$0xff] %vm3012_vm4, %v4512_v6  ;;  %v4513_v23 = vadd.f32 %v7292_v37, %v4474_v17  ;;  %v7516_v17 = vld [vmem:[#allocation16_spill] sm:$0xff] }
 0x6c8   : > { %4547 = vst.msk [vmem:[%s7300_s30 + $0x78] sm:$0xff] %vm3012_vm4, %v4515_v54 }
 0x6c9   : > { %4545 = vst.msk [vmem:[%s7300_s30 + $0x68] sm:$0xff] %vm3012_vm4, %v4513_v23 }
 0x6d1   : > { %v5802_v29 = vpop.f32.mrb[176].mxu1 }
 0x6d2   : > { %v4479_v57 = vadd.f32 %v5802_v29, %v7501_v60  ;;  %v4398_v48 = vpop.f32.mrb[177].mxu1 }
 0x6d3   : > { %v4477_v55 = vadd.f32 %v4398_v48, %v7502_v24  ;;  %v5803_v51 = vpop.f32.mrb[178].mxu1 }
 0x6d4   : > { %v4518_v53 = vadd.f32 %v7292_v37, %v4479_v57  ;;  %v4480_v33 = vadd.f32 %v5803_v51, %v7503_v49  ;;  %v4401_v8 = vpop.f32.mrb[179].mxu1 }
 0x6d5   : > { %v4516_v15 = vadd.f32 %v7292_v37, %v4477_v55  ;;  %v4478_v11 = vadd.f32 %v4401_v8, %v7504_v59 }
 0x6d6   : > { %4550 = vst.msk [vmem:[%s7300_s30 + $0x90] sm:$0xff] %vm3012_vm4, %v4518_v53  ;;  %v4519_v58 = vadd.f32 %v7292_v37, %v4480_v33 }
 0x6d7   : > { %4548 = vst.msk [vmem:[%s7300_s30 + $0x80] sm:$0xff] %vm3012_vm4, %v4516_v15  ;;  %v4517_v5 = vadd.f32 %v7292_v37, %v4478_v11 }
 0x6d8   : > { %4551 = vst.msk [vmem:[%s7300_s30 + $0x98] sm:$0xff] %vm3012_vm4, %v4519_v58 }
 0x6d9   : > { %4549 = vst.msk [vmem:[%s7300_s30 + $0x88] sm:$0xff] %vm3012_vm4, %v4517_v5 }
 0x6e1   : > { %v5806_v19 = vpop.f32.mrb[180].mxu1 }
 0x6e2   : > { %v4483_v41 = vadd.f32 %v5806_v19, %v7505_v46  ;;  %v4414_v12 = vpop.f32.mrb[181].mxu1 }
 0x6e3   : > { %v4481_v25 = vadd.f32 %v4414_v12, %v7506_v21  ;;  %v5807_v1 = vpop.f32.mrb[182].mxu1 }
 0x6e4   : > { %v4522_v47 = vadd.f32 %v7292_v37, %v4483_v41  ;;  %v4484_v63 = vadd.f32 %v5807_v1, %v7507_v16  ;;  %v4417_v30 = vpop.f32.mrb[183].mxu1 }
 0x6e5   : > { %v4520_v50 = vadd.f32 %v7292_v37, %v4481_v25  ;;  %v4482_v56 = vadd.f32 %v4417_v30, %v7508_v7 }
 0x6e6   : > { %4554 = vst.msk [vmem:[%s7300_s30 + $0xb0] sm:$0xff] %vm3012_vm4, %v4522_v47  ;;  %v4523_v34 = vadd.f32 %v7292_v37, %v4484_v63 }
 0x6e7   : > { %4552 = vst.msk [vmem:[%s7300_s30 + $0xa0] sm:$0xff] %vm3012_vm4, %v4520_v50  ;;  %v4521_v32 = vadd.f32 %v7292_v37, %v4482_v56 }
 0x6e8   : > { %4555 = vst.msk [vmem:[%s7300_s30 + $0xb8] sm:$0xff] %vm3012_vm4, %v4523_v34 }
 0x6e9   : > { %4553 = vst.msk [vmem:[%s7300_s30 + $0xa8] sm:$0xff] %vm3012_vm4, %v4521_v32 }
 0x6f1   : > { %v5810_v18 = vpop.f32.mrb[184].mxu1 }
 0x6f2   : > { %v4487_v45 = vadd.f32 %v5810_v18, %v7509_v13  ;;  %v4430_v10 = vpop.f32.mrb[185].mxu1 }
 0x6f3   : > { %v4485_v0 = vadd.f32 %v4430_v10, %v7510_v3  ;;  %v5811_v31 = vpop.f32.mrb[186].mxu1 }
 0x6f4   : > { %v4526_v40 = vadd.f32 %v7292_v37, %v4487_v45  ;;  %v4488_v42 = vadd.f32 %v5811_v31, %v7511_v43  ;;  %v4433_v28 = vpop.f32.mrb[187].mxu1 }
 0x6f5   : > { %v4524_v52 = vadd.f32 %v7292_v37, %v4485_v0  ;;  %v4486_v61 = vadd.f32 %v4433_v28, %v7512_v38 }
 0x6f6   : > { %4558 = vst.msk [vmem:[%s7300_s30 + $0xd0] sm:$0xff] %vm3012_vm4, %v4526_v40  ;;  %v4527_v39 = vadd.f32 %v7292_v37, %v4488_v42 }
 0x6f7   : > { %4556 = vst.msk [vmem:[%s7300_s30 + $0xc0] sm:$0xff] %vm3012_vm4, %v4524_v52  ;;  %v4525_v27 = vadd.f32 %v7292_v37, %v4486_v61 }
 0x6f8   : > { %4559 = vst.msk [vmem:[%s7300_s30 + $0xd8] sm:$0xff] %vm3012_vm4, %v4527_v39 }
 0x6f9   : > { %4557 = vst.msk [vmem:[%s7300_s30 + $0xc8] sm:$0xff] %vm3012_vm4, %v4525_v27 }
 0x701   : > { %v5814_v36 = vpop.f32.mrb[188].mxu1 }
 0x702   : > { %v4491_v62 = vadd.f32 %v5814_v36, %v7513_v44  ;;  %v4446_v20 = vpop.f32.mrb[189].mxu1 }
 0x703   : > { %v4489_v2 = vadd.f32 %v4446_v20, %v7514_v4  ;;  %v5815_v9 = vpop.f32.mrb[190].mxu1 }
 0x704   : > { %v4530_v35 = vadd.f32 %v7292_v37, %v4491_v62  ;;  %v4492_v22 = vadd.f32 %v5815_v9, %v7515_v26  ;;  %v4449_v14 = vpop.f32.mrb[191].mxu1 }
 0x705   : > { %v4528_v6 = vadd.f32 %v7292_v37, %v4489_v2  ;;  %v4490_v54 = vadd.f32 %v4449_v14, %v7516_v17 }
 0x706   : > { %4562 = vst.msk [vmem:[%s7300_s30 + $0xf0] sm:$0xff] %vm3012_vm4, %v4530_v35  ;;  %v4531_v23 = vadd.f32 %v7292_v37, %v4492_v22 }
 0x707   : > { %4560 = vst.msk [vmem:[%s7300_s30 + $0xe0] sm:$0xff] %vm3012_vm4, %v4528_v6  ;;  %v4529_v29 = vadd.f32 %v7292_v37, %v4490_v54 }
 0x708   : > { %4563 = vst.msk [vmem:[%s7300_s30 + $0xf8] sm:$0xff] %vm3012_vm4, %v4531_v23 }
 0x709   : > { %4561 = vst.msk [vmem:[%s7300_s30 + $0xe8] sm:$0xff] %vm3012_vm4, %v4529_v29 }
 0x70a PF: > { %s32_s3 = sadd.s32 1, %s5993_s3  }
 0x70b   : > { %p29_p4 = scmp.ge.s32.totalorder %s32_s3, 4  }
 0x70d   :  { %31 = sbr.rel (!%p29_p4) target bundleno = 8 (0x8), region = 156 }

</bundles_post_ra>
